<compile_context>
chip_gen: v5e
topology: v5e:2x2
jax: 0.10.0
libtpu: 0.0.40
codegen_flags: <defaults>
</compile_context>

<pallas_src>
import functools

import jax
import jax.numpy as jnp
import numpy as np
from jax.experimental import pallas as pl
from jax.experimental.pallas import tpu as pltpu

EPS = 1e-5  # matches nn.InstanceNorm2d default


def _round_up(x, m):
    return ((x + m - 1) // m) * m


@functools.lru_cache(maxsize=None)
def _roll_shift_sign():
    """Empirically pin pltpu.roll's shift convention (documented = jnp.roll).

    Returns +1 if pltpu.roll(x, s)[i] == x[(i - s) % n]  (jnp.roll convention),
    -1 for the opposite convention.  Guarantees the conv tap mapping can never
    silently flip.
    """
    def probe(x_ref, o_ref):
        o_ref[...] = pltpu.roll(x_ref[...], shift=1, axis=0)

    try:
        x = jnp.broadcast_to(
            jnp.arange(8, dtype=jnp.float32)[:, None], (8, 128))
        out = pl.pallas_call(
            probe, out_shape=jax.ShapeDtypeStruct((8, 128), jnp.float32))(x)
        return 1 if float(out[0, 0]) == 7.0 else -1
    except Exception:  # pragma: no cover - fall back to documented convention
        return 1


def _resnet_block_kernel(x_ref, m_ref, w1_ref, b1_ref, g1_ref, be1_ref,
                         w2_ref, b2_ref, g2_ref, be2_ref, out_ref,
                         *, H, W, Wp, roll_sign, compute_dtype):
    # x_ref : (1, rows, C) f32   flattened zero-padded NHWC frame, rows=(H+2)*Wp
    #                            data at frame rows 1..H, cols 1..W; zeros else.
    # m_ref : (rows, 1)    f32   1.0 on the HxW interior, 0.0 on padding.
    # w*_ref: (9, C, C)    compute_dtype  3x3 conv weights, k = ky*3+kx, [cin,cout]
    # b*/g*/be*: (1, C)    f32   conv bias / instance-norm gamma / beta
    # out_ref: (1, rows, C) f32  full frame; wrapper crops the valid window.
    rows = x_ref.shape[1]
    inv_count = 1.0 / float(H * W)

    x_f32 = x_ref[0]            # (rows, C) f32, kept for the residual add
    mask = m_ref[...]           # (rows, 1) f32

    def conv3x3(src, w_ref):
        # out[i] = sum_{ky,kx} src[i + (ky-1)*Wp + (kx-1)] @ w[ky,kx]
        # Row taps (+-Wp, multiple of 8 sublanes) are applied as static rolls
        # of the compute-dtype input; column taps (+-1) as static rolls of the
        # f32 partial.  All rolls are XLU work (off the MXU critical path);
        # wrap-around only lands on border frame rows/cols, which are never
        # part of the valid output window the wrapper extracts.
        s_up = pltpu.roll(src, shift=(roll_sign * Wp) % rows, axis=0)   # src[i-Wp]
        s_dn = pltpu.roll(src, shift=(-roll_sign * Wp) % rows, axis=0)  # src[i+Wp]
        srcs = (s_up, src, s_dn)                                        # ky = 0,1,2
        acc = None
        for kx in range(3):
            part = None
            for ky in range(3):
                t = jnp.dot(srcs[ky], w_ref[ky * 3 + kx],
                            preferred_element_type=jnp.float32)
                part = t if part is None else part + t
            d = kx - 1
            if d != 0:
                part = pltpu.roll(part, shift=(-roll_sign * d) % rows, axis=0)
            acc = part if acc is None else acc + part
        return acc

    def instance_norm_stats(a):
        # Single-pass masked stats (mean, E[x^2]) over the valid HxW interior.
        am = a * mask
        s = jnp.sum(am, axis=0, keepdims=True)            # (1, C)
        ss = jnp.sum(am * a, axis=0, keepdims=True)       # (1, C)
        mean = s * inv_count
        var = jnp.maximum(ss * inv_count - mean * mean, 0.0)
        inv = jax.lax.rsqrt(var + EPS)
        return inv, mean

    # --- conv1 -> instance norm -> ReLU ----------------------------------
    a1 = conv3x3(x_f32.astype(compute_dtype), w1_ref) + b1_ref[...]
    inv1, mean1 = instance_norm_stats(a1)
    scale1 = inv1 * g1_ref[...]
    shift1 = be1_ref[...] - mean1 * scale1
    # mask multiply re-creates the zero padding required by conv2's input.
    h1 = jnp.maximum(a1 * scale1 + shift1, 0.0) * mask

    # --- conv2 -> instance norm ------------------------------------------
    a2 = conv3x3(h1.astype(compute_dtype), w2_ref) + b2_ref[...]
    inv2, mean2 = instance_norm_stats(a2)
    scale2 = inv2 * g2_ref[...]
    shift2 = be2_ref[...] - mean2 * scale2

    # --- residual add (border positions are garbage; wrapper crops them) --
    out_ref[0] = (x_f32 + a2 * scale2 + shift2).astype(out_ref.dtype)


@functools.partial(jax.jit, static_argnames=("compute_dtype", "roll_sign"))
def _resnet_block_impl(x_nchw, params, *, compute_dtype, roll_sign):
    w1, b1, g1, be1, w2, b2, g2, be2 = params
    N, C, H, W = x_nchw.shape
    Hp = H + 2
    Wp = _round_up(W + 2, 8)       # lane/sublane-aligned padded width
    rows = Hp * Wp

    # NCHW -> NHWC and zero pad (fused by XLA under jit): interior at
    # frame rows 1..H, cols 1..W; extra right columns are alignment padding.
    x_nhwc = jnp.transpose(x_nchw, (0, 2, 3, 1))
    xpad = jnp.pad(x_nhwc, ((0, 0), (1, 1), (1, Wp - W - 1), (0, 0)))
    xflat = xpad.reshape(N, rows, C)

    # (rows, 1) validity mask (constant) for masked stats / re-padding.
    rr, cc = np.meshgrid(np.arange(Hp), np.arange(Wp), indexing="ij")
    valid = ((rr >= 1) & (rr <= H) & (cc >= 1) & (cc <= W))
    mask = jnp.asarray(valid.reshape(rows, 1).astype(np.float32))

    # Weights in the MXU compute dtype (bf16 by default: halves DMA + VMEM).
    w1c = w1.astype(compute_dtype)
    w2c = w2.astype(compute_dtype)

    kernel = functools.partial(_resnet_block_kernel,
                               H=H, W=W, Wp=Wp,
                               roll_sign=roll_sign,
                               compute_dtype=compute_dtype)

    img_spec = pl.BlockSpec((1, rows, C), lambda n: (n, 0, 0))
    mask_spec = pl.BlockSpec((rows, 1), lambda n: (0, 0))
    w_spec = pl.BlockSpec((9, C, C), lambda n: (0, 0, 0))
    v_spec = pl.BlockSpec((1, C), lambda n: (0, 0))

    out_flat = pl.pallas_call(
        kernel,
        out_shape=jax.ShapeDtypeStruct((N, rows, C), x_nchw.dtype),
        grid_spec=pltpu.PrefetchScalarGridSpec(
            num_scalar_prefetch=0,
            grid=(N,),
            in_specs=[img_spec, mask_spec,
                      w_spec, v_spec, v_spec, v_spec,
                      w_spec, v_spec, v_spec, v_spec],
            out_specs=pl.BlockSpec((1, rows, C), lambda n: (n, 0, 0)),
        ),
        compiler_params=pltpu.CompilerParams(
            dimension_semantics=("parallel",),
            vmem_limit_bytes=64 * 1024 * 1024),
    )(xflat, mask, w1c, b1, g1, be1, w2c, b2, g2, be2)

    # Crop the valid window and go back to NCHW (fused with the transpose).
    out = out_flat.reshape(N, Hp, Wp, C)[:, 1:H + 1, 1:W + 1, :]
    return jnp.transpose(out, (0, 3, 1, 2))


def resnet_block_pallas(x_nchw, params, *, compute_dtype=jnp.bfloat16):
    """Forward pass of ResnetBlock. x_nchw: (N, C, H, W) float32."""
    return _resnet_block_impl(x_nchw, params,
                              compute_dtype=compute_dtype,
                              roll_sign=_roll_shift_sign())


def resnet_block_ref(x_nchw, params):
    """Pure-JAX reference (XLA conv, f32) for numerical validation."""
    w1, b1, g1, be1, w2, b2, g2, be2 = params
    C = x_nchw.shape[1]
    x = jnp.transpose(x_nchw, (0, 2, 3, 1))

    def conv(h, w9, b):
        w = w9.reshape(3, 3, C, C)  # HWIO
        y = jax.lax.conv_general_dilated(
            h, w, window_strides=(1, 1), padding=((1, 1), (1, 1)),
            dimension_numbers=('NHWC', 'HWIO', 'NHWC'))
        return y + b.reshape(1, 1, 1, C)

    def inorm(h, g, be):
        m = jnp.mean(h, axis=(1, 2), keepdims=True)
        v = jnp.mean((h - m) ** 2, axis=(1, 2), keepdims=True)
        return ((h - m) * jax.lax.rsqrt(v + EPS) * g.reshape(1, 1, 1, C)
                + be.reshape(1, 1, 1, C))

    h = jnp.maximum(inorm(conv(x, w1, b1), g1, be1), 0.0)
    h = inorm(conv(h, w2, b2), g2, be2)
    return jnp.transpose(x + h, (0, 3, 1, 2))


def init_params(key, dim):
    """Deterministic synthetic parameters (shapes match the PyTorch module)."""
    ks = jax.random.split(key, 4)
    # conv weights stored as (9, Cin, Cout) = flattened (ky, kx, Cin, Cout)
    w1 = 0.1 * jax.random.normal(ks[0], (9, dim, dim), jnp.float32)
    w2 = 0.1 * jax.random.normal(ks[1], (9, dim, dim), jnp.float32)
    b1 = 0.05 * jax.random.normal(ks[2], (1, dim), jnp.float32)
    b2 = 0.05 * jax.random.normal(ks[3], (1, dim), jnp.float32)
    g1 = jnp.ones((1, dim), jnp.float32)
    be1 = jnp.zeros((1, dim), jnp.float32)
    g2 = jnp.ones((1, dim), jnp.float32)
    be2 = jnp.zeros((1, dim), jnp.float32)
    return (w1, b1, g1, be1, w2, b2, g2, be2)


if __name__ == "__main__":
    key = jax.random.PRNGKey(0)
    kx, kp = jax.random.split(key)

    N, C, H, W = 2, 4, 16, 16          # small NCHW input, dim = C = 4
    x = jax.random.normal(kx, (N, C, H, W), jnp.float32)
    params = init_params(kp, C)

    ref = jax.block_until_ready(resnet_block_ref(x, params))

    # f32 compute path: tight check of the roll-based conv / masked-IN logic.
    out_f32 = jax.block_until_ready(
        resnet_block_pallas(x, params, compute_dtype=jnp.float32))
    np.testing.assert_allclose(np.asarray(out_f32), np.asarray(ref),
                               rtol=1e-3, atol=1e-3)

    # bf16 MXU path (the optimized configuration): bf16-appropriate tolerance.
    out = jax.block_until_ready(resnet_block_pallas(x, params))
    np.testing.assert_allclose(np.asarray(out), np.asarray(ref),
                               rtol=5e-2, atol=5e-2)

    assert out.shape == x.shape and out.dtype == x.dtype
    print("KERNEL_OK")
</pallas_src>

<mosaic_0001>
module attributes {stable_mosaic.version = 11 : i64} {
  func.func @probe(%arg0: memref<8x128xf32, #tpu.memory_space<vmem>>, %arg1: memref<8x128xf32, #tpu.memory_space<vmem>>) attributes {dimension_semantics = [], scalar_prefetch = 0 : i64, scratch_operands = 0 : i64, tpu.core_type = #tpu.core_type<tc>} {
    %c0 = arith.constant 0 : index
    %c0_0 = arith.constant 0 : index
    %0 = vector.load %arg0[%c0, %c0_0] : memref<8x128xf32, #tpu.memory_space<vmem>>, vector<8x128xf32>
    %c1_i32 = arith.constant 1 : i32
    %1 = tpu.dynamic_rotate %0 by %c1_i32 dim 0 : vector<8x128xf32>, i32 -> vector<8x128xf32>
    %c0_1 = arith.constant 0 : index
    %c0_2 = arith.constant 0 : index
    %2 = vector.load %arg1[%c0_1, %c0_2] : memref<8x128xf32, #tpu.memory_space<vmem>>, vector<8x128xf32>
    tpu.vector_store %arg1[%c0_1, %c0_2], %1 {strides = array<i32>} : memref<8x128xf32, #tpu.memory_space<vmem>>, vector<8x128xf32>,
    return
  }
}

module attributes {stable_mosaic.version = 11 : i64} {
  func.func @_resnet_block_kernel(%arg0: i32, %arg1: memref<1x432x4xf32, #tpu.memory_space<vmem>>, %arg2: memref<432x1xf32, #tpu.memory_space<vmem>>, %arg3: memref<9x4x4xf32, #tpu.memory_space<vmem>>, %arg4: memref<1x4xf32, #tpu.memory_space<vmem>>, %arg5: memref<1x4xf32, #tpu.memory_space<vmem>>, %arg6: memref<1x4xf32, #tpu.memory_space<vmem>>, %arg7: memref<9x4x4xf32, #tpu.memory_space<vmem>>, %arg8: memref<1x4xf32, #tpu.memory_space<vmem>>, %arg9: memref<1x4xf32, #tpu.memory_space<vmem>>, %arg10: memref<1x4xf32, #tpu.memory_space<vmem>>, %arg11: memref<1x432x4xf32, #tpu.memory_space<vmem>>) attributes {dimension_semantics = [#tpu.dimension_semantics<parallel>], iteration_bounds = array<i64: 2>, scalar_prefetch = 0 : i64, scratch_operands = 0 : i64, tpu.core_type = #tpu.core_type<tc>, window_params = [{transform_indices = @transform_0, window_bounds = array<i64: 1, 432, 4>}, {pipeline_mode = #tpu.pipeline_mode<synchronous>, transform_indices = @transform_1, window_bounds = array<i64: 432, 1>}, {pipeline_mode = #tpu.pipeline_mode<synchronous>, transform_indices = @transform_2, window_bounds = array<i64: 9, 4, 4>}, {pipeline_mode = #tpu.pipeline_mode<synchronous>, transform_indices = @transform_3, window_bounds = array<i64: 1, 4>}, {pipeline_mode = #tpu.pipeline_mode<synchronous>, transform_indices = @transform_4, window_bounds = array<i64: 1, 4>}, {pipeline_mode = #tpu.pipeline_mode<synchronous>, transform_indices = @transform_5, window_bounds = array<i64: 1, 4>}, {pipeline_mode = #tpu.pipeline_mode<synchronous>, transform_indices = @transform_6, window_bounds = array<i64: 9, 4, 4>}, {pipeline_mode = #tpu.pipeline_mode<synchronous>, transform_indices = @transform_7, window_bounds = array<i64: 1, 4>}, {pipeline_mode = #tpu.pipeline_mode<synchronous>, transform_indices = @transform_8, window_bounds = array<i64: 1, 4>}, {pipeline_mode = #tpu.pipeline_mode<synchronous>, transform_indices = @transform_9, window_bounds = array<i64: 1, 4>}, {transform_indices = @transform_10, window_bounds = array<i64: 1, 432, 4>}]} {
    %c0 = arith.constant 0 : index
    %c0_0 = arith.constant 0 : index
    %c0_1 = arith.constant 0 : index
    %0 = vector.load %arg1[%c0, %c0_0, %c0_1] : memref<1x432x4xf32, #tpu.memory_space<vmem>>, vector<1x432x4xf32>
    %1 = vector.shape_cast %0 : vector<1x432x4xf32> to vector<432x4xf32>
    %c0_2 = arith.constant 0 : index
    %c0_3 = arith.constant 0 : index
    %2 = vector.load %arg2[%c0_2, %c0_3] : memref<432x1xf32, #tpu.memory_space<vmem>>, vector<432x1xf32>
    %c24_i32 = arith.constant 24 : i32
    %3 = tpu.dynamic_rotate %1 by %c24_i32 dim 0 : vector<432x4xf32>, i32 -> vector<432x4xf32>
    %c408_i32 = arith.constant 408 : i32
    %4 = tpu.dynamic_rotate %1 by %c408_i32 dim 0 : vector<432x4xf32>, i32 -> vector<432x4xf32>
    %c0_4 = arith.constant 0 : index
    %c0_5 = arith.constant 0 : index
    %c0_6 = arith.constant 0 : index
    %5 = vector.load %arg3[%c0_4, %c0_5, %c0_6] : memref<9x4x4xf32, #tpu.memory_space<vmem>>, vector<1x4x4xf32>
    %6 = vector.shape_cast %5 : vector<1x4x4xf32> to vector<4x4xf32>
    %cst = arith.constant dense<0.000000e+00> : vector<432x4xf32>
    %7 = tpu.matmul %3, %6, %cst {dimension_numbers = #tpu.dot_dimension_numbers<[1], [0], [0], [1], [0, 0, 1, 1], [], []>} : vector<432x4xf32>, vector<4x4xf32>, vector<432x4xf32> -> vector<432x4xf32>
    %c3 = arith.constant 3 : index
    %c0_7 = arith.constant 0 : index
    %c0_8 = arith.constant 0 : index
    %8 = vector.load %arg3[%c3, %c0_7, %c0_8] : memref<9x4x4xf32, #tpu.memory_space<vmem>>, vector<1x4x4xf32>
    %9 = vector.shape_cast %8 : vector<1x4x4xf32> to vector<4x4xf32>
    %cst_9 = arith.constant dense<0.000000e+00> : vector<432x4xf32>
    %10 = tpu.matmul %1, %9, %cst_9 {dimension_numbers = #tpu.dot_dimension_numbers<[1], [0], [0], [1], [0, 0, 1, 1], [], []>} : vector<432x4xf32>, vector<4x4xf32>, vector<432x4xf32> -> vector<432x4xf32>
    %11 = arith.addf %7, %10 : vector<432x4xf32>
    %c6 = arith.constant 6 : index
    %c0_10 = arith.constant 0 : index
    %c0_11 = arith.constant 0 : index
    %12 = vector.load %arg3[%c6, %c0_10, %c0_11] : memref<9x4x4xf32, #tpu.memory_space<vmem>>, vector<1x4x4xf32>
    %13 = vector.shape_cast %12 : vector<1x4x4xf32> to vector<4x4xf32>
    %cst_12 = arith.constant dense<0.000000e+00> : vector<432x4xf32>
    %14 = tpu.matmul %4, %13, %cst_12 {dimension_numbers = #tpu.dot_dimension_numbers<[1], [0], [0], [1], [0, 0, 1, 1], [], []>} : vector<432x4xf32>, vector<4x4xf32>, vector<432x4xf32> -> vector<432x4xf32>
    %15 = arith.addf %11, %14 : vector<432x4xf32>
    %c1_i32 = arith.constant 1 : i32
    %16 = tpu.dynamic_rotate %15 by %c1_i32 dim 0 : vector<432x4xf32>, i32 -> vector<432x4xf32>
    %c1 = arith.constant 1 : index
    %c0_13 = arith.constant 0 : index
    %c0_14 = arith.constant 0 : index
    %17 = vector.load %arg3[%c1, %c0_13, %c0_14] : memref<9x4x4xf32, #tpu.memory_space<vmem>>, vector<1x4x4xf32>
    %18 = vector.shape_cast %17 : vector<1x4x4xf32> to vector<4x4xf32>
    %cst_15 = arith.constant dense<0.000000e+00> : vector<432x4xf32>
    %19 = tpu.matmul %3, %18, %cst_15 {dimension_numbers = #tpu.dot_dimension_numbers<[1], [0], [0], [1], [0, 0, 1, 1], [], []>} : vector<432x4xf32>, vector<4x4xf32>, vector<432x4xf32> -> vector<432x4xf32>
    %c4 = arith.constant 4 : index
    %c0_16 = arith.constant 0 : index
    %c0_17 = arith.constant 0 : index
    %20 = vector.load %arg3[%c4, %c0_16, %c0_17] : memref<9x4x4xf32, #tpu.memory_space<vmem>>, vector<1x4x4xf32>
    %21 = vector.shape_cast %20 : vector<1x4x4xf32> to vector<4x4xf32>
    %cst_18 = arith.constant dense<0.000000e+00> : vector<432x4xf32>
    %22 = tpu.matmul %1, %21, %cst_18 {dimension_numbers = #tpu.dot_dimension_numbers<[1], [0], [0], [1], [0, 0, 1, 1], [], []>} : vector<432x4xf32>, vector<4x4xf32>, vector<432x4xf32> -> vector<432x4xf32>
    %23 = arith.addf %19, %22 : vector<432x4xf32>
    %c7 = arith.constant 7 : index
    %c0_19 = arith.constant 0 : index
    %c0_20 = arith.constant 0 : index
    %24 = vector.load %arg3[%c7, %c0_19, %c0_20] : memref<9x4x4xf32, #tpu.memory_space<vmem>>, vector<1x4x4xf32>
    %25 = vector.shape_cast %24 : vector<1x4x4xf32> to vector<4x4xf32>
    %cst_21 = arith.constant dense<0.000000e+00> : vector<432x4xf32>
    %26 = tpu.matmul %4, %25, %cst_21 {dimension_numbers = #tpu.dot_dimension_numbers<[1], [0], [0], [1], [0, 0, 1, 1], [], []>} : vector<432x4xf32>, vector<4x4xf32>, vector<432x4xf32> -> vector<432x4xf32>
    %27 = arith.addf %23, %26 : vector<432x4xf32>
    %28 = arith.addf %16, %27 : vector<432x4xf32>
    %c2 = arith.constant 2 : index
    %c0_22 = arith.constant 0 : index
    %c0_23 = arith.constant 0 : index
    %29 = vector.load %arg3[%c2, %c0_22, %c0_23] : memref<9x4x4xf32, #tpu.memory_space<vmem>>, vector<1x4x4xf32>
    %30 = vector.shape_cast %29 : vector<1x4x4xf32> to vector<4x4xf32>
    %cst_24 = arith.constant dense<0.000000e+00> : vector<432x4xf32>
    %31 = tpu.matmul %3, %30, %cst_24 {dimension_numbers = #tpu.dot_dimension_numbers<[1], [0], [0], [1], [0, 0, 1, 1], [], []>} : vector<432x4xf32>, vector<4x4xf32>, vector<432x4xf32> -> vector<432x4xf32>
    %c5 = arith.constant 5 : index
    %c0_25 = arith.constant 0 : index
    %c0_26 = arith.constant 0 : index
    %32 = vector.load %arg3[%c5, %c0_25, %c0_26] : memref<9x4x4xf32, #tpu.memory_space<vmem>>, vector<1x4x4xf32>
    %33 = vector.shape_cast %32 : vector<1x4x4xf32> to vector<4x4xf32>
    %cst_27 = arith.constant dense<0.000000e+00> : vector<432x4xf32>
    %34 = tpu.matmul %1, %33, %cst_27 {dimension_numbers = #tpu.dot_dimension_numbers<[1], [0], [0], [1], [0, 0, 1, 1], [], []>} : vector<432x4xf32>, vector<4x4xf32>, vector<432x4xf32> -> vector<432x4xf32>
    %35 = arith.addf %31, %34 : vector<432x4xf32>
    %c8 = arith.constant 8 : index
    %c0_28 = arith.constant 0 : index
    %c0_29 = arith.constant 0 : index
    %36 = vector.load %arg3[%c8, %c0_28, %c0_29] : memref<9x4x4xf32, #tpu.memory_space<vmem>>, vector<1x4x4xf32>
    %37 = vector.shape_cast %36 : vector<1x4x4xf32> to vector<4x4xf32>
    %cst_30 = arith.constant dense<0.000000e+00> : vector<432x4xf32>
    %38 = tpu.matmul %4, %37, %cst_30 {dimension_numbers = #tpu.dot_dimension_numbers<[1], [0], [0], [1], [0, 0, 1, 1], [], []>} : vector<432x4xf32>, vector<4x4xf32>, vector<432x4xf32> -> vector<432x4xf32>
    %39 = arith.addf %35, %38 : vector<432x4xf32>
    %c431_i32 = arith.constant 431 : i32
    %40 = tpu.dynamic_rotate %39 by %c431_i32 dim 0 : vector<432x4xf32>, i32 -> vector<432x4xf32>
    %41 = arith.addf %28, %40 : vector<432x4xf32>
    %c0_31 = arith.constant 0 : index
    %c0_32 = arith.constant 0 : index
    %42 = vector.load %arg4[%c0_31, %c0_32] : memref<1x4xf32, #tpu.memory_space<vmem>>, vector<1x4xf32>
    %43 = vector.broadcast %42 : vector<1x4xf32> to vector<432x4xf32>
    %44 = arith.addf %41, %43 : vector<432x4xf32>
    %45 = vector.broadcast %2 : vector<432x1xf32> to vector<432x4xf32>
    %46 = arith.mulf %44, %45 : vector<432x4xf32>
    %cst_33 = arith.constant dense<0.000000e+00> : vector<4xf32>
    %47 = vector.multi_reduction <add>, %46, %cst_33 [0] : vector<432x4xf32> to vector<4xf32>
    %48 = vector.shape_cast %47 : vector<4xf32> to vector<1x4xf32>
    %49 = arith.mulf %46, %44 : vector<432x4xf32>
    %cst_34 = arith.constant dense<0.000000e+00> : vector<4xf32>
    %50 = vector.multi_reduction <add>, %49, %cst_34 [0] : vector<432x4xf32> to vector<4xf32>
    %51 = vector.shape_cast %50 : vector<4xf32> to vector<1x4xf32>
    %cst_35 = arith.constant 3.906250e-03 : f32
    %52 = vector.broadcast %cst_35 : f32 to vector<1x4xf32>
    %53 = arith.mulf %48, %52 : vector<1x4xf32>
    %cst_36 = arith.constant 3.906250e-03 : f32
    %54 = vector.broadcast %cst_36 : f32 to vector<1x4xf32>
    %55 = arith.mulf %51, %54 : vector<1x4xf32>
    %56 = arith.mulf %53, %53 : vector<1x4xf32>
    %57 = arith.subf %55, %56 : vector<1x4xf32>
    %cst_37 = arith.constant 0.000000e+00 : f32
    %58 = vector.broadcast %cst_37 : f32 to vector<1x4xf32>
    %59 = arith.maximumf %57, %58 : vector<1x4xf32>
    %cst_38 = arith.constant 9.99999974E-6 : f32
    %60 = vector.broadcast %cst_38 : f32 to vector<1x4xf32>
    %61 = arith.addf %59, %60 : vector<1x4xf32>
    %62 = math.rsqrt %61 : vector<1x4xf32>
    %c0_39 = arith.constant 0 : index
    %c0_40 = arith.constant 0 : index
    %63 = vector.load %arg5[%c0_39, %c0_40] : memref<1x4xf32, #tpu.memory_space<vmem>>, vector<1x4xf32>
    %64 = arith.mulf %62, %63 : vector<1x4xf32>
    %c0_41 = arith.constant 0 : index
    %c0_42 = arith.constant 0 : index
    %65 = vector.load %arg6[%c0_41, %c0_42] : memref<1x4xf32, #tpu.memory_space<vmem>>, vector<1x4xf32>
    %66 = arith.mulf %53, %64 : vector<1x4xf32>
    %67 = arith.subf %65, %66 : vector<1x4xf32>
    %68 = vector.broadcast %64 : vector<1x4xf32> to vector<432x4xf32>
    %69 = arith.mulf %44, %68 : vector<432x4xf32>
    %70 = vector.broadcast %67 : vector<1x4xf32> to vector<432x4xf32>
    %71 = arith.addf %69, %70 : vector<432x4xf32>
    %cst_43 = arith.constant 0.000000e+00 : f32
    %72 = vector.broadcast %cst_43 : f32 to vector<432x4xf32>
    %73 = arith.maximumf %71, %72 : vector<432x4xf32>
    %74 = vector.broadcast %2 : vector<432x1xf32> to vector<432x4xf32>
    %75 = arith.mulf %73, %74 : vector<432x4xf32>
    %c24_i32_44 = arith.constant 24 : i32
    %76 = tpu.dynamic_rotate %75 by %c24_i32_44 dim 0 : vector<432x4xf32>, i32 -> vector<432x4xf32>
    %c408_i32_45 = arith.constant 408 : i32
    %77 = tpu.dynamic_rotate %75 by %c408_i32_45 dim 0 : vector<432x4xf32>, i32 -> vector<432x4xf32>
    %c0_46 = arith.constant 0 : index
    %c0_47 = arith.constant 0 : index
    %c0_48 = arith.constant 0 : index
    %78 = vector.load %arg7[%c0_46, %c0_47, %c0_48] : memref<9x4x4xf32, #tpu.memory_space<vmem>>, vector<1x4x4xf32>
    %79 = vector.shape_cast %78 : vector<1x4x4xf32> to vector<4x4xf32>
    %cst_49 = arith.constant dense<0.000000e+00> : vector<432x4xf32>
    %80 = tpu.matmul %76, %79, %cst_49 {dimension_numbers = #tpu.dot_dimension_numbers<[1], [0], [0], [1], [0, 0, 1, 1], [], []>} : vector<432x4xf32>, vector<4x4xf32>, vector<432x4xf32> -> vector<432x4xf32>
    %c3_50 = arith.constant 3 : index
    %c0_51 = arith.constant 0 : index
    %c0_52 = arith.constant 0 : index
    %81 = vector.load %arg7[%c3_50, %c0_51, %c0_52] : memref<9x4x4xf32, #tpu.memory_space<vmem>>, vector<1x4x4xf32>
    %82 = vector.shape_cast %81 : vector<1x4x4xf32> to vector<4x4xf32>
    %cst_53 = arith.constant dense<0.000000e+00> : vector<432x4xf32>
    %83 = tpu.matmul %75, %82, %cst_53 {dimension_numbers = #tpu.dot_dimension_numbers<[1], [0], [0], [1], [0, 0, 1, 1], [], []>} : vector<432x4xf32>, vector<4x4xf32>, vector<432x4xf32> -> vector<432x4xf32>
    %84 = arith.addf %80, %83 : vector<432x4xf32>
    %c6_54 = arith.constant 6 : index
    %c0_55 = arith.constant 0 : index
    %c0_56 = arith.constant 0 : index
    %85 = vector.load %arg7[%c6_54, %c0_55, %c0_56] : memref<9x4x4xf32, #tpu.memory_space<vmem>>, vector<1x4x4xf32>
    %86 = vector.shape_cast %85 : vector<1x4x4xf32> to vector<4x4xf32>
    %cst_57 = arith.constant dense<0.000000e+00> : vector<432x4xf32>
    %87 = tpu.matmul %77, %86, %cst_57 {dimension_numbers = #tpu.dot_dimension_numbers<[1], [0], [0], [1], [0, 0, 1, 1], [], []>} : vector<432x4xf32>, vector<4x4xf32>, vector<432x4xf32> -> vector<432x4xf32>
    %88 = arith.addf %84, %87 : vector<432x4xf32>
    %c1_i32_58 = arith.constant 1 : i32
    %89 = tpu.dynamic_rotate %88 by %c1_i32_58 dim 0 : vector<432x4xf32>, i32 -> vector<432x4xf32>
    %c1_59 = arith.constant 1 : index
    %c0_60 = arith.constant 0 : index
    %c0_61 = arith.constant 0 : index
    %90 = vector.load %arg7[%c1_59, %c0_60, %c0_61] : memref<9x4x4xf32, #tpu.memory_space<vmem>>, vector<1x4x4xf32>
    %91 = vector.shape_cast %90 : vector<1x4x4xf32> to vector<4x4xf32>
    %cst_62 = arith.constant dense<0.000000e+00> : vector<432x4xf32>
    %92 = tpu.matmul %76, %91, %cst_62 {dimension_numbers = #tpu.dot_dimension_numbers<[1], [0], [0], [1], [0, 0, 1, 1], [], []>} : vector<432x4xf32>, vector<4x4xf32>, vector<432x4xf32> -> vector<432x4xf32>
    %c4_63 = arith.constant 4 : index
    %c0_64 = arith.constant 0 : index
    %c0_65 = arith.constant 0 : index
    %93 = vector.load %arg7[%c4_63, %c0_64, %c0_65] : memref<9x4x4xf32, #tpu.memory_space<vmem>>, vector<1x4x4xf32>
    %94 = vector.shape_cast %93 : vector<1x4x4xf32> to vector<4x4xf32>
    %cst_66 = arith.constant dense<0.000000e+00> : vector<432x4xf32>
    %95 = tpu.matmul %75, %94, %cst_66 {dimension_numbers = #tpu.dot_dimension_numbers<[1], [0], [0], [1], [0, 0, 1, 1], [], []>} : vector<432x4xf32>, vector<4x4xf32>, vector<432x4xf32> -> vector<432x4xf32>
    %96 = arith.addf %92, %95 : vector<432x4xf32>
    %c7_67 = arith.constant 7 : index
    %c0_68 = arith.constant 0 : index
    %c0_69 = arith.constant 0 : index
    %97 = vector.load %arg7[%c7_67, %c0_68, %c0_69] : memref<9x4x4xf32, #tpu.memory_space<vmem>>, vector<1x4x4xf32>
    %98 = vector.shape_cast %97 : vector<1x4x4xf32> to vector<4x4xf32>
    %cst_70 = arith.constant dense<0.000000e+00> : vector<432x4xf32>
    %99 = tpu.matmul %77, %98, %cst_70 {dimension_numbers = #tpu.dot_dimension_numbers<[1], [0], [0], [1], [0, 0, 1, 1], [], []>} : vector<432x4xf32>, vector<4x4xf32>, vector<432x4xf32> -> vector<432x4xf32>
    %100 = arith.addf %96, %99 : vector<432x4xf32>
    %101 = arith.addf %89, %100 : vector<432x4xf32>
    %c2_71 = arith.constant 2 : index
    %c0_72 = arith.constant 0 : index
    %c0_73 = arith.constant 0 : index
    %102 = vector.load %arg7[%c2_71, %c0_72, %c0_73] : memref<9x4x4xf32, #tpu.memory_space<vmem>>, vector<1x4x4xf32>
    %103 = vector.shape_cast %102 : vector<1x4x4xf32> to vector<4x4xf32>
    %cst_74 = arith.constant dense<0.000000e+00> : vector<432x4xf32>
    %104 = tpu.matmul %76, %103, %cst_74 {dimension_numbers = #tpu.dot_dimension_numbers<[1], [0], [0], [1], [0, 0, 1, 1], [], []>} : vector<432x4xf32>, vector<4x4xf32>, vector<432x4xf32> -> vector<432x4xf32>
    %c5_75 = arith.constant 5 : index
    %c0_76 = arith.constant 0 : index
    %c0_77 = arith.constant 0 : index
    %105 = vector.load %arg7[%c5_75, %c0_76, %c0_77] : memref<9x4x4xf32, #tpu.memory_space<vmem>>, vector<1x4x4xf32>
    %106 = vector.shape_cast %105 : vector<1x4x4xf32> to vector<4x4xf32>
    %cst_78 = arith.constant dense<0.000000e+00> : vector<432x4xf32>
    %107 = tpu.matmul %75, %106, %cst_78 {dimension_numbers = #tpu.dot_dimension_numbers<[1], [0], [0], [1], [0, 0, 1, 1], [], []>} : vector<432x4xf32>, vector<4x4xf32>, vector<432x4xf32> -> vector<432x4xf32>
    %108 = arith.addf %104, %107 : vector<432x4xf32>
    %c8_79 = arith.constant 8 : index
    %c0_80 = arith.constant 0 : index
    %c0_81 = arith.constant 0 : index
    %109 = vector.load %arg7[%c8_79, %c0_80, %c0_81] : memref<9x4x4xf32, #tpu.memory_space<vmem>>, vector<1x4x4xf32>
    %110 = vector.shape_cast %109 : vector<1x4x4xf32> to vector<4x4xf32>
    %cst_82 = arith.constant dense<0.000000e+00> : vector<432x4xf32>
    %111 = tpu.matmul %77, %110, %cst_82 {dimension_numbers = #tpu.dot_dimension_numbers<[1], [0], [0], [1], [0, 0, 1, 1], [], []>} : vector<432x4xf32>, vector<4x4xf32>, vector<432x4xf32> -> vector<432x4xf32>
    %112 = arith.addf %108, %111 : vector<432x4xf32>
    %c431_i32_83 = arith.constant 431 : i32
    %113 = tpu.dynamic_rotate %112 by %c431_i32_83 dim 0 : vector<432x4xf32>, i32 -> vector<432x4xf32>
    %114 = arith.addf %101, %113 : vector<432x4xf32>
    %c0_84 = arith.constant 0 : index
    %c0_85 = arith.constant 0 : index
    %115 = vector.load %arg8[%c0_84, %c0_85] : memref<1x4xf32, #tpu.memory_space<vmem>>, vector<1x4xf32>
    %116 = vector.broadcast %115 : vector<1x4xf32> to vector<432x4xf32>
    %117 = arith.addf %114, %116 : vector<432x4xf32>
    %118 = vector.broadcast %2 : vector<432x1xf32> to vector<432x4xf32>
    %119 = arith.mulf %117, %118 : vector<432x4xf32>
    %cst_86 = arith.constant dense<0.000000e+00> : vector<4xf32>
    %120 = vector.multi_reduction <add>, %119, %cst_86 [0] : vector<432x4xf32> to vector<4xf32>
    %121 = vector.shape_cast %120 : vector<4xf32> to vector<1x4xf32>
    %122 = arith.mulf %119, %117 : vector<432x4xf32>
    %cst_87 = arith.constant dense<0.000000e+00> : vector<4xf32>
    %123 = vector.multi_reduction <add>, %122, %cst_87 [0] : vector<432x4xf32> to vector<4xf32>
    %124 = vector.shape_cast %123 : vector<4xf32> to vector<1x4xf32>
    %cst_88 = arith.constant 3.906250e-03 : f32
    %125 = vector.broadcast %cst_88 : f32 to vector<1x4xf32>
    %126 = arith.mulf %121, %125 : vector<1x4xf32>
    %cst_89 = arith.constant 3.906250e-03 : f32
    %127 = vector.broadcast %cst_89 : f32 to vector<1x4xf32>
    %128 = arith.mulf %124, %127 : vector<1x4xf32>
    %129 = arith.mulf %126, %126 : vector<1x4xf32>
    %130 = arith.subf %128, %129 : vector<1x4xf32>
    %cst_90 = arith.constant 0.000000e+00 : f32
    %131 = vector.broadcast %cst_90 : f32 to vector<1x4xf32>
    %132 = arith.maximumf %130, %131 : vector<1x4xf32>
    %cst_91 = arith.constant 9.99999974E-6 : f32
    %133 = vector.broadcast %cst_91 : f32 to vector<1x4xf32>
    %134 = arith.addf %132, %133 : vector<1x4xf32>
    %135 = math.rsqrt %134 : vector<1x4xf32>
    %c0_92 = arith.constant 0 : index
    %c0_93 = arith.constant 0 : index
    %136 = vector.load %arg9[%c0_92, %c0_93] : memref<1x4xf32, #tpu.memory_space<vmem>>, vector<1x4xf32>
    %137 = arith.mulf %135, %136 : vector<1x4xf32>
    %c0_94 = arith.constant 0 : index
    %c0_95 = arith.constant 0 : index
    %138 = vector.load %arg10[%c0_94, %c0_95] : memref<1x4xf32, #tpu.memory_space<vmem>>, vector<1x4xf32>
    %139 = arith.mulf %126, %137 : vector<1x4xf32>
    %140 = arith.subf %138, %139 : vector<1x4xf32>
    %141 = vector.broadcast %137 : vector<1x4xf32> to vector<432x4xf32>
    %142 = arith.mulf %117, %141 : vector<432x4xf32>
    %143 = arith.addf %1, %142 : vector<432x4xf32>
    %144 = vector.broadcast %140 : vector<1x4xf32> to vector<432x4xf32>
    %145 = arith.addf %143, %144 : vector<432x4xf32>
    %c0_96 = arith.constant 0 : index
    %c0_97 = arith.constant 0 : index
    %c0_98 = arith.constant 0 : index
    %146 = vector.load %arg11[%c0_96, %c0_97, %c0_98] : memref<1x432x4xf32, #tpu.memory_space<vmem>>, vector<1x432x4xf32>
    %147 = vector.shape_cast %146 : vector<1x432x4xf32> to vector<432x4xf32>
    %148 = vector.shape_cast %145 : vector<432x4xf32> to vector<1x432x4xf32>
    tpu.vector_store %arg11[%c0_96, %c0_97, %c0_98], %148 {strides = array<i32>} : memref<1x432x4xf32, #tpu.memory_space<vmem>>, vector<1x432x4xf32>,
    return
  }
  func.func @transform_0(%arg0: i32) -> (i32, i32, i32) {
    %c0_i32 = arith.constant 0 : i32
    %c0_i32_0 = arith.constant 0 : i32
    %c0_i32_1 = arith.constant 0 : i32
    return %arg0, %c0_i32, %c0_i32_0 : i32, i32, i32
  }
  func.func @transform_1(%arg0: i32) -> (i32, i32) {
    %c0_i32 = arith.constant 0 : i32
    %c0_i32_0 = arith.constant 0 : i32
    %c0_i32_1 = arith.constant 0 : i32
    return %c0_i32, %c0_i32_0 : i32, i32
  }
  func.func @transform_2(%arg0: i32) -> (i32, i32, i32) {
    %c0_i32 = arith.constant 0 : i32
    %c0_i32_0 = arith.constant 0 : i32
    %c0_i32_1 = arith.constant 0 : i32
    %c0_i32_2 = arith.constant 0 : i32
    return %c0_i32, %c0_i32_0, %c0_i32_1 : i32, i32, i32
  }
  func.func @transform_3(%arg0: i32) -> (i32, i32) {
    %c0_i32 = arith.constant 0 : i32
    %c0_i32_0 = arith.constant 0 : i32
    %c0_i32_1 = arith.constant 0 : i32
    return %c0_i32, %c0_i32_0 : i32, i32
  }
  func.func @transform_4(%arg0: i32) -> (i32, i32) {
    %c0_i32 = arith.constant 0 : i32
    %c0_i32_0 = arith.constant 0 : i32
    %c0_i32_1 = arith.constant 0 : i32
    return %c0_i32, %c0_i32_0 : i32, i32
  }
  func.func @transform_5(%arg0: i32) -> (i32, i32) {
    %c0_i32 = arith.constant 0 : i32
    %c0_i32_0 = arith.constant 0 : i32
    %c0_i32_1 = arith.constant 0 : i32
    return %c0_i32, %c0_i32_0 : i32, i32
  }
  func.func @transform_6(%arg0: i32) -> (i32, i32, i32) {
    %c0_i32 = arith.constant 0 : i32
    %c0_i32_0 = arith.constant 0 : i32
    %c0_i32_1 = arith.constant 0 : i32
    %c0_i32_2 = arith.constant 0 : i32
    return %c0_i32, %c0_i32_0, %c0_i32_1 : i32, i32, i32
  }
  func.func @transform_7(%arg0: i32) -> (i32, i32) {
    %c0_i32 = arith.constant 0 : i32
    %c0_i32_0 = arith.constant 0 : i32
    %c0_i32_1 = arith.constant 0 : i32
    return %c0_i32, %c0_i32_0 : i32, i32
  }
  func.func @transform_8(%arg0: i32) -> (i32, i32) {
    %c0_i32 = arith.constant 0 : i32
    %c0_i32_0 = arith.constant 0 : i32
    %c0_i32_1 = arith.constant 0 : i32
    return %c0_i32, %c0_i32_0 : i32, i32
  }
  func.func @transform_9(%arg0: i32) -> (i32, i32) {
    %c0_i32 = arith.constant 0 : i32
    %c0_i32_0 = arith.constant 0 : i32
    %c0_i32_1 = arith.constant 0 : i32
    return %c0_i32, %c0_i32_0 : i32, i32
  }
  func.func @transform_10(%arg0: i32) -> (i32, i32, i32) {
    %c0_i32 = arith.constant 0 : i32
    %c0_i32_0 = arith.constant 0 : i32
    %c0_i32_1 = arith.constant 0 : i32
    return %arg0, %c0_i32, %c0_i32_0 : i32, i32, i32
  }
}

</mosaic_0001>

<bundles_post_ra>
// kernel: tpu_custom_call.1
= control target key start
LH: loop header
LB: loop body
LE: loop exit
PB: predicated region body
PF: predicated region fallthrough
CT: control target
= control target key end

     0   :  { %6 = vsyncpa [#allocation3], 0  ;;  %s115_s0 = inlined_call_operand.hbm [shape: f32[8,128], index: 0, kind: input, shape index: {}]   ;;  %s116_s1 = inlined_call_operand.hbm [shape: f32[8,128], index: 1, kind: output, shape index: {}]  }
   0x1   :  { %7 = vsyncpa [#allocation4], 0  ;;  %s13_s8 = sshll.u32 %s115_s0, 4  ;;  %s97_s9 = smov [#allocation2]   ;;  %s14_s8 = int_to_ptr.hbm [resolvable:$true] %s13_s8 }
   0x2   :  { %s15_s10 = sshll.u32 %s97_s9, 4  ;;  %s16_s10 = int_to_ptr.vmem [resolvable:$true] %s15_s10 }
   0x3   :  { %18 = dma.hbm_to_vmem [thread:$0]  %s14_s8, 128, %s16_s10, [#allocation3]  }
   0x4   :  { %93 = dma.done.wait [#allocation3], 128  }
   0x5   :  { %94 = vsyncadd [#allocation3], 4294967168  ;;  %s98_s11 = smov [#allocation5]   ;;  %s33_s15 = sshll.u32 %s116_s1, 4  ;;  %v23_v0 = vld [vmem:[#allocation2] sm:$0xff]  ;;  %s34_s15 = int_to_ptr.hbm [resolvable:$true] %s33_s15 }
   0x6   :  { %s31_s12 = sshll.u32 %s98_s11, 4  ;;  %v24_v1 = vrot.slane %v23_v0, 7  ;;  %s32_s12 = int_to_ptr.vmem [resolvable:$true] %s31_s12 }
   0x8   :  { %25 = vst [vmem:[#allocation5] sm:$0xff] %v24_v1 }
   0x9   :  { %36 = dma.vmem_to_hbm [thread:$0]  %s32_s12, 128, %s34_s15, [#allocation4]  }
   0xa   :  { %95 = dma.done.wait [#allocation4], 128  }
   0xb   :  { %96 = vsyncadd [#allocation4], 4294967168 }
   0xc   :  { %41 = vsyncpa [#allocation3], 1 }
   0xd   :  { %42 = vsyncpa [#allocation4], 1 }

// kernel: _resnet_block_impl.1
= control target key start
LH: loop header
LB: loop body
LE: loop exit
PB: predicated region body
PF: predicated region fallthrough
CT: control target
= control target key end

     0   :  { %s7914_s13 = smov 0   ;;  %s14375_s0 = inlined_call_operand.vmem [shape: f32[2,432,4], index: 0, kind: input, shape index: {}]   ;;  %s14376_s1 = inlined_call_operand.vmem [shape: f32[432,1], index: 1, kind: input, shape index: {}]   ;;  %s14377_s2 = inlined_call_operand.vmem [shape: f32[9,4,4], index: 2, kind: input, shape index: {}]   ;;  %s14378_s3 = inlined_call_operand.vmem [shape: f32[1,4], index: 3, kind: input, shape index: {}]   ;;  %s14379_s4 = inlined_call_operand.vmem [shape: f32[1,4], index: 4, kind: input, shape index: {}]   ;;  %s14380_s5 = inlined_call_operand.vmem [shape: f32[1,4], index: 5, kind: input, shape index: {}]   ;;  %s14381_s6 = inlined_call_operand.vmem [shape: f32[9,4,4], index: 6, kind: input, shape index: {}]   ;;  %s14382_s7 = inlined_call_operand.vmem [shape: f32[1,4], index: 7, kind: input, shape index: {}]   ;;  %s14383_s8 = inlined_call_operand.vmem [shape: f32[1,4], index: 8, kind: input, shape index: {}]   ;;  %s14384_s9 = inlined_call_operand.vmem [shape: f32[1,4], index: 9, kind: input, shape index: {}]   ;;  %s14385_s10 = inlined_call_operand.vmem [shape: f32[2,432,4], index: 10, kind: output, shape index: {}]  }
   0x1 LB: > { %s6671_s14 = sadd.s32 4294967295, %s7856_s13   ;;  %p6675_p0 = scmp.ge.s32.totalorder %s7856_s13, 1  ;;  %s7856_s13 = sphi %s7914_s13, %s20_s13  }
   0x2   : > { %p312_p1 = scmp.lt.s32.totalorder %s7856_s13, 3 }
   0x4   : > { %p313_p2 = pnand %p6675_p0, %p312_p1 }
   0x6   : > { %316 = sbr.rel (%p313_p2) target bundleno = 2876 (0xb3c), region = 60 }
   0xb   : > { %v6678_v0 = vld [vmem:[%s14377_s2 + $0xc] sm:$0xf]  ;;  %vm634_vm0 = vcmask 1043456   ;;  %v468_v1 = vld [vmem:[%s14377_s2] sm:$0xf]  ;;  %p350_p3 = scmp.lt.s32.totalorder %s6671_s14, 1 }
   0xc   : > { %7686 = vmatpush.msk.msra.mxu2 %vm634_vm0, %v6678_v0  ;;  %7687 = vmatpush.msk.msra.mxu3 %vm634_vm0, %v468_v1  ;;  %v6789_v2 = vld [vmem:[%s14377_s2 + $0x18] sm:$0xf]  ;;  %v6846_v3 = vld [vmem:[%s14377_s2 + $0x10] sm:$0xf]  ;;  %v6845_v4 = vld [vmem:[%s14377_s2 + $0x4] sm:$0xf] }
   0xd   : > { %s15510_s14 = smov (!%p350_p3, %s6671_s14), 1  ;;  %6679 = vmatpush.msk.msra.mxu0 %vm634_vm0, %v6678_v0  ;;  %6734 = vmatpush.msk.msra.mxu1 %vm634_vm0, %v468_v1  ;;  %vm471_vm1 = vcmask 31744  }
   0xe   : > { %6790 = vmatpush.msk.msrb.mxu2 %vm634_vm0, %v6789_v2  ;;  %6847 = vmatpush.msk.msrb.mxu3 %vm634_vm0, %v6846_v3  ;;  %s7688_s25 = smul.u32 432, %s15510_s14 }
   0xf   : > { %6902 = vmatpush.msk.msrb.mxu0 %vm634_vm0, %v6845_v4 }
  0x10   : > { %s7952_s28 = scalar_lea.vmem %s14375_s0, %s7688_s25  ;;  %s14138_s19 = scalar_lea.vmem %s14385_s10, %s7688_s25 }
  0x11   : > { %v7955_v5 = vld [vmem:[%s7952_s28 + $0xd8] sm:$0xff]  ;;  %v7958_v6 = vld [vmem:[%s7952_s28 + $0xc0] sm:$0xff]  ;;  %v7978_v10 = vld [vmem:[%s7952_s28 + $0xc8] sm:$0xff] }
  0x12   : > { %v7961_v7 = vld [vmem:[%s7952_s28] sm:$0xff]  ;;  %6707 = vmatmul.msk.f32.vlgmr.msra.gmra.mxu2 %vm471_vm1, %v7955_v5  ;;  %6762 = vmatmul.msk.f32.vlgmr.msra.gmra.mxu3 %vm471_vm1, %v7958_v6  ;;  %v7968_v8 = vld [vmem:[%s7952_s28 + $0x198] sm:$0xff]  ;;  %v7981_v11 = vld [vmem:[%s7952_s28 + $0x8] sm:$0xff] }
  0x13   : > { %6680 = vmatmul.msk.f32.vlgmr.msra.gmra.mxu0 %vm471_vm1, %v7961_v7  ;;  %6735 = vmatmul.msk.f32.vlgmr.msra.gmra.mxu1 %vm471_vm1, %v7968_v8  ;;  %v7975_v9 = vld [vmem:[%s7952_s28 + $0xe0] sm:$0xff]  ;;  %v7995_v13 = vld [vmem:[%s7952_s28 + $0xe8] sm:$0xff]  ;;  %v7998_v14 = vld [vmem:[%s7952_s28 + $0xd0] sm:$0xff] }
  0x14   : > { %v7984_v12 = vld [vmem:[%s7952_s28 + $0x1a0] sm:$0xff]  ;;  %v8001_v15 = vld [vmem:[%s7952_s28 + $0x10] sm:$0xff]  ;;  %v8004_v16 = vld [vmem:[%s7952_s28 + $0x1a8] sm:$0xff] }
  0x15   : > { %v390_v17 = vld [vmem:[%s7952_s28 + $0xf0] sm:$0xff]  ;;  %v8016_v18 = vld [vmem:[%s7952_s28 + $0x18] sm:$0xff]  ;;  %v8027_v20 = vld [vmem:[%s7952_s28 + $0x20] sm:$0xff] }
  0x16   : > { %v391_v19 = vld [vmem:[%s7952_s28 + $0xf8] sm:$0xff]  ;;  %v392_v21 = vld [vmem:[%s7952_s28 + $0x100] sm:$0xff]  ;;  %v8038_v22 = vld [vmem:[%s7952_s28 + $0x28] sm:$0xff] }
  0x17   : > { %v393_v23 = vld [vmem:[%s7952_s28 + $0x108] sm:$0xff]  ;;  %v8049_v24 = vld [vmem:[%s7952_s28 + $0x30] sm:$0xff]  ;;  %v8059_v26 = vld [vmem:[%s7952_s28 + $0x38] sm:$0xff] }
  0x18   : > { %v394_v25 = vld [vmem:[%s7952_s28 + $0x110] sm:$0xff]  ;;  %v395_v27 = vld [vmem:[%s7952_s28 + $0x118] sm:$0xff]  ;;  %v8069_v28 = vld [vmem:[%s7952_s28 + $0x40] sm:$0xff] }
  0x19   : > { %v396_v29 = vld [vmem:[%s7952_s28 + $0x120] sm:$0xff]  ;;  %v8079_v30 = vld [vmem:[%s7952_s28 + $0x48] sm:$0xff]  ;;  %v8089_v32 = vld [vmem:[%s7952_s28 + $0x50] sm:$0xff] }
  0x1a   : > { %6708 = vmatmul.msk.f32.gmra.mxu2 %vm471_vm1, %v7975_v9  ;;  %6763 = vmatmul.msk.f32.gmra.mxu3 %vm471_vm1, %v7978_v10  ;;  %v397_v31 = vld [vmem:[%s7952_s28 + $0x128] sm:$0xff]  ;;  %v398_v33 = vld [vmem:[%s7952_s28 + $0x130] sm:$0xff]  ;;  %v8099_v34 = vld [vmem:[%s7952_s28 + $0x58] sm:$0xff] }
  0x1b   : > { %6681 = vmatmul.msk.f32.gmra.mxu0 %vm471_vm1, %v7981_v11  ;;  %6736 = vmatmul.msk.f32.gmra.mxu1 %vm471_vm1, %v7984_v12  ;;  %v399_v35 = vld [vmem:[%s7952_s28 + $0x138] sm:$0xff]  ;;  %v8109_v36 = vld [vmem:[%s7952_s28 + $0x60] sm:$0xff]  ;;  %v8119_v38 = vld [vmem:[%s7952_s28 + $0x68] sm:$0xff] }
  0x1c   : > { %v400_v37 = vld [vmem:[%s7952_s28 + $0x140] sm:$0xff]  ;;  %v401_v39 = vld [vmem:[%s7952_s28 + $0x148] sm:$0xff]  ;;  %v8129_v40 = vld [vmem:[%s7952_s28 + $0x70] sm:$0xff] }
  0x1d   : > { %v402_v41 = vld [vmem:[%s7952_s28 + $0x150] sm:$0xff]  ;;  %v8139_v42 = vld [vmem:[%s7952_s28 + $0x78] sm:$0xff]  ;;  %v8153_v46 = vld [vmem:[%s7952_s28 + $0x80] sm:$0xff] }
  0x1e   : > { %v403_v43 = vld [vmem:[%s7952_s28 + $0x158] sm:$0xff]  ;;  %v404_v50 = vld [vmem:[%s7952_s28 + $0x160] sm:$0xff]  ;;  %v8169_v53 = vld [vmem:[%s7952_s28 + $0x88] sm:$0xff] }
  0x1f   : > { %v405_v57 = vld [vmem:[%s7952_s28 + $0x168] sm:$0xff]  ;;  %v8185_v60 = vld [vmem:[%s7952_s28 + $0x90] sm:$0xff]  ;;  %v8201_v3 = vld [vmem:[%s7952_s28 + $0x98] sm:$0xff] }
  0x20   : > { %v406_v0 = vld [vmem:[%s7952_s28 + $0x170] sm:$0xff] }
  0x22   : > { %6709 = vmatmul.msk.f32.gmra.mxu2 %vm471_vm1, %v7995_v13  ;;  %6764 = vmatmul.msk.f32.gmra.mxu3 %vm471_vm1, %v7998_v14 }
  0x23   : > { %6682 = vmatmul.msk.f32.gmra.mxu0 %vm471_vm1, %v8001_v15  ;;  %6737 = vmatmul.msk.f32.gmra.mxu1 %vm471_vm1, %v8004_v16 }
  0x2a   : > { %6710 = vmatmul.msk.f32.gmra.mxu2 %vm471_vm1, %v390_v17  ;;  %6765 = vmatmul.msk.f32.gmra.mxu3 %vm471_vm1, %v7955_v5 }
  0x2b   : > { %6683 = vmatmul.msk.f32.gmra.mxu0 %vm471_vm1, %v8016_v18  ;;  %6738 = vmatmul.msk.f32.gmra.mxu1 %vm471_vm1, %v7961_v7 }
  0x32   : > { %6711 = vmatmul.msk.f32.gmra.mxu2 %vm471_vm1, %v391_v19  ;;  %6766 = vmatmul.msk.f32.gmra.mxu3 %vm471_vm1, %v7975_v9 }
  0x33   : > { %6684 = vmatmul.msk.f32.gmra.mxu0 %vm471_vm1, %v8027_v20  ;;  %6739 = vmatmul.msk.f32.gmra.mxu1 %vm471_vm1, %v7981_v11 }
  0x3a   : > { %6712 = vmatmul.msk.f32.gmra.mxu2 %vm471_vm1, %v392_v21  ;;  %6767 = vmatmul.msk.f32.gmra.mxu3 %vm471_vm1, %v7995_v13 }
  0x3b   : > { %6685 = vmatmul.msk.f32.gmra.mxu0 %vm471_vm1, %v8038_v22  ;;  %6740 = vmatmul.msk.f32.gmra.mxu1 %vm471_vm1, %v8001_v15 }
  0x42   : > { %6713 = vmatmul.msk.f32.gmra.mxu2 %vm471_vm1, %v393_v23  ;;  %6768 = vmatmul.msk.f32.gmra.mxu3 %vm471_vm1, %v390_v17 }
  0x43   : > { %6686 = vmatmul.msk.f32.gmra.mxu0 %vm471_vm1, %v8049_v24  ;;  %6741 = vmatmul.msk.f32.gmra.mxu1 %vm471_vm1, %v8016_v18 }
  0x4a   : > { %6714 = vmatmul.msk.f32.gmra.mxu2 %vm471_vm1, %v394_v25  ;;  %6769 = vmatmul.msk.f32.gmra.mxu3 %vm471_vm1, %v391_v19 }
  0x4b   : > { %6687 = vmatmul.msk.f32.gmra.mxu0 %vm471_vm1, %v8059_v26  ;;  %6742 = vmatmul.msk.f32.gmra.mxu1 %vm471_vm1, %v8027_v20 }
  0x52   : > { %6715 = vmatmul.msk.f32.gmra.mxu2 %vm471_vm1, %v395_v27  ;;  %6770 = vmatmul.msk.f32.gmra.mxu3 %vm471_vm1, %v392_v21  ;;  %v407_v21 = vld [vmem:[%s7952_s28 + $0x178] sm:$0xff] }
  0x53   : > { %6688 = vmatmul.msk.f32.gmra.mxu0 %vm471_vm1, %v8069_v28  ;;  %6743 = vmatmul.msk.f32.gmra.mxu1 %vm471_vm1, %v8038_v22 }
  0x5a   : > { %6716 = vmatmul.msk.f32.gmra.mxu2 %vm471_vm1, %v396_v29  ;;  %6771 = vmatmul.msk.f32.gmra.mxu3 %vm471_vm1, %v393_v23 }
  0x5b   : > { %6689 = vmatmul.msk.f32.gmra.mxu0 %vm471_vm1, %v8079_v30  ;;  %6744 = vmatmul.msk.f32.gmra.mxu1 %vm471_vm1, %v8049_v24 }
  0x62   : > { %6717 = vmatmul.msk.f32.gmra.mxu2 %vm471_vm1, %v397_v31  ;;  %6772 = vmatmul.msk.f32.gmra.mxu3 %vm471_vm1, %v394_v25 }
  0x63   : > { %6690 = vmatmul.msk.f32.gmra.mxu0 %vm471_vm1, %v8089_v32  ;;  %6745 = vmatmul.msk.f32.gmra.mxu1 %vm471_vm1, %v8059_v26 }
  0x6a   : > { %6718 = vmatmul.msk.f32.gmra.mxu2 %vm471_vm1, %v398_v33  ;;  %6773 = vmatmul.msk.f32.gmra.mxu3 %vm471_vm1, %v395_v27  ;;  %v8217_v27 = vld [vmem:[%s7952_s28 + $0xa0] sm:$0xff] }
  0x6b   : > { %6691 = vmatmul.msk.f32.gmra.mxu0 %vm471_vm1, %v8099_v34  ;;  %6746 = vmatmul.msk.f32.gmra.mxu1 %vm471_vm1, %v8069_v28 }
  0x72   : > { %6719 = vmatmul.msk.f32.gmra.mxu2 %vm471_vm1, %v399_v35  ;;  %6774 = vmatmul.msk.f32.gmra.mxu3 %vm471_vm1, %v396_v29 }
  0x73   : > { %6692 = vmatmul.msk.f32.gmra.mxu0 %vm471_vm1, %v8109_v36  ;;  %6747 = vmatmul.msk.f32.gmra.mxu1 %vm471_vm1, %v8079_v30 }
  0x7a   : > { %6720 = vmatmul.msk.f32.gmra.mxu2 %vm471_vm1, %v400_v37  ;;  %6775 = vmatmul.msk.f32.gmra.mxu3 %vm471_vm1, %v397_v31 }
  0x7b   : > { %6693 = vmatmul.msk.f32.gmra.mxu0 %vm471_vm1, %v8119_v38  ;;  %6748 = vmatmul.msk.f32.gmra.mxu1 %vm471_vm1, %v8089_v32 }
  0x82   : > { %6721 = vmatmul.msk.f32.gmra.mxu2 %vm471_vm1, %v401_v39  ;;  %6776 = vmatmul.msk.f32.gmra.mxu3 %vm471_vm1, %v398_v33 }
  0x83   : > { %6694 = vmatmul.msk.f32.gmra.mxu0 %vm471_vm1, %v8129_v40  ;;  %6749 = vmatmul.msk.f32.gmra.mxu1 %vm471_vm1, %v8099_v34 }
  0x8a   : > { %6722 = vmatmul.msk.f32.gmra.mxu2 %vm471_vm1, %v402_v41  ;;  %6777 = vmatmul.msk.f32.gmra.mxu3 %vm471_vm1, %v399_v35  ;;  %v408_v35 = vld [vmem:[%s7952_s28 + $0x180] sm:$0xff] }
  0x8b   : > { %6695 = vmatmul.msk.f32.gmra.mxu0 %vm471_vm1, %v8139_v42  ;;  %6750 = vmatmul.msk.f32.gmra.mxu1 %vm471_vm1, %v8109_v36 }
  0x90   : > { %v8148_v44 = vpop.f32.mrf.mxu0  ;;  %v8150_v45 = vpop.f32.mrf.mxu1 }
  0x92   : > { %6723 = vmatmul.msk.f32.gmra.mxu2 %vm471_vm1, %v403_v43  ;;  %6778 = vmatmul.msk.f32.gmra.mxu3 %vm471_vm1, %v400_v37 }
  0x93   : > { %6696 = vmatmul.msk.f32.gmra.mxu0 %vm471_vm1, %v8153_v46  ;;  %6751 = vmatmul.msk.f32.gmra.mxu1 %vm471_vm1, %v8119_v38 }
  0x95   : > { %v736_v47 = vpop.f32.mrf.mxu2  ;;  %v918_v48 = vpop.f32.mrf.mxu3 }
  0x96   : > { %v8161_v49 = vadd.f32 %v918_v48, %v736_v47 }
  0x98   : > { %14593 = vst [vmem:[#allocation2_spill] sm:$0xff] %v8161_v49  ;;  %v8164_v51 = vpop.f32.mrf.mxu0  ;;  %v8166_v52 = vpop.f32.mrf.mxu1 }
  0x9a   : > { %6724 = vmatmul.msk.f32.gmra.mxu2 %vm471_vm1, %v404_v50  ;;  %6779 = vmatmul.msk.f32.gmra.mxu3 %vm471_vm1, %v401_v39 }
  0x9b   : > { %6697 = vmatmul.msk.f32.gmra.mxu0 %vm471_vm1, %v8169_v53  ;;  %6752 = vmatmul.msk.f32.gmra.mxu1 %vm471_vm1, %v8129_v40 }
  0x9d   : > { %v739_v54 = vpop.f32.mrf.mxu2  ;;  %v921_v55 = vpop.f32.mrf.mxu3 }
  0x9e   : > { %v8177_v56 = vadd.f32 %v921_v55, %v739_v54 }
  0xa0   : > { %14594 = vst [vmem:[#allocation3_spill] sm:$0xff] %v8177_v56  ;;  %v8180_v58 = vpop.f32.mrf.mxu0  ;;  %v8182_v59 = vpop.f32.mrf.mxu1 }
  0xa2   : > { %6725 = vmatmul.msk.f32.gmra.mxu2 %vm471_vm1, %v405_v57  ;;  %6780 = vmatmul.msk.f32.gmra.mxu3 %vm471_vm1, %v402_v41  ;;  %v8233_v41 = vld [vmem:[%s7952_s28 + $0xa8] sm:$0xff] }
  0xa3   : > { %6698 = vmatmul.msk.f32.gmra.mxu0 %vm471_vm1, %v8185_v60  ;;  %6753 = vmatmul.msk.f32.gmra.mxu1 %vm471_vm1, %v8139_v42 }
  0xa5   : > { %v742_v61 = vpop.f32.mrf.mxu2  ;;  %v924_v62 = vpop.f32.mrf.mxu3 }
  0xa6   : > { %v8193_v63 = vadd.f32 %v924_v62, %v742_v61  ;;  %v8249_v61 = vld [vmem:[%s7952_s28 + $0xb0] sm:$0xff] }
  0xa8   : > { %14595 = vst [vmem:[#allocation4_spill] sm:$0xff] %v8193_v63  ;;  %v8196_v1 = vpop.f32.mrf.mxu0  ;;  %v8198_v2 = vpop.f32.mrf.mxu1 }
  0xaa   : > { %6726 = vmatmul.msk.f32.gmra.mxu2 %vm471_vm1, %v406_v0  ;;  %6781 = vmatmul.msk.f32.gmra.mxu3 %vm471_vm1, %v403_v43 }
  0xab   : > { %6699 = vmatmul.msk.f32.gmra.mxu0 %vm471_vm1, %v8201_v3  ;;  %6754 = vmatmul.msk.f32.gmra.mxu1 %vm471_vm1, %v8153_v46 }
  0xad   : > { %v745_v4 = vpop.f32.mrf.mxu2  ;;  %v927_v17 = vpop.f32.mrf.mxu3 }
  0xae   : > { %v8209_v19 = vadd.f32 %v927_v17, %v745_v4  ;;  %v410_v17 = vld [vmem:[%s7952_s28 + $0x190] sm:$0xff] }
  0xb0   : > { %14596 = vst [vmem:[#allocation5_spill] sm:$0xff] %v8209_v19  ;;  %v8212_v23 = vpop.f32.mrf.mxu0  ;;  %v8214_v25 = vpop.f32.mrf.mxu1 }
  0xb2   : > { %6727 = vmatmul.msk.f32.gmra.mxu2 %vm471_vm1, %v407_v21  ;;  %6782 = vmatmul.msk.f32.gmra.mxu3 %vm471_vm1, %v404_v50  ;;  %v409_v50 = vld [vmem:[%s7952_s28 + $0x188] sm:$0xff] }
  0xb3   : > { %6700 = vmatmul.msk.f32.gmra.mxu0 %vm471_vm1, %v8217_v27  ;;  %6755 = vmatmul.msk.f32.gmra.mxu1 %vm471_vm1, %v8169_v53 }
  0xb5   : > { %v748_v29 = vpop.f32.mrf.mxu2  ;;  %v930_v31 = vpop.f32.mrf.mxu3 }
  0xb6   : > { %v8225_v33 = vadd.f32 %v930_v31, %v748_v29 }
  0xb8   : > { %14597 = vst [vmem:[#allocation6_spill] sm:$0xff] %v8225_v33  ;;  %v8228_v37 = vpop.f32.mrf.mxu0  ;;  %v8230_v39 = vpop.f32.mrf.mxu1 }
  0xba   : > { %6728 = vmatmul.msk.f32.gmra.mxu2 %vm471_vm1, %v408_v35  ;;  %6783 = vmatmul.msk.f32.gmra.mxu3 %vm471_vm1, %v405_v57 }
  0xbb   : > { %6701 = vmatmul.msk.f32.gmra.mxu0 %vm471_vm1, %v8233_v41  ;;  %6756 = vmatmul.msk.f32.gmra.mxu1 %vm471_vm1, %v8185_v60 }
  0xbd   : > { %v751_v43 = vpop.f32.mrf.mxu2  ;;  %v933_v47 = vpop.f32.mrf.mxu3 }
  0xbe   : > { %v8241_v48 = vadd.f32 %v933_v47, %v751_v43  ;;  %v8265_v43 = vld [vmem:[%s7952_s28 + $0xb8] sm:$0xff]  ;;  %v7013_v47 = vld [vmem:[%s14377_s2 + $0x8] sm:$0xf] }
  0xbf   : > { %7070 = vmatpush.msk.msra.mxu3 %vm634_vm0, %v7013_v47 }
  0xc0   : > { %14598 = vst [vmem:[#allocation7_spill] sm:$0xff] %v8241_v48  ;;  %v8244_v54 = vpop.f32.mrf.mxu0  ;;  %v8246_v55 = vpop.f32.mrf.mxu1 }
  0xc2   : > { %6729 = vmatmul.msk.f32.gmra.mxu2 %vm471_vm1, %v409_v50  ;;  %6784 = vmatmul.msk.f32.gmra.mxu3 %vm471_vm1, %v406_v0  ;;  %v7014_v0 = vld [vmem:[%s14377_s2 + $0x14] sm:$0xf] }
  0xc3   : > { %6702 = vmatmul.msk.f32.gmra.mxu0 %vm471_vm1, %v8249_v61  ;;  %6757 = vmatmul.msk.f32.gmra.mxu1 %vm471_vm1, %v8201_v3 }
  0xc4   : > { %7015 = vmatpush.msk.msra.mxu2 %vm634_vm0, %v7014_v0  ;;  %v7125_v0 = vld [vmem:[%s14377_s2 + $0x20] sm:$0xf] }
  0xc5   : > { %v754_v57 = vpop.f32.mrf.mxu2  ;;  %v936_v62 = vpop.f32.mrf.mxu3  ;;  %7126 = vmatpush.msk.msra.mxu0 %vm634_vm0, %v7125_v0 }
  0xc6   : > { %v8257_v4 = vadd.f32 %v936_v62, %v754_v57 }
  0xc8   : > { %14599 = vst [vmem:[#allocation8_spill] sm:$0xff] %v8257_v4  ;;  %v8260_v29 = vpop.f32.mrf.mxu0  ;;  %v8262_v31 = vpop.f32.mrf.mxu1  ;;  %v6957_v4 = vld [vmem:[%s14377_s2 + $0x1c] sm:$0xf] }
  0xc9   : > { %6958 = vmatpush.msk.msrb.mxu1 %vm634_vm0, %v6957_v4 }
  0xca   : > { %6730 = vmatmul.msk.f32.gmra.mxu2 %vm471_vm1, %v410_v17  ;;  %6785 = vmatmul.msk.f32.gmra.mxu3 %vm471_vm1, %v407_v21 }
  0xcb   : > { %6703 = vmatmul.msk.f32.gmra.mxu0 %vm471_vm1, %v8265_v43  ;;  %6758 = vmatmul.msk.f32.gmra.mxu1 %vm471_vm1, %v8217_v27 }
  0xcd   : > { %v757_v57 = vpop.f32.mrf.mxu2  ;;  %v939_v21 = vpop.f32.mrf.mxu3 }
  0xce   : > { %v8281_v62 = vadd.f32 %v939_v21, %v757_v57 }
  0xd0   : > { %14600 = vst [vmem:[#allocation9_spill] sm:$0xff] %v8281_v62  ;;  %v8287_v48 = vpop.f32.mrf.mxu0  ;;  %v8289_v33 = vpop.f32.mrf.mxu1 }
  0xd2   : > { %6731 = vmatmul.msk.f32.gmra.mxu2 %vm471_vm1, %v7968_v8  ;;  %6786 = vmatmul.msk.f32.gmra.mxu3 %vm471_vm1, %v408_v35 }
  0xd3   : > { %6704 = vmatmul.msk.f32.gmra.mxu0 %vm471_vm1, %v7958_v6  ;;  %6759 = vmatmul.msk.f32.gmra.mxu1 %vm471_vm1, %v8233_v41 }
  0xd5   : > { %v760_v4 = vpop.f32.mrf.mxu2  ;;  %v942_v47 = vpop.f32.mrf.mxu3 }
  0xd6   : > { %v8302_v57 = vadd.f32 %v942_v47, %v760_v4 }
  0xd8   : > { %14601 = vst [vmem:[#allocation10_spill] sm:$0xff] %v8302_v57  ;;  %v8304_v21 = vpop.f32.mrf.mxu0  ;;  %v8306_v62 = vpop.f32.mrf.mxu1 }
  0xda   : > { %6732 = vmatmul.msk.f32.gmra.mxu2 %vm471_vm1, %v7984_v12  ;;  %6787 = vmatmul.msk.f32.gmra.mxu3 %vm471_vm1, %v409_v50 }
  0xdb   : > { %6705 = vmatmul.msk.f32.gmra.mxu0 %vm471_vm1, %v7978_v10  ;;  %6760 = vmatmul.msk.f32.gmra.mxu1 %vm471_vm1, %v8249_v61 }
  0xdd   : > { %v763_v35 = vpop.f32.mrf.mxu2  ;;  %v945_v0 = vpop.f32.mrf.mxu3 }
  0xde   : > { %v8315_v19 = vadd.f32 %v945_v0, %v763_v35 }
  0xe0   : > { %14602 = vst [vmem:[#allocation11_spill] sm:$0xff] %v8315_v19  ;;  %v8317_v4 = vpop.f32.mrf.mxu0  ;;  %v8319_v47 = vpop.f32.mrf.mxu1 }
  0xe2   : > { %6733 = vmatmul.msk.f32.gmra.mxu2 %vm471_vm1, %v8004_v16  ;;  %6788 = vmatmul.msk.f32.gmra.mxu3 %vm471_vm1, %v410_v17 }
  0xe3   : > { %6706 = vmatmul.msk.f32.gmra.mxu0 %vm471_vm1, %v7998_v14  ;;  %6761 = vmatmul.msk.f32.gmra.mxu1 %vm471_vm1, %v8265_v43 }
  0xe5   : > { %v766_v50 = vpop.f32.mrf.mxu2  ;;  %v948_v57 = vpop.f32.mrf.mxu3 }
  0xe6   : > { %v8328_v63 = vadd.f32 %v948_v57, %v766_v50 }
  0xe8   : > { %14603 = vst [vmem:[#allocation12_spill] sm:$0xff] %v8328_v63  ;;  %v8330_v35 = vpop.f32.mrf.mxu0  ;;  %v8332_v0 = vpop.f32.mrf.mxu1 }
  0xea   : > { %6791 = vmatmul.msk.f32.vlgmr.msrb.gmra.mxu2 %vm471_vm1, %v8016_v18  ;;  %6848 = vmatmul.msk.f32.vlgmr.msrb.gmra.mxu3 %vm471_vm1, %v7961_v7 }
  0xeb   : > { %6903 = vmatmul.msk.f32.vlgmr.msrb.gmra.mxu0 %vm471_vm1, %v7968_v8  ;;  %6959 = vmatmul.msk.f32.vlgmr.msrb.gmra.mxu1 %vm471_vm1, %v8016_v18 }
  0xed   : > { %v769_v17 = vpop.f32.mrf.mxu2  ;;  %v951_v19 = vpop.f32.mrf.mxu3 }
  0xee   : > { %v8342_v57 = vadd.f32 %v951_v19, %v769_v17 }
  0xf0   : > { %14604 = vst [vmem:[#allocation13_spill] sm:$0xff] %v8342_v57  ;;  %v8344_v50 = vpop.f32.mrf.mxu0  ;;  %v8346_v63 = vpop.f32.mrf.mxu1 }
  0xf2   : > { %6792 = vmatmul.msk.f32.gmra.mxu2 %vm471_vm1, %v8027_v20  ;;  %6849 = vmatmul.msk.f32.gmra.mxu3 %vm471_vm1, %v7981_v11 }
  0xf3   : > { %6904 = vmatmul.msk.f32.gmra.mxu0 %vm471_vm1, %v7984_v12  ;;  %6960 = vmatmul.msk.f32.gmra.mxu1 %vm471_vm1, %v8027_v20 }
  0xf5   : > { %v772_v8 = vpop.f32.mrf.mxu2  ;;  %v954_v56 = vpop.f32.mrf.mxu3 }
  0xf6   : > { %v8356_v19 = vadd.f32 %v954_v56, %v772_v8 }
  0xf8   : > { %14605 = vst [vmem:[#allocation14_spill] sm:$0xff] %v8356_v19  ;;  %v8358_v17 = vpop.f32.mrf.mxu0  ;;  %v8360_v57 = vpop.f32.mrf.mxu1 }
  0xf9   : > { %14606 = vst [vmem:[#allocation15_spill] sm:$0xff] %v8360_v57 }
  0xfa   : > { %6793 = vmatmul.msk.f32.gmra.mxu2 %vm471_vm1, %v8038_v22  ;;  %6850 = vmatmul.msk.f32.gmra.mxu3 %vm471_vm1, %v8001_v15 }
  0xfb   : > { %6905 = vmatmul.msk.f32.gmra.mxu0 %vm471_vm1, %v8004_v16  ;;  %6961 = vmatmul.msk.f32.gmra.mxu1 %vm471_vm1, %v8038_v22 }
  0xfd   : > { %v775_v12 = vpop.f32.mrf.mxu2  ;;  %v957_v49 = vpop.f32.mrf.mxu3 }
  0xfe   : > { %v8370_v56 = vadd.f32 %v957_v49, %v775_v12 }
 0x100   : > { %14607 = vst [vmem:[#allocation16_spill] sm:$0xff] %v8370_v56  ;;  %v8372_v8 = vpop.f32.mrf.mxu0  ;;  %v8374_v19 = vpop.f32.mrf.mxu1 }
 0x101   : > { %14608 = vst [vmem:[#allocation17_spill] sm:$0xff] %v8374_v19 }
 0x102   : > { %6794 = vmatmul.msk.f32.gmra.mxu2 %vm471_vm1, %v8049_v24  ;;  %6851 = vmatmul.msk.f32.gmra.mxu3 %vm471_vm1, %v8016_v18 }
 0x103   : > { %6906 = vmatmul.msk.f32.gmra.mxu0 %vm471_vm1, %v7961_v7  ;;  %6962 = vmatmul.msk.f32.gmra.mxu1 %vm471_vm1, %v8049_v24 }
 0x105   : > { %v778_v16 = vpop.f32.mrf.mxu2  ;;  %v960_v57 = vpop.f32.mrf.mxu3 }
 0x106   : > { %v8384_v49 = vadd.f32 %v960_v57, %v778_v16 }
 0x108   : > { %14609 = vst [vmem:[#allocation18_spill] sm:$0xff] %v8384_v49  ;;  %v8386_v12 = vpop.f32.mrf.mxu0  ;;  %v8388_v56 = vpop.f32.mrf.mxu1 }
 0x109   : > { %14610 = vst [vmem:[#allocation19_spill] sm:$0xff] %v8388_v56 }
 0x10a   : > { %6795 = vmatmul.msk.f32.gmra.mxu2 %vm471_vm1, %v8059_v26  ;;  %6852 = vmatmul.msk.f32.gmra.mxu3 %vm471_vm1, %v8027_v20 }
 0x10b   : > { %6907 = vmatmul.msk.f32.gmra.mxu0 %vm471_vm1, %v7981_v11  ;;  %6963 = vmatmul.msk.f32.gmra.mxu1 %vm471_vm1, %v8059_v26 }
 0x10d   : > { %v781_v7 = vpop.f32.mrf.mxu2  ;;  %v963_v19 = vpop.f32.mrf.mxu3 }
 0x10e   : > { %v8398_v57 = vadd.f32 %v963_v19, %v781_v7 }
 0x110   : > { %14611 = vst [vmem:[#allocation20_spill] sm:$0xff] %v8398_v57  ;;  %v8400_v16 = vpop.f32.mrf.mxu0  ;;  %v8402_v49 = vpop.f32.mrf.mxu1 }
 0x111   : > { %14612 = vst [vmem:[#allocation21_spill] sm:$0xff] %v8402_v49 }
 0x112   : > { %6796 = vmatmul.msk.f32.gmra.mxu2 %vm471_vm1, %v8069_v28  ;;  %6853 = vmatmul.msk.f32.gmra.mxu3 %vm471_vm1, %v8038_v22 }
 0x113   : > { %6908 = vmatmul.msk.f32.gmra.mxu0 %vm471_vm1, %v8001_v15  ;;  %6964 = vmatmul.msk.f32.gmra.mxu1 %vm471_vm1, %v8069_v28 }
 0x115   : > { %v784_v11 = vpop.f32.mrf.mxu2  ;;  %v966_v56 = vpop.f32.mrf.mxu3 }
 0x116   : > { %v8412_v19 = vadd.f32 %v966_v56, %v784_v11 }
 0x118   : > { %14613 = vst [vmem:[#allocation22_spill] sm:$0xff] %v8412_v19  ;;  %v8414_v7 = vpop.f32.mrf.mxu0  ;;  %v8416_v57 = vpop.f32.mrf.mxu1 }
 0x119   : > { %14614 = vst [vmem:[#allocation23_spill] sm:$0xff] %v8416_v57 }
 0x11a   : > { %6797 = vmatmul.msk.f32.gmra.mxu2 %vm471_vm1, %v8079_v30  ;;  %6854 = vmatmul.msk.f32.gmra.mxu3 %vm471_vm1, %v8049_v24 }
 0x11b   : > { %6909 = vmatmul.msk.f32.gmra.mxu0 %vm471_vm1, %v8016_v18  ;;  %6965 = vmatmul.msk.f32.gmra.mxu1 %vm471_vm1, %v8079_v30 }
 0x11d   : > { %v787_v15 = vpop.f32.mrf.mxu2  ;;  %v969_v49 = vpop.f32.mrf.mxu3 }
 0x11e   : > { %v8426_v56 = vadd.f32 %v969_v49, %v787_v15 }
 0x120   : > { %14615 = vst [vmem:[#allocation24_spill] sm:$0xff] %v8426_v56  ;;  %v8428_v11 = vpop.f32.mrf.mxu0  ;;  %v8430_v19 = vpop.f32.mrf.mxu1 }
 0x121   : > { %14616 = vst [vmem:[#allocation25_spill] sm:$0xff] %v8430_v19 }
 0x122   : > { %6798 = vmatmul.msk.f32.gmra.mxu2 %vm471_vm1, %v8089_v32  ;;  %6855 = vmatmul.msk.f32.gmra.mxu3 %vm471_vm1, %v8059_v26 }
 0x123   : > { %6910 = vmatmul.msk.f32.gmra.mxu0 %vm471_vm1, %v8027_v20  ;;  %6966 = vmatmul.msk.f32.gmra.mxu1 %vm471_vm1, %v8089_v32 }
 0x125   : > { %v790_v18 = vpop.f32.mrf.mxu2  ;;  %v972_v57 = vpop.f32.mrf.mxu3 }
 0x126   : > { %v8440_v49 = vadd.f32 %v972_v57, %v790_v18 }
 0x128   : > { %14617 = vst [vmem:[#allocation26_spill] sm:$0xff] %v8440_v49  ;;  %v8442_v15 = vpop.f32.mrf.mxu0  ;;  %v8444_v56 = vpop.f32.mrf.mxu1 }
 0x129   : > { %14618 = vst [vmem:[#allocation27_spill] sm:$0xff] %v8444_v56 }
 0x12a   : > { %6799 = vmatmul.msk.f32.gmra.mxu2 %vm471_vm1, %v8099_v34  ;;  %6856 = vmatmul.msk.f32.gmra.mxu3 %vm471_vm1, %v8069_v28 }
 0x12b   : > { %6911 = vmatmul.msk.f32.gmra.mxu0 %vm471_vm1, %v8038_v22  ;;  %6967 = vmatmul.msk.f32.gmra.mxu1 %vm471_vm1, %v8099_v34 }
 0x12d   : > { %v793_v20 = vpop.f32.mrf.mxu2  ;;  %v975_v19 = vpop.f32.mrf.mxu3 }
 0x12e   : > { %v8454_v57 = vadd.f32 %v975_v19, %v793_v20 }
 0x130   : > { %14619 = vst [vmem:[#allocation28_spill] sm:$0xff] %v8454_v57  ;;  %v8456_v18 = vpop.f32.mrf.mxu0  ;;  %v8458_v49 = vpop.f32.mrf.mxu1 }
 0x131   : > { %14620 = vst [vmem:[#allocation29_spill] sm:$0xff] %v8458_v49 }
 0x132   : > { %6800 = vmatmul.msk.f32.gmra.mxu2 %vm471_vm1, %v8109_v36  ;;  %6857 = vmatmul.msk.f32.gmra.mxu3 %vm471_vm1, %v8079_v30 }
 0x133   : > { %6912 = vmatmul.msk.f32.gmra.mxu0 %vm471_vm1, %v8049_v24  ;;  %6968 = vmatmul.msk.f32.gmra.mxu1 %vm471_vm1, %v8109_v36 }
 0x135   : > { %v796_v22 = vpop.f32.mrf.mxu2  ;;  %v978_v56 = vpop.f32.mrf.mxu3 }
 0x136   : > { %v8468_v19 = vadd.f32 %v978_v56, %v796_v22 }
 0x138   : > { %14621 = vst [vmem:[#allocation30_spill] sm:$0xff] %v8468_v19  ;;  %v8470_v20 = vpop.f32.mrf.mxu0  ;;  %v8472_v57 = vpop.f32.mrf.mxu1 }
 0x139   : > { %14622 = vst [vmem:[#allocation31_spill] sm:$0xff] %v8470_v20 }
 0x13a   : > { %14623 = vst [vmem:[#allocation32_spill] sm:$0xff] %v8472_v57  ;;  %6801 = vmatmul.msk.f32.gmra.mxu2 %vm471_vm1, %v8119_v38  ;;  %6858 = vmatmul.msk.f32.gmra.mxu3 %vm471_vm1, %v8089_v32 }
 0x13b   : > { %6913 = vmatmul.msk.f32.gmra.mxu0 %vm471_vm1, %v8059_v26  ;;  %6969 = vmatmul.msk.f32.gmra.mxu1 %vm471_vm1, %v8119_v38 }
 0x13d   : > { %v799_v24 = vpop.f32.mrf.mxu2  ;;  %v981_v49 = vpop.f32.mrf.mxu3 }
 0x13e   : > { %v8482_v56 = vadd.f32 %v981_v49, %v799_v24 }
 0x140   : > { %14624 = vst [vmem:[#allocation33_spill] sm:$0xff] %v8482_v56  ;;  %v8484_v22 = vpop.f32.mrf.mxu0  ;;  %v8486_v19 = vpop.f32.mrf.mxu1 }
 0x141   : > { %14625 = vst [vmem:[#allocation34_spill] sm:$0xff] %v8484_v22 }
 0x142   : > { %14626 = vst [vmem:[#allocation35_spill] sm:$0xff] %v8486_v19  ;;  %6802 = vmatmul.msk.f32.gmra.mxu2 %vm471_vm1, %v8129_v40  ;;  %6859 = vmatmul.msk.f32.gmra.mxu3 %vm471_vm1, %v8099_v34 }
 0x143   : > { %6914 = vmatmul.msk.f32.gmra.mxu0 %vm471_vm1, %v8069_v28  ;;  %6970 = vmatmul.msk.f32.gmra.mxu1 %vm471_vm1, %v8129_v40 }
 0x145   : > { %v802_v26 = vpop.f32.mrf.mxu2  ;;  %v984_v57 = vpop.f32.mrf.mxu3 }
 0x146   : > { %v8496_v49 = vadd.f32 %v984_v57, %v802_v26 }
 0x148   : > { %14627 = vst [vmem:[#allocation36_spill] sm:$0xff] %v8496_v49  ;;  %v8498_v24 = vpop.f32.mrf.mxu0  ;;  %v8500_v56 = vpop.f32.mrf.mxu1 }
 0x149   : > { %14628 = vst [vmem:[#allocation37_spill] sm:$0xff] %v8498_v24 }
 0x14a   : > { %14629 = vst [vmem:[#allocation38_spill] sm:$0xff] %v8500_v56  ;;  %6803 = vmatmul.msk.f32.gmra.mxu2 %vm471_vm1, %v8139_v42  ;;  %6860 = vmatmul.msk.f32.gmra.mxu3 %vm471_vm1, %v8109_v36 }
 0x14b   : > { %6915 = vmatmul.msk.f32.gmra.mxu0 %vm471_vm1, %v8079_v30  ;;  %6971 = vmatmul.msk.f32.gmra.mxu1 %vm471_vm1, %v8139_v42 }
 0x14d   : > { %v805_v28 = vpop.f32.mrf.mxu2  ;;  %v987_v19 = vpop.f32.mrf.mxu3 }
 0x14e   : > { %v8510_v57 = vadd.f32 %v987_v19, %v805_v28 }
 0x150   : > { %14630 = vst [vmem:[#allocation39_spill] sm:$0xff] %v8510_v57  ;;  %v8512_v26 = vpop.f32.mrf.mxu0  ;;  %v8514_v49 = vpop.f32.mrf.mxu1 }
 0x151   : > { %14631 = vst [vmem:[#allocation40_spill] sm:$0xff] %v8512_v26  ;;  %v838_v26 = vadd.f32 %v8150_v45, %v8148_v44 }
 0x152   : > { %14632 = vst [vmem:[#allocation41_spill] sm:$0xff] %v8514_v49  ;;  %6804 = vmatmul.msk.f32.gmra.mxu2 %vm471_vm1, %v8153_v46  ;;  %6861 = vmatmul.msk.f32.gmra.mxu3 %vm471_vm1, %v8119_v38 }
 0x153   : > { %6916 = vmatmul.msk.f32.gmra.mxu0 %vm471_vm1, %v8089_v32  ;;  %6972 = vmatmul.msk.f32.gmra.mxu1 %vm471_vm1, %v8153_v46 }
 0x155   : > { %v808_v30 = vpop.f32.mrf.mxu2  ;;  %v990_v56 = vpop.f32.mrf.mxu3 }
 0x156   : > { %v8524_v19 = vadd.f32 %v990_v56, %v808_v30 }
 0x158   : > { %14633 = vst [vmem:[#allocation42_spill] sm:$0xff] %v8524_v19  ;;  %v8526_v28 = vpop.f32.mrf.mxu0  ;;  %v8528_v57 = vpop.f32.mrf.mxu1 }
 0x159   : > { %14634 = vst [vmem:[#allocation43_spill] sm:$0xff] %v8526_v28  ;;  %v1291_v28 = vlaneseq }
 0x15a   : > { %14635 = vst [vmem:[#allocation44_spill] sm:$0xff] %v8528_v57  ;;  %6805 = vmatmul.msk.f32.gmra.mxu2 %vm471_vm1, %v8169_v53  ;;  %6862 = vmatmul.msk.f32.gmra.mxu3 %vm471_vm1, %v8129_v40 }
 0x15b   : > { %6917 = vmatmul.msk.f32.gmra.mxu0 %vm471_vm1, %v8099_v34  ;;  %6973 = vmatmul.msk.f32.gmra.mxu1 %vm471_vm1, %v8169_v53 }
 0x15d   : > { %v811_v32 = vpop.f32.mrf.mxu2  ;;  %v993_v49 = vpop.f32.mrf.mxu3 }
 0x15e   : > { %v8538_v56 = vadd.f32 %v993_v49, %v811_v32 }
 0x160   : > { %14636 = vst [vmem:[#allocation45_spill] sm:$0xff] %v8538_v56  ;;  %v8540_v30 = vpop.f32.mrf.mxu0  ;;  %v8542_v19 = vpop.f32.mrf.mxu1 }
 0x161   : > { %14637 = vst [vmem:[#allocation46_spill] sm:$0xff] %v8540_v30 }
 0x162   : > { %14638 = vst [vmem:[#allocation47_spill] sm:$0xff] %v8542_v19  ;;  %6806 = vmatmul.msk.f32.gmra.mxu2 %vm471_vm1, %v8185_v60  ;;  %6863 = vmatmul.msk.f32.gmra.mxu3 %vm471_vm1, %v8139_v42 }
 0x163   : > { %6918 = vmatmul.msk.f32.gmra.mxu0 %vm471_vm1, %v8109_v36  ;;  %6974 = vmatmul.msk.f32.gmra.mxu1 %vm471_vm1, %v8185_v60 }
 0x165   : > { %v814_v34 = vpop.f32.mrf.mxu2  ;;  %v996_v57 = vpop.f32.mrf.mxu3 }
 0x166   : > { %v8552_v49 = vadd.f32 %v996_v57, %v814_v34 }
 0x168   : > { %14639 = vst [vmem:[#allocation48_spill] sm:$0xff] %v8552_v49  ;;  %v1554_v32 = vpop.f32.mrf.mxu0  ;;  %v1738_v56 = vpop.f32.mrf.mxu1 }
 0x16a   : > { %6807 = vmatmul.msk.f32.gmra.mxu2 %vm471_vm1, %v8201_v3  ;;  %6864 = vmatmul.msk.f32.gmra.mxu3 %vm471_vm1, %v8153_v46 }
 0x16b   : > { %6919 = vmatmul.msk.f32.gmra.mxu0 %vm471_vm1, %v8119_v38  ;;  %6975 = vmatmul.msk.f32.gmra.mxu1 %vm471_vm1, %v8201_v3  ;;  %v8570_v38 = vshrl.u32 %v1291_v28, 7 }
 0x16d   : > { %v1021_v36 = vpop.f32.mrf.mxu2  ;;  %v1372_v19 = vpop.f32.mrf.mxu3  ;;  %14641 = vst [vmem:[#allocation50_spill] sm:$0xff] %v8570_v38  ;;  %vm1293_vm2 = vcmp.lt.s32.totalorder %v8570_v38, 1  ;;  %vm2668_vm3 = vcmp.lt.s32.totalorder %v8570_v38, 7 }
 0x16e   : > { %v1555_v30 = vadd.f32 %v1554_v32, %v1372_v19  ;;  %v841_v19 = vadd.f32 %v8166_v52, %v8164_v51  ;;  %v844_v52 = vadd.f32 %v8182_v59, %v8180_v58  ;;  %v847_v58 = vadd.f32 %v8198_v2, %v8196_v1 }
 0x16f   : > { %v850_v1 = vadd.f32 %v8214_v25, %v8212_v23  ;;  %v853_v23 = vadd.f32 %v8230_v39, %v8228_v37  ;;  %v856_v37 = vadd.f32 %v8246_v55, %v8244_v54  ;;  %v859_v54 = vadd.f32 %v8262_v31, %v8260_v29 }
 0x170   : > { %v8562_v57 = vadd.f32 %v1738_v56, %v1555_v30  ;;  %v1557_v34 = vpop.f32.mrf.mxu0  ;;  %v1741_v49 = vpop.f32.mrf.mxu1  ;;  %v8578_v56 = vadd.f32 %v1021_v36, %v838_v26  ;;  %v862_v29 = vadd.f32 %v8289_v33, %v8287_v48  ;;  %v865_v33 = vadd.f32 %v8306_v62, %v8304_v21 }
 0x172   : > { %14640 = vst [vmem:[#allocation49_spill] sm:$0xff] %v8562_v57  ;;  %6808 = vmatmul.msk.f32.gmra.mxu2 %vm471_vm1, %v8217_v27  ;;  %6865 = vmatmul.msk.f32.gmra.mxu3 %vm471_vm1, %v8169_v53  ;;  %v14386_v28 = vrot.slane %v8578_v56, 7 }
 0x173   : > { %6920 = vmatmul.msk.f32.gmra.mxu0 %vm471_vm1, %v8129_v40  ;;  %6976 = vmatmul.msk.f32.gmra.mxu1 %vm471_vm1, %v8217_v27 }
 0x175   : > { %v1024_v44 = vpop.f32.mrf.mxu2  ;;  %v1375_v45 = vpop.f32.mrf.mxu3 }
 0x176   : > { %v1184_v30 = vadd.f32 %v1024_v44, %v841_v19  ;;  %v1558_v32 = vadd.f32 %v1557_v34, %v1375_v45 }
 0x178   : > { %v1238_v57 = vrot.slane %v1184_v30, 7  ;;  %v1901_v24 = vadd.f32 %v1741_v49, %v1558_v32  ;;  %v1560_v22 = vpop.f32.mrf.mxu0  ;;  %v1744_v40 = vpop.f32.mrf.mxu1 }
 0x17a   : > { %v1346_v20 = vsel %vm1293_vm2, %v14386_v28, %v1238_v57  ;;  %6809 = vmatmul.msk.f32.gmra.mxu2 %vm471_vm1, %v8233_v41  ;;  %6866 = vmatmul.msk.f32.gmra.mxu3 %vm471_vm1, %v8185_v60  ;;  %v9232_v28 = vld [vmem:[%s7952_s28 + $0x38] sm:$0xff] }
 0x17b   : > { %v8590_v51 = vadd.f32 %v1901_v24, %v1346_v20  ;;  %6921 = vmatmul.msk.f32.gmra.mxu0 %vm471_vm1, %v8139_v42  ;;  %6977 = vmatmul.msk.f32.gmra.mxu1 %vm471_vm1, %v8233_v41 }
 0x17d   : > { %v1027_v26 = vpop.f32.mrf.mxu2  ;;  %v1378_v49 = vpop.f32.mrf.mxu3 }
 0x17e   : > { %v1185_v36 = vadd.f32 %v1027_v26, %v844_v52  ;;  %v1561_v34 = vadd.f32 %v1560_v22, %v1378_v49 }
 0x180   : > { %v1239_v19 = vrot.slane %v1185_v36, 7  ;;  %v1902_v44 = vadd.f32 %v1744_v40, %v1561_v34  ;;  %v1563_v45 = vpop.f32.mrf.mxu0  ;;  %v1747_v30 = vpop.f32.mrf.mxu1 }
 0x182   : > { %v1345_v20 = vsel %vm1293_vm2, %v1238_v57, %v1239_v19  ;;  %6810 = vmatmul.msk.f32.gmra.mxu2 %vm471_vm1, %v8249_v61  ;;  %6867 = vmatmul.msk.f32.gmra.mxu3 %vm471_vm1, %v8201_v3 }
 0x183   : > { %v8604_v42 = vadd.f32 %v1902_v44, %v1345_v20  ;;  %6922 = vmatmul.msk.f32.gmra.mxu0 %vm471_vm1, %v8153_v46  ;;  %6978 = vmatmul.msk.f32.gmra.mxu1 %vm471_vm1, %v8249_v61 }
 0x185   : > { %v1030_v59 = vpop.f32.mrf.mxu2  ;;  %v1381_v22 = vpop.f32.mrf.mxu3 }
 0x186   : > { %v1186_v24 = vadd.f32 %v1030_v59, %v847_v58  ;;  %v1564_v57 = vadd.f32 %v1563_v45, %v1381_v22 }
 0x188   : > { %v1240_v32 = vrot.slane %v1186_v24, 7  ;;  %v1903_v40 = vadd.f32 %v1747_v30, %v1564_v57  ;;  %v1566_v52 = vpop.f32.mrf.mxu0  ;;  %v1750_v26 = vpop.f32.mrf.mxu1 }
 0x18a   : > { %v1344_v49 = vsel %vm1293_vm2, %v1239_v19, %v1240_v32  ;;  %6811 = vmatmul.msk.f32.gmra.mxu2 %vm471_vm1, %v8265_v43  ;;  %6868 = vmatmul.msk.f32.gmra.mxu3 %vm471_vm1, %v8217_v27 }
 0x18b   : > { %v8618_v46 = vadd.f32 %v1903_v40, %v1344_v49  ;;  %6923 = vmatmul.msk.f32.gmra.mxu0 %vm471_vm1, %v8169_v53  ;;  %6979 = vmatmul.msk.f32.gmra.mxu1 %vm471_vm1, %v8265_v43 }
 0x18d   : > { %v1033_v2 = vpop.f32.mrf.mxu2  ;;  %v1384_v36 = vpop.f32.mrf.mxu3 }
 0x18e   : > { %v1187_v34 = vadd.f32 %v1033_v2, %v850_v1  ;;  %v1567_v19 = vadd.f32 %v1566_v52, %v1384_v36 }
 0x190   : > { %v1241_v44 = vrot.slane %v1187_v34, 7  ;;  %v1904_v45 = vadd.f32 %v1750_v26, %v1567_v19  ;;  %v1569_v30 = vpop.f32.mrf.mxu0  ;;  %v1753_v20 = vpop.f32.mrf.mxu1 }
 0x192   : > { %v1343_v58 = vsel %vm1293_vm2, %v1240_v32, %v1241_v44  ;;  %6812 = vmatmul.msk.f32.gmra.mxu2 %vm471_vm1, %v7958_v6  ;;  %6869 = vmatmul.msk.f32.gmra.mxu3 %vm471_vm1, %v8233_v41 }
 0x193   : > { %v8632_v53 = vadd.f32 %v1904_v45, %v1343_v58  ;;  %6924 = vmatmul.msk.f32.gmra.mxu0 %vm471_vm1, %v8185_v60  ;;  %6980 = vmatmul.msk.f32.gmra.mxu1 %vm471_vm1, %v7958_v6 }
 0x195   : > { %v1036_v25 = vpop.f32.mrf.mxu2  ;;  %v1387_v59 = vpop.f32.mrf.mxu3 }
 0x196   : > { %v1188_v22 = vadd.f32 %v1036_v25, %v853_v23  ;;  %v1570_v24 = vadd.f32 %v1569_v30, %v1387_v59 }
 0x198   : > { %v1242_v57 = vrot.slane %v1188_v22, 7  ;;  %v1905_v32 = vadd.f32 %v1753_v20, %v1570_v24  ;;  %v1572_v40 = vpop.f32.mrf.mxu0  ;;  %v1756_v52 = vpop.f32.mrf.mxu1 }
 0x19a   : > { %v1342_v26 = vsel %vm1293_vm2, %v1241_v44, %v1242_v57  ;;  %6813 = vmatmul.msk.f32.gmra.mxu2 %vm471_vm1, %v7978_v10  ;;  %6870 = vmatmul.msk.f32.gmra.mxu3 %vm471_vm1, %v8249_v61 }
 0x19b   : > { %v8646_v60 = vadd.f32 %v1905_v32, %v1342_v26  ;;  %6925 = vmatmul.msk.f32.gmra.mxu0 %vm471_vm1, %v8201_v3  ;;  %6981 = vmatmul.msk.f32.gmra.mxu1 %vm471_vm1, %v7978_v10 }
 0x19d   : > { %v1039_v39 = vpop.f32.mrf.mxu2  ;;  %v1390_v49 = vpop.f32.mrf.mxu3 }
 0x19e   : > { %v1189_v1 = vadd.f32 %v1039_v39, %v856_v37  ;;  %v1573_v2 = vadd.f32 %v1572_v40, %v1390_v49 }
 0x1a0   : > { %v1243_v36 = vrot.slane %v1189_v1, 7  ;;  %v1906_v34 = vadd.f32 %v1756_v52, %v1573_v2  ;;  %v1575_v19 = vpop.f32.mrf.mxu0  ;;  %v1759_v44 = vpop.f32.mrf.mxu1 }
 0x1a2   : > { %v1341_v45 = vsel %vm1293_vm2, %v1242_v57, %v1243_v36  ;;  %6814 = vmatmul.msk.f32.gmra.mxu2 %vm471_vm1, %v7998_v14  ;;  %6871 = vmatmul.msk.f32.gmra.mxu3 %vm471_vm1, %v8265_v43 }
 0x1a3   : > { %v8660_v3 = vadd.f32 %v1906_v34, %v1341_v45  ;;  %6926 = vmatmul.msk.f32.gmra.mxu0 %vm471_vm1, %v8217_v27  ;;  %6982 = vmatmul.msk.f32.gmra.mxu1 %vm471_vm1, %v7998_v14 }
 0x1a5   : > { %v1042_v55 = vpop.f32.mrf.mxu2  ;;  %v1393_v30 = vpop.f32.mrf.mxu3 }
 0x1a6   : > { %v1190_v20 = vadd.f32 %v1042_v55, %v859_v54  ;;  %v1576_v58 = vadd.f32 %v1575_v19, %v1393_v30 }
 0x1a8   : > { %v1244_v23 = vrot.slane %v1190_v20, 7  ;;  %v1907_v25 = vadd.f32 %v1759_v44, %v1576_v58  ;;  %v1578_v59 = vpop.f32.mrf.mxu0  ;;  %v1762_v22 = vpop.f32.mrf.mxu1  ;;  %v8713_v58 = vld [vmem:[%s7952_s28 + $0xf0] sm:$0xff] }
 0x1aa   : > { %v1340_v24 = vsel %vm1293_vm2, %v1243_v36, %v1244_v23  ;;  %6815 = vmatmul.msk.f32.gmra.mxu2 %vm471_vm1, %v7955_v5  ;;  %6872 = vmatmul.msk.f32.gmra.mxu3 %vm471_vm1, %v7958_v6 }
 0x1ab   : > { %v8674_v27 = vadd.f32 %v1907_v25, %v1340_v24  ;;  %6927 = vmatmul.msk.f32.gmra.mxu0 %vm471_vm1, %v8233_v41  ;;  %6983 = vmatmul.msk.f32.gmra.mxu1 %vm471_vm1, %v7955_v5 }
 0x1ad   : > { %v1045_v31 = vpop.f32.mrf.mxu2  ;;  %v1396_v57 = vpop.f32.mrf.mxu3 }
 0x1ae   : > { %v1191_v32 = vadd.f32 %v1045_v31, %v862_v29  ;;  %v1579_v40 = vadd.f32 %v1578_v59, %v1396_v57 }
 0x1b0   : > { %v1245_v52 = vrot.slane %v1191_v32, 7  ;;  %v1908_v26 = vadd.f32 %v1762_v22, %v1579_v40  ;;  %v1581_v37 = vpop.f32.mrf.mxu0  ;;  %v1765_v39 = vpop.f32.mrf.mxu1  ;;  %v8730_v40 = vld [vmem:[%s7952_s28 + $0xf8] sm:$0xff] }
 0x1b2   : > { %v1339_v6 = vsel %vm1293_vm2, %v1244_v23, %v1245_v52  ;;  %6816 = vmatmul.msk.f32.gmra.mxu2 %vm471_vm1, %v7975_v9  ;;  %6873 = vmatmul.msk.f32.gmra.mxu3 %vm471_vm1, %v7978_v10 }
 0x1b3   : > { %v8688_v5 = vadd.f32 %v1908_v26, %v1339_v6  ;;  %6928 = vmatmul.msk.f32.gmra.mxu0 %vm471_vm1, %v8249_v61  ;;  %6984 = vmatmul.msk.f32.gmra.mxu1 %vm471_vm1, %v7975_v9  ;;  %v868_v61 = vadd.f32 %v8319_v47, %v8317_v4  ;;  %v7709_v4 = vld [vmem:[%s7952_s28 + $0xc0] sm:$0xff]  ;;  %v871_v47 = vadd.f32 %v8332_v0, %v8330_v35  ;;  %v7712_v0 = vld [vmem:[%s7952_s28 + $0xc8] sm:$0xff] }
 0x1b4   : > { %v874_v26 = vadd.f32 %v8346_v63, %v8344_v50  ;;  %v7715_v50 = vld [vmem:[%s7952_s28 + $0xd0] sm:$0xff] }
 0x1b5   : > { %v1048_v41 = vpop.f32.mrf.mxu2  ;;  %v1399_v48 = vpop.f32.mrf.mxu3 }
 0x1b6   : > { %v1192_v49 = vadd.f32 %v1048_v41, %v865_v33  ;;  %v1582_v1 = vadd.f32 %v1581_v37, %v1399_v48 }
 0x1b8   : > { %v1246_v2 = vrot.slane %v1192_v49, 7  ;;  %v1909_v36 = vadd.f32 %v1765_v39, %v1582_v1  ;;  %v1584_v34 = vpop.f32.mrf.mxu0  ;;  %v1768_v19 = vpop.f32.mrf.mxu1 }
 0x1ba   : > { %v1338_v10 = vsel %vm1293_vm2, %v1245_v52, %v1246_v2  ;;  %6817 = vmatmul.msk.f32.gmra.mxu2 %vm471_vm1, %v7995_v13  ;;  %6874 = vmatmul.msk.f32.gmra.mxu3 %vm471_vm1, %v7998_v14  ;;  %v7711_v52 = vld [vmem:[%s7952_s28 + $0xe0] sm:$0xff] }
 0x1bb   : > { %v8702_v9 = vadd.f32 %v1909_v36, %v1338_v10  ;;  %6929 = vmatmul.msk.f32.gmra.mxu0 %vm471_vm1, %v8265_v43  ;;  %6985 = vmatmul.msk.f32.gmra.mxu1 %vm471_vm1, %v7995_v13  ;;  %v7708_v13 = vld [vmem:[%s7952_s28 + $0xd8] sm:$0xff]  ;;  %v8747_v36 = vld [vmem:[%s7952_s28 + $0x100] sm:$0xff] }
 0x1bd   : > { %v1051_v62 = vpop.f32.mrf.mxu2  ;;  %v1402_v21 = vpop.f32.mrf.mxu3 }
 0x1be   : > { %v1193_v44 = vadd.f32 %v1051_v62, %v868_v61  ;;  %v1585_v45 = vadd.f32 %v1584_v34, %v1402_v21  ;;  %v7714_v34 = vld [vmem:[%s7952_s28 + $0xe8] sm:$0xff] }
 0x1c0   : > { %v1247_v54 = vrot.slane %v1193_v44, 7  ;;  %v1910_v55 = vadd.f32 %v1768_v19, %v1585_v45  ;;  %v1587_v14 = vpop.f32.mrf.mxu0  ;;  %v1771_v30 = vpop.f32.mrf.mxu1  ;;  %v14642_v19 = vld [vmem:[#allocation15_spill] sm:$0xff] }
 0x1c1   : > { %v877_v10 = vadd.f32 %v14642_v19, %v8358_v17 }
 0x1c2   : > { %v1337_v20 = vsel %vm1293_vm2, %v1246_v2, %v1247_v54  ;;  %6818 = vmatmul.msk.f32.gmra.mxu2 %vm471_vm1, %v8713_v58  ;;  %6875 = vmatmul.msk.f32.gmra.mxu3 %vm471_vm1, %v7708_v13 }
 0x1c3   : > { %v8719_v43 = vadd.f32 %v1910_v55, %v1337_v20  ;;  %6930 = vmatmul.msk.f32.gmra.mxu0 %vm471_vm1, %v7709_v4  ;;  %6986 = vmatmul.msk.f32.gmra.mxu1 %vm471_vm1, %v8713_v58  ;;  %v8764_v20 = vld [vmem:[%s7952_s28 + $0x108] sm:$0xff]  ;;  %v14643_v4 = vld [vmem:[#allocation17_spill] sm:$0xff] }
 0x1c5   : > { %v1054_v23 = vpop.f32.mrf.mxu2  ;;  %v1405_v25 = vpop.f32.mrf.mxu3 }
 0x1c6   : > { %v1194_v59 = vadd.f32 %v1054_v23, %v871_v47  ;;  %v1588_v22 = vadd.f32 %v1587_v14, %v1405_v25  ;;  %v880_v47 = vadd.f32 %v14643_v4, %v8372_v8 }
 0x1c8   : > { %v1248_v24 = vrot.slane %v1194_v59, 7  ;;  %v1911_v29 = vadd.f32 %v1771_v30, %v1588_v22  ;;  %v1590_v31 = vpop.f32.mrf.mxu0  ;;  %v1774_v57 = vpop.f32.mrf.mxu1 }
 0x1ca   : > { %v1336_v32 = vsel %vm1293_vm2, %v1247_v54, %v1248_v24  ;;  %6819 = vmatmul.msk.f32.gmra.mxu2 %vm471_vm1, %v8730_v40  ;;  %6876 = vmatmul.msk.f32.gmra.mxu3 %vm471_vm1, %v7711_v52 }
 0x1cb   : > { %v8736_v35 = vadd.f32 %v1911_v29, %v1336_v32  ;;  %6931 = vmatmul.msk.f32.gmra.mxu0 %vm471_vm1, %v7712_v0  ;;  %6987 = vmatmul.msk.f32.gmra.mxu1 %vm471_vm1, %v8730_v40  ;;  %v8780_v0 = vld [vmem:[%s7952_s28 + $0x110] sm:$0xff] }
 0x1cd   : > { %v1057_v37 = vpop.f32.mrf.mxu2  ;;  %v1408_v39 = vpop.f32.mrf.mxu3 }
 0x1ce   : > { %v1195_v6 = vadd.f32 %v1057_v37, %v874_v26  ;;  %v1591_v33 = vadd.f32 %v1590_v31, %v1408_v39 }
 0x1d0   : > { %v1249_v41 = vrot.slane %v1195_v6, 7  ;;  %v1912_v48 = vadd.f32 %v1774_v57, %v1591_v33  ;;  %v1593_v49 = vpop.f32.mrf.mxu0  ;;  %v1777_v1 = vpop.f32.mrf.mxu1 }
 0x1d2   : > { %v1335_v2 = vsel %vm1293_vm2, %v1248_v24, %v1249_v41  ;;  %6820 = vmatmul.msk.f32.gmra.mxu2 %vm471_vm1, %v8747_v36  ;;  %6877 = vmatmul.msk.f32.gmra.mxu3 %vm471_vm1, %v7714_v34 }
 0x1d3   : > { %v8753_v63 = vadd.f32 %v1912_v48, %v1335_v2  ;;  %6932 = vmatmul.msk.f32.gmra.mxu0 %vm471_vm1, %v7715_v50  ;;  %6988 = vmatmul.msk.f32.gmra.mxu1 %vm471_vm1, %v8747_v36  ;;  %v8796_v50 = vld [vmem:[%s7952_s28 + $0x118] sm:$0xff] }
 0x1d5   : > { %v1060_v61 = vpop.f32.mrf.mxu2  ;;  %v1411_v62 = vpop.f32.mrf.mxu3 }
 0x1d6   : > { %v1196_v21 = vadd.f32 %v1060_v61, %v877_v10  ;;  %v1594_v44 = vadd.f32 %v1593_v49, %v1411_v62 }
 0x1d8   : > { %v1250_v45 = vrot.slane %v1196_v21, 7  ;;  %v1913_v54 = vadd.f32 %v1777_v1, %v1594_v44  ;;  %v1596_v55 = vpop.f32.mrf.mxu0  ;;  %v1780_v14 = vpop.f32.mrf.mxu1 }
 0x1da   : > { %v1334_v30 = vsel %vm1293_vm2, %v1249_v41, %v1250_v45  ;;  %6821 = vmatmul.msk.f32.gmra.mxu2 %vm471_vm1, %v8764_v20  ;;  %6878 = vmatmul.msk.f32.gmra.mxu3 %vm471_vm1, %v8713_v58 }
 0x1db   : > { %v8770_v17 = vadd.f32 %v1913_v54, %v1334_v30  ;;  %6933 = vmatmul.msk.f32.gmra.mxu0 %vm471_vm1, %v7708_v13  ;;  %6989 = vmatmul.msk.f32.gmra.mxu1 %vm471_vm1, %v8764_v20  ;;  %v14644_v13 = vld [vmem:[#allocation19_spill] sm:$0xff]  ;;  %v8812_v30 = vld [vmem:[%s7952_s28 + $0x120] sm:$0xff] }
 0x1dc   : > { %v883_v26 = vadd.f32 %v14644_v13, %v8386_v12 }
 0x1dd   : > { %v1063_v23 = vpop.f32.mrf.mxu2  ;;  %v1414_v25 = vpop.f32.mrf.mxu3 }
 0x1de   : > { %v1197_v59 = vadd.f32 %v1063_v23, %v880_v47  ;;  %v1597_v22 = vadd.f32 %v1596_v55, %v1414_v25 }
 0x1e0   : > { %v1251_v24 = vrot.slane %v1197_v59, 7  ;;  %v1914_v29 = vadd.f32 %v1780_v14, %v1597_v22  ;;  %v1599_v31 = vpop.f32.mrf.mxu0  ;;  %v1783_v57 = vpop.f32.mrf.mxu1 }
 0x1e2   : > { %v1333_v32 = vsel %vm1293_vm2, %v1250_v45, %v1251_v24  ;;  %6822 = vmatmul.msk.f32.gmra.mxu2 %vm471_vm1, %v8780_v0  ;;  %6879 = vmatmul.msk.f32.gmra.mxu3 %vm471_vm1, %v8730_v40 }
 0x1e3   : > { %v8786_v8 = vadd.f32 %v1914_v29, %v1333_v32  ;;  %6934 = vmatmul.msk.f32.gmra.mxu0 %vm471_vm1, %v7711_v52  ;;  %6990 = vmatmul.msk.f32.gmra.mxu1 %vm471_vm1, %v8780_v0  ;;  %v14645_v52 = vld [vmem:[#allocation21_spill] sm:$0xff]  ;;  %v8829_v32 = vld [vmem:[%s7952_s28 + $0x128] sm:$0xff] }
 0x1e4   : > { %v886_v19 = vadd.f32 %v14645_v52, %v8400_v16 }
 0x1e5   : > { %v1066_v37 = vpop.f32.mrf.mxu2  ;;  %v1417_v39 = vpop.f32.mrf.mxu3 }
 0x1e6   : > { %v1198_v6 = vadd.f32 %v1066_v37, %v883_v26  ;;  %v1600_v33 = vadd.f32 %v1599_v31, %v1417_v39 }
 0x1e8   : > { %v1252_v41 = vrot.slane %v1198_v6, 7  ;;  %v1915_v48 = vadd.f32 %v1783_v57, %v1600_v33  ;;  %v1602_v49 = vpop.f32.mrf.mxu0  ;;  %v1786_v1 = vpop.f32.mrf.mxu1 }
 0x1ea   : > { %v1332_v2 = vsel %vm1293_vm2, %v1251_v24, %v1252_v41  ;;  %6823 = vmatmul.msk.f32.gmra.mxu2 %vm471_vm1, %v8796_v50  ;;  %6880 = vmatmul.msk.f32.gmra.mxu3 %vm471_vm1, %v8747_v36 }
 0x1eb   : > { %v8802_v12 = vadd.f32 %v1915_v48, %v1332_v2  ;;  %6935 = vmatmul.msk.f32.gmra.mxu0 %vm471_vm1, %v7714_v34  ;;  %6991 = vmatmul.msk.f32.gmra.mxu1 %vm471_vm1, %v8796_v50  ;;  %v14646_v34 = vld [vmem:[#allocation23_spill] sm:$0xff]  ;;  %v8846_v2 = vld [vmem:[%s7952_s28 + $0x130] sm:$0xff] }
 0x1ec   : > { %v889_v4 = vadd.f32 %v14646_v34, %v8414_v7 }
 0x1ed   : > { %v1069_v10 = vpop.f32.mrf.mxu2  ;;  %v1420_v61 = vpop.f32.mrf.mxu3 }
 0x1ee   : > { %v1199_v62 = vadd.f32 %v1069_v10, %v886_v19  ;;  %v1603_v21 = vadd.f32 %v1602_v49, %v1420_v61 }
 0x1f0   : > { %v1253_v44 = vrot.slane %v1199_v62, 7  ;;  %v1916_v45 = vadd.f32 %v1786_v1, %v1603_v21  ;;  %v1605_v54 = vpop.f32.mrf.mxu0  ;;  %v1789_v55 = vpop.f32.mrf.mxu1 }
 0x1f2   : > { %v1331_v14 = vsel %vm1293_vm2, %v1252_v41, %v1253_v44  ;;  %6824 = vmatmul.msk.f32.gmra.mxu2 %vm471_vm1, %v8812_v30  ;;  %6881 = vmatmul.msk.f32.gmra.mxu3 %vm471_vm1, %v8764_v20 }
 0x1f3   : > { %v8818_v16 = vadd.f32 %v1916_v45, %v1331_v14  ;;  %6936 = vmatmul.msk.f32.gmra.mxu0 %vm471_vm1, %v8713_v58  ;;  %6992 = vmatmul.msk.f32.gmra.mxu1 %vm471_vm1, %v8812_v30  ;;  %v14647_v58 = vld [vmem:[#allocation25_spill] sm:$0xff] }
 0x1f4   : > { %v892_v13 = vadd.f32 %v14647_v58, %v8428_v11  ;;  %v8863_v14 = vld [vmem:[%s7952_s28 + $0x138] sm:$0xff]  ;;  %v14651_v58 = vld [vmem:[#allocation32_spill] sm:$0xff] }
 0x1f5   : > { %v1072_v47 = vpop.f32.mrf.mxu2  ;;  %v1423_v23 = vpop.f32.mrf.mxu3 }
 0x1f6   : > { %v1200_v25 = vadd.f32 %v1072_v47, %v889_v4  ;;  %v1606_v59 = vadd.f32 %v1605_v54, %v1423_v23 }
 0x1f8   : > { %v1254_v22 = vrot.slane %v1200_v25, 7  ;;  %v1917_v24 = vadd.f32 %v1789_v55, %v1606_v59  ;;  %v1608_v29 = vpop.f32.mrf.mxu0  ;;  %v1792_v31 = vpop.f32.mrf.mxu1 }
 0x1fa   : > { %v1330_v57 = vsel %vm1293_vm2, %v1253_v44, %v1254_v22  ;;  %6825 = vmatmul.msk.f32.gmra.mxu2 %vm471_vm1, %v8829_v32  ;;  %6882 = vmatmul.msk.f32.gmra.mxu3 %vm471_vm1, %v8780_v0 }
 0x1fb   : > { %v8835_v7 = vadd.f32 %v1917_v24, %v1330_v57  ;;  %6937 = vmatmul.msk.f32.gmra.mxu0 %vm471_vm1, %v8730_v40  ;;  %6993 = vmatmul.msk.f32.gmra.mxu1 %vm471_vm1, %v8829_v32  ;;  %v14648_v40 = vld [vmem:[#allocation27_spill] sm:$0xff]  ;;  %v8880_v57 = vld [vmem:[%s7952_s28 + $0x140] sm:$0xff] }
 0x1fc   : > { %v895_v52 = vadd.f32 %v14648_v40, %v8442_v15  ;;  %v8897_v40 = vld [vmem:[%s7952_s28 + $0x148] sm:$0xff] }
 0x1fd   : > { %v1075_v26 = vpop.f32.mrf.mxu2  ;;  %v1426_v37 = vpop.f32.mrf.mxu3 }
 0x1fe   : > { %v1201_v39 = vadd.f32 %v1075_v26, %v892_v13  ;;  %v1609_v6 = vadd.f32 %v1608_v29, %v1426_v37 }
 0x200   : > { %v1255_v33 = vrot.slane %v1201_v39, 7  ;;  %v1918_v41 = vadd.f32 %v1792_v31, %v1609_v6  ;;  %v1611_v48 = vpop.f32.mrf.mxu0  ;;  %v1795_v49 = vpop.f32.mrf.mxu1 }
 0x202   : > { %v1329_v1 = vsel %vm1293_vm2, %v1254_v22, %v1255_v33  ;;  %6826 = vmatmul.msk.f32.gmra.mxu2 %vm471_vm1, %v8846_v2  ;;  %6883 = vmatmul.msk.f32.gmra.mxu3 %vm471_vm1, %v8796_v50 }
 0x203   : > { %v8852_v11 = vadd.f32 %v1918_v41, %v1329_v1  ;;  %6938 = vmatmul.msk.f32.gmra.mxu0 %vm471_vm1, %v8747_v36  ;;  %6994 = vmatmul.msk.f32.gmra.mxu1 %vm471_vm1, %v8846_v2  ;;  %v14649_v36 = vld [vmem:[#allocation29_spill] sm:$0xff] }
 0x204   : > { %v898_v34 = vadd.f32 %v14649_v36, %v8456_v18 }
 0x205   : > { %v1078_v19 = vpop.f32.mrf.mxu2  ;;  %v1429_v10 = vpop.f32.mrf.mxu3 }
 0x206   : > { %v1202_v61 = vadd.f32 %v1078_v19, %v895_v52  ;;  %v1612_v62 = vadd.f32 %v1611_v48, %v1429_v10  ;;  %v14652_v52 = vld [vmem:[#allocation34_spill] sm:$0xff]  ;;  %v14653_v19 = vld [vmem:[#allocation35_spill] sm:$0xff] }
 0x207   : > { %v904_v10 = vadd.f32 %v14653_v19, %v14652_v52 }
 0x208   : > { %v1256_v21 = vrot.slane %v1202_v61, 7  ;;  %v1919_v44 = vadd.f32 %v1795_v49, %v1612_v62  ;;  %v1614_v45 = vpop.f32.mrf.mxu0  ;;  %v1798_v54 = vpop.f32.mrf.mxu1 }
 0x20a   : > { %v1328_v55 = vsel %vm1293_vm2, %v1255_v33, %v1256_v21  ;;  %6827 = vmatmul.msk.f32.gmra.mxu2 %vm471_vm1, %v8863_v14  ;;  %6884 = vmatmul.msk.f32.gmra.mxu3 %vm471_vm1, %v8812_v30 }
 0x20b   : > { %v8869_v15 = vadd.f32 %v1919_v44, %v1328_v55  ;;  %6939 = vmatmul.msk.f32.gmra.mxu0 %vm471_vm1, %v8764_v20  ;;  %6995 = vmatmul.msk.f32.gmra.mxu1 %vm471_vm1, %v8863_v14  ;;  %v14650_v20 = vld [vmem:[#allocation31_spill] sm:$0xff] }
 0x20c   : > { %v901_v13 = vadd.f32 %v14651_v58, %v14650_v20 }
 0x20d   : > { %v1081_v4 = vpop.f32.mrf.mxu2  ;;  %v1432_v47 = vpop.f32.mrf.mxu3 }
 0x20e   : > { %v1203_v23 = vadd.f32 %v1081_v4, %v898_v34  ;;  %v1615_v25 = vadd.f32 %v1614_v45, %v1432_v47  ;;  %v8914_v4 = vld [vmem:[%s7952_s28 + $0x150] sm:$0xff]  ;;  %v14654_v47 = vld [vmem:[#allocation37_spill] sm:$0xff] }
 0x210   : > { %v1257_v59 = vrot.slane %v1203_v23, 7  ;;  %v1920_v22 = vadd.f32 %v1798_v54, %v1615_v25  ;;  %v1617_v24 = vpop.f32.mrf.mxu0  ;;  %v1801_v29 = vpop.f32.mrf.mxu1  ;;  %v14655_v23 = vld [vmem:[#allocation38_spill] sm:$0xff] }
 0x211   : > { %v907_v25 = vadd.f32 %v14655_v23, %v14654_v47 }
 0x212   : > { %v1327_v31 = vsel %vm1293_vm2, %v1256_v21, %v1257_v59  ;;  %6828 = vmatmul.msk.f32.gmra.mxu2 %vm471_vm1, %v8880_v57  ;;  %6885 = vmatmul.msk.f32.gmra.mxu3 %vm471_vm1, %v8829_v32 }
 0x213   : > { %v8886_v18 = vadd.f32 %v1920_v22, %v1327_v31  ;;  %6940 = vmatmul.msk.f32.gmra.mxu0 %vm471_vm1, %v8780_v0  ;;  %6996 = vmatmul.msk.f32.gmra.mxu1 %vm471_vm1, %v8880_v57 }
 0x215   : > { %v1084_v26 = vpop.f32.mrf.mxu2  ;;  %v1435_v37 = vpop.f32.mrf.mxu3 }
 0x216   : > { %v1204_v39 = vadd.f32 %v1084_v26, %v901_v13  ;;  %v1618_v6 = vadd.f32 %v1617_v24, %v1435_v37  ;;  %v8931_v37 = vld [vmem:[%s7952_s28 + $0x158] sm:$0xff] }
 0x218   : > { %v1258_v33 = vrot.slane %v1204_v39, 7  ;;  %v1921_v41 = vadd.f32 %v1801_v29, %v1618_v6  ;;  %v1620_v48 = vpop.f32.mrf.mxu0  ;;  %v1804_v49 = vpop.f32.mrf.mxu1  ;;  %v14656_v39 = vld [vmem:[#allocation40_spill] sm:$0xff]  ;;  %v14657_v6 = vld [vmem:[#allocation41_spill] sm:$0xff] }
 0x21a   : > { %v1326_v1 = vsel %vm1293_vm2, %v1257_v59, %v1258_v33  ;;  %6829 = vmatmul.msk.f32.gmra.mxu2 %vm471_vm1, %v8897_v40  ;;  %6886 = vmatmul.msk.f32.gmra.mxu3 %vm471_vm1, %v8846_v2 }
 0x21b   : > { %v8903_v0 = vadd.f32 %v1921_v41, %v1326_v1  ;;  %6941 = vmatmul.msk.f32.gmra.mxu0 %vm471_vm1, %v8796_v50  ;;  %6997 = vmatmul.msk.f32.gmra.mxu1 %vm471_vm1, %v8897_v40 }
 0x21d   : > { %v1087_v61 = vpop.f32.mrf.mxu2  ;;  %v1438_v62 = vpop.f32.mrf.mxu3 }
 0x21e   : > { %v1205_v21 = vadd.f32 %v1087_v61, %v904_v10  ;;  %v1621_v44 = vadd.f32 %v1620_v48, %v1438_v62 }
 0x220   : > { %v1259_v45 = vrot.slane %v1205_v21, 7  ;;  %v1922_v54 = vadd.f32 %v1804_v49, %v1621_v44  ;;  %v1623_v55 = vpop.f32.mrf.mxu0  ;;  %v1807_v36 = vpop.f32.mrf.mxu1  ;;  %v8948_v21 = vld [vmem:[%s7952_s28 + $0x160] sm:$0xff]  ;;  %v14658_v44 = vld [vmem:[#allocation43_spill] sm:$0xff] }
 0x222   : > { %v1325_v34 = vsel %vm1293_vm2, %v1258_v33, %v1259_v45  ;;  %6830 = vmatmul.msk.f32.gmra.mxu2 %vm471_vm1, %v8914_v4  ;;  %6887 = vmatmul.msk.f32.gmra.mxu3 %vm471_vm1, %v8863_v14  ;;  %v910_v33 = vadd.f32 %v14657_v6, %v14656_v39 }
 0x223   : > { %v8920_v50 = vadd.f32 %v1922_v54, %v1325_v34  ;;  %6942 = vmatmul.msk.f32.gmra.mxu0 %vm471_vm1, %v8812_v30  ;;  %6998 = vmatmul.msk.f32.gmra.mxu1 %vm471_vm1, %v8914_v4 }
 0x225   : > { %v1090_v59 = vpop.f32.mrf.mxu2  ;;  %v1441_v22 = vpop.f32.mrf.mxu3 }
 0x226   : > { %v1206_v24 = vadd.f32 %v1090_v59, %v907_v25  ;;  %v1624_v29 = vadd.f32 %v1623_v55, %v1441_v22 }
 0x228   : > { %v1260_v31 = vrot.slane %v1206_v24, 7  ;;  %v1923_v20 = vadd.f32 %v1807_v36, %v1624_v29  ;;  %v1626_v58 = vpop.f32.mrf.mxu0  ;;  %v1810_v13 = vpop.f32.mrf.mxu1  ;;  %v8965_v29 = vld [vmem:[%s7952_s28 + $0x168] sm:$0xff] }
 0x22a   : > { %v1324_v26 = vsel %vm1293_vm2, %v1259_v45, %v1260_v31  ;;  %6831 = vmatmul.msk.f32.gmra.mxu2 %vm471_vm1, %v8931_v37  ;;  %6888 = vmatmul.msk.f32.gmra.mxu3 %vm471_vm1, %v8880_v57  ;;  %v14659_v45 = vld [vmem:[#allocation44_spill] sm:$0xff] }
 0x22b   : > { %v8937_v30 = vadd.f32 %v1923_v20, %v1324_v26  ;;  %6943 = vmatmul.msk.f32.gmra.mxu0 %vm471_vm1, %v8829_v32  ;;  %6999 = vmatmul.msk.f32.gmra.mxu1 %vm471_vm1, %v8931_v37  ;;  %v913_v54 = vadd.f32 %v14659_v45, %v14658_v44  ;;  %v14661_v20 = vld [vmem:[#allocation47_spill] sm:$0xff] }
 0x22d   : > { %v1093_v41 = vpop.f32.mrf.mxu2  ;;  %v1444_v48 = vpop.f32.mrf.mxu3 }
 0x22e   : > { %v1207_v49 = vadd.f32 %v1093_v41, %v910_v33  ;;  %v1627_v1 = vadd.f32 %v1626_v58, %v1444_v48 }
 0x230   : > { %v1261_v52 = vrot.slane %v1207_v49, 7  ;;  %v1924_v19 = vadd.f32 %v1810_v13, %v1627_v1  ;;  %v1629_v10 = vpop.f32.mrf.mxu0  ;;  %v1813_v61 = vpop.f32.mrf.mxu1 }
 0x232   : > { %v1323_v62 = vsel %vm1293_vm2, %v1260_v31, %v1261_v52  ;;  %6832 = vmatmul.msk.f32.gmra.mxu2 %vm471_vm1, %v8948_v21  ;;  %6889 = vmatmul.msk.f32.gmra.mxu3 %vm471_vm1, %v8897_v40  ;;  %v14660_v31 = vld [vmem:[#allocation46_spill] sm:$0xff] }
 0x233   : > { %v8954_v32 = vadd.f32 %v1924_v19, %v1323_v62  ;;  %6944 = vmatmul.msk.f32.gmra.mxu0 %vm471_vm1, %v8846_v2  ;;  %7000 = vmatmul.msk.f32.gmra.mxu1 %vm471_vm1, %v8948_v21  ;;  %v916_v58 = vadd.f32 %v14661_v20, %v14660_v31 }
 0x235   : > { %v1096_v55 = vpop.f32.mrf.mxu2  ;;  %v1447_v36 = vpop.f32.mrf.mxu3 }
 0x236   : > { %v1208_v34 = vadd.f32 %v1096_v55, %v913_v54  ;;  %v1630_v47 = vadd.f32 %v1629_v10, %v1447_v36 }
 0x238   : > { %v1262_v23 = vrot.slane %v1208_v34, 7  ;;  %v1925_v25 = vadd.f32 %v1813_v61, %v1630_v47  ;;  %v1632_v59 = vpop.f32.mrf.mxu0  ;;  %v1816_v22 = vpop.f32.mrf.mxu1  ;;  %v14662_v61 = vld [vmem:[#allocation2_spill] sm:$0xff]  ;;  %v8998_v47 = vld [vmem:[%s7952_s28 + $0x178] sm:$0xff] }
 0x23a   : > { %v1322_v24 = vsel %vm1293_vm2, %v1261_v52, %v1262_v23  ;;  %6833 = vmatmul.msk.f32.gmra.mxu2 %vm471_vm1, %v8965_v29  ;;  %6890 = vmatmul.msk.f32.gmra.mxu3 %vm471_vm1, %v8914_v4  ;;  %v8982_v52 = vld [vmem:[%s7952_s28 + $0x170] sm:$0xff] }
 0x23b   : > { %v8971_v2 = vadd.f32 %v1925_v25, %v1322_v24  ;;  %6945 = vmatmul.msk.f32.gmra.mxu0 %vm471_vm1, %v8863_v14  ;;  %7001 = vmatmul.msk.f32.gmra.mxu1 %vm471_vm1, %v8965_v29 }
 0x23d   : > { %v1099_v13 = vpop.f32.mrf.mxu2  ;;  %v1450_v26 = vpop.f32.mrf.mxu3 }
 0x23e   : > { %v1209_v39 = vadd.f32 %v1099_v13, %v916_v58  ;;  %v1633_v6 = vadd.f32 %v1632_v59, %v1450_v26  ;;  %v14663_v59 = vld [vmem:[#allocation3_spill] sm:$0xff] }
 0x240   : > { %v1263_v33 = vrot.slane %v1209_v39, 7  ;;  %v1926_v41 = vadd.f32 %v1816_v22, %v1633_v6  ;;  %v1635_v48 = vpop.f32.mrf.mxu0  ;;  %v1819_v49 = vpop.f32.mrf.mxu1  ;;  %v9014_v39 = vld [vmem:[%s7952_s28 + $0x180] sm:$0xff] }
 0x242   : > { %v1321_v1 = vsel %vm1293_vm2, %v1262_v23, %v1263_v33  ;;  %6834 = vmatmul.msk.f32.gmra.mxu2 %vm471_vm1, %v8982_v52  ;;  %6891 = vmatmul.msk.f32.gmra.mxu3 %vm471_vm1, %v8931_v37 }
 0x243   : > { %v8988_v14 = vadd.f32 %v1926_v41, %v1321_v1  ;;  %6946 = vmatmul.msk.f32.gmra.mxu0 %vm471_vm1, %v8880_v57  ;;  %7002 = vmatmul.msk.f32.gmra.mxu1 %vm471_vm1, %v8982_v52  ;;  %v14664_v41 = vld [vmem:[#allocation4_spill] sm:$0xff] }
 0x245   : > { %v1102_v19 = vpop.f32.mrf.mxu2  ;;  %v1453_v10 = vpop.f32.mrf.mxu3 }
 0x246   : > { %v1210_v62 = vadd.f32 %v1102_v19, %v14662_v61  ;;  %v1636_v44 = vadd.f32 %v1635_v48, %v1453_v10 }
 0x248   : > { %v1264_v45 = vrot.slane %v1210_v62, 7  ;;  %v1927_v54 = vadd.f32 %v1819_v49, %v1636_v44  ;;  %v1638_v55 = vpop.f32.mrf.mxu0  ;;  %v1822_v36 = vpop.f32.mrf.mxu1  ;;  %v9030_v44 = vld [vmem:[%s7952_s28 + $0x188] sm:$0xff] }
 0x24a   : > { %v1320_v34 = vsel %vm1293_vm2, %v1263_v33, %v1264_v45  ;;  %6835 = vmatmul.msk.f32.gmra.mxu2 %vm471_vm1, %v8998_v47  ;;  %6892 = vmatmul.msk.f32.gmra.mxu3 %vm471_vm1, %v8948_v21 }
 0x24b   : > { %v9004_v57 = vadd.f32 %v1927_v54, %v1320_v34  ;;  %6947 = vmatmul.msk.f32.gmra.mxu0 %vm471_vm1, %v8897_v40  ;;  %7003 = vmatmul.msk.f32.gmra.mxu1 %vm471_vm1, %v8998_v47 }
 0x24d   : > { %v1105_v23 = vpop.f32.mrf.mxu2  ;;  %v1456_v25 = vpop.f32.mrf.mxu3 }
 0x24e   : > { %v1211_v22 = vadd.f32 %v1105_v23, %v14663_v59  ;;  %v1639_v24 = vadd.f32 %v1638_v55, %v1456_v25  ;;  %v14665_v55 = vld [vmem:[#allocation5_spill] sm:$0xff] }
 0x250   : > { %v1265_v31 = vrot.slane %v1211_v22, 7  ;;  %v1928_v20 = vadd.f32 %v1822_v36, %v1639_v24  ;;  %v1641_v58 = vpop.f32.mrf.mxu0  ;;  %v1825_v13 = vpop.f32.mrf.mxu1 }
 0x252   : > { %v1319_v26 = vsel %vm1293_vm2, %v1264_v45, %v1265_v31  ;;  %6836 = vmatmul.msk.f32.gmra.mxu2 %vm471_vm1, %v9014_v39  ;;  %6893 = vmatmul.msk.f32.gmra.mxu3 %vm471_vm1, %v8965_v29 }
 0x253   : > { %v9020_v40 = vadd.f32 %v1928_v20, %v1319_v26  ;;  %6948 = vmatmul.msk.f32.gmra.mxu0 %vm471_vm1, %v8914_v4  ;;  %7004 = vmatmul.msk.f32.gmra.mxu1 %vm471_vm1, %v9014_v39 }
 0x255   : > { %v1108_v6 = vpop.f32.mrf.mxu2  ;;  %v1459_v33 = vpop.f32.mrf.mxu3 }
 0x256   : > { %v1212_v48 = vadd.f32 %v1108_v6, %v14664_v41  ;;  %v1642_v49 = vadd.f32 %v1641_v58, %v1459_v33 }
 0x258   : > { %v1266_v1 = vrot.slane %v1212_v48, 7  ;;  %v1929_v19 = vadd.f32 %v1825_v13, %v1642_v49  ;;  %v1644_v10 = vpop.f32.mrf.mxu0  ;;  %v1828_v61 = vpop.f32.mrf.mxu1  ;;  %v14667_v13 = vld [vmem:[#allocation6_spill] sm:$0xff] }
 0x25a   : > { %v1318_v62 = vsel %vm1293_vm2, %v1265_v31, %v1266_v1  ;;  %6837 = vmatmul.msk.f32.gmra.mxu2 %vm471_vm1, %v9030_v44  ;;  %6894 = vmatmul.msk.f32.gmra.mxu3 %vm471_vm1, %v8982_v52  ;;  %v9046_v31 = vld [vmem:[%s7952_s28 + $0x190] sm:$0xff] }
 0x25b   : > { %v9036_v4 = vadd.f32 %v1929_v19, %v1318_v62  ;;  %6949 = vmatmul.msk.f32.gmra.mxu0 %vm471_vm1, %v8931_v37  ;;  %7005 = vmatmul.msk.f32.gmra.mxu1 %vm471_vm1, %v9030_v44  ;;  %v9062_v19 = vld [vmem:[%s7952_s28 + $0x198] sm:$0xff]  ;;  %v14669_v62 = vld [vmem:[#allocation7_spill] sm:$0xff] }
 0x25d   : > { %v1111_v45 = vpop.f32.mrf.mxu2  ;;  %v1462_v54 = vpop.f32.mrf.mxu3 }
 0x25e   : > { %v1213_v36 = vadd.f32 %v1111_v45, %v14665_v55  ;;  %v1645_v34 = vadd.f32 %v1644_v10, %v1462_v54 }
 0x260   : > { %v1267_v23 = vrot.slane %v1213_v36, 7  ;;  %v1930_v25 = vadd.f32 %v1828_v61, %v1645_v34  ;;  %v1647_v59 = vpop.f32.mrf.mxu0  ;;  %v1831_v22 = vpop.f32.mrf.mxu1 }
 0x262   : > { %v1317_v24 = vsel %vm1293_vm2, %v1266_v1, %v1267_v23  ;;  %6838 = vmatmul.msk.f32.gmra.mxu2 %vm471_vm1, %v9046_v31  ;;  %6895 = vmatmul.msk.f32.gmra.mxu3 %vm471_vm1, %v8998_v47 }
 0x263   : > { %v9052_v37 = vadd.f32 %v1930_v25, %v1317_v24  ;;  %6950 = vmatmul.msk.f32.gmra.mxu0 %vm471_vm1, %v8948_v21  ;;  %7006 = vmatmul.msk.f32.gmra.mxu1 %vm471_vm1, %v9046_v31 }
 0x265   : > { %14666 = vst [vmem:[#allocation15_spill] sm:$0xff] %v9052_v37  ;;  %v1114_v20 = vpop.f32.mrf.mxu2  ;;  %v1465_v58 = vpop.f32.mrf.mxu3 }
 0x266   : > { %v1214_v26 = vadd.f32 %v1114_v20, %v14667_v13  ;;  %v1648_v6 = vadd.f32 %v1647_v59, %v1465_v58  ;;  %v9078_v59 = vld [vmem:[%s7952_s28 + $0x1a0] sm:$0xff]  ;;  %v14671_v20 = vld [vmem:[#allocation8_spill] sm:$0xff] }
 0x268   : > { %v1268_v33 = vrot.slane %v1214_v26, 7  ;;  %v1931_v41 = vadd.f32 %v1831_v22, %v1648_v6  ;;  %v1650_v48 = vpop.f32.mrf.mxu0  ;;  %v1834_v49 = vpop.f32.mrf.mxu1 }
 0x26a   : > { %v1316_v1 = vsel %vm1293_vm2, %v1267_v23, %v1268_v33  ;;  %6839 = vmatmul.msk.f32.gmra.mxu2 %vm471_vm1, %v9062_v19  ;;  %6896 = vmatmul.msk.f32.gmra.mxu3 %vm471_vm1, %v9014_v39 }
 0x26b   : > { %v9068_v21 = vadd.f32 %v1931_v41, %v1316_v1  ;;  %6951 = vmatmul.msk.f32.gmra.mxu0 %vm471_vm1, %v8965_v29  ;;  %7007 = vmatmul.msk.f32.gmra.mxu1 %vm471_vm1, %v9062_v19 }
 0x26d   : > { %14668 = vst [vmem:[#allocation17_spill] sm:$0xff] %v9068_v21  ;;  %v1117_v10 = vpop.f32.mrf.mxu2  ;;  %v1468_v61 = vpop.f32.mrf.mxu3 }
 0x26e   : > { %v1215_v45 = vadd.f32 %v1117_v10, %v14669_v62  ;;  %v1651_v54 = vadd.f32 %v1650_v48, %v1468_v61  ;;  %v14673_v61 = vld [vmem:[#allocation9_spill] sm:$0xff] }
 0x270   : > { %v1269_v55 = vrot.slane %v1215_v45, 7  ;;  %v1932_v36 = vadd.f32 %v1834_v49, %v1651_v54  ;;  %v1653_v34 = vpop.f32.mrf.mxu0  ;;  %v1837_v23 = vpop.f32.mrf.mxu1  ;;  %v9094_v49 = vld [vmem:[%s7952_s28 + $0x1a8] sm:$0xff] }
 0x272   : > { %v1315_v25 = vsel %vm1293_vm2, %v1268_v33, %v1269_v55  ;;  %6840 = vmatmul.msk.f32.gmra.mxu2 %vm471_vm1, %v9078_v59  ;;  %6897 = vmatmul.msk.f32.gmra.mxu3 %vm471_vm1, %v9030_v44 }
 0x273   : > { %v9084_v29 = vadd.f32 %v1932_v36, %v1315_v25  ;;  %6952 = vmatmul.msk.f32.gmra.mxu0 %vm471_vm1, %v8982_v52  ;;  %7008 = vmatmul.msk.f32.gmra.mxu1 %vm471_vm1, %v9078_v59  ;;  %v9110_v25 = vld [vmem:[%s7952_s28] sm:$0xff] }
 0x275   : > { %14670 = vst [vmem:[#allocation19_spill] sm:$0xff] %v9084_v29  ;;  %v1120_v22 = vpop.f32.mrf.mxu2  ;;  %v1471_v24 = vpop.f32.mrf.mxu3 }
 0x276   : > { %v1216_v58 = vadd.f32 %v1120_v22, %v14671_v20  ;;  %v1654_v13 = vadd.f32 %v1653_v34, %v1471_v24  ;;  %v14675_v20 = vld [vmem:[#allocation10_spill] sm:$0xff] }
 0x278   : > { %v1270_v26 = vrot.slane %v1216_v58, 7  ;;  %v1933_v6 = vadd.f32 %v1837_v23, %v1654_v13  ;;  %v1656_v33 = vpop.f32.mrf.mxu0  ;;  %v1840_v41 = vpop.f32.mrf.mxu1 }
 0x27a   : > { %v1314_v48 = vsel %vm1293_vm2, %v1269_v55, %v1270_v26  ;;  %6841 = vmatmul.msk.f32.gmra.mxu2 %vm471_vm1, %v9094_v49  ;;  %6898 = vmatmul.msk.f32.gmra.mxu3 %vm471_vm1, %v9046_v31 }
 0x27b   : > { %v9100_v52 = vadd.f32 %v1933_v6, %v1314_v48  ;;  %6953 = vmatmul.msk.f32.gmra.mxu0 %vm471_vm1, %v8998_v47  ;;  %7009 = vmatmul.msk.f32.gmra.mxu1 %vm471_vm1, %v9094_v49 }
 0x27d   : > { %14672 = vst [vmem:[#allocation21_spill] sm:$0xff] %v9100_v52  ;;  %v1123_v1 = vpop.f32.mrf.mxu2  ;;  %v1474_v10 = vpop.f32.mrf.mxu3 }
 0x27e   : > { %v1217_v62 = vadd.f32 %v1123_v1, %v14673_v61  ;;  %v1657_v45 = vadd.f32 %v1656_v33, %v1474_v10  ;;  %v9126_v1 = vld [vmem:[%s7952_s28 + $0x8] sm:$0xff] }
 0x280   : > { %v1271_v54 = vrot.slane %v1217_v62, 7  ;;  %v1934_v55 = vadd.f32 %v1840_v41, %v1657_v45  ;;  %v1659_v36 = vpop.f32.mrf.mxu0  ;;  %v1843_v34 = vpop.f32.mrf.mxu1  ;;  %v14677_v62 = vld [vmem:[#allocation11_spill] sm:$0xff] }
 0x282   : > { %v1313_v23 = vsel %vm1293_vm2, %v1270_v26, %v1271_v54  ;;  %6842 = vmatmul.msk.f32.gmra.mxu2 %vm471_vm1, %v9110_v25  ;;  %6899 = vmatmul.msk.f32.gmra.mxu3 %vm471_vm1, %v9062_v19 }
 0x283   : > { %v9116_v47 = vadd.f32 %v1934_v55, %v1313_v23  ;;  %6954 = vmatmul.msk.f32.gmra.mxu0 %vm471_vm1, %v9014_v39  ;;  %7010 = vmatmul.msk.f32.gmra.mxu1 %vm471_vm1, %v9110_v25 }
 0x285   : > { %14674 = vst [vmem:[#allocation23_spill] sm:$0xff] %v9116_v47  ;;  %v1126_v22 = vpop.f32.mrf.mxu2  ;;  %v1477_v24 = vpop.f32.mrf.mxu3 }
 0x286   : > { %v1218_v58 = vadd.f32 %v1126_v22, %v14675_v20  ;;  %v1660_v13 = vadd.f32 %v1659_v36, %v1477_v24  ;;  %v9142_v24 = vld [vmem:[%s7952_s28 + $0x10] sm:$0xff] }
 0x288   : > { %v1272_v26 = vrot.slane %v1218_v58, 7  ;;  %v1935_v6 = vadd.f32 %v1843_v34, %v1660_v13  ;;  %v1662_v33 = vpop.f32.mrf.mxu0  ;;  %v1846_v41 = vpop.f32.mrf.mxu1  ;;  %v14679_v13 = vld [vmem:[#allocation12_spill] sm:$0xff] }
 0x28a   : > { %v1312_v48 = vsel %vm1293_vm2, %v1271_v54, %v1272_v26  ;;  %6843 = vmatmul.msk.f32.gmra.mxu2 %vm471_vm1, %v9126_v1  ;;  %6900 = vmatmul.msk.f32.gmra.mxu3 %vm471_vm1, %v9078_v59 }
 0x28b   : > { %v9132_v39 = vadd.f32 %v1935_v6, %v1312_v48  ;;  %6955 = vmatmul.msk.f32.gmra.mxu0 %vm471_vm1, %v9030_v44  ;;  %7011 = vmatmul.msk.f32.gmra.mxu1 %vm471_vm1, %v9126_v1 }
 0x28d   : > { %14676 = vst [vmem:[#allocation25_spill] sm:$0xff] %v9132_v39  ;;  %v1129_v10 = vpop.f32.mrf.mxu2  ;;  %v1480_v61 = vpop.f32.mrf.mxu3 }
 0x28e   : > { %v1219_v45 = vadd.f32 %v1129_v10, %v14677_v62  ;;  %v1663_v54 = vadd.f32 %v1662_v33, %v1480_v61  ;;  %v9164_v62 = vld [vmem:[%s7952_s28 + $0x18] sm:$0xff] }
 0x290   : > { %v1273_v55 = vrot.slane %v1219_v45, 7  ;;  %v1936_v36 = vadd.f32 %v1846_v41, %v1663_v54  ;;  %v1665_v34 = vpop.f32.mrf.mxu0  ;;  %v1849_v23 = vpop.f32.mrf.mxu1  ;;  %v7858_v45 = vmov 0  }
 0x291   : > { %7698 = vset.pattern.permute.xlu0 %v7858_v45  ;;  %7699 = vset.pattern.permute.xlu1 %v7858_v45 }
 0x292   : > { %v1311_v22 = vsel %vm1293_vm2, %v1272_v26, %v1273_v55  ;;  %6844 = vmatmul.msk.f32.gmra.mxu2 %vm471_vm1, %v9142_v24  ;;  %6901 = vmatmul.msk.f32.gmra.mxu3 %vm471_vm1, %v9094_v49 }
 0x293   : > { %v9148_v44 = vadd.f32 %v1936_v36, %v1311_v22  ;;  %6956 = vmatmul.msk.f32.gmra.mxu0 %vm471_vm1, %v9046_v31  ;;  %7012 = vmatmul.msk.f32.gmra.mxu1 %vm471_vm1, %v9142_v24 }
 0x294   : > { %7700 = vset.pattern.permute.xlu2 %v7858_v45 }
 0x295   : > { %14678 = vst [vmem:[#allocation27_spill] sm:$0xff] %v9148_v44  ;;  %v1132_v20 = vpop.f32.mrf.mxu2  ;;  %v1483_v58 = vpop.f32.mrf.mxu3 }
 0x296   : > { %v1220_v26 = vadd.f32 %v1132_v20, %v14679_v13  ;;  %v1666_v6 = vadd.f32 %v1665_v34, %v1483_v58  ;;  %v14681_v34 = vld [vmem:[#allocation13_spill] sm:$0xff] }
 0x298   : > { %v1274_v33 = vrot.slane %v1220_v26, 7  ;;  %v1937_v41 = vadd.f32 %v1849_v23, %v1666_v6  ;;  %v1668_v48 = vpop.f32.mrf.mxu0  ;;  %v1852_v10 = vpop.f32.mrf.mxu1 }
 0x29a   : > { %v1310_v61 = vsel %vm1293_vm2, %v1273_v55, %v1274_v33  ;;  %7016 = vmatmul.msk.f32.vlgmr.msra.gmra.mxu2 %vm471_vm1, %v9110_v25  ;;  %7071 = vmatmul.msk.f32.vlgmr.msra.gmra.mxu3 %vm471_vm1, %v9062_v19  ;;  %v414_v55 = vld [vmem:[%s14376_s1] sm:$0xff] }
 0x29b   : > { %v9161_v31 = vadd.f32 %v1937_v41, %v1310_v61  ;;  %7127 = vmatmul.msk.f32.vlgmr.msra.gmra.mxu0 %vm471_vm1, %v9164_v62  ;;  %2837 = vperm.xlu0 %7698, %v414_v55   ;;  %v9181_v41 = vld [vmem:[%s7952_s28 + $0x20] sm:$0xff] }
 0x29c   : > { %v14683_v61 = vld [vmem:[#allocation14_spill] sm:$0xff] }
 0x29d   : > { %14680 = vst [vmem:[#allocation29_spill] sm:$0xff] %v9161_v31  ;;  %v1135_v54 = vpop.f32.mrf.mxu2  ;;  %v1486_v36 = vpop.f32.mrf.mxu3 }
 0x29e   : > { %v1221_v19 = vadd.f32 %v1135_v54, %v14681_v34  ;;  %v1669_v23 = vadd.f32 %v1668_v48, %v1486_v36 }
 0x2a0   : > { %v1275_v22 = vrot.slane %v1221_v19, 7  ;;  %v1938_v20 = vadd.f32 %v1852_v10, %v1669_v23  ;;  %v1671_v58 = vpop.f32.mrf.mxu0  ;;  %v1855_v13 = vpop.f32.mrf.mxu1 }
 0x2a2   : > { %v1309_v26 = vsel %vm1293_vm2, %v1274_v33, %v1275_v22  ;;  %7017 = vmatmul.msk.f32.gmra.mxu2 %vm471_vm1, %v9126_v1  ;;  %7072 = vmatmul.msk.f32.gmra.mxu3 %vm471_vm1, %v9078_v59  ;;  %v415_v33 = vld [vmem:[%s14376_s1 + $0x8] sm:$0xff] }
 0x2a3   : > { %v9178_v6 = vadd.f32 %v1938_v20, %v1309_v26  ;;  %7128 = vmatmul.msk.f32.gmra.mxu0 %vm471_vm1, %v9181_v41  ;;  %2842 = vperm.xlu0 %7698, %v415_v33   ;;  %v9198_v20 = vld [vmem:[%s7952_s28 + $0x28] sm:$0xff]  ;;  %v14685_v26 = vld [vmem:[#allocation16_spill] sm:$0xff] }
 0x2a5   : > { %14682 = vst [vmem:[#allocation31_spill] sm:$0xff] %v9178_v6  ;;  %v1138_v48 = vpop.f32.mrf.mxu2  ;;  %v1489_v10 = vpop.f32.mrf.mxu3 }
 0x2a6   : > { %v1222_v45 = vadd.f32 %v1138_v48, %v14683_v61  ;;  %v1672_v54 = vadd.f32 %v1671_v58, %v1489_v10 }
 0x2a8   : > { %v1276_v36 = vrot.slane %v1222_v45, 7  ;;  %v1939_v59 = vadd.f32 %v1855_v13, %v1672_v54  ;;  %v1674_v55 = vpop.f32.mrf.mxu0  ;;  %v1858_v34 = vpop.f32.mrf.mxu1 }
 0x2aa   : > { %v1308_v19 = vsel %vm1293_vm2, %v1275_v22, %v1276_v36  ;;  %7018 = vmatmul.msk.f32.gmra.mxu2 %vm471_vm1, %v9142_v24  ;;  %7073 = vmatmul.msk.f32.gmra.mxu3 %vm471_vm1, %v9094_v49  ;;  %v416_v22 = vld [vmem:[%s14376_s1 + $0x10] sm:$0xff] }
 0x2ab   : > { %v9195_v23 = vadd.f32 %v1939_v59, %v1308_v19  ;;  %7129 = vmatmul.msk.f32.gmra.mxu0 %vm471_vm1, %v9198_v20  ;;  %2847 = vperm.xlu1 %7699, %v416_v22   ;;  %v9215_v19 = vld [vmem:[%s7952_s28 + $0x30] sm:$0xff] }
 0x2ad   : > { %14684 = vst [vmem:[#allocation32_spill] sm:$0xff] %v9195_v23  ;;  %v1141_v58 = vpop.f32.mrf.mxu2  ;;  %v1492_v13 = vpop.f32.mrf.mxu3  ;;  %v7791_v23 = vld [vmem:[%s7952_s28] sm:$0xff] }
 0x2ae   : > { %v1223_v48 = vadd.f32 %v1141_v58, %v14685_v26  ;;  %v1675_v10 = vadd.f32 %v1674_v55, %v1492_v13  ;;  %v14687_v58 = vld [vmem:[#allocation18_spill] sm:$0xff] }
 0x2b0   : > { %v1277_v33 = vrot.slane %v1223_v48, 7  ;;  %v1940_v49 = vadd.f32 %v1858_v34, %v1675_v10  ;;  %v1677_v61 = vpop.f32.mrf.mxu0  ;;  %v1861_v45 = vpop.f32.mrf.mxu1 }
 0x2b2   : > { %v1307_v54 = vsel %vm1293_vm2, %v1276_v36, %v1277_v33  ;;  %7019 = vmatmul.msk.f32.gmra.mxu2 %vm471_vm1, %v9164_v62  ;;  %7074 = vmatmul.msk.f32.gmra.mxu3 %vm471_vm1, %v9110_v25  ;;  %v417_v36 = vld [vmem:[%s14376_s1 + $0x18] sm:$0xff] }
 0x2b3   : > { %v9212_v59 = vadd.f32 %v1940_v49, %v1307_v54  ;;  %7130 = vmatmul.msk.f32.gmra.mxu0 %vm471_vm1, %v9215_v19  ;;  %2852 = vperm.xlu1 %7699, %v417_v36  }
 0x2b5   : > { %14686 = vst [vmem:[#allocation34_spill] sm:$0xff] %v9212_v59  ;;  %v1144_v55 = vpop.f32.mrf.mxu2  ;;  %v1495_v34 = vpop.f32.mrf.mxu3  ;;  %v9297_v59 = vld [vmem:[%s7952_s28 + $0x58] sm:$0xff] }
 0x2b6   : > { %v1224_v13 = vadd.f32 %v1144_v55, %v14687_v58  ;;  %v1678_v22 = vadd.f32 %v1677_v61, %v1495_v34  ;;  %v14689_v55 = vld [vmem:[#allocation20_spill] sm:$0xff] }
 0x2b8   : > { %v1278_v26 = vrot.slane %v1224_v13, 7  ;;  %v1941_v25 = vadd.f32 %v1861_v45, %v1678_v22  ;;  %v1680_v48 = vpop.f32.mrf.mxu0  ;;  %v1864_v10 = vpop.f32.mrf.mxu1 }
 0x2ba   : > { %v1306_v49 = vsel %vm1293_vm2, %v1277_v33, %v1278_v26  ;;  %7020 = vmatmul.msk.f32.gmra.mxu2 %vm471_vm1, %v9181_v41  ;;  %7075 = vmatmul.msk.f32.gmra.mxu3 %vm471_vm1, %v9126_v1 }
 0x2bb   : > { %v9229_v54 = vadd.f32 %v1941_v25, %v1306_v49  ;;  %7131 = vmatmul.msk.f32.gmra.mxu0 %vm471_vm1, %v9232_v28  ;;  %v9246_v49 = vld [vmem:[%s7952_s28 + $0x40] sm:$0xff] }
 0x2bd   : > { %14688 = vst [vmem:[#allocation35_spill] sm:$0xff] %v9229_v54  ;;  %v1147_v61 = vpop.f32.mrf.mxu2  ;;  %v1498_v45 = vpop.f32.mrf.mxu3 }
 0x2be   : > { %v1225_v34 = vadd.f32 %v1147_v61, %v14689_v55  ;;  %v1681_v36 = vadd.f32 %v1680_v48, %v1498_v45  ;;  %v14691_v61 = vld [vmem:[#allocation22_spill] sm:$0xff] }
 0x2c0   : > { %v1279_v33 = vrot.slane %v1225_v34, 7  ;;  %v1942_v58 = vadd.f32 %v1864_v10, %v1681_v36  ;;  %v1683_v13 = vpop.f32.mrf.mxu0  ;;  %v1867_v22 = vpop.f32.mrf.mxu1 }
 0x2c2   : > { %v1305_v1 = vsel %vm1293_vm2, %v1278_v26, %v1279_v33  ;;  %7021 = vmatmul.msk.f32.gmra.mxu2 %vm471_vm1, %v9198_v20  ;;  %7076 = vmatmul.msk.f32.gmra.mxu3 %vm471_vm1, %v9142_v24 }
 0x2c3   : > { %v9243_v25 = vadd.f32 %v1942_v58, %v1305_v1  ;;  %7132 = vmatmul.msk.f32.gmra.mxu0 %vm471_vm1, %v9246_v49  ;;  %v9260_v1 = vld [vmem:[%s7952_s28 + $0x48] sm:$0xff] }
 0x2c5   : > { %14690 = vst [vmem:[#allocation37_spill] sm:$0xff] %v9243_v25  ;;  %v1150_v48 = vpop.f32.mrf.mxu2  ;;  %v1501_v10 = vpop.f32.mrf.mxu3  ;;  %v9277_v25 = vld [vmem:[%s7952_s28 + $0x50] sm:$0xff] }
 0x2c6   : > { %v1226_v45 = vadd.f32 %v1150_v48, %v14691_v61  ;;  %v1684_v55 = vadd.f32 %v1683_v13, %v1501_v10  ;;  %v14693_v48 = vld [vmem:[#allocation24_spill] sm:$0xff] }
 0x2c8   : > { %v1280_v26 = vrot.slane %v1226_v45, 7  ;;  %v1943_v34 = vadd.f32 %v1867_v22, %v1684_v55  ;;  %v1686_v36 = vpop.f32.mrf.mxu0  ;;  %v1870_v54 = vpop.f32.mrf.mxu1 }
 0x2ca   : > { %v1304_v24 = vsel %vm1293_vm2, %v1279_v33, %v1280_v26  ;;  %7022 = vmatmul.msk.f32.gmra.mxu2 %vm471_vm1, %v9215_v19  ;;  %7077 = vmatmul.msk.f32.gmra.mxu3 %vm471_vm1, %v9164_v62  ;;  %v420_v33 = vld [vmem:[%s14376_s1 + $0x30] sm:$0xff] }
 0x2cb   : > { %v9257_v58 = vadd.f32 %v1943_v34, %v1304_v24  ;;  %7133 = vmatmul.msk.f32.gmra.mxu0 %vm471_vm1, %v9260_v1  ;;  %2867 = vperm.xlu0 %7698, %v420_v33  }
 0x2cd   : > { %14692 = vst [vmem:[#allocation38_spill] sm:$0xff] %v9257_v58  ;;  %v1153_v13 = vpop.f32.mrf.mxu2  ;;  %v1504_v22 = vpop.f32.mrf.mxu3 }
 0x2ce   : > { %v1227_v10 = vadd.f32 %v1153_v13, %v14693_v48  ;;  %v1687_v61 = vadd.f32 %v1686_v36, %v1504_v22  ;;  %v421_v13 = vld [vmem:[%s14376_s1 + $0x38] sm:$0xff]  ;;  %v14695_v22 = vld [vmem:[#allocation26_spill] sm:$0xff] }
 0x2cf   : > { %2872 = vperm.xlu1 %7699, %v421_v13  }
 0x2d0   : > { %v1281_v45 = vrot.slane %v1227_v10, 7  ;;  %v1944_v62 = vadd.f32 %v1870_v54, %v1687_v61  ;;  %v1689_v55 = vpop.f32.mrf.mxu0  ;;  %v1873_v34 = vpop.f32.mrf.mxu1 }
 0x2d2   : > { %v1303_v24 = vsel %vm1293_vm2, %v1280_v26, %v1281_v45  ;;  %7023 = vmatmul.msk.f32.gmra.mxu2 %vm471_vm1, %v9232_v28  ;;  %7078 = vmatmul.msk.f32.gmra.mxu3 %vm471_vm1, %v9181_v41  ;;  %v418_v26 = vld [vmem:[%s14376_s1 + $0x20] sm:$0xff] }
 0x2d3   : > { %v9274_v58 = vadd.f32 %v1944_v62, %v1303_v24  ;;  %7134 = vmatmul.msk.f32.gmra.mxu0 %vm471_vm1, %v9277_v25  ;;  %2857 = vperm.xlu2 %7700, %v418_v26  }
 0x2d5   : > { %14694 = vst [vmem:[#allocation40_spill] sm:$0xff] %v9274_v58  ;;  %v1156_v36 = vpop.f32.mrf.mxu2  ;;  %v1507_v54 = vpop.f32.mrf.mxu3 }
 0x2d6   : > { %v1228_v41 = vadd.f32 %v1156_v36, %v14695_v22  ;;  %v1690_v33 = vadd.f32 %v1689_v55, %v1507_v54  ;;  %v14697_v36 = vld [vmem:[#allocation28_spill] sm:$0xff] }
 0x2d8   : > { %v1282_v48 = vrot.slane %v1228_v41, 7  ;;  %v1945_v10 = vadd.f32 %v1873_v34, %v1690_v33  ;;  %v1692_v61 = vpop.f32.mrf.mxu0  ;;  %v1876_v62 = vpop.f32.mrf.mxu1 }
 0x2da   : > { %v1302_v24 = vsel %vm1293_vm2, %v1281_v45, %v1282_v48  ;;  %7024 = vmatmul.msk.f32.gmra.mxu2 %vm471_vm1, %v9246_v49  ;;  %7079 = vmatmul.msk.f32.gmra.mxu3 %vm471_vm1, %v9198_v20  ;;  %v419_v45 = vld [vmem:[%s14376_s1 + $0x28] sm:$0xff] }
 0x2db   : > { %v9294_v58 = vadd.f32 %v1945_v10, %v1302_v24  ;;  %7135 = vmatmul.msk.f32.gmra.mxu0 %vm471_vm1, %v9297_v59  ;;  %2862 = vperm.xlu2 %7700, %v419_v45   ;;  %v9314_v24 = vld [vmem:[%s7952_s28 + $0x60] sm:$0xff] }
 0x2dd   : > { %14696 = vst [vmem:[#allocation41_spill] sm:$0xff] %v9294_v58  ;;  %v1159_v55 = vpop.f32.mrf.mxu2  ;;  %v1510_v34 = vpop.f32.mrf.mxu3 }
 0x2de   : > { %v1229_v54 = vadd.f32 %v1159_v55, %v14697_v36  ;;  %v1693_v26 = vadd.f32 %v1692_v61, %v1510_v34  ;;  %v14699_v55 = vld [vmem:[#allocation30_spill] sm:$0xff] }
 0x2e0   : > { %v1283_v13 = vrot.slane %v1229_v54, 7  ;;  %v1946_v20 = vadd.f32 %v1876_v62, %v1693_v26  ;;  %v1695_v22 = vpop.f32.mrf.mxu0  ;;  %v1879_v41 = vpop.f32.mrf.mxu1 }
 0x2e2   : > { %v1301_v33 = vsel %vm1293_vm2, %v1282_v48, %v1283_v13  ;;  %7025 = vmatmul.msk.f32.gmra.mxu2 %vm471_vm1, %v9260_v1  ;;  %7080 = vmatmul.msk.f32.gmra.mxu3 %vm471_vm1, %v9215_v19  ;;  %v423_v48 = vld [vmem:[%s14376_s1 + $0x48] sm:$0xff] }
 0x2e3   : > { %v9311_v10 = vadd.f32 %v1946_v20, %v1301_v33  ;;  %7136 = vmatmul.msk.f32.gmra.mxu0 %vm471_vm1, %v9314_v24  ;;  %2882 = vperm.xlu0 %7698, %v423_v48  }
 0x2e5   : > { %14698 = vst [vmem:[#allocation43_spill] sm:$0xff] %v9311_v10  ;;  %v1162_v61 = vpop.f32.mrf.mxu2  ;;  %v1513_v62 = vpop.f32.mrf.mxu3  ;;  %v9331_v10 = vld [vmem:[%s7952_s28 + $0x68] sm:$0xff] }
 0x2e6   : > { %v1230_v34 = vadd.f32 %v1162_v61, %v14699_v55  ;;  %v1696_v45 = vadd.f32 %v1695_v22, %v1513_v62  ;;  %v14701_v61 = vld [vmem:[#allocation33_spill] sm:$0xff] }
 0x2e8   : > { %v1284_v36 = vrot.slane %v1230_v34, 7  ;;  %v1947_v19 = vadd.f32 %v1879_v41, %v1696_v45  ;;  %v1698_v54 = vpop.f32.mrf.mxu0  ;;  %v1882_v26 = vpop.f32.mrf.mxu1 }
 0x2ea   : > { %v1300_v20 = vsel %vm1293_vm2, %v1283_v13, %v1284_v36  ;;  %7026 = vmatmul.msk.f32.gmra.mxu2 %vm471_vm1, %v9277_v25  ;;  %7081 = vmatmul.msk.f32.gmra.mxu3 %vm471_vm1, %v9232_v28  ;;  %v424_v13 = vld [vmem:[%s14376_s1 + $0x50] sm:$0xff] }
 0x2eb   : > { %v9328_v33 = vadd.f32 %v1947_v19, %v1300_v20  ;;  %7137 = vmatmul.msk.f32.gmra.mxu0 %vm471_vm1, %v9331_v10  ;;  %2887 = vperm.xlu1 %7699, %v424_v13  }
 0x2ed   : > { %14700 = vst [vmem:[#allocation44_spill] sm:$0xff] %v9328_v33  ;;  %v1165_v22 = vpop.f32.mrf.mxu2  ;;  %v1516_v41 = vpop.f32.mrf.mxu3  ;;  %v9348_v33 = vld [vmem:[%s7952_s28 + $0x70] sm:$0xff] }
 0x2ee   : > { %v1231_v62 = vadd.f32 %v1165_v22, %v14701_v61  ;;  %v1699_v48 = vadd.f32 %v1698_v54, %v1516_v41  ;;  %v14703_v22 = vld [vmem:[#allocation36_spill] sm:$0xff] }
 0x2f0   : > { %v1285_v55 = vrot.slane %v1231_v62, 7  ;;  %v1948_v28 = vadd.f32 %v1882_v26, %v1699_v48  ;;  %v1701_v34 = vpop.f32.mrf.mxu0  ;;  %v1885_v45 = vpop.f32.mrf.mxu1 }
 0x2f2   : > { %v1299_v19 = vsel %vm1293_vm2, %v1284_v36, %v1285_v55  ;;  %7027 = vmatmul.msk.f32.gmra.mxu2 %vm471_vm1, %v9297_v59  ;;  %7082 = vmatmul.msk.f32.gmra.mxu3 %vm471_vm1, %v9246_v49  ;;  %v422_v36 = vld [vmem:[%s14376_s1 + $0x40] sm:$0xff] }
 0x2f3   : > { %v9345_v20 = vadd.f32 %v1948_v28, %v1299_v19  ;;  %7138 = vmatmul.msk.f32.gmra.mxu0 %vm471_vm1, %v9348_v33  ;;  %2877 = vperm.xlu2 %7700, %v422_v36  }
 0x2f5   : > { %14702 = vst [vmem:[#allocation46_spill] sm:$0xff] %v9345_v20  ;;  %v1168_v54 = vpop.f32.mrf.mxu2  ;;  %v1519_v26 = vpop.f32.mrf.mxu3  ;;  %v9365_v20 = vld [vmem:[%s7952_s28 + $0x78] sm:$0xff] }
 0x2f6   : > { %v1232_v41 = vadd.f32 %v1168_v54, %v14703_v22  ;;  %v1702_v13 = vadd.f32 %v1701_v34, %v1519_v26  ;;  %v14705_v54 = vld [vmem:[#allocation39_spill] sm:$0xff] }
 0x2f8   : > { %v1286_v61 = vrot.slane %v1232_v41, 7  ;;  %v1949_v49 = vadd.f32 %v1885_v45, %v1702_v13  ;;  %v1704_v62 = vpop.f32.mrf.mxu0  ;;  %v1888_v48 = vpop.f32.mrf.mxu1 }
 0x2fa   : > { %v1298_v28 = vsel %vm1293_vm2, %v1285_v55, %v1286_v61  ;;  %7028 = vmatmul.msk.f32.gmra.mxu2 %vm471_vm1, %v9314_v24  ;;  %7083 = vmatmul.msk.f32.gmra.mxu3 %vm471_vm1, %v9260_v1  ;;  %v426_v55 = vld [vmem:[%s14376_s1 + $0x60] sm:$0xff] }
 0x2fb   : > { %v9362_v19 = vadd.f32 %v1949_v49, %v1298_v28  ;;  %7139 = vmatmul.msk.f32.gmra.mxu0 %vm471_vm1, %v9365_v20  ;;  %2897 = vperm.xlu0 %7698, %v426_v55  }
 0x2fd   : > { %14704 = vst [vmem:[#allocation47_spill] sm:$0xff] %v9362_v19  ;;  %v1171_v34 = vpop.f32.mrf.mxu2  ;;  %v1522_v45 = vpop.f32.mrf.mxu3  ;;  %v9382_v19 = vld [vmem:[%s7952_s28 + $0x80] sm:$0xff] }
 0x2fe   : > { %v1233_v26 = vadd.f32 %v1171_v34, %v14705_v54  ;;  %v1705_v36 = vadd.f32 %v1704_v62, %v1522_v45  ;;  %v14707_v34 = vld [vmem:[#allocation42_spill] sm:$0xff] }
 0x300   : > { %v1287_v22 = vrot.slane %v1233_v26, 7  ;;  %v1950_v1 = vadd.f32 %v1888_v48, %v1705_v36  ;;  %v1707_v41 = vpop.f32.mrf.mxu0  ;;  %v1891_v13 = vpop.f32.mrf.mxu1 }
 0x302   : > { %v1297_v49 = vsel %vm1293_vm2, %v1286_v61, %v1287_v22  ;;  %7029 = vmatmul.msk.f32.gmra.mxu2 %vm471_vm1, %v9331_v10  ;;  %7084 = vmatmul.msk.f32.gmra.mxu3 %vm471_vm1, %v9277_v25  ;;  %v427_v61 = vld [vmem:[%s14376_s1 + $0x68] sm:$0xff] }
 0x303   : > { %v9379_v28 = vadd.f32 %v1950_v1, %v1297_v49  ;;  %7140 = vmatmul.msk.f32.gmra.mxu0 %vm471_vm1, %v9382_v19  ;;  %2902 = vperm.xlu1 %7699, %v427_v61  }
 0x305   : > { %14706 = vst [vmem:[#allocation2_spill] sm:$0xff] %v9379_v28  ;;  %v1174_v62 = vpop.f32.mrf.mxu2  ;;  %v1525_v48 = vpop.f32.mrf.mxu3  ;;  %v9399_v28 = vld [vmem:[%s7952_s28 + $0x88] sm:$0xff] }
 0x306   : > { %v1234_v45 = vadd.f32 %v1174_v62, %v14707_v34  ;;  %v1708_v55 = vadd.f32 %v1707_v41, %v1525_v48  ;;  %v14709_v62 = vld [vmem:[#allocation45_spill] sm:$0xff] }
 0x308   : > { %v1288_v54 = vrot.slane %v1234_v45, 7  ;;  %v1951_v25 = vadd.f32 %v1891_v13, %v1708_v55  ;;  %v1710_v26 = vpop.f32.mrf.mxu0  ;;  %v1894_v1 = vpop.f32.mrf.mxu1 }
 0x30a   : > { %v1296_v36 = vsel %vm1293_vm2, %v1287_v22, %v1288_v54  ;;  %7030 = vmatmul.msk.f32.gmra.mxu2 %vm471_vm1, %v9348_v33  ;;  %7085 = vmatmul.msk.f32.gmra.mxu3 %vm471_vm1, %v9297_v59  ;;  %v425_v22 = vld [vmem:[%s14376_s1 + $0x58] sm:$0xff] }
 0x30b   : > { %v9396_v49 = vadd.f32 %v1951_v25, %v1296_v36  ;;  %7141 = vmatmul.msk.f32.gmra.mxu0 %vm471_vm1, %v9399_v28  ;;  %2892 = vperm.xlu2 %7700, %v425_v22   ;;  %v9416_v36 = vld [vmem:[%s7952_s28 + $0x90] sm:$0xff] }
 0x30d   : > { %14708 = vst [vmem:[#allocation3_spill] sm:$0xff] %v9396_v49  ;;  %v1177_v41 = vpop.f32.mrf.mxu2  ;;  %v1528_v13 = vpop.f32.mrf.mxu3 }
 0x30e   : > { %v1235_v48 = vadd.f32 %v1177_v41, %v14709_v62  ;;  %v1711_v61 = vadd.f32 %v1710_v26, %v1528_v13  ;;  %v14711_v13 = vld [vmem:[#allocation48_spill] sm:$0xff] }
 0x310   : > { %v1289_v59 = vrot.slane %v1235_v48, 7  ;;  %v1952_v34 = vadd.f32 %v1894_v1, %v1711_v61  ;;  %v1713_v45 = vpop.f32.mrf.mxu0  ;;  %v1897_v26 = vpop.f32.mrf.mxu1 }
 0x312   : > { %v1295_v55 = vsel %vm1293_vm2, %v1288_v54, %v1289_v59  ;;  %7031 = vmatmul.msk.f32.gmra.mxu2 %vm471_vm1, %v9365_v20  ;;  %7086 = vmatmul.msk.f32.gmra.mxu3 %vm471_vm1, %v9314_v24  ;;  %v429_v54 = vld [vmem:[%s14376_s1 + $0x78] sm:$0xff] }
 0x313   : > { %v9413_v25 = vadd.f32 %v1952_v34, %v1295_v55  ;;  %7142 = vmatmul.msk.f32.gmra.mxu0 %vm471_vm1, %v9416_v36  ;;  %2912 = vperm.xlu0 %7698, %v429_v54   ;;  %v14712_v34 = vrot.slane %v8578_v56, 7 }
 0x315   : > { %14710 = vst [vmem:[#allocation4_spill] sm:$0xff] %v9413_v25  ;;  %v1180_v1 = vpop.f32.mrf.mxu2  ;;  %v1531_v41 = vpop.f32.mrf.mxu3 }
 0x316   : > { %v1236_v22 = vadd.f32 %v1180_v1, %v14711_v13  ;;  %v1714_v62 = vadd.f32 %v1713_v45, %v1531_v41  ;;  %v14713_v45 = vld [vmem:[#allocation49_spill] sm:$0xff] }
 0x318   : > { %v1290_v24 = vrot.slane %v1236_v22, 7  ;;  %v1953_v48 = vadd.f32 %v1897_v26, %v1714_v62  ;;  %v2398_v61 = vpop.f32.mrf.mxu0  ;;  %v9438_v26 = vld [vmem:[%s7952_s28 + $0x98] sm:$0xff] }
 0x31a   : > { %v1347_v55 = vsel %vm1293_vm2, %v1290_v24, %v14712_v34  ;;  %v1294_v25 = vsel %vm1293_vm2, %v1289_v59, %v1290_v24  ;;  %7032 = vmatmul.msk.f32.gmra.mxu2 %vm471_vm1, %v9382_v19  ;;  %7087 = vmatmul.msk.f32.gmra.mxu3 %vm471_vm1, %v9331_v10  ;;  %v430_v59 = vld [vmem:[%s14376_s1 + $0x80] sm:$0xff] }
 0x31b   : > { %v1954_v1 = vadd.f32 %v14713_v45, %v1347_v55  ;;  %v9435_v41 = vadd.f32 %v1953_v48, %v1294_v25  ;;  %7143 = vmatmul.msk.f32.gmra.mxu0 %vm471_vm1, %v9438_v26  ;;  %2917 = vperm.xlu1 %7699, %v430_v59   ;;  %v9452_v25 = vld [vmem:[%s7952_s28 + $0xa0] sm:$0xff]  ;;  %v428_v48 = vld [vmem:[%s14376_s1 + $0x70] sm:$0xff] }
 0x31c   : > { %2907 = vperm.xlu2 %7700, %v428_v48  }
 0x31d   : > { %14714 = vst [vmem:[#allocation5_spill] sm:$0xff] %v9435_v41  ;;  %v2032_v56 = vpop.f32.mrf.mxu2  ;;  %v2214_v54 = vpop.f32.mrf.mxu3 }
 0x31e   : > { %v2215_v13 = vadd.f32 %v2214_v54, %v2032_v56  ;;  %v9466_v56 = vld [vmem:[%s7952_s28 + $0xa8] sm:$0xff]  ;;  %v10031_v58 = vpop.permute.xlu1 %2847 }
 0x31f   : > { %14723 = vst [vmem:[#allocation14_spill] sm:$0xff] %v10031_v58 }
 0x320   : > { %v9445_v22 = vadd.f32 %v2398_v61, %v2215_v13  ;;  %v2401_v10 = vpop.f32.mrf.mxu0 }
 0x322   : > { %14715 = vst [vmem:[#allocation6_spill] sm:$0xff] %v9445_v22  ;;  %7033 = vmatmul.msk.f32.gmra.mxu2 %vm471_vm1, %v9399_v28  ;;  %7088 = vmatmul.msk.f32.gmra.mxu3 %vm471_vm1, %v9348_v33  ;;  %v14387_v45 = vrot.slane %v9445_v22, 1  ;;  %v10027_v22 = vpop.permute.xlu0 %2837 }
 0x323   : > { %7144 = vmatmul.msk.f32.gmra.mxu0 %vm471_vm1, %v9452_v25  ;;  %14721 = vst [vmem:[#allocation12_spill] sm:$0xff] %v10027_v22 }
 0x325   : > { %v2035_v62 = vpop.f32.mrf.mxu2  ;;  %v2217_v24 = vpop.f32.mrf.mxu3 }
 0x326   : > { %v2218_v61 = vadd.f32 %v2217_v24, %v2035_v62  ;;  %v432_v62 = vld [vmem:[%s14376_s1 + $0x90] sm:$0xff] }
 0x327   : > { %2927 = vperm.xlu0 %7698, %v432_v62  }
 0x328   : > { %v2561_v34 = vadd.f32 %v2401_v10, %v2218_v61  ;;  %v2404_v55 = vpop.f32.mrf.mxu0 }
 0x32a   : > { %v2615_v33 = vrot.slane %v2561_v34, 1  ;;  %7034 = vmatmul.msk.f32.gmra.mxu2 %vm471_vm1, %v9416_v36  ;;  %7089 = vmatmul.msk.f32.gmra.mxu3 %vm471_vm1, %v9365_v20  ;;  %v10043_v44 = vpop.permute.xlu0 %2842 }
 0x32b   : > { %7145 = vmatmul.msk.f32.gmra.mxu0 %vm471_vm1, %v9466_v56  ;;  %14727 = vst [vmem:[#allocation22_spill] sm:$0xff] %v10043_v44 }
 0x32c   : > { %v2721_v54 = vsel %vm2668_vm3, %v14387_v45, %v2615_v33 }
 0x32d   : > { %v9474_v59 = vadd.f32 %v2721_v54, %v1954_v1  ;;  %v2038_v13 = vpop.f32.mrf.mxu2  ;;  %v2220_v10 = vpop.f32.mrf.mxu3  ;;  %v9484_v1 = vld [vmem:[%s7952_s28 + $0xb0] sm:$0xff] }
 0x32e   : > { %v2221_v24 = vadd.f32 %v2220_v10, %v2038_v13  ;;  %v433_v10 = vld [vmem:[%s14376_s1 + $0x98] sm:$0xff] }
 0x32f   : > { %2932 = vperm.xlu1 %7699, %v433_v10  }
 0x330   : > { %v2562_v20 = vadd.f32 %v2404_v55, %v2221_v24  ;;  %v2407_v48 = vpop.f32.mrf.mxu0 }
 0x332   : > { %v2616_v61 = vrot.slane %v2562_v20, 1  ;;  %7035 = vmatmul.msk.f32.gmra.mxu2 %vm471_vm1, %v9438_v26  ;;  %7090 = vmatmul.msk.f32.gmra.mxu3 %vm471_vm1, %v9382_v19 }
 0x333   : > { %7146 = vmatmul.msk.f32.gmra.mxu0 %vm471_vm1, %v9484_v1 }
 0x334   : > { %v2720_v34 = vsel %vm2668_vm3, %v2615_v33, %v2616_v61  ;;  %v9501_v33 = vld [vmem:[%s7952_s28 + $0xb8] sm:$0xff] }
 0x335   : > { %v9491_v54 = vadd.f32 %v2720_v34, %v8590_v51  ;;  %v2041_v55 = vpop.f32.mrf.mxu2  ;;  %v2223_v13 = vpop.f32.mrf.mxu3 }
 0x336   : > { %v2224_v62 = vadd.f32 %v2223_v13, %v2041_v55  ;;  %v431_v13 = vld [vmem:[%s14376_s1 + $0x88] sm:$0xff] }
 0x337   : > { %2922 = vperm.xlu2 %7700, %v431_v13   ;;  %v435_v13 = vld [vmem:[%s14376_s1 + $0xa8] sm:$0xff] }
 0x338   : > { %v2563_v19 = vadd.f32 %v2407_v48, %v2224_v62  ;;  %v2410_v24 = vpop.f32.mrf.mxu0  ;;  %2942 = vperm.xlu0 %7698, %v435_v13  }
 0x33a   : > { %v2617_v20 = vrot.slane %v2563_v19, 1  ;;  %7036 = vmatmul.msk.f32.gmra.mxu2 %vm471_vm1, %v9452_v25  ;;  %7091 = vmatmul.msk.f32.gmra.mxu3 %vm471_vm1, %v9399_v28  ;;  %v7181_v28 = vld [vmem:[%s14381_s6 + $0xc] sm:$0xf] }
 0x33b   : > { %7147 = vmatmul.msk.f32.gmra.mxu0 %vm471_vm1, %v9501_v33  ;;  %7182 = vmatpush.msk.msra.mxu1 %vm634_vm0, %v7181_v28 }
 0x33c   : > { %v2719_v51 = vsel %vm2668_vm3, %v2616_v61, %v2617_v20 }
 0x33d   : > { %v9508_v34 = vadd.f32 %v2719_v51, %v8604_v42  ;;  %v2044_v48 = vpop.f32.mrf.mxu2  ;;  %v2226_v55 = vpop.f32.mrf.mxu3  ;;  %v9522_v42 = vld [vmem:[%s7952_s28 + $0xc0] sm:$0xff] }
 0x33e   : > { %v2227_v10 = vadd.f32 %v2226_v55, %v2044_v48  ;;  %v10059_v29 = vpop.permute.xlu0 %2867 }
 0x33f   : > { %14733 = vst [vmem:[#allocation36_spill] sm:$0xff] %v10059_v29 }
 0x340   : > { %v2564_v62 = vadd.f32 %v2410_v24, %v2227_v10  ;;  %v2413_v19 = vpop.f32.mrf.mxu0 }
 0x342   : > { %v2618_v61 = vrot.slane %v2564_v62, 1  ;;  %7037 = vmatmul.msk.f32.gmra.mxu2 %vm471_vm1, %v9466_v56  ;;  %7092 = vmatmul.msk.f32.gmra.mxu3 %vm471_vm1, %v9416_v36 }
 0x343   : > { %7148 = vmatmul.msk.f32.gmra.mxu0 %vm471_vm1, %v9522_v42 }
 0x344   : > { %v2718_v51 = vsel %vm2668_vm3, %v2617_v20, %v2618_v61 }
 0x345   : > { %v9529_v48 = vadd.f32 %v2718_v51, %v8618_v46  ;;  %v2047_v24 = vpop.f32.mrf.mxu2  ;;  %v2229_v55 = vpop.f32.mrf.mxu3  ;;  %v9539_v46 = vld [vmem:[%s7952_s28 + $0xc8] sm:$0xff] }
 0x346   : > { %v2230_v10 = vadd.f32 %v2229_v55, %v2047_v24  ;;  %v436_v55 = vld [vmem:[%s14376_s1 + $0xb0] sm:$0xff] }
 0x347   : > { %2947 = vperm.xlu1 %7699, %v436_v55  }
 0x348   : > { %v2565_v36 = vadd.f32 %v2413_v19, %v2230_v10  ;;  %v2416_v28 = vpop.f32.mrf.mxu0 }
 0x34a   : > { %v2619_v62 = vrot.slane %v2565_v36, 1  ;;  %7038 = vmatmul.msk.f32.gmra.mxu2 %vm471_vm1, %v9484_v1  ;;  %7093 = vmatmul.msk.f32.gmra.mxu3 %vm471_vm1, %v9438_v26 }
 0x34b   : > { %7149 = vmatmul.msk.f32.gmra.mxu0 %vm471_vm1, %v9539_v46 }
 0x34c   : > { %v2717_v20 = vsel %vm2668_vm3, %v2618_v61, %v2619_v62 }
 0x34d   : > { %v9546_v51 = vadd.f32 %v2717_v20, %v8632_v53  ;;  %v2050_v19 = vpop.f32.mrf.mxu2  ;;  %v2232_v24 = vpop.f32.mrf.mxu3  ;;  %v9556_v53 = vld [vmem:[%s7952_s28 + $0xd0] sm:$0xff] }
 0x34e   : > { %v2233_v13 = vadd.f32 %v2232_v24, %v2050_v19  ;;  %v434_v24 = vld [vmem:[%s14376_s1 + $0xa0] sm:$0xff] }
 0x34f   : > { %2937 = vperm.xlu2 %7700, %v434_v24  }
 0x350   : > { %v2566_v26 = vadd.f32 %v2416_v28, %v2233_v13  ;;  %v2419_v10 = vpop.f32.mrf.mxu0 }
 0x352   : > { %v2620_v36 = vrot.slane %v2566_v26, 1  ;;  %7039 = vmatmul.msk.f32.gmra.mxu2 %vm471_vm1, %v9501_v33  ;;  %7094 = vmatmul.msk.f32.gmra.mxu3 %vm471_vm1, %v9452_v25 }
 0x353   : > { %7150 = vmatmul.msk.f32.gmra.mxu0 %vm471_vm1, %v9556_v53 }
 0x354   : > { %v2716_v61 = vsel %vm2668_vm3, %v2619_v62, %v2620_v36 }
 0x355   : > { %v9563_v20 = vadd.f32 %v2716_v61, %v8646_v60  ;;  %v2053_v28 = vpop.f32.mrf.mxu2  ;;  %v2235_v19 = vpop.f32.mrf.mxu3  ;;  %v9573_v60 = vld [vmem:[%s7952_s28 + $0xd8] sm:$0xff] }
 0x356   : > { %v2236_v55 = vadd.f32 %v2235_v19, %v2053_v28  ;;  %v438_v19 = vld [vmem:[%s14376_s1 + $0xc0] sm:$0xff] }
 0x357   : > { %2957 = vperm.xlu0 %7698, %v438_v19  }
 0x358   : > { %v2567_v25 = vadd.f32 %v2419_v10, %v2236_v55  ;;  %v2422_v13 = vpop.f32.mrf.mxu0 }
 0x35a   : > { %v2621_v26 = vrot.slane %v2567_v25, 1  ;;  %7040 = vmatmul.msk.f32.gmra.mxu2 %vm471_vm1, %v9522_v42  ;;  %7095 = vmatmul.msk.f32.gmra.mxu3 %vm471_vm1, %v9466_v56 }
 0x35b   : > { %7151 = vmatmul.msk.f32.gmra.mxu0 %vm471_vm1, %v9573_v60 }
 0x35c   : > { %v2715_v62 = vsel %vm2668_vm3, %v2620_v36, %v2621_v26 }
 0x35d   : > { %v9580_v61 = vadd.f32 %v2715_v62, %v8660_v3  ;;  %v2056_v10 = vpop.f32.mrf.mxu2  ;;  %v2238_v28 = vpop.f32.mrf.mxu3  ;;  %v9590_v3 = vld [vmem:[%s7952_s28 + $0xe0] sm:$0xff] }
 0x35e   : > { %v2239_v24 = vadd.f32 %v2238_v28, %v2056_v10  ;;  %v439_v28 = vld [vmem:[%s14376_s1 + $0xc8] sm:$0xff] }
 0x35f   : > { %2962 = vperm.xlu1 %7699, %v439_v28  }
 0x360   : > { %v2568_v56 = vadd.f32 %v2422_v13, %v2239_v24  ;;  %v2425_v55 = vpop.f32.mrf.mxu0 }
 0x362   : > { %v2622_v25 = vrot.slane %v2568_v56, 1  ;;  %7041 = vmatmul.msk.f32.gmra.mxu2 %vm471_vm1, %v9539_v46  ;;  %7096 = vmatmul.msk.f32.gmra.mxu3 %vm471_vm1, %v9484_v1 }
 0x363   : > { %7152 = vmatmul.msk.f32.gmra.mxu0 %vm471_vm1, %v9590_v3 }
 0x364   : > { %v2714_v36 = vsel %vm2668_vm3, %v2621_v26, %v2622_v25 }
 0x365   : > { %v9597_v62 = vadd.f32 %v2714_v36, %v8674_v27  ;;  %v2059_v13 = vpop.f32.mrf.mxu2  ;;  %v2241_v10 = vpop.f32.mrf.mxu3  ;;  %v9607_v27 = vld [vmem:[%s7952_s28 + $0xe8] sm:$0xff] }
 0x366   : > { %v2242_v19 = vadd.f32 %v2241_v10, %v2059_v13  ;;  %v437_v10 = vld [vmem:[%s14376_s1 + $0xb8] sm:$0xff] }
 0x367   : > { %2952 = vperm.xlu2 %7700, %v437_v10  }
 0x368   : > { %v2569_v1 = vadd.f32 %v2425_v55, %v2242_v19  ;;  %v2428_v24 = vpop.f32.mrf.mxu0 }
 0x36a   : > { %v2623_v56 = vrot.slane %v2569_v1, 1  ;;  %7042 = vmatmul.msk.f32.gmra.mxu2 %vm471_vm1, %v9556_v53  ;;  %7097 = vmatmul.msk.f32.gmra.mxu3 %vm471_vm1, %v9501_v33 }
 0x36b   : > { %7153 = vmatmul.msk.f32.gmra.mxu0 %vm471_vm1, %v9607_v27 }
 0x36c   : > { %v2713_v26 = vsel %vm2668_vm3, %v2622_v25, %v2623_v56  ;;  %v9624_v25 = vld [vmem:[%s7952_s28 + $0xf0] sm:$0xff] }
 0x36d   : > { %v9614_v36 = vadd.f32 %v2713_v26, %v8688_v5  ;;  %v2062_v55 = vpop.f32.mrf.mxu2  ;;  %v2244_v13 = vpop.f32.mrf.mxu3  ;;  %v441_v5 = vld [vmem:[%s14376_s1 + $0xd8] sm:$0xff] }
 0x36e   : > { %v2245_v28 = vadd.f32 %v2244_v13, %v2062_v55  ;;  %2972 = vperm.xlu0 %7698, %v441_v5  }
 0x370   : > { %v2570_v33 = vadd.f32 %v2428_v24, %v2245_v28  ;;  %v2431_v19 = vpop.f32.mrf.mxu0 }
 0x372   : > { %v2624_v1 = vrot.slane %v2570_v33, 1  ;;  %7043 = vmatmul.msk.f32.gmra.mxu2 %vm471_vm1, %v9573_v60  ;;  %7098 = vmatmul.msk.f32.gmra.mxu3 %vm471_vm1, %v9522_v42  ;;  %v442_v42 = vld [vmem:[%s14376_s1 + $0xe0] sm:$0xff] }
 0x373   : > { %7154 = vmatmul.msk.f32.gmra.mxu0 %vm471_vm1, %v9624_v25  ;;  %2977 = vperm.xlu1 %7699, %v442_v42  }
 0x374   : > { %v2712_v24 = vsel %vm2668_vm3, %v2623_v56, %v2624_v1  ;;  %v9644_v56 = vld [vmem:[%s7952_s28 + $0xf8] sm:$0xff] }
 0x375   : > { %v9634_v26 = vadd.f32 %v2712_v24, %v8702_v9  ;;  %v2065_v55 = vpop.f32.mrf.mxu2  ;;  %v2247_v13 = vpop.f32.mrf.mxu3  ;;  %v444_v9 = vld [vmem:[%s14376_s1 + $0xf0] sm:$0xff] }
 0x376   : > { %v2248_v10 = vadd.f32 %v2247_v13, %v2065_v55  ;;  %2987 = vperm.xlu0 %7698, %v444_v9  }
 0x378   : > { %v2571_v28 = vadd.f32 %v2431_v19, %v2248_v10  ;;  %v2434_v33 = vpop.f32.mrf.mxu0 }
 0x37a   : > { %v2625_v45 = vrot.slane %v2571_v28, 1  ;;  %7044 = vmatmul.msk.f32.gmra.mxu2 %vm471_vm1, %v9590_v3  ;;  %7099 = vmatmul.msk.f32.gmra.mxu3 %vm471_vm1, %v9539_v46  ;;  %v445_v46 = vld [vmem:[%s14376_s1 + $0xf8] sm:$0xff] }
 0x37b   : > { %7155 = vmatmul.msk.f32.gmra.mxu0 %vm471_vm1, %v9644_v56  ;;  %2992 = vperm.xlu1 %7699, %v445_v46  }
 0x37c   : > { %v2711_v19 = vsel %vm2668_vm3, %v2624_v1, %v2625_v45  ;;  %v9664_v1 = vld [vmem:[%s7952_s28 + $0x100] sm:$0xff] }
 0x37d   : > { %v9654_v5 = vadd.f32 %v2711_v19, %v8719_v43  ;;  %v2068_v24 = vpop.f32.mrf.mxu2  ;;  %v2250_v55 = vpop.f32.mrf.mxu3  ;;  %v447_v43 = vld [vmem:[%s14376_s1 + $0x108] sm:$0xff] }
 0x37e   : > { %v2251_v13 = vadd.f32 %v2250_v55, %v2068_v24  ;;  %3002 = vperm.xlu0 %7698, %v447_v43   ;;  %v448_v55 = vld [vmem:[%s14376_s1 + $0x110] sm:$0xff]  ;;  %v450_v43 = vld [vmem:[%s14376_s1 + $0x120] sm:$0xff] }
 0x380   : > { %v2572_v42 = vadd.f32 %v2434_v33, %v2251_v13  ;;  %v2437_v10 = vpop.f32.mrf.mxu0 }
 0x382   : > { %v2626_v28 = vrot.slane %v2572_v42, 1  ;;  %7045 = vmatmul.msk.f32.gmra.mxu2 %vm471_vm1, %v9607_v27  ;;  %7100 = vmatmul.msk.f32.gmra.mxu3 %vm471_vm1, %v9556_v53  ;;  %v440_v53 = vld [vmem:[%s14376_s1 + $0xd0] sm:$0xff] }
 0x383   : > { %7156 = vmatmul.msk.f32.gmra.mxu0 %vm471_vm1, %v9664_v1  ;;  %2967 = vperm.xlu2 %7700, %v440_v53  }
 0x384   : > { %v2710_v33 = vsel %vm2668_vm3, %v2625_v45, %v2626_v28  ;;  %3007 = vperm.xlu1 %7699, %v448_v55   ;;  %v443_v55 = vld [vmem:[%s14376_s1 + $0xe8] sm:$0xff] }
 0x385   : > { %v9674_v9 = vadd.f32 %v2710_v33, %v8736_v35  ;;  %v2071_v19 = vpop.f32.mrf.mxu2  ;;  %v2253_v24 = vpop.f32.mrf.mxu3  ;;  %v9687_v35 = vld [vmem:[%s7952_s28 + $0x108] sm:$0xff] }
 0x386   : > { %v2254_v46 = vadd.f32 %v2253_v24, %v2071_v19  ;;  %3017 = vperm.xlu0 %7698, %v450_v43   ;;  %v453_v43 = vld [vmem:[%s14376_s1 + $0x138] sm:$0xff] }
 0x388   : > { %v2573_v13 = vadd.f32 %v2437_v10, %v2254_v46  ;;  %v2440_v42 = vpop.f32.mrf.mxu0 }
 0x38a   : > { %v2627_v45 = vrot.slane %v2573_v13, 1  ;;  %7046 = vmatmul.msk.f32.gmra.mxu2 %vm471_vm1, %v9624_v25  ;;  %7101 = vmatmul.msk.f32.gmra.mxu3 %vm471_vm1, %v9573_v60  ;;  %v451_v60 = vld [vmem:[%s14376_s1 + $0x128] sm:$0xff] }
 0x38b   : > { %7157 = vmatmul.msk.f32.gmra.mxu0 %vm471_vm1, %v9687_v35  ;;  %2982 = vperm.xlu2 %7700, %v443_v55  }
 0x38c   : > { %v2709_v10 = vsel %vm2668_vm3, %v2626_v28, %v2627_v45  ;;  %3022 = vperm.xlu1 %7699, %v451_v60  }
 0x38d   : > { %v9697_v33 = vadd.f32 %v2709_v10, %v8753_v63  ;;  %v2074_v19 = vpop.f32.mrf.mxu2  ;;  %v2256_v24 = vpop.f32.mrf.mxu3  ;;  %v9710_v63 = vld [vmem:[%s7952_s28 + $0x110] sm:$0xff] }
 0x38e   : > { %v2257_v53 = vadd.f32 %v2256_v24, %v2074_v19  ;;  %3032 = vperm.xlu0 %7698, %v453_v43   ;;  %v456_v43 = vld [vmem:[%s14376_s1 + $0x150] sm:$0xff] }
 0x390   : > { %v2574_v46 = vadd.f32 %v2440_v42, %v2257_v53  ;;  %v2443_v13 = vpop.f32.mrf.mxu0  ;;  %v446_v53 = vld [vmem:[%s14376_s1 + $0x100] sm:$0xff] }
 0x392   : > { %v2628_v28 = vrot.slane %v2574_v46, 1  ;;  %7047 = vmatmul.msk.f32.gmra.mxu2 %vm471_vm1, %v9644_v56  ;;  %7102 = vmatmul.msk.f32.gmra.mxu3 %vm471_vm1, %v9590_v3  ;;  %v454_v3 = vld [vmem:[%s14376_s1 + $0x140] sm:$0xff] }
 0x393   : > { %7158 = vmatmul.msk.f32.gmra.mxu0 %vm471_vm1, %v9710_v63  ;;  %2997 = vperm.xlu2 %7700, %v446_v53  }
 0x394   : > { %v2708_v42 = vsel %vm2668_vm3, %v2627_v45, %v2628_v28  ;;  %3037 = vperm.xlu1 %7699, %v454_v3  }
 0x395   : > { %v9720_v10 = vadd.f32 %v2708_v42, %v8770_v17  ;;  %v2077_v19 = vpop.f32.mrf.mxu2  ;;  %v2259_v24 = vpop.f32.mrf.mxu3  ;;  %v9733_v17 = vld [vmem:[%s7952_s28 + $0x118] sm:$0xff] }
 0x396   : > { %v2260_v60 = vadd.f32 %v2259_v24, %v2077_v19  ;;  %3047 = vperm.xlu0 %7698, %v456_v43   ;;  %v459_v43 = vld [vmem:[%s14376_s1 + $0x168] sm:$0xff] }
 0x398   : > { %v2575_v55 = vadd.f32 %v2443_v13, %v2260_v60  ;;  %v2446_v46 = vpop.f32.mrf.mxu0  ;;  %v449_v60 = vld [vmem:[%s14376_s1 + $0x118] sm:$0xff] }
 0x39a   : > { %v2629_v45 = vrot.slane %v2575_v55, 1  ;;  %7048 = vmatmul.msk.f32.gmra.mxu2 %vm471_vm1, %v9664_v1  ;;  %7103 = vmatmul.msk.f32.gmra.mxu3 %vm471_vm1, %v9607_v27  ;;  %v457_v27 = vld [vmem:[%s14376_s1 + $0x158] sm:$0xff] }
 0x39b   : > { %7159 = vmatmul.msk.f32.gmra.mxu0 %vm471_vm1, %v9733_v17  ;;  %3012 = vperm.xlu2 %7700, %v449_v60  }
 0x39c   : > { %v2707_v13 = vsel %vm2668_vm3, %v2628_v28, %v2629_v45  ;;  %3052 = vperm.xlu1 %7699, %v457_v27  }
 0x39d   : > { %v9743_v42 = vadd.f32 %v2707_v13, %v8786_v8  ;;  %v2080_v19 = vpop.f32.mrf.mxu2  ;;  %v2262_v24 = vpop.f32.mrf.mxu3  ;;  %v9756_v8 = vld [vmem:[%s7952_s28 + $0x120] sm:$0xff] }
 0x39e   : > { %v2263_v3 = vadd.f32 %v2262_v24, %v2080_v19  ;;  %3062 = vperm.xlu0 %7698, %v459_v43   ;;  %v462_v43 = vld [vmem:[%s14376_s1 + $0x180] sm:$0xff] }
 0x3a0   : > { %v2576_v53 = vadd.f32 %v2446_v46, %v2263_v3  ;;  %v2449_v55 = vpop.f32.mrf.mxu0  ;;  %v452_v3 = vld [vmem:[%s14376_s1 + $0x130] sm:$0xff] }
 0x3a2   : > { %v2630_v28 = vrot.slane %v2576_v53, 1  ;;  %7049 = vmatmul.msk.f32.gmra.mxu2 %vm471_vm1, %v9687_v35  ;;  %7104 = vmatmul.msk.f32.gmra.mxu3 %vm471_vm1, %v9624_v25  ;;  %v460_v25 = vld [vmem:[%s14376_s1 + $0x170] sm:$0xff] }
 0x3a3   : > { %7160 = vmatmul.msk.f32.gmra.mxu0 %vm471_vm1, %v9756_v8  ;;  %3027 = vperm.xlu2 %7700, %v452_v3  }
 0x3a4   : > { %v2706_v46 = vsel %vm2668_vm3, %v2629_v45, %v2630_v28  ;;  %3067 = vperm.xlu1 %7699, %v460_v25  }
 0x3a5   : > { %v9766_v13 = vadd.f32 %v2706_v46, %v8802_v12  ;;  %v2083_v19 = vpop.f32.mrf.mxu2  ;;  %v2265_v24 = vpop.f32.mrf.mxu3  ;;  %v9779_v12 = vld [vmem:[%s7952_s28 + $0x128] sm:$0xff] }
 0x3a6   : > { %v2266_v27 = vadd.f32 %v2265_v24, %v2083_v19  ;;  %3077 = vperm.xlu0 %7698, %v462_v43   ;;  %v465_v43 = vld [vmem:[%s14376_s1 + $0x198] sm:$0xff] }
 0x3a8   : > { %v2577_v60 = vadd.f32 %v2449_v55, %v2266_v27  ;;  %v2452_v53 = vpop.f32.mrf.mxu0  ;;  %v455_v27 = vld [vmem:[%s14376_s1 + $0x148] sm:$0xff] }
 0x3aa   : > { %v2631_v45 = vrot.slane %v2577_v60, 1  ;;  %7050 = vmatmul.msk.f32.gmra.mxu2 %vm471_vm1, %v9710_v63  ;;  %7105 = vmatmul.msk.f32.gmra.mxu3 %vm471_vm1, %v9644_v56  ;;  %v463_v56 = vld [vmem:[%s14376_s1 + $0x188] sm:$0xff] }
 0x3ab   : > { %7161 = vmatmul.msk.f32.gmra.mxu0 %vm471_vm1, %v9779_v12  ;;  %3042 = vperm.xlu2 %7700, %v455_v27  }
 0x3ac   : > { %v2705_v55 = vsel %vm2668_vm3, %v2630_v28, %v2631_v45  ;;  %3082 = vperm.xlu1 %7699, %v463_v56  }
 0x3ad   : > { %v9789_v46 = vadd.f32 %v2705_v55, %v8818_v16  ;;  %v2086_v19 = vpop.f32.mrf.mxu2  ;;  %v2268_v24 = vpop.f32.mrf.mxu3  ;;  %v9802_v16 = vld [vmem:[%s7952_s28 + $0x130] sm:$0xff] }
 0x3ae   : > { %v2269_v25 = vadd.f32 %v2268_v24, %v2086_v19  ;;  %3092 = vperm.xlu0 %7698, %v465_v43  }
 0x3b0   : > { %v2578_v3 = vadd.f32 %v2452_v53, %v2269_v25  ;;  %v2455_v60 = vpop.f32.mrf.mxu0  ;;  %v458_v25 = vld [vmem:[%s14376_s1 + $0x160] sm:$0xff] }
 0x3b2   : > { %v2632_v28 = vrot.slane %v2578_v3, 1  ;;  %7051 = vmatmul.msk.f32.gmra.mxu2 %vm471_vm1, %v9733_v17  ;;  %7106 = vmatmul.msk.f32.gmra.mxu3 %vm471_vm1, %v9664_v1  ;;  %v466_v1 = vld [vmem:[%s14376_s1 + $0x1a0] sm:$0xff] }
 0x3b3   : > { %7162 = vmatmul.msk.f32.gmra.mxu0 %vm471_vm1, %v9802_v16  ;;  %3057 = vperm.xlu2 %7700, %v458_v25  }
 0x3b4   : > { %v2704_v53 = vsel %vm2668_vm3, %v2631_v45, %v2632_v28  ;;  %3097 = vperm.xlu1 %7699, %v466_v1   ;;  %v461_v1 = vld [vmem:[%s14376_s1 + $0x178] sm:$0xff] }
 0x3b5   : > { %v9812_v55 = vadd.f32 %v2704_v53, %v8835_v7  ;;  %v2089_v19 = vpop.f32.mrf.mxu2  ;;  %v2271_v24 = vpop.f32.mrf.mxu3  ;;  %v9825_v7 = vld [vmem:[%s7952_s28 + $0x138] sm:$0xff] }
 0x3b6   : > { %v2272_v56 = vadd.f32 %v2271_v24, %v2089_v19 }
 0x3b8   : > { %v2579_v27 = vadd.f32 %v2455_v60, %v2272_v56  ;;  %v2458_v3 = vpop.f32.mrf.mxu0 }
 0x3ba   : > { %v2633_v45 = vrot.slane %v2579_v27, 1  ;;  %7052 = vmatmul.msk.f32.gmra.mxu2 %vm471_vm1, %v9756_v8  ;;  %7107 = vmatmul.msk.f32.gmra.mxu3 %vm471_vm1, %v9687_v35 }
 0x3bb   : > { %7163 = vmatmul.msk.f32.gmra.mxu0 %vm471_vm1, %v9825_v7  ;;  %3072 = vperm.xlu2 %7700, %v461_v1  }
 0x3bc   : > { %v2703_v43 = vsel %vm2668_vm3, %v2632_v28, %v2633_v45 }
 0x3bd   : > { %v9832_v60 = vadd.f32 %v2703_v43, %v8852_v11  ;;  %v2092_v53 = vpop.f32.mrf.mxu2  ;;  %v2274_v19 = vpop.f32.mrf.mxu3  ;;  %v9842_v11 = vld [vmem:[%s7952_s28 + $0x140] sm:$0xff] }
 0x3be   : > { %v2275_v24 = vadd.f32 %v2274_v19, %v2092_v53  ;;  %v464_v19 = vld [vmem:[%s14376_s1 + $0x190] sm:$0xff] }
 0x3c0   : > { %v2580_v56 = vadd.f32 %v2458_v3, %v2275_v24  ;;  %v2461_v35 = vpop.f32.mrf.mxu0 }
 0x3c2   : > { %v2634_v25 = vrot.slane %v2580_v56, 1  ;;  %7053 = vmatmul.msk.f32.gmra.mxu2 %vm471_vm1, %v9779_v12  ;;  %7108 = vmatmul.msk.f32.gmra.mxu3 %vm471_vm1, %v9710_v63 }
 0x3c3   : > { %7164 = vmatmul.msk.f32.gmra.mxu0 %vm471_vm1, %v9842_v11  ;;  %3087 = vperm.xlu2 %7700, %v464_v19  }
 0x3c4   : > { %v2702_v28 = vsel %vm2668_vm3, %v2633_v45, %v2634_v25 }
 0x3c5   : > { %v9849_v27 = vadd.f32 %v2702_v28, %v8869_v15  ;;  %v2095_v3 = vpop.f32.mrf.mxu2  ;;  %v2277_v43 = vpop.f32.mrf.mxu3  ;;  %v9859_v15 = vld [vmem:[%s7952_s28 + $0x148] sm:$0xff] }
 0x3c6   : > { %v2278_v53 = vadd.f32 %v2277_v43, %v2095_v3  ;;  %v467_v43 = vld [vmem:[%s14376_s1 + $0x1a8] sm:$0xff] }
 0x3c8   : > { %v2581_v24 = vadd.f32 %v2461_v35, %v2278_v53  ;;  %v2464_v63 = vpop.f32.mrf.mxu0 }
 0x3ca   : > { %v2635_v1 = vrot.slane %v2581_v24, 1  ;;  %7054 = vmatmul.msk.f32.gmra.mxu2 %vm471_vm1, %v9802_v16  ;;  %7109 = vmatmul.msk.f32.gmra.mxu3 %vm471_vm1, %v9733_v17 }
 0x3cb   : > { %7165 = vmatmul.msk.f32.gmra.mxu0 %vm471_vm1, %v9859_v15  ;;  %3102 = vperm.xlu2 %7700, %v467_v43  }
 0x3cc   : > { %v2701_v45 = vsel %vm2668_vm3, %v2634_v25, %v2635_v1 }
 0x3cd   : > { %v9866_v56 = vadd.f32 %v2701_v45, %v8886_v18  ;;  %v2098_v35 = vpop.f32.mrf.mxu2  ;;  %v2280_v28 = vpop.f32.mrf.mxu3  ;;  %v9876_v18 = vld [vmem:[%s7952_s28 + $0x150] sm:$0xff] }
 0x3ce   : > { %v2281_v3 = vadd.f32 %v2280_v28, %v2098_v35 }
 0x3d0   : > { %v2582_v53 = vadd.f32 %v2464_v63, %v2281_v3  ;;  %v2467_v17 = vpop.f32.mrf.mxu0 }
 0x3d2   : > { %v2636_v19 = vrot.slane %v2582_v53, 1  ;;  %7055 = vmatmul.msk.f32.gmra.mxu2 %vm471_vm1, %v9825_v7  ;;  %7110 = vmatmul.msk.f32.gmra.mxu3 %vm471_vm1, %v9756_v8  ;;  %v9890_v8 = vld [vmem:[%s7952_s28 + $0x158] sm:$0xff] }
 0x3d3   : > { %7166 = vmatmul.msk.f32.gmra.mxu0 %vm471_vm1, %v9876_v18 }
 0x3d4   : > { %v2700_v25 = vsel %vm2668_vm3, %v2635_v1, %v2636_v19 }
 0x3d5   : > { %v9883_v24 = vadd.f32 %v2700_v25, %v8903_v0  ;;  %v2101_v63 = vpop.f32.mrf.mxu2  ;;  %v2283_v45 = vpop.f32.mrf.mxu3 }
 0x3d6   : > { %v2284_v35 = vadd.f32 %v2283_v45, %v2101_v63 }
 0x3d8   : > { %v2583_v28 = vadd.f32 %v2467_v17, %v2284_v35  ;;  %v2470_v3 = vpop.f32.mrf.mxu0 }
 0x3da   : > { %v2637_v43 = vrot.slane %v2583_v28, 1  ;;  %7056 = vmatmul.msk.f32.gmra.mxu2 %vm471_vm1, %v9842_v11  ;;  %7111 = vmatmul.msk.f32.gmra.mxu3 %vm471_vm1, %v9779_v12  ;;  %v9904_v12 = vld [vmem:[%s7952_s28 + $0x160] sm:$0xff] }
 0x3db   : > { %7167 = vmatmul.msk.f32.gmra.mxu0 %vm471_vm1, %v9890_v8 }
 0x3dc   : > { %v2699_v0 = vsel %vm2668_vm3, %v2636_v19, %v2637_v43 }
 0x3dd   : > { %v9897_v1 = vadd.f32 %v2699_v0, %v8920_v50  ;;  %v2104_v53 = vpop.f32.mrf.mxu2  ;;  %v2286_v17 = vpop.f32.mrf.mxu3 }
 0x3de   : > { %v2287_v25 = vadd.f32 %v2286_v17, %v2104_v53 }
 0x3e0   : > { %v2584_v63 = vadd.f32 %v2470_v3, %v2287_v25  ;;  %v2473_v45 = vpop.f32.mrf.mxu0 }
 0x3e2   : > { %v2638_v35 = vrot.slane %v2584_v63, 1  ;;  %7057 = vmatmul.msk.f32.gmra.mxu2 %vm471_vm1, %v9859_v15  ;;  %7112 = vmatmul.msk.f32.gmra.mxu3 %vm471_vm1, %v9802_v16  ;;  %v9918_v16 = vld [vmem:[%s7952_s28 + $0x168] sm:$0xff] }
 0x3e3   : > { %7168 = vmatmul.msk.f32.gmra.mxu0 %vm471_vm1, %v9904_v12 }
 0x3e4   : > { %v2698_v50 = vsel %vm2668_vm3, %v2637_v43, %v2638_v35 }
 0x3e5   : > { %v9911_v19 = vadd.f32 %v2698_v50, %v8937_v30  ;;  %v2107_v28 = vpop.f32.mrf.mxu2  ;;  %v2289_v3 = vpop.f32.mrf.mxu3 }
 0x3e6   : > { %v2290_v0 = vadd.f32 %v2289_v3, %v2107_v28 }
 0x3e8   : > { %v2585_v53 = vadd.f32 %v2473_v45, %v2290_v0  ;;  %v2476_v17 = vpop.f32.mrf.mxu0 }
 0x3ea   : > { %v2639_v25 = vrot.slane %v2585_v53, 1  ;;  %7058 = vmatmul.msk.f32.gmra.mxu2 %vm471_vm1, %v9876_v18  ;;  %7113 = vmatmul.msk.f32.gmra.mxu3 %vm471_vm1, %v9825_v7  ;;  %v9932_v7 = vld [vmem:[%s7952_s28 + $0x170] sm:$0xff] }
 0x3eb   : > { %7169 = vmatmul.msk.f32.gmra.mxu0 %vm471_vm1, %v9918_v16 }
 0x3ec   : > { %v2697_v30 = vsel %vm2668_vm3, %v2638_v35, %v2639_v25 }
 0x3ed   : > { %v9925_v43 = vadd.f32 %v2697_v30, %v8954_v32  ;;  %v2110_v63 = vpop.f32.mrf.mxu2  ;;  %v2292_v45 = vpop.f32.mrf.mxu3 }
 0x3ee   : > { %v2293_v50 = vadd.f32 %v2292_v45, %v2110_v63 }
 0x3f0   : > { %v2586_v28 = vadd.f32 %v2476_v17, %v2293_v50  ;;  %v2479_v3 = vpop.f32.mrf.mxu0 }
 0x3f2   : > { %v2640_v0 = vrot.slane %v2586_v28, 1  ;;  %7059 = vmatmul.msk.f32.gmra.mxu2 %vm471_vm1, %v9890_v8  ;;  %7114 = vmatmul.msk.f32.gmra.mxu3 %vm471_vm1, %v9842_v11  ;;  %v7784_v11 = vld [vmem:[%s7952_s28 + $0x178] sm:$0xff] }
 0x3f3   : > { %7170 = vmatmul.msk.f32.gmra.mxu0 %vm471_vm1, %v9932_v7 }
 0x3f4   : > { %v2696_v32 = vsel %vm2668_vm3, %v2639_v25, %v2640_v0 }
 0x3f5   : > { %v9939_v35 = vadd.f32 %v2696_v32, %v8971_v2  ;;  %v2113_v53 = vpop.f32.mrf.mxu2  ;;  %v2295_v17 = vpop.f32.mrf.mxu3 }
 0x3f6   : > { %v2296_v30 = vadd.f32 %v2295_v17, %v2113_v53 }
 0x3f8   : > { %v2587_v63 = vadd.f32 %v2479_v3, %v2296_v30  ;;  %v2482_v45 = vpop.f32.mrf.mxu0 }
 0x3fa   : > { %v2641_v50 = vrot.slane %v2587_v63, 1  ;;  %7060 = vmatmul.msk.f32.gmra.mxu2 %vm471_vm1, %v9904_v12  ;;  %7115 = vmatmul.msk.f32.gmra.mxu3 %vm471_vm1, %v9859_v15  ;;  %v7785_v15 = vld [vmem:[%s7952_s28 + $0x180] sm:$0xff] }
 0x3fb   : > { %7171 = vmatmul.msk.f32.gmra.mxu0 %vm471_vm1, %v7784_v11 }
 0x3fc   : > { %v2695_v2 = vsel %vm2668_vm3, %v2640_v0, %v2641_v50 }
 0x3fd   : > { %v9950_v25 = vadd.f32 %v2695_v2, %v8988_v14  ;;  %v2116_v28 = vpop.f32.mrf.mxu2  ;;  %v2298_v3 = vpop.f32.mrf.mxu3 }
 0x3fe   : > { %v2299_v32 = vadd.f32 %v2298_v3, %v2116_v28 }
 0x400   : > { %v2588_v53 = vadd.f32 %v2482_v45, %v2299_v32  ;;  %v2485_v17 = vpop.f32.mrf.mxu0 }
 0x402   : > { %v2642_v30 = vrot.slane %v2588_v53, 1  ;;  %7061 = vmatmul.msk.f32.gmra.mxu2 %vm471_vm1, %v9918_v16  ;;  %7116 = vmatmul.msk.f32.gmra.mxu3 %vm471_vm1, %v9876_v18  ;;  %v7786_v18 = vld [vmem:[%s7952_s28 + $0x188] sm:$0xff] }
 0x403   : > { %7172 = vmatmul.msk.f32.gmra.mxu0 %vm471_vm1, %v7785_v15 }
 0x404   : > { %v2694_v14 = vsel %vm2668_vm3, %v2641_v50, %v2642_v30 }
 0x405   : > { %v9961_v0 = vadd.f32 %v2694_v14, %v9004_v57  ;;  %v2119_v63 = vpop.f32.mrf.mxu2  ;;  %v2301_v45 = vpop.f32.mrf.mxu3 }
 0x406   : > { %v2302_v2 = vadd.f32 %v2301_v45, %v2119_v63 }
 0x408   : > { %v2589_v28 = vadd.f32 %v2485_v17, %v2302_v2  ;;  %v2488_v3 = vpop.f32.mrf.mxu0 }
 0x40a   : > { %v2643_v32 = vrot.slane %v2589_v28, 1  ;;  %7062 = vmatmul.msk.f32.gmra.mxu2 %vm471_vm1, %v9932_v7  ;;  %7117 = vmatmul.msk.f32.gmra.mxu3 %vm471_vm1, %v9890_v8  ;;  %v7787_v8 = vld [vmem:[%s7952_s28 + $0x190] sm:$0xff] }
 0x40b   : > { %7173 = vmatmul.msk.f32.gmra.mxu0 %vm471_vm1, %v7786_v18 }
 0x40c   : > { %v2693_v57 = vsel %vm2668_vm3, %v2642_v30, %v2643_v32 }
 0x40d   : > { %v9972_v50 = vadd.f32 %v2693_v57, %v9020_v40  ;;  %v2122_v53 = vpop.f32.mrf.mxu2  ;;  %v2304_v17 = vpop.f32.mrf.mxu3 }
 0x40e   : > { %v2305_v14 = vadd.f32 %v2304_v17, %v2122_v53  ;;  %v7789_v17 = vld [vmem:[%s7952_s28 + $0x1a0] sm:$0xff] }
 0x40f   : > { %14716 = vst [vmem:[#allocation7_spill] sm:$0xff] %v9972_v50 }
 0x410   : > { %v9974_v63 = vadd.f32 %v2488_v3, %v2305_v14  ;;  %v9976_v45 = vpop.f32.mrf.mxu0 }
 0x412   : > { %14717 = vst [vmem:[#allocation8_spill] sm:$0xff] %v9974_v63  ;;  %v14388_v2 = vrot.slane %v9974_v63, 1  ;;  %7063 = vmatmul.msk.f32.gmra.mxu2 %vm471_vm1, %v7784_v11  ;;  %7118 = vmatmul.msk.f32.gmra.mxu3 %vm471_vm1, %v9904_v12  ;;  %v7788_v12 = vld [vmem:[%s7952_s28 + $0x198] sm:$0xff] }
 0x413   : > { %7174 = vmatmul.msk.f32.gmra.mxu0 %vm471_vm1, %v7787_v8 }
 0x414   : > { %v2692_v40 = vsel %vm2668_vm3, %v2643_v32, %v14388_v2  ;;  %v7790_v2 = vld [vmem:[%s7952_s28 + $0x1a8] sm:$0xff] }
 0x415   : > { %v9989_v30 = vadd.f32 %v2692_v40, %v9036_v4  ;;  %v9991_v28 = vpop.f32.mrf.mxu2  ;;  %v9993_v3 = vpop.f32.mrf.mxu3 }
 0x417   : > { %14718 = vst [vmem:[#allocation9_spill] sm:$0xff] %v9989_v30 }
 0x418   : > { %v9995_v57 = vpop.f32.mrf.mxu0 }
 0x41a   : > { %7064 = vmatmul.msk.f32.gmra.mxu2 %vm471_vm1, %v7785_v15  ;;  %7119 = vmatmul.msk.f32.gmra.mxu3 %vm471_vm1, %v9918_v16 }
 0x41b   : > { %7175 = vmatmul.msk.f32.gmra.mxu0 %vm471_vm1, %v7788_v12 }
 0x41d   : > { %v10002_v53 = vpop.f32.mrf.mxu2  ;;  %v10004_v32 = vpop.f32.mrf.mxu3 }
 0x420   : > { %v10006_v4 = vpop.f32.mrf.mxu0 }
 0x421   : > { %14719 = vst [vmem:[#allocation10_spill] sm:$0xff] %v10006_v4 }
 0x422   : > { %7065 = vmatmul.msk.f32.gmra.mxu2 %vm471_vm1, %v7786_v18  ;;  %7120 = vmatmul.msk.f32.gmra.mxu3 %vm471_vm1, %v9932_v7 }
 0x423   : > { %7176 = vmatmul.msk.f32.gmra.mxu0 %vm471_vm1, %v7789_v17 }
 0x425   : > { %v10013_v14 = vpop.f32.mrf.mxu2  ;;  %v10015_v16 = vpop.f32.mrf.mxu3 }
 0x428   : > { %v10017_v40 = vpop.f32.mrf.mxu0 }
 0x429   : > { %14720 = vst [vmem:[#allocation11_spill] sm:$0xff] %v10017_v40 }
 0x42a   : > { %7066 = vmatmul.msk.f32.gmra.mxu2 %vm471_vm1, %v7787_v8  ;;  %7121 = vmatmul.msk.f32.gmra.mxu3 %vm471_vm1, %v7784_v11  ;;  %v10037_v11 = vpop.permute.xlu2 %2857 }
 0x42b   : > { %7177 = vmatmul.msk.f32.gmra.mxu0 %vm471_vm1, %v7790_v2  ;;  %14724 = vst [vmem:[#allocation16_spill] sm:$0xff] %v10037_v11 }
 0x42d   : > { %v10023_v41 = vpop.f32.mrf.mxu2  ;;  %v10025_v7 = vpop.f32.mrf.mxu3 }
 0x430   : > { %v10029_v49 = vpop.f32.mrf.mxu0 }
 0x431   : > { %14722 = vst [vmem:[#allocation13_spill] sm:$0xff] %v10029_v49 }
 0x432   : > { %7067 = vmatmul.msk.f32.gmra.mxu2 %vm471_vm1, %v7788_v12  ;;  %7122 = vmatmul.msk.f32.gmra.mxu3 %vm471_vm1, %v7785_v15  ;;  %v7792_v12 = vld [vmem:[%s7952_s28 + $0x8] sm:$0xff]  ;;  %v10051_v15 = vpop.permute.xlu1 %2852  ;;  %v10057_v52 = vpop.permute.xlu2 %2862 }
 0x433   : > { %7178 = vmatmul.msk.f32.gmra.mxu0 %vm471_vm1, %v7791_v23  ;;  %14729 = vst [vmem:[#allocation26_spill] sm:$0xff] %v10051_v15 }
 0x434   : > { %14732 = vst [vmem:[#allocation33_spill] sm:$0xff] %v10057_v52 }
 0x435   : > { %v10039_v6 = vpop.f32.mrf.mxu2  ;;  %v10041_v31 = vpop.f32.mrf.mxu3 }
 0x436   : > { %14725 = vst [vmem:[#allocation18_spill] sm:$0xff] %v10039_v6 }
 0x437   : > { %14726 = vst [vmem:[#allocation20_spill] sm:$0xff] %v10041_v31 }
 0x438   : > { %v10045_v39 = vpop.f32.mrf.mxu0 }
 0x439   : > { %14728 = vst [vmem:[#allocation24_spill] sm:$0xff] %v10045_v39 }
 0x43a   : > { %7068 = vmatmul.msk.f32.gmra.mxu2 %vm471_vm1, %v7789_v17  ;;  %7123 = vmatmul.msk.f32.gmra.mxu3 %vm471_vm1, %v7786_v18  ;;  %v7793_v18 = vld [vmem:[%s7952_s28 + $0x10] sm:$0xff]  ;;  %v10070_v17 = vld [vmem:[%s14378_s3] ss:$0 sm:$0xff] }
 0x43b   : > { %7179 = vmatmul.msk.f32.gmra.mxu0 %vm471_vm1, %v7792_v12  ;;  %v10072_v12 = vpop.permute.xlu1 %2872  ;;  %v10094_v37 = vadd.f32 %v10070_v17, %v9508_v34 }
 0x43c   : > { %14735 = vst [vmem:[#allocation42_spill] sm:$0xff] %v10072_v12 }
 0x43d   : > { %v10053_v23 = vpop.f32.mrf.mxu2  ;;  %v10055_v47 = vpop.f32.mrf.mxu3  ;;  %14743 = vst [vmem:[#allocation55_spill] sm:$0xff] %v10094_v37 }
 0x43e   : > { %14730 = vst [vmem:[#allocation28_spill] sm:$0xff] %v10053_v23 }
 0x43f   : > { %14731 = vst [vmem:[#allocation30_spill] sm:$0xff] %v10055_v47  ;;  %v3107_v47 = vmul.f32 %v10031_v58, %v10094_v37 }
 0x440   : > { %v10061_v21 = vpop.f32.mrf.mxu0 }
 0x441   : > { %14734 = vst [vmem:[#allocation39_spill] sm:$0xff] %v10061_v21  ;;  %v10080_v21 = vadd.f32 %v10070_v17, %v9491_v54  ;;  %v10100_v54 = vadd.f32 %v10070_v17, %v9529_v48 }
 0x442   : > { %7069 = vmatmul.msk.f32.gmra.mxu2 %vm471_vm1, %v7790_v2  ;;  %7124 = vmatmul.msk.f32.gmra.mxu3 %vm471_vm1, %v7787_v8  ;;  %v10082_v2 = vpop.permute.xlu2 %2877  ;;  %v10086_v8 = vadd.f32 %v10070_v17, %v9474_v59 }
 0x443   : > { %7180 = vmatmul.msk.f32.gmra.mxu0 %vm471_vm1, %v7793_v18  ;;  %14738 = vst [vmem:[#allocation49_spill] sm:$0xff] %v10080_v21  ;;  %v10088_v18 = vpop.permute.xlu0 %2882  ;;  %v10104_v59 = vpop.permute.xlu1 %2887  ;;  %v3108_v48 = vmul.f32 %v10051_v15, %v10100_v54  ;;  %v10135_v15 = vadd.f32 %v10070_v17, %v9580_v61  ;;  %v3162_v61 = vsel %vm471_vm1, %v3107_v47, 0.0 }
 0x444   : > { %14739 = vst [vmem:[#allocation51_spill] sm:$0xff] %v10082_v2 }
 0x445   : > { %v10074_v39 = vpop.f32.mrf.mxu2  ;;  %v10076_v30 = vpop.f32.mrf.mxu3  ;;  %14740 = vst [vmem:[#allocation52_spill] sm:$0xff] %v10086_v8  ;;  %v3275_v38 = vmul.f32 %v3108_v48, %v10100_v54 }
 0x446   : > { %14736 = vst [vmem:[#allocation45_spill] sm:$0xff] %v10074_v39  ;;  %v3105_v39 = vmul.f32 %v10027_v22, %v10086_v8  ;;  %v10121_v22 = vadd.f32 %v10070_v17, %v9563_v20 }
 0x447   : > { %14737 = vst [vmem:[#allocation48_spill] sm:$0xff] %v10076_v30  ;;  %v3106_v30 = vmul.f32 %v10043_v44, %v10080_v21  ;;  %v3331_v6 = vsel %vm471_vm1, %v3275_v38, 0.0 }
 0x448   : > { %14741 = vst [vmem:[#allocation53_spill] sm:$0xff] %v10088_v18  ;;  %v10090_v49 = vpop.f32.mrf.mxu0  ;;  %v3272_v58 = vmul.f32 %v3105_v39, %v10086_v8  ;;  %v3110_v8 = vmul.f32 %v10057_v52, %v10121_v22  ;;  %v10157_v52 = vadd.f32 %v10070_v17, %v9614_v36 }
 0x449   : > { %14742 = vst [vmem:[#allocation54_spill] sm:$0xff] %v10090_v49  ;;  %v10110_v49 = vadd.f32 %v10070_v17, %v9546_v51  ;;  %v3273_v44 = vmul.f32 %v3106_v30, %v10080_v21  ;;  %v3160_v20 = vsel %vm471_vm1, %v3106_v30, 0.0 }
 0x44a   : > { %14744 = vst [vmem:[#allocation56_spill] sm:$0xff] %v10100_v54  ;;  %v10123_v50 = vpop.permute.xlu2 %2892  ;;  %v3111_v54 = vmul.f32 %v10059_v29, %v10135_v15  ;;  %v10170_v29 = vadd.f32 %v10070_v17, %v9634_v26  ;;  %v10185_v26 = vadd.f32 %v10070_v17, %v9654_v5 }
 0x44b   : > { %14745 = vst [vmem:[#allocation57_spill] sm:$0xff] %v10104_v59  ;;  %v10126_v40 = vpop.permute.xlu0 %2897  ;;  %v3109_v21 = vmul.f32 %v10037_v11, %v10110_v49  ;;  %v3326_v11 = vsel %vm471_vm1, %v3272_v58, 0.0  ;;  %v10149_v63 = vpop.permute.xlu1 %2902 }
 0x44c   : > { %14746 = vst [vmem:[#allocation58_spill] sm:$0xff] %v10110_v49  ;;  %v3170_v5 = vsel %vm471_vm1, %v3111_v54, 0.0 }
 0x44d   : > { %v10112_v34 = vpop.f32.mrf.mxu2  ;;  %v10114_v23 = vpop.f32.mrf.mxu3  ;;  %14749 = vst [vmem:[#allocation61_spill] sm:$0xff] %v10121_v22 }
 0x44e   : > { %14747 = vst [vmem:[#allocation59_spill] sm:$0xff] %v10112_v34  ;;  %v3274_v34 = vmul.f32 %v3107_v47, %v10094_v37  ;;  %v3159_v37 = vsel %vm471_vm1, %v3105_v39, 0.0  ;;  %v3164_v47 = vsel %vm471_vm1, %v3108_v48, 0.0  ;;  %v3278_v48 = vmul.f32 %v3111_v54, %v10135_v15 }
 0x44f   : > { %14748 = vst [vmem:[#allocation60_spill] sm:$0xff] %v10114_v23  ;;  %v3327_v23 = vsel %vm471_vm1, %v3273_v44, 0.0  ;;  %v3276_v44 = vmul.f32 %v3109_v21, %v10110_v49  ;;  %v3161_v58 = vadd.f32 %v3160_v20, %v3159_v37  ;;  %v3166_v37 = vsel %vm471_vm1, %v3109_v21, 0.0 }
 0x450   : > { %14750 = vst [vmem:[#allocation62_spill] sm:$0xff] %v10123_v50  ;;  %v10128_v51 = vpop.f32.mrf.mxu0  ;;  %v3329_v30 = vsel %vm471_vm1, %v3274_v34, 0.0  ;;  %v3328_v31 = vadd.f32 %v3327_v23, %v3326_v11  ;;  %v3277_v34 = vmul.f32 %v3110_v8, %v10121_v22  ;;  %v3113_v20 = vmul.f32 %v10082_v2, %v10157_v52 }
 0x451   : > { %14751 = vst [vmem:[#allocation63_spill] sm:$0xff] %v10126_v40  ;;  %v3333_v38 = vsel %vm471_vm1, %v3276_v44, 0.0  ;;  %v3114_v44 = vmul.f32 %v10088_v18, %v10170_v29 }
 0x452   : > { %14752 = vst [vmem:[#allocation64_spill] sm:$0xff] %v10128_v51  ;;  %v10144_v51 = vadd.f32 %v10070_v17, %v9597_v62  ;;  %v10172_v36 = vpop.permute.xlu2 %2907  ;;  %v3330_v4 = vadd.f32 %v3329_v30, %v3328_v31  ;;  %v3168_v31 = vsel %vm471_vm1, %v3110_v8, 0.0  ;;  %v3335_v21 = vsel %vm471_vm1, %v3277_v34, 0.0 }
 0x453   : > { %14753 = vst [vmem:[#allocation65_spill] sm:$0xff] %v10135_v15  ;;  %v10175_v11 = vpop.permute.xlu0 %2912  ;;  %v10197_v22 = vpop.permute.xlu1 %2917  ;;  %v3115_v8 = vmul.f32 %v10104_v59, %v10185_v26 }
 0x454   : > { %14754 = vst [vmem:[#allocation66_spill] sm:$0xff] %v10149_v63  ;;  %v3112_v49 = vmul.f32 %v10072_v12, %v10144_v51 }
 0x455   : > { %v10159_v62 = vpop.f32.mrf.mxu2  ;;  %v10161_v39 = vpop.f32.mrf.mxu3  ;;  %14756 = vst [vmem:[#allocation68_spill] sm:$0xff] %v10170_v29 }
 0x456   : > { %14755 = vst [vmem:[#allocation67_spill] sm:$0xff] %v10159_v62  ;;  %v3163_v62 = vadd.f32 %v3162_v61, %v3161_v58  ;;  %v3332_v61 = vadd.f32 %v3331_v6, %v3330_v4  ;;  %v3279_v30 = vmul.f32 %v3112_v49, %v10144_v51  ;;  %v10194_v58 = vadd.f32 %v10070_v17, %v9674_v9 }
 0x457   : > { %14757 = vst [vmem:[#allocation69_spill] sm:$0xff] %v10172_v36  ;;  %v3337_v6 = vsel %vm471_vm1, %v3278_v48, 0.0  ;;  %v3280_v4 = vmul.f32 %v3113_v20, %v10157_v52  ;;  %v3172_v54 = vsel %vm471_vm1, %v3112_v49, 0.0 }
 0x458   : > { %14758 = vst [vmem:[#allocation70_spill] sm:$0xff] %v10175_v11  ;;  %v10177_v23 = vpop.f32.mrf.mxu0  ;;  %v3165_v12 = vadd.f32 %v3164_v47, %v3163_v62  ;;  %v3334_v15 = vadd.f32 %v3333_v38, %v3332_v61  ;;  %v10205_v62 = vadd.f32 %v10070_v17, %v9697_v33  ;;  %v3281_v38 = vmul.f32 %v3114_v44, %v10170_v29 }
 0x459   : > { %14759 = vst [vmem:[#allocation71_spill] sm:$0xff] %v10185_v26  ;;  %v3116_v48 = vmul.f32 %v10123_v50, %v10194_v58  ;;  %v10218_v61 = vadd.f32 %v10070_v17, %v9720_v10  ;;  %v10233_v10 = vadd.f32 %v10070_v17, %v9743_v42  ;;  %v3178_v42 = vsel %vm471_vm1, %v3115_v8, 0.0 }
 0x45a   : > { %v3167_v2 = vadd.f32 %v3166_v37, %v3165_v12  ;;  %14760 = vst [vmem:[#allocation72_spill] sm:$0xff] %v10197_v22  ;;  %v3336_v34 = vadd.f32 %v3335_v21, %v3334_v15  ;;  %v3339_v37 = vsel %vm471_vm1, %v3279_v30, 0.0  ;;  %v10220_v33 = vpop.permute.xlu2 %2922  ;;  %v3282_v21 = vmul.f32 %v3115_v8, %v10185_v26 }
 0x45b   : > { %14761 = vst [vmem:[#allocation73_spill] sm:$0xff] %v10218_v61  ;;  %v10223_v15 = vpop.permute.xlu0 %2927  ;;  %v3117_v30 = vmul.f32 %v10126_v40, %v10205_v62  ;;  %v10245_v29 = vpop.permute.xlu1 %2932  ;;  %v3180_v8 = vsel %vm471_vm1, %v3116_v48, 0.0 }
 0x45c   : > { %v3169_v12 = vadd.f32 %v3168_v31, %v3167_v2  ;;  %14762 = vst [vmem:[#allocation74_spill] sm:$0xff] %v10220_v33  ;;  %v3338_v18 = vadd.f32 %v3337_v6, %v3336_v34  ;;  %v3174_v2 = vsel %vm471_vm1, %v3113_v20, 0.0  ;;  %v3341_v31 = vsel %vm471_vm1, %v3280_v4, 0.0 }
 0x45d   : > { %v10207_v47 = vpop.f32.mrf.mxu2  ;;  %v10209_v9 = vpop.f32.mrf.mxu3  ;;  %14763 = vst [vmem:[#allocation75_spill] sm:$0xff] %v10223_v15  ;;  %v3176_v6 = vsel %vm471_vm1, %v3114_v44, 0.0  ;;  %v3343_v20 = vsel %vm471_vm1, %v3281_v38, 0.0  ;;  %v3118_v4 = vmul.f32 %v10149_v63, %v10218_v61  ;;  %v10242_v34 = vadd.f32 %v10070_v17, %v9766_v13 }
 0x45e   : > { %v3171_v59 = vadd.f32 %v3170_v5, %v3169_v12  ;;  %14764 = vst [vmem:[#allocation76_spill] sm:$0xff] %v10233_v10  ;;  %v3340_v5 = vadd.f32 %v3339_v37, %v3338_v18  ;;  %v3283_v12 = vmul.f32 %v3116_v48, %v10194_v58  ;;  %v3345_v18 = vsel %vm471_vm1, %v3282_v21, 0.0 }
 0x45f   : > { %14765 = vst [vmem:[#allocation77_spill] sm:$0xff] %v10245_v29  ;;  %v3119_v44 = vmul.f32 %v10172_v36, %v10233_v10  ;;  %v3120_v21 = vmul.f32 %v10175_v11, %v10242_v34 }
 0x460   : > { %v10225_v49 = vpop.f32.mrf.mxu0  ;;  %v3173_v50 = vadd.f32 %v3172_v54, %v3171_v59  ;;  %v3342_v26 = vadd.f32 %v3341_v31, %v3340_v5  ;;  %v3284_v59 = vmul.f32 %v3117_v30, %v10205_v62  ;;  %v10253_v54 = vadd.f32 %v10070_v17, %v9789_v46 }
 0x461   : > { %v3285_v31 = vmul.f32 %v3118_v4, %v10218_v61  ;;  %v10266_v5 = vadd.f32 %v10070_v17, %v9812_v55  ;;  %v10281_v55 = vadd.f32 %v10070_v17, %v9832_v60  ;;  %v3186_v60 = vsel %vm471_vm1, %v3119_v44, 0.0 }
 0x462   : > { %v3175_v40 = vadd.f32 %v3174_v2, %v3173_v50  ;;  %14766 = vst [vmem:[#allocation78_spill] sm:$0xff] %v10253_v54  ;;  %v3344_v38 = vadd.f32 %v3343_v20, %v3342_v26  ;;  %v3347_v2 = vsel %vm471_vm1, %v3283_v12, 0.0  ;;  %v10268_v46 = vpop.permute.xlu2 %2937  ;;  %v3286_v20 = vmul.f32 %v3119_v44, %v10233_v10 }
 0x463   : > { %14767 = vst [vmem:[#allocation79_spill] sm:$0xff] %v10266_v5  ;;  %v10271_v26 = vpop.permute.xlu0 %2942  ;;  %v3121_v12 = vmul.f32 %v10197_v22, %v10253_v54  ;;  %v10293_v61 = vpop.permute.xlu1 %2947  ;;  %v3188_v44 = vsel %vm471_vm1, %v3120_v21, 0.0 }
 0x464   : > { %v3177_v50 = vadd.f32 %v3176_v6, %v3175_v40  ;;  %14768 = vst [vmem:[#allocation80_spill] sm:$0xff] %v10268_v46  ;;  %v3346_v63 = vadd.f32 %v3345_v18, %v3344_v38  ;;  %v3182_v40 = vsel %vm471_vm1, %v3117_v30, 0.0  ;;  %v3349_v6 = vsel %vm471_vm1, %v3284_v59, 0.0 }
 0x465   : > { %v10255_v37 = vpop.f32.mrf.mxu2  ;;  %v10257_v13 = vpop.f32.mrf.mxu3  ;;  %14769 = vst [vmem:[#allocation81_spill] sm:$0xff] %v10271_v26  ;;  %v3184_v18 = vsel %vm471_vm1, %v3118_v4, 0.0  ;;  %v3351_v30 = vsel %vm471_vm1, %v3285_v31, 0.0  ;;  %v3122_v59 = vmul.f32 %v10220_v33, %v10266_v5  ;;  %v10290_v38 = vadd.f32 %v10070_v17, %v9849_v27 }
 0x466   : > { %v3179_v36 = vadd.f32 %v3178_v42, %v3177_v50  ;;  %14770 = vst [vmem:[#allocation82_spill] sm:$0xff] %v10281_v55  ;;  %v3348_v42 = vadd.f32 %v3347_v2, %v3346_v63  ;;  %v3287_v50 = vmul.f32 %v3120_v21, %v10242_v34  ;;  %v3353_v63 = vsel %vm471_vm1, %v3286_v20, 0.0 }
 0x467   : > { %14771 = vst [vmem:[#allocation83_spill] sm:$0xff] %v10290_v38  ;;  %v3123_v4 = vmul.f32 %v10223_v15, %v10281_v55  ;;  %v3124_v20 = vmul.f32 %v10245_v29, %v10290_v38 }
 0x468   : > { %v10273_v48 = vpop.f32.mrf.mxu0  ;;  %v3181_v11 = vadd.f32 %v3180_v8, %v3179_v36  ;;  %v3350_v10 = vadd.f32 %v3349_v6, %v3348_v42  ;;  %14772 = vst [vmem:[#allocation84_spill] sm:$0xff] %v10293_v61  ;;  %v3288_v36 = vmul.f32 %v3121_v12, %v10253_v54  ;;  %v10301_v8 = vadd.f32 %v10070_v17, %v9866_v56 }
 0x469   : > { %v3289_v6 = vmul.f32 %v3122_v59, %v10266_v5  ;;  %v10314_v42 = vadd.f32 %v10070_v17, %v9883_v24  ;;  %v10329_v24 = vadd.f32 %v10070_v17, %v9897_v1  ;;  %v3194_v1 = vsel %vm471_vm1, %v3123_v4, 0.0 }
 0x46a   : > { %v3183_v22 = vadd.f32 %v3182_v40, %v3181_v11  ;;  %14773 = vst [vmem:[#allocation85_spill] sm:$0xff] %v10301_v8  ;;  %v3352_v31 = vadd.f32 %v3351_v30, %v3350_v10  ;;  %v3355_v40 = vsel %vm471_vm1, %v3287_v50, 0.0  ;;  %v10316_v56 = vpop.permute.xlu2 %2952  ;;  %v3290_v30 = vmul.f32 %v3123_v4, %v10281_v55 }
 0x46b   : > { %14774 = vst [vmem:[#allocation86_spill] sm:$0xff] %v10314_v42  ;;  %v10319_v10 = vpop.permute.xlu0 %2957  ;;  %v3125_v50 = vmul.f32 %v10268_v46, %v10301_v8  ;;  %v10338_v46 = vadd.f32 %v10070_v17, %v9911_v19  ;;  %v10340_v5 = vpop.permute.xlu1 %2962  ;;  %v3196_v19 = vsel %vm471_vm1, %v3124_v20, 0.0 }
 0x46c   : > { %v3185_v11 = vadd.f32 %v3184_v18, %v3183_v22  ;;  %14775 = vst [vmem:[#allocation87_spill] sm:$0xff] %v10316_v56  ;;  %v3354_v33 = vadd.f32 %v3353_v63, %v3352_v31  ;;  %v3190_v22 = vsel %vm471_vm1, %v3121_v12, 0.0  ;;  %v3357_v18 = vsel %vm471_vm1, %v3288_v36, 0.0 }
 0x46d   : > { %v10303_v2 = vpop.f32.mrf.mxu2  ;;  %v10305_v27 = vpop.f32.mrf.mxu3  ;;  %14776 = vst [vmem:[#allocation88_spill] sm:$0xff] %v10319_v10  ;;  %v3192_v63 = vsel %vm471_vm1, %v3122_v59, 0.0  ;;  %v3359_v12 = vsel %vm471_vm1, %v3289_v6, 0.0  ;;  %v3126_v36 = vmul.f32 %v10271_v26, %v10314_v42  ;;  %v3127_v59 = vmul.f32 %v10293_v61, %v10329_v24 }
 0x46e   : > { %v3187_v15 = vadd.f32 %v3186_v60, %v3185_v11  ;;  %14777 = vst [vmem:[#allocation89_spill] sm:$0xff] %v10329_v24  ;;  %v3356_v60 = vadd.f32 %v3355_v40, %v3354_v33  ;;  %v3291_v11 = vmul.f32 %v3124_v20, %v10290_v38  ;;  %v3361_v33 = vsel %vm471_vm1, %v3290_v30, 0.0 }
 0x46f   : > { %14778 = vst [vmem:[#allocation90_spill] sm:$0xff] %v10338_v46  ;;  %v2308_v30 = vadd.f32 %v9993_v3, %v9991_v28  ;;  %v3128_v61 = vmul.f32 %v10316_v56, %v10338_v46  ;;  %v2311_v28 = vadd.f32 %v10004_v32, %v10002_v53  ;;  %v3202_v32 = vsel %vm471_vm1, %v3127_v59, 0.0 }
 0x470   : > { %v10321_v21 = vpop.f32.mrf.mxu0  ;;  %v3189_v29 = vadd.f32 %v3188_v44, %v3187_v15  ;;  %v3358_v55 = vadd.f32 %v3357_v18, %v3356_v60  ;;  %14779 = vst [vmem:[#allocation91_spill] sm:$0xff] %v10340_v5  ;;  %v3292_v15 = vmul.f32 %v3125_v50, %v10301_v8  ;;  %v3293_v18 = vmul.f32 %v3126_v36, %v10314_v42  ;;  %v14806_v8 = vld [vmem:[#allocation17_spill] sm:$0xff] }
 0x472   : > { %v3191_v31 = vadd.f32 %v3190_v22, %v3189_v29  ;;  %v3360_v6 = vadd.f32 %v3359_v12, %v3358_v55  ;;  %v3363_v22 = vsel %vm471_vm1, %v3291_v11, 0.0  ;;  %v10354_v4 = vpop.permute.xlu2 %2967  ;;  %v3198_v12 = vsel %vm471_vm1, %v3125_v50, 0.0 }
 0x473   : > { %14780 = vst [vmem:[#allocation92_spill] sm:$0xff] %v10354_v4  ;;  %v10364_v55 = vpop.permute.xlu0 %2972  ;;  %v3365_v11 = vsel %vm471_vm1, %v3292_v15, 0.0  ;;  %v3295_v15 = vmul.f32 %v3128_v61, %v10338_v46  ;;  %v10383_v53 = vpop.permute.xlu1 %2977  ;;  %v14805_v46 = vld [vmem:[#allocation9_spill] sm:$0xff] }
 0x474   : > { %v3193_v29 = vadd.f32 %v3192_v63, %v3191_v31  ;;  %v3362_v26 = vadd.f32 %v3361_v33, %v3360_v6  ;;  %v10362_v63 = vadd.f32 %v10070_v17, %v9925_v43  ;;  %14782 = vst [vmem:[#allocation94_spill] sm:$0xff] %v10364_v55  ;;  %v3294_v31 = vmul.f32 %v3127_v59, %v10329_v24 }
 0x475   : > { %v10347_v44 = vpop.f32.mrf.mxu2  ;;  %v10349_v40 = vpop.f32.mrf.mxu3  ;;  %v10375_v33 = vadd.f32 %v10070_v17, %v9939_v35  ;;  %v3200_v43 = vsel %vm471_vm1, %v3126_v36, 0.0  ;;  %v2591_v6 = vadd.f32 %v9976_v45, %v2308_v30  ;;  %14784 = vst [vmem:[#allocation96_spill] sm:$0xff] %v10383_v53  ;;  %v2314_v36 = vadd.f32 %v10015_v16, %v10013_v14 }
 0x476   : > { %v3195_v60 = vadd.f32 %v3194_v1, %v3193_v29  ;;  %14781 = vst [vmem:[#allocation93_spill] sm:$0xff] %v10362_v63  ;;  %v3364_v1 = vadd.f32 %v3363_v22, %v3362_v26  ;;  %v3367_v29 = vsel %vm471_vm1, %v3293_v18, 0.0  ;;  %v3129_v24 = vmul.f32 %v10319_v10, %v10362_v63 }
 0x477   : > { %14783 = vst [vmem:[#allocation95_spill] sm:$0xff] %v10375_v33  ;;  %v3369_v35 = vsel %vm471_vm1, %v3294_v31, 0.0  ;;  %v2592_v26 = vadd.f32 %v9995_v57, %v2311_v28  ;;  %v3130_v30 = vmul.f32 %v10340_v5, %v10375_v33  ;;  %v10399_v59 = vadd.f32 %v10070_v17, %v9950_v25 }
 0x478   : > { %v10366_v20 = vpop.f32.mrf.mxu0  ;;  %v3197_v3 = vadd.f32 %v3196_v19, %v3195_v60  ;;  %v3366_v56 = vadd.f32 %v3365_v11, %v3364_v1  ;;  %v3204_v60 = vsel %vm471_vm1, %v3128_v61, 0.0  ;;  %v2317_v57 = vadd.f32 %v10025_v7, %v10023_v41  ;;  %v14788_v1 = vld [vmem:[#allocation10_spill] sm:$0xff] }
 0x479   : > { %14785 = vst [vmem:[#allocation97_spill] sm:$0xff] %v10399_v59  ;;  %v3371_v11 = vsel %vm471_vm1, %v3295_v15, 0.0  ;;  %v3296_v31 = vmul.f32 %v3129_v24, %v10362_v63  ;;  %v3206_v61 = vsel %vm471_vm1, %v3129_v24, 0.0  ;;  %v10412_v25 = vadd.f32 %v10070_v17, %v9961_v0  ;;  %v14792_v24 = vld [vmem:[#allocation8_spill] sm:$0xff] }
 0x47a   : > { %v3199_v50 = vadd.f32 %v3198_v12, %v3197_v3  ;;  %v3368_v18 = vadd.f32 %v3367_v29, %v3366_v56  ;;  %v2645_v12 = vrot.slane %v2591_v6, 1  ;;  %v10405_v56 = vpop.permute.xlu2 %2982  ;;  %v2646_v3 = vrot.slane %v2592_v26, 1  ;;  %v14790_v6 = vld [vmem:[#allocation18_spill] sm:$0xff]  ;;  %v14795_v26 = vld [vmem:[#allocation11_spill] sm:$0xff] }
 0x47b   : > { %14786 = vst [vmem:[#allocation98_spill] sm:$0xff] %v10405_v56  ;;  %v3297_v7 = vmul.f32 %v3130_v30, %v10375_v33  ;;  %v10416_v29 = vpop.permute.xlu0 %2987  ;;  %v2594_v5 = vadd.f32 %v14795_v26, %v2317_v57  ;;  %v14804_v33 = vld [vmem:[#allocation48_spill] sm:$0xff] }
 0x47c   : > { %v3201_v22 = vadd.f32 %v3200_v43, %v3199_v50  ;;  %v3370_v16 = vadd.f32 %v3369_v35, %v3368_v18  ;;  %14787 = vst [vmem:[#allocation99_spill] sm:$0xff] %v10412_v25  ;;  %v2593_v43 = vadd.f32 %v14788_v1, %v2314_v36  ;;  %v14791_v50 = vld [vmem:[#allocation20_spill] sm:$0xff]  ;;  %v3131_v35 = vmul.f32 %v10354_v4, %v10399_v59  ;;  %v14796_v1 = vld [vmem:[#allocation7_spill] sm:$0xff] }
 0x47d   : > { %v10390_v19 = vpop.f32.mrf.mxu2  ;;  %v10392_v45 = vpop.f32.mrf.mxu3  ;;  %14789 = vst [vmem:[#allocation10_spill] sm:$0xff] %v10416_v29  ;;  %v2320_v15 = vadd.f32 %v14791_v50, %v14790_v6  ;;  %v10431_v10 = vadd.f32 %v10070_v17, %v14796_v1  ;;  %v14798_v50 = vld [vmem:[#allocation28_spill] sm:$0xff]  ;;  %v14802_v1 = vld [vmem:[#allocation13_spill] sm:$0xff] }
 0x47e   : > { %v3203_v14 = vadd.f32 %v3202_v32, %v3201_v22  ;;  %v3372_v32 = vadd.f32 %v3371_v11, %v3370_v16  ;;  %v14793_v22 = vrot.slane %v14792_v24, 1  ;;  %v3132_v16 = vmul.f32 %v10364_v55, %v10412_v25  ;;  %v14799_v24 = vld [vmem:[#allocation30_spill] sm:$0xff]  ;;  %v14803_v55 = vld [vmem:[#allocation45_spill] sm:$0xff]  ;;  %v14884_v18 = vld [vmem:[#allocation95_spill] sm:$0xff] }
 0x47f   : > { %14797 = vst [vmem:[#allocation18_spill] sm:$0xff] %v10431_v10  ;;  %v2690_v11 = vsel %vm2668_vm3, %v2645_v12, %v2646_v3  ;;  %v2647_v6 = vrot.slane %v2593_v43, 1  ;;  %v2595_v4 = vadd.f32 %v14802_v1, %v2320_v15  ;;  %v2326_v63 = vadd.f32 %v14804_v33, %v14803_v55  ;;  %v14807_v33 = vld [vmem:[#allocation24_spill] sm:$0xff]  ;;  %v14811_v1 = vld [vmem:[#allocation59_spill] sm:$0xff] }
 0x480   : > { %v10407_v28 = vpop.f32.mrf.mxu0  ;;  %v3205_v41 = vadd.f32 %v3204_v60, %v3203_v14  ;;  %v2691_v0 = vsel %vm2668_vm3, %v14793_v22, %v2645_v12  ;;  %v3373_v60 = vsel %vm471_vm1, %v3296_v31, 0.0  ;;  %v3208_v14 = vsel %vm471_vm1, %v3130_v30, 0.0  ;;  %v10444_v31 = vpop.permute.xlu1 %2992 }
 0x481   : > { %v2323_v22 = vadd.f32 %v14799_v24, %v14798_v50  ;;  %v3375_v30 = vsel %vm471_vm1, %v3297_v7, 0.0  ;;  %14800 = vst [vmem:[#allocation20_spill] sm:$0xff] %v10444_v31  ;;  %v3374_v12 = vadd.f32 %v3373_v60, %v3372_v32  ;;  %v3298_v43 = vmul.f32 %v3131_v35, %v10399_v59 }
 0x482   : > { %v3207_v36 = vadd.f32 %v3206_v61, %v3205_v41  ;;  %v14801_v41 = vld [vmem:[#allocation15_spill] sm:$0xff]  ;;  %v10453_v50 = vadd.f32 %v10070_v17, %v14805_v46  ;;  %v2648_v24 = vrot.slane %v2594_v5, 1  ;;  %v3133_v7 = vmul.f32 %v10383_v53, %v10431_v10  ;;  %v10465_v60 = vpop.permute.xlu2 %2997 }
 0x483   : > { %v2753_v26 = vadd.f32 %v2691_v0, %v14801_v41  ;;  %v2754_v38 = vadd.f32 %v2690_v11, %v14806_v8  ;;  %v3376_v15 = vadd.f32 %v3375_v30, %v3374_v12  ;;  %v3299_v41 = vmul.f32 %v3132_v16, %v10412_v25  ;;  %14808 = vst [vmem:[#allocation8_spill] sm:$0xff] %v10465_v60 }
 0x484   : > { %v3209_v42 = vadd.f32 %v3208_v14, %v3207_v36  ;;  %v2689_v55 = vsel %vm2668_vm3, %v2646_v3, %v2647_v6  ;;  %v2596_v32 = vadd.f32 %v14807_v33, %v2323_v22  ;;  %v3210_v46 = vsel %vm471_vm1, %v3131_v35, 0.0  ;;  %v14810_v14 = vld [vmem:[#allocation39_spill] sm:$0xff]  ;;  %v14812_v22 = vld [vmem:[#allocation60_spill] sm:$0xff] }
 0x485   : > { %v10439_v57 = vpop.f32.mrf.mxu2  ;;  %v10441_v61 = vpop.f32.mrf.mxu3  ;;  %v10468_v5 = vadd.f32 %v10070_v17, %v2753_v26  ;;  %v2649_v36 = vrot.slane %v2595_v4, 1  ;;  %v2597_v8 = vadd.f32 %v14810_v14, %v2326_v63  ;;  %v3377_v11 = vsel %vm471_vm1, %v3298_v43, 0.0  ;;  %v14815_v63 = vld [vmem:[#allocation19_spill] sm:$0xff] }
 0x486   : > { %v3134_v30 = vmul.f32 %v10405_v56, %v10453_v50  ;;  %v2688_v3 = vsel %vm2668_vm3, %v2647_v6, %v2648_v24  ;;  %v2329_v12 = vadd.f32 %v14812_v22, %v14811_v1  ;;  %v3212_v35 = vsel %vm471_vm1, %v3132_v16, 0.0  ;;  %v10480_v26 = vpop.permute.xlu0 %3002  ;;  %v14816_v22 = vld [vmem:[#allocation21_spill] sm:$0xff] }
 0x487   : > { %14809 = vst [vmem:[#allocation11_spill] sm:$0xff] %v10468_v5  ;;  %v3300_v33 = vmul.f32 %v3133_v7, %v10431_v10  ;;  %v10483_v4 = vadd.f32 %v10070_v17, %v2754_v38  ;;  %v2755_v43 = vadd.f32 %v2689_v55, %v14815_v63  ;;  %v3211_v14 = vadd.f32 %v3210_v46, %v3209_v42  ;;  %v14817_v46 = vld [vmem:[#allocation54_spill] sm:$0xff] }
 0x488   : > { %v10458_v0 = vpop.f32.mrf.mxu0  ;;  %14813 = vst [vmem:[#allocation7_spill] sm:$0xff] %v10480_v26  ;;  %v3379_v56 = vsel %vm471_vm1, %v3299_v41, 0.0  ;;  %v3214_v53 = vsel %vm471_vm1, %v3133_v7, 0.0  ;;  %v2650_v6 = vrot.slane %v2596_v32, 1  ;;  %v3135_v16 = vmul.f32 %v10416_v29, %v10468_v5  ;;  %v10500_v63 = vpop.permute.xlu1 %3007 }
 0x489   : > { %14814 = vst [vmem:[#allocation28_spill] sm:$0xff] %v10483_v4  ;;  %v2756_v10 = vadd.f32 %v2688_v3, %v14816_v22  ;;  %v2687_v38 = vsel %vm2668_vm3, %v2648_v24, %v2649_v36  ;;  %v2651_v59 = vrot.slane %v2597_v8, 1  ;;  %v3378_v55 = vadd.f32 %v3377_v11, %v3376_v15  ;;  %v14819_v3 = vld [vmem:[#allocation67_spill] sm:$0xff] }
 0x48a   : > { %v3213_v42 = vadd.f32 %v3212_v35, %v3211_v14  ;;  %v3301_v41 = vmul.f32 %v3134_v30, %v10453_v50  ;;  %v2598_v7 = vadd.f32 %v14817_v46, %v2329_v12  ;;  %v3381_v32 = vsel %vm471_vm1, %v3300_v33, 0.0  ;;  %14818 = vst [vmem:[#allocation30_spill] sm:$0xff] %v10500_v63  ;;  %v14820_v35 = vld [vmem:[#allocation23_spill] sm:$0xff] }
 0x48b   : > { %v3136_v54 = vmul.f32 %v10444_v31, %v10483_v4  ;;  %v10505_v29 = vadd.f32 %v10070_v17, %v2755_v43  ;;  %v2332_v24 = vadd.f32 %v10161_v39, %v14819_v3  ;;  %v3380_v15 = vadd.f32 %v3379_v56, %v3378_v55  ;;  %v14822_v55 = vld [vmem:[#allocation25_spill] sm:$0xff] }
 0x48c   : > { %v3215_v11 = vadd.f32 %v3214_v53, %v3213_v42  ;;  %v2757_v14 = vadd.f32 %v2687_v38, %v14820_v35  ;;  %v2686_v12 = vsel %vm2668_vm3, %v2649_v36, %v2650_v6  ;;  %v3216_v33 = vsel %vm471_vm1, %v3134_v30, 0.0  ;;  %v10523_v38 = vpop.permute.xlu2 %3012 }
 0x48d   : > { %v10488_v25 = vpop.f32.mrf.mxu2  ;;  %v10490_v1 = vpop.f32.mrf.mxu3  ;;  %v3302_v22 = vmul.f32 %v3135_v16, %v10468_v5  ;;  %v10517_v46 = vadd.f32 %v10070_v17, %v2756_v10  ;;  %v2685_v43 = vsel %vm2668_vm3, %v2650_v6, %v2651_v59  ;;  %v3382_v39 = vadd.f32 %v3381_v32, %v3380_v15  ;;  %14821 = vst [vmem:[#allocation15_spill] sm:$0xff] %v10523_v38  ;;  %v14823_v10 = vld [vmem:[#allocation64_spill] sm:$0xff]  ;;  %v14824_v32 = vld [vmem:[#allocation27_spill] sm:$0xff] }
 0x48e   : > { %v3383_v3 = vsel %vm471_vm1, %v3301_v41, 0.0  ;;  %v3218_v53 = vsel %vm471_vm1, %v3135_v16, 0.0  ;;  %v2652_v56 = vrot.slane %v2598_v7, 1  ;;  %v3303_v36 = vmul.f32 %v3136_v54, %v10483_v4  ;;  %v10541_v5 = vpop.permute.xlu0 %3017 }
 0x48f   : > { %v3137_v30 = vmul.f32 %v10465_v60, %v10505_v29  ;;  %v2758_v42 = vadd.f32 %v2686_v12, %v14822_v55  ;;  %v2599_v35 = vadd.f32 %v14823_v10, %v2332_v24  ;;  %v3217_v31 = vadd.f32 %v3216_v33, %v3215_v11  ;;  %14825 = vst [vmem:[#allocation13_spill] sm:$0xff] %v10541_v5 }
 0x490   : > { %v10509_v8 = vpop.f32.mrf.mxu0  ;;  %v10531_v6 = vadd.f32 %v10070_v17, %v2757_v14  ;;  %v2759_v41 = vadd.f32 %v2685_v43, %v14824_v32  ;;  %v2335_v16 = vadd.f32 %v10209_v9, %v10207_v47  ;;  %v3384_v4 = vadd.f32 %v3383_v3, %v3382_v39 }
 0x491   : > { %v3385_v60 = vsel %vm471_vm1, %v3302_v22, 0.0  ;;  %v3138_v24 = vmul.f32 %v10480_v26, %v10517_v46  ;;  %v3219_v11 = vadd.f32 %v3218_v53, %v3217_v31  ;;  %v3220_v14 = vsel %vm471_vm1, %v3136_v54, 0.0  ;;  %v14827_v53 = vld [vmem:[#allocation29_spill] sm:$0xff] }
 0x492   : > { %v2684_v12 = vsel %vm2668_vm3, %v2651_v59, %v2652_v56  ;;  %v2338_v47 = vadd.f32 %v10257_v13, %v10255_v37  ;;  %v3387_v9 = vsel %vm471_vm1, %v3303_v36, 0.0  ;;  %v3304_v33 = vmul.f32 %v3137_v30, %v10505_v29  ;;  %v10563_v37 = vpop.permute.xlu1 %3022  ;;  %v14883_v26 = vld [vmem:[#allocation93_spill] sm:$0xff] }
 0x493   : > { %v10553_v22 = vadd.f32 %v10070_v17, %v2758_v42  ;;  %v2653_v43 = vrot.slane %v2599_v35, 1  ;;  %v3386_v3 = vadd.f32 %v3385_v60, %v3384_v4  ;;  %v3139_v54 = vmul.f32 %v10500_v63, %v10531_v6  ;;  %14826 = vst [vmem:[#allocation45_spill] sm:$0xff] %v10563_v37  ;;  %v14882_v63 = vld [vmem:[#allocation90_spill] sm:$0xff] }
 0x494   : > { %v10560_v31 = vadd.f32 %v10070_v17, %v2759_v41  ;;  %v2600_v59 = vadd.f32 %v10177_v23, %v2335_v16  ;;  %v3305_v13 = vmul.f32 %v3138_v24, %v10517_v46  ;;  %v2760_v36 = vadd.f32 %v2684_v12, %v14827_v53 }
 0x495   : > { %v10536_v7 = vpop.f32.mrf.mxu2  ;;  %v10538_v15 = vpop.f32.mrf.mxu3  ;;  %v2341_v55 = vadd.f32 %v10305_v27, %v10303_v2  ;;  %v3221_v42 = vadd.f32 %v3220_v14, %v3219_v11  ;;  %v3388_v10 = vadd.f32 %v3387_v9, %v3386_v3  ;;  %v3222_v60 = vsel %vm471_vm1, %v3137_v30, 0.0 }
 0x496   : > { %v2601_v4 = vadd.f32 %v10225_v49, %v2338_v47  ;;  %v3389_v35 = vsel %vm471_vm1, %v3304_v33, 0.0  ;;  %v3140_v23 = vmul.f32 %v10523_v38, %v10553_v22  ;;  %v2683_v32 = vsel %vm2668_vm3, %v2652_v56, %v2653_v43  ;;  %v10582_v14 = vpop.permute.xlu2 %3027  ;;  %v14881_v38 = vld [vmem:[#allocation89_spill] sm:$0xff] }
 0x497   : > { %v2344_v41 = vadd.f32 %v10349_v40, %v10347_v44  ;;  %v3224_v16 = vsel %vm471_vm1, %v3138_v24, 0.0  ;;  %v3306_v2 = vmul.f32 %v3139_v54, %v10531_v6  ;;  %v3141_v27 = vmul.f32 %v10541_v5, %v10560_v31  ;;  %14828 = vst [vmem:[#allocation48_spill] sm:$0xff] %v10582_v14  ;;  %v14829_v24 = vld [vmem:[#allocation31_spill] sm:$0xff] }
 0x498   : > { %v10555_v39 = vpop.f32.mrf.mxu0  ;;  %v2654_v30 = vrot.slane %v2600_v59, 1  ;;  %v3223_v12 = vadd.f32 %v3222_v60, %v3221_v42  ;;  %v3391_v47 = vsel %vm471_vm1, %v3305_v13, 0.0  ;;  %v10586_v56 = vadd.f32 %v10070_v17, %v2760_v36  ;;  %v10592_v59 = vpop.permute.xlu0 %3032 }
 0x499   : > { %v2602_v44 = vadd.f32 %v10273_v48, %v2341_v55  ;;  %v3390_v40 = vadd.f32 %v3389_v35, %v3388_v10  ;;  %v2761_v9 = vadd.f32 %v2683_v32, %v14829_v24  ;;  %v2655_v33 = vrot.slane %v2601_v4, 1  ;;  %14830 = vst [vmem:[#allocation9_spill] sm:$0xff] %v10592_v59  ;;  %v14833_v24 = vld [vmem:[#allocation34_spill] sm:$0xff] }
 0x49a   : > { %v2347_v3 = vadd.f32 %v10392_v45, %v10390_v19  ;;  %v3225_v53 = vadd.f32 %v3224_v16, %v3223_v12  ;;  %v3226_v5 = vsel %vm471_vm1, %v3139_v54, 0.0  ;;  %v3307_v42 = vmul.f32 %v3140_v23, %v10553_v22  ;;  %v10614_v16 = vpop.permute.xlu1 %3037 }
 0x49b   : > { %v2603_v13 = vadd.f32 %v10321_v21, %v2344_v41  ;;  %v3392_v60 = vadd.f32 %v3391_v47, %v3390_v40  ;;  %v3393_v48 = vsel %vm471_vm1, %v3306_v2, 0.0  ;;  %v3308_v55 = vmul.f32 %v3141_v27, %v10560_v31  ;;  %14831 = vst [vmem:[#allocation17_spill] sm:$0xff] %v10614_v16 }
 0x49c   : > { %v2682_v10 = vsel %vm2668_vm3, %v2653_v43, %v2654_v30  ;;  %v3228_v19 = vsel %vm471_vm1, %v3140_v23, 0.0  ;;  %v3142_v45 = vmul.f32 %v10563_v37, %v10586_v56  ;;  %v2656_v54 = vrot.slane %v2602_v44, 1  ;;  %v14832_v23 = vld [vmem:[#allocation32_spill] sm:$0xff]  ;;  %v14880_v37 = vld [vmem:[#allocation86_spill] sm:$0xff] }
 0x49d   : > { %v2176_v49 = vpop.f32.mrf.mxu2  ;;  %v2358_v11 = vpop.f32.mrf.mxu3  ;;  %v2350_v4 = vadd.f32 %v10441_v61, %v10439_v57  ;;  %v3227_v21 = vadd.f32 %v3226_v5, %v3225_v53  ;;  %v10609_v35 = vadd.f32 %v10070_v17, %v2761_v9  ;;  %v2681_v32 = vsel %vm2668_vm3, %v2654_v30, %v2655_v33 }
 0x49e   : > { %v2604_v41 = vadd.f32 %v10366_v20, %v2347_v3  ;;  %v3395_v43 = vsel %vm471_vm1, %v3307_v42, 0.0  ;;  %v2762_v2 = vadd.f32 %v2682_v10, %v14832_v23  ;;  %v2657_v12 = vrot.slane %v2603_v13, 1  ;;  %v10631_v13 = vpop.permute.xlu2 %3042  ;;  %v14837_v23 = vld [vmem:[#allocation37_spill] sm:$0xff] }
 0x49f   : > { %v2353_v47 = vadd.f32 %v10490_v1, %v10488_v25  ;;  %v3394_v57 = vadd.f32 %v3393_v48, %v3392_v60  ;;  %v3229_v61 = vadd.f32 %v3228_v19, %v3227_v21  ;;  %v3230_v5 = vsel %vm471_vm1, %v3141_v27, 0.0  ;;  %14834 = vst [vmem:[#allocation24_spill] sm:$0xff] %v10631_v13  ;;  %v14835_v19 = vld [vmem:[#allocation35_spill] sm:$0xff] }
 0x4a0   : > { %v10597_v36 = vpop.f32.mrf.mxu0  ;;  %v3397_v44 = vsel %vm471_vm1, %v3308_v55, 0.0  ;;  %v3309_v20 = vmul.f32 %v3142_v45, %v10586_v56  ;;  %v2763_v9 = vadd.f32 %v2681_v32, %v14833_v24  ;;  %v2680_v3 = vsel %vm2668_vm3, %v2655_v33, %v2656_v54  ;;  %v10640_v32 = vpop.permute.xlu0 %3047 }
 0x4a1   : > { %v2605_v53 = vadd.f32 %v10407_v28, %v2350_v4  ;;  %v3396_v42 = vadd.f32 %v3395_v43, %v3394_v57  ;;  %v3143_v25 = vmul.f32 %v10582_v14, %v10609_v35  ;;  %v2658_v1 = vrot.slane %v2604_v41, 1  ;;  %14836 = vst [vmem:[#allocation39_spill] sm:$0xff] %v10640_v32  ;;  %v14879_v14 = vld [vmem:[#allocation85_spill] sm:$0xff] }
 0x4a2   : > { %v2356_v27 = vadd.f32 %v10538_v15, %v10536_v7  ;;  %v10634_v60 = vadd.f32 %v10070_v17, %v2762_v2  ;;  %v2679_v48 = vsel %vm2668_vm3, %v2656_v54, %v2657_v12  ;;  %v2606_v33 = vadd.f32 %v10458_v0, %v2353_v47 }
 0x4a3   : > { %v3231_v28 = vadd.f32 %v3230_v5, %v3229_v61  ;;  %v3398_v10 = vadd.f32 %v3397_v44, %v3396_v42  ;;  %v2764_v4 = vadd.f32 %v2680_v3, %v14835_v19  ;;  %v2359_v21 = vadd.f32 %v2358_v11, %v2176_v49  ;;  %v10663_v42 = vpop.permute.xlu1 %3052 }
 0x4a4   : > { %v3232_v7 = vsel %vm471_vm1, %v3142_v45, 0.0  ;;  %v3399_v15 = vsel %vm471_vm1, %v3309_v20, 0.0  ;;  %v10645_v41 = vadd.f32 %v10070_v17, %v2763_v9  ;;  %v2659_v43 = vrot.slane %v2605_v53, 1  ;;  %14839 = vst [vmem:[#allocation59_spill] sm:$0xff] %v10663_v42 }
 0x4a5   : > { %v2179_v40 = vpop.f32.mrf.mxu2  ;;  %v2361_v30 = vpop.f32.mrf.mxu3  ;;  %v3310_v54 = vmul.f32 %v3143_v25, %v10609_v35  ;;  %v2765_v0 = vadd.f32 %v2679_v48, %v14837_v23  ;;  %v2678_v2 = vsel %vm2668_vm3, %v2657_v12, %v2658_v1  ;;  %v2607_v47 = vadd.f32 %v10509_v8, %v2356_v27  ;;  %v14838_v12 = vld [vmem:[#allocation38_spill] sm:$0xff] }
 0x4a6   : > { %v3144_v49 = vmul.f32 %v10592_v59, %v10634_v60  ;;  %v2660_v11 = vrot.slane %v2606_v33, 1  ;;  %v2362_v45 = vadd.f32 %v2361_v30, %v2179_v40  ;;  %v3233_v57 = vadd.f32 %v3232_v7, %v3231_v28  ;;  %v14878_v59 = vld [vmem:[#allocation83_spill] sm:$0xff] }
 0x4a7   : > { %v3400_v61 = vadd.f32 %v3399_v15, %v3398_v10  ;;  %v10655_v5 = vadd.f32 %v10070_v17, %v2764_v4  ;;  %v2608_v44 = vadd.f32 %v10555_v39, %v2359_v21  ;;  %v3145_v9 = vmul.f32 %v10614_v16, %v10645_v41  ;;  %v10678_v15 = vpop.permute.xlu2 %3057  ;;  %v14877_v16 = vld [vmem:[#allocation82_spill] sm:$0xff] }
 0x4a8   : > { %v2548_v55 = vpop.f32.mrf.mxu0  ;;  %v2766_v3 = vadd.f32 %v2678_v2, %v14838_v12  ;;  %v2677_v8 = vsel %vm2668_vm3, %v2658_v1, %v2659_v43  ;;  %v3234_v40 = vsel %vm471_vm1, %v3143_v25, 0.0  ;;  %v3401_v30 = vsel %vm471_vm1, %v3310_v54, 0.0  ;;  %v14840_v25 = vld [vmem:[#allocation40_spill] sm:$0xff]  ;;  %14841 = vst [vmem:[#allocation60_spill] sm:$0xff] %v10678_v15 }
 0x4a9   : > { %v10668_v27 = vadd.f32 %v10070_v17, %v2765_v0  ;;  %v2661_v39 = vrot.slane %v2607_v47, 1  ;;  %v3236_v48 = vsel %vm471_vm1, %v3144_v49, 0.0  ;;  %v3311_v33 = vmul.f32 %v3144_v49, %v10634_v60 }
 0x4aa   : > { %v2676_v28 = vsel %vm2668_vm3, %v2659_v43, %v2660_v11  ;;  %v2609_v1 = vadd.f32 %v10597_v36, %v2362_v45  ;;  %v3146_v19 = vmul.f32 %v10631_v13, %v10655_v5  ;;  %v2767_v4 = vadd.f32 %v2677_v8, %v14840_v25  ;;  %v14842_v43 = vld [vmem:[#allocation41_spill] sm:$0xff]  ;;  %v10689_v45 = vpop.permute.xlu0 %3062 }
 0x4ab   : > { %v2662_v21 = vrot.slane %v2608_v44, 1  ;;  %v3235_v54 = vadd.f32 %v3234_v40, %v3233_v57  ;;  %v3312_v23 = vmul.f32 %v3145_v9, %v10645_v41  ;;  %v10682_v0 = vadd.f32 %v10070_v17, %v2766_v3  ;;  %14843 = vst [vmem:[#allocation19_spill] sm:$0xff] %v10689_v45 }
 0x4ac   : > { %v3402_v2 = vadd.f32 %v3401_v30, %v3400_v61  ;;  %v3147_v36 = vmul.f32 %v10640_v32, %v10668_v27  ;;  %v2768_v47 = vadd.f32 %v2676_v28, %v14842_v43  ;;  %v2675_v49 = vsel %vm2668_vm3, %v2660_v11, %v2661_v39  ;;  %v14844_v30 = vld [vmem:[#allocation43_spill] sm:$0xff]  ;;  %v10711_v43 = vpop.permute.xlu1 %3067 }
 0x4ad   : > { %v2182_v20 = vpop.f32.mrf.mxu2  ;;  %v2364_v24 = vpop.f32.mrf.mxu3  ;;  %v3403_v44 = vsel %vm471_vm1, %v3311_v33, 0.0  ;;  %v3238_v57 = vsel %vm471_vm1, %v3145_v9, 0.0  ;;  %v10695_v61 = vadd.f32 %v10070_v17, %v2767_v4  ;;  %v2674_v12 = vsel %vm2668_vm3, %v2661_v39, %v2662_v21  ;;  %v14845_v4 = vld [vmem:[#allocation44_spill] sm:$0xff]  ;;  %14846 = vst [vmem:[#allocation21_spill] sm:$0xff] %v10711_v43 }
 0x4ae   : > { %v2365_v53 = vadd.f32 %v2364_v24, %v2182_v20  ;;  %v2663_v20 = vrot.slane %v2609_v1, 1  ;;  %v3313_v24 = vmul.f32 %v3146_v19, %v10655_v5  ;;  %v3405_v11 = vsel %vm471_vm1, %v3312_v23, 0.0 }
 0x4af   : > { %v3148_v40 = vmul.f32 %v10663_v42, %v10682_v0  ;;  %v3404_v33 = vadd.f32 %v3403_v44, %v3402_v2  ;;  %v3314_v1 = vmul.f32 %v3147_v36, %v10668_v27  ;;  %v10705_v25 = vadd.f32 %v10070_v17, %v2768_v47 }
 0x4b0   : > { %v2551_v10 = vpop.f32.mrf.mxu0  ;;  %v2610_v7 = vadd.f32 %v2548_v55, %v2365_v53  ;;  %v3237_v55 = vadd.f32 %v3236_v48, %v3235_v54  ;;  %v2769_v48 = vadd.f32 %v2675_v49, %v14844_v30  ;;  %v3240_v39 = vsel %vm471_vm1, %v3146_v19, 0.0  ;;  %v14849_v30 = vld [vmem:[#allocation47_spill] sm:$0xff] }
 0x4b1   : > { %v2673_v54 = vsel %vm2668_vm3, %v2662_v21, %v2663_v20  ;;  %v3406_v42 = vadd.f32 %v3405_v11, %v3404_v33  ;;  %v3407_v49 = vsel %vm471_vm1, %v3313_v24, 0.0  ;;  %v3149_v2 = vmul.f32 %v10678_v15, %v10695_v61  ;;  %v10727_v11 = vpop.permute.xlu2 %3072 }
 0x4b2   : > { %v2664_v3 = vrot.slane %v2610_v7, 1  ;;  %v3239_v28 = vadd.f32 %v3238_v57, %v3237_v55  ;;  %v2770_v7 = vadd.f32 %v2674_v12, %v14845_v4  ;;  %v3242_v55 = vsel %vm471_vm1, %v3147_v36, 0.0  ;;  %14848 = vst [vmem:[#allocation54_spill] sm:$0xff] %v10727_v11 }
 0x4b3   : > { %v3315_v19 = vmul.f32 %v3148_v40, %v10682_v0  ;;  %v10721_v44 = vadd.f32 %v10070_v17, %v2769_v48  ;;  %v3409_v12 = vsel %vm471_vm1, %v3314_v1, 0.0  ;;  %v3150_v24 = vmul.f32 %v10689_v45, %v10705_v25 }
 0x4b4   : > { %v2672_v47 = vsel %vm2668_vm3, %v2663_v20, %v2664_v3  ;;  %v3241_v57 = vadd.f32 %v3240_v39, %v3239_v28  ;;  %v3408_v20 = vadd.f32 %v3407_v49, %v3406_v42  ;;  %v10730_v36 = vadd.f32 %v10070_v17, %v2770_v7 }
 0x4b5   : > { %v2185_v8 = vpop.f32.mrf.mxu2  ;;  %v2367_v53 = vpop.f32.mrf.mxu3  ;;  %v3244_v28 = vsel %vm471_vm1, %v3148_v40, 0.0  ;;  %v3316_v1 = vmul.f32 %v3149_v2, %v10695_v61  ;;  %v3411_v42 = vsel %vm471_vm1, %v3315_v19, 0.0  ;;  %v3151_v7 = vmul.f32 %v10711_v43, %v10721_v44  ;;  %v14851_v40 = vld [vmem:[#allocation2_spill] sm:$0xff] }
 0x4b6   : > { %v2368_v9 = vadd.f32 %v2367_v53, %v2185_v8  ;;  %v14847_v8 = vld [vmem:[#allocation46_spill] sm:$0xff]  ;;  %v3243_v33 = vadd.f32 %v3242_v55, %v3241_v57  ;;  %v10757_v43 = vpop.permute.xlu1 %3082 }
 0x4b7   : > { %v2771_v53 = vadd.f32 %v2673_v54, %v14847_v8  ;;  %v3410_v54 = vadd.f32 %v3409_v12, %v3408_v20  ;;  %v7794_v19 = vld [vmem:[%s14378_s3] ss:$0 sm:$0xff]  ;;  %14852 = vst [vmem:[#allocation23_spill] sm:$0xff] %v10757_v43 }
 0x4b8   : > { %v2611_v23 = vadd.f32 %v2551_v10, %v2368_v9  ;;  %v2554_v10 = vpop.f32.mrf.mxu0  ;;  %v2772_v9 = vadd.f32 %v2672_v47, %v14849_v30  ;;  %v3246_v47 = vsel %vm471_vm1, %v3149_v2, 0.0  ;;  %v3245_v8 = vadd.f32 %v3244_v28, %v3243_v33 }
 0x4b9   : > { %v10745_v55 = vadd.f32 %v10070_v17, %v2771_v53  ;;  %v3152_v30 = vmul.f32 %v10727_v11, %v10730_v36  ;;  %v3413_v2 = vsel %vm471_vm1, %v3316_v1, 0.0  ;;  %v3318_v17 = vmul.f32 %v3151_v7, %v10721_v44 }
 0x4ba   : > { %v2665_v21 = vrot.slane %v2611_v23, 1  ;;  %v10737_v23 = vpop.permute.xlu0 %3077  ;;  %v10753_v12 = vadd.f32 %v7794_v19, %v2772_v9 }
 0x4bb   : > { %14850 = vst [vmem:[#allocation67_spill] sm:$0xff] %v10737_v23  ;;  %v3153_v28 = vmul.f32 %v10737_v23, %v10745_v55  ;;  %v3252_v11 = vsel %vm471_vm1, %v3152_v30, 0.0 }
 0x4bc   : > { %v2671_v48 = vsel %vm2668_vm3, %v2664_v3, %v2665_v21  ;;  %v3317_v3 = vmul.f32 %v3150_v24, %v10705_v25  ;;  %v3154_v1 = vmul.f32 %v10757_v43, %v10753_v12 }
 0x4bd   : > { %v2188_v39 = vpop.f32.mrf.mxu2  ;;  %v2370_v4 = vpop.f32.mrf.mxu3  ;;  %v2773_v57 = vadd.f32 %v2671_v48, %v14851_v40  ;;  %v3248_v48 = vsel %vm471_vm1, %v3150_v24, 0.0  ;;  %v14853_v24 = vld [vmem:[#allocation3_spill] sm:$0xff]  ;;  %v3320_v43 = vmul.f32 %v3153_v28, %v10745_v55 }
 0x4be   : > { %v2371_v49 = vadd.f32 %v2370_v4, %v2188_v39  ;;  %v3412_v39 = vadd.f32 %v3411_v42, %v3410_v54  ;;  %v3247_v4 = vadd.f32 %v3246_v47, %v3245_v8  ;;  %v3415_v33 = vsel %vm471_vm1, %v3317_v3, 0.0 }
 0x4bf   : > { %v10763_v40 = vadd.f32 %v7794_v19, %v2773_v57 }
 0x4c0   : > { %v2612_v20 = vadd.f32 %v2554_v10, %v2371_v49  ;;  %v3414_v9 = vadd.f32 %v3413_v2, %v3412_v39  ;;  %v3319_v10 = vmul.f32 %v3152_v30, %v10730_v36  ;;  %v2557_v42 = vpop.f32.mrf.mxu0  ;;  %v3250_v49 = vsel %vm471_vm1, %v3151_v7, 0.0 }
 0x4c1   : > { %v3249_v57 = vadd.f32 %v3248_v48, %v3247_v4  ;;  %v3417_v2 = vsel %vm471_vm1, %v3318_v17, 0.0  ;;  %v3321_v4 = vmul.f32 %v3154_v1, %v10753_v12  ;;  %v3254_v17 = vsel %vm471_vm1, %v3153_v28, 0.0 }
 0x4c2   : > { %v2666_v53 = vrot.slane %v2612_v20, 1  ;;  %v10772_v20 = vpop.permute.xlu2 %3087  ;;  %v3416_v23 = vadd.f32 %v3415_v33, %v3414_v9  ;;  %v10781_v7 = vpop.permute.xlu0 %3092 }
 0x4c3   : > { %14854 = vst [vmem:[#allocation25_spill] sm:$0xff] %v10772_v20 }
 0x4c4   : > { %v2670_v54 = vsel %vm2668_vm3, %v2665_v21, %v2666_v53  ;;  %v3155_v21 = vmul.f32 %v10772_v20, %v10763_v40  ;;  %14855 = vst [vmem:[#allocation64_spill] sm:$0xff] %v10781_v7  ;;  %v3418_v33 = vadd.f32 %v3417_v2, %v3416_v23  ;;  %v3256_v20 = vsel %vm471_vm1, %v3154_v1, 0.0  ;;  %v14859_v1 = vld [vmem:[#allocation5_spill] sm:$0xff] }
 0x4c5   : > { %v2774_v47 = vadd.f32 %v2670_v54, %v14853_v24  ;;  %v2191_v3 = vpop.f32.mrf.mxu2  ;;  %v2373_v8 = vpop.f32.mrf.mxu3  ;;  %v3251_v54 = vadd.f32 %v3250_v49, %v3249_v57  ;;  %v3419_v24 = vsel %vm471_vm1, %v3319_v10, 0.0  ;;  %v3423_v10 = vsel %vm471_vm1, %v3321_v4, 0.0 }
 0x4c6   : > { %v2374_v39 = vadd.f32 %v2373_v8, %v2191_v3  ;;  %v3420_v8 = vadd.f32 %v3419_v24, %v3418_v33  ;;  %v3322_v49 = vmul.f32 %v3155_v21, %v10763_v40 }
 0x4c7   : > { %v10779_v45 = vadd.f32 %v7794_v19, %v2774_v47  ;;  %v3253_v9 = vadd.f32 %v3252_v11, %v3251_v54  ;;  %v3421_v47 = vsel %vm471_vm1, %v3320_v43, 0.0  ;;  %v3258_v11 = vsel %vm471_vm1, %v3155_v21, 0.0  ;;  %v14858_v43 = vld [vmem:[#allocation4_spill] sm:$0xff] }
 0x4c8   : > { %v2613_v48 = vadd.f32 %v2557_v42, %v2374_v39  ;;  %v14856_v42 = vld [vmem:[#allocation6_spill] sm:$0xff]  ;;  %v3425_v4 = vsel %vm471_vm1, %v3322_v49, 0.0 }
 0x4c9   : > { %v3156_v30 = vmul.f32 %v10781_v7, %v10779_v45  ;;  %v3255_v57 = vadd.f32 %v3254_v17, %v3253_v9  ;;  %v14857_v28 = vrot.slane %v14856_v42, 1  ;;  %v10804_v42 = vpop.permute.xlu1 %3097 }
 0x4ca   : > { %v2667_v3 = vrot.slane %v2613_v48, 1  ;;  %v3422_v48 = vadd.f32 %v3421_v47, %v3420_v8  ;;  %14860 = vst [vmem:[#allocation27_spill] sm:$0xff] %v10804_v42  ;;  %v10806_v15 = vpop.permute.xlu2 %3102 }
 0x4cb   : > { %v3323_v39 = vmul.f32 %v3156_v30, %v10779_v45  ;;  %v3257_v33 = vadd.f32 %v3256_v20, %v3255_v57  ;;  %v3260_v17 = vsel %vm471_vm1, %v3156_v30, 0.0  ;;  %14861 = vst [vmem:[#allocation29_spill] sm:$0xff] %v10806_v15 }
 0x4cc   : > { %v2669_v23 = vsel %vm2668_vm3, %v2666_v53, %v2667_v3  ;;  %v2722_v2 = vsel %vm2668_vm3, %v2667_v3, %v14857_v28  ;;  %v3424_v3 = vadd.f32 %v3423_v10, %v3422_v48 }
 0x4cd   : > { %v2775_v54 = vadd.f32 %v2669_v23, %v14858_v43  ;;  %v2776_v24 = vadd.f32 %v2722_v2, %v14859_v1  ;;  %v3259_v21 = vadd.f32 %v3258_v11, %v3257_v33  ;;  %v3427_v28 = vsel %vm471_vm1, %v3323_v39, 0.0 }
 0x4ce   : > { %v3426_v8 = vadd.f32 %v3425_v4, %v3424_v3 }
 0x4cf   : > { %v2833_v53 = vadd.f32 %v7794_v19, %v2775_v54  ;;  %v2834_v9 = vadd.f32 %v7794_v19, %v2776_v24  ;;  %v3261_v20 = vadd.f32 %v3260_v17, %v3259_v21 }
 0x4d0   : > { %v3428_v57 = vadd.f32 %v3427_v28, %v3426_v8 }
 0x4d1   : > { %v3157_v23 = vmul.f32 %v10804_v42, %v2833_v53  ;;  %v3158_v2 = vmul.f32 %v10806_v15, %v2834_v9  ;;  %v14885_v15 = vld [vmem:[#allocation97_spill] sm:$0xff]  ;;  %v14887_v42 = vld [vmem:[#allocation18_spill] sm:$0xff] }
 0x4d3   : > { %v3262_v47 = vsel %vm471_vm1, %v3157_v23, 0.0  ;;  %v3324_v49 = vmul.f32 %v3157_v23, %v2833_v53  ;;  %v3325_v30 = vmul.f32 %v3158_v2, %v2834_v9  ;;  %v3264_v43 = vsel %vm471_vm1, %v3158_v2, 0.0 }
 0x4d4   : > { %v3263_v19 = vadd.f32 %v3262_v47, %v3261_v20 }
 0x4d5   : > { %v3429_v54 = vsel %vm471_vm1, %v3324_v49, 0.0  ;;  %v3431_v39 = vsel %vm471_vm1, %v3325_v30, 0.0  ;;  %v7292_v30 = vld [vmem:[%s14381_s6 + $0x18] sm:$0xf] }
 0x4d6   : > { %v3265_v10 = vadd.f32 %v3264_v43, %v3263_v19  ;;  %v3430_v11 = vadd.f32 %v3429_v54, %v3428_v57  ;;  %7293 = vmatpush.msk.msrb.mxu3 %vm634_vm0, %v7292_v30 }
 0x4d8   : > { %v3266_v1 = vrot.slane %v3265_v10, 4  ;;  %v3432_v24 = vadd.f32 %v3431_v39, %v3430_v11 }
 0x4da   : > { %v3267_v48 = vadd.f32 %v3266_v1, %v3265_v10  ;;  %v3433_v33 = vrot.slane %v3432_v24, 4 }
 0x4dc   : > { %v3268_v4 = vrot.slane %v3267_v48, 2  ;;  %v3434_v17 = vadd.f32 %v3433_v33, %v3432_v24  ;;  %v3455_v24 = vld [vmem:[%s14379_s4] sm:$0x1] }
 0x4de   : > { %v3269_v3 = vadd.f32 %v3268_v4, %v3267_v48  ;;  %v3435_v21 = vrot.slane %v3434_v17, 2  ;;  %v3680_v4 = vld [vmem:[%s14381_s6] sm:$0xf] }
 0x4df   : > { %7237 = vmatpush.msk.msrb.mxu2 %vm634_vm0, %v3680_v4  ;;  %v14871_v4 = vld [vmem:[#allocation68_spill] sm:$0xff] }
 0x4e0   : > { %v3270_v23 = vrot.slane %v3269_v3, 1  ;;  %v3436_v32 = vadd.f32 %v3435_v21, %v3434_v17  ;;  %v3457_v17 = vld [vmem:[%s14380_s5] sm:$0x1] }
 0x4e2   : > { %v3271_v28 = vadd.f32 %v3270_v23, %v3269_v3  ;;  %v3437_v8 = vrot.slane %v3436_v32, 1 }
 0x4e4   : > { %v3438_v20 = vadd.f32 %v3437_v8, %v3436_v32  ;;  %v3439_v2 = vmul.f32 0.00390625, %v3271_v28 }
 0x4e6   : > { %v3440_v47 = vmul.f32 0.00390625, %v3438_v20  ;;  %v3441_v49 = vmul.f32 %v3439_v2, %v3439_v2  ;;  %v14862_v20 = vld [vmem:[#allocation52_spill] sm:$0xff] }
 0x4e8   : > { %v3442_v19 = vsub.f32 %v3440_v47, %v3441_v49 }
 0x4ea   : > { %v3443_v57 = vmax.f32 %v3442_v19, 0.0  ;;  %v14863_v19 = vld [vmem:[#allocation49_spill] sm:$0xff] }
 0x4ec   : > { %v3444_v43 = vadd.f32 1e-05, %v3443_v57 }
 0x4ee   : > { %7703 = vrsqrt.f32 %v3444_v43  ;;  %vm3451_vm5 = vweird.f32 %v3444_v43 }
 0x4f4   : > { %v7704_v54 = vpop.eup %7703 }
 0x4f5   : > { %v3446_v10 = vmul.f32 %v7704_v54, %v3444_v43  ;;  %vm3452_vm4 = vweird.f32 %v7704_v54  ;;  %v14864_v43 = vld [vmem:[#allocation55_spill] sm:$0xff] }
 0x4f6   : > { %vm3453_vm6 = vmor %vm3451_vm5, %vm3452_vm4 }
 0x4f7   : > { %v3447_v11 = vmul.f32 %v7704_v54, %v3446_v10 }
 0x4f9   : > { %v3448_v39 = vmul.f32 0.5, %v3447_v11  ;;  %v14866_v11 = vld [vmem:[#allocation58_spill] sm:$0xff] }
 0x4fb   : > { %v3449_v1 = vsub.f32 1.5, %v3448_v39 }
 0x4fd   : > { %v3450_v32 = vmul.f32 %v7704_v54, %v3449_v1  ;;  %v14867_v1 = vld [vmem:[#allocation61_spill] sm:$0xff] }
 0x4ff   : > { %v3454_v48 = vsel %vm3453_vm6, %v7704_v54, %v3450_v32  ;;  %v14865_v54 = vld [vmem:[#allocation56_spill] sm:$0xff] }
 0x500   : > { %v3456_v33 = vmul.f32 %v3455_v24, %v3454_v48  ;;  %v14868_v24 = vld [vmem:[#allocation65_spill] sm:$0xff] }
 0x502   : > { %v3458_v3 = vmul.f32 %v3456_v33, %v3439_v2  ;;  %v3460_v21 = vperm.slane %v3456_v33, 0 }
 0x504   : > { %v3459_v23 = vsub.f32 %v3457_v17, %v3458_v3  ;;  %v3513_v28 = vmul.f32 %v3460_v21, %v2833_v53  ;;  %v3514_v8 = vmul.f32 %v3460_v21, %v2834_v9  ;;  %v3461_v47 = vmul.f32 %v3460_v21, %v14862_v20  ;;  %v14872_v3 = vld [vmem:[#allocation71_spill] sm:$0xff] }
 0x505   : > { %v3462_v57 = vmul.f32 %v3460_v21, %v14863_v19  ;;  %v3463_v30 = vmul.f32 %v3460_v21, %v14864_v43  ;;  %v3464_v10 = vmul.f32 %v3460_v21, %v14865_v54  ;;  %v3465_v39 = vmul.f32 %v3460_v21, %v14866_v11  ;;  %v14873_v43 = vld [vmem:[#allocation73_spill] sm:$0xff]  ;;  %v14874_v11 = vld [vmem:[#allocation76_spill] sm:$0xff] }
 0x506   : > { %v10830_v49 = vperm.slane %v3459_v23, 0  ;;  %v3466_v32 = vmul.f32 %v3460_v21, %v14867_v1  ;;  %v3467_v2 = vmul.f32 %v3460_v21, %v14868_v24  ;;  %v3468_v48 = vmul.f32 %v3460_v21, %v10144_v51  ;;  %v14875_v1 = vld [vmem:[#allocation78_spill] sm:$0xff] }
 0x507   : > { %v3469_v33 = vmul.f32 %v3460_v21, %v10157_v52  ;;  %v3470_v17 = vmul.f32 %v3460_v21, %v14871_v4  ;;  %v3471_v23 = vmul.f32 %v3460_v21, %v14872_v3  ;;  %v3472_v20 = vmul.f32 %v3460_v21, %v10194_v58 }
 0x508   : > { %v10840_v53 = vadd.f32 %v10830_v49, %v3513_v28  ;;  %v10843_v9 = vadd.f32 %v10830_v49, %v3514_v8  ;;  %v3473_v19 = vmul.f32 %v3460_v21, %v10205_v62  ;;  %v3474_v54 = vmul.f32 %v3460_v21, %v14873_v43  ;;  %v14876_v8 = vld [vmem:[#allocation79_spill] sm:$0xff] }
 0x509   : > { %v3475_v51 = vmul.f32 %v3460_v21, %v14874_v11  ;;  %v3476_v28 = vmul.f32 %v3460_v21, %v10242_v34  ;;  %v3477_v24 = vmul.f32 %v3460_v21, %v14875_v1  ;;  %v3478_v13 = vmul.f32 %v3460_v21, %v14876_v8 }
 0x50a   : > { %14869 = vst [vmem:[#allocation31_spill] sm:$0xff] %v10840_v53  ;;  %v3479_v52 = vmul.f32 %v3460_v21, %v14877_v16  ;;  %v3480_v4 = vmul.f32 %v3460_v21, %v14878_v59  ;;  %v3481_v3 = vmul.f32 %v3460_v21, %v14879_v14  ;;  %v3482_v58 = vmul.f32 %v3460_v21, %v14880_v37  ;;  %v7349_v37 = vld [vmem:[%s14381_s6 + $0x10] sm:$0xf]  ;;  %v14888_v14 = vld [vmem:[#allocation11_spill] sm:$0xff] }
 0x50b   : > { %14870 = vst [vmem:[#allocation32_spill] sm:$0xff] %v10843_v9  ;;  %v3483_v62 = vmul.f32 %v3460_v21, %v14881_v38  ;;  %v3484_v43 = vmul.f32 %v3460_v21, %v14882_v63  ;;  %v3485_v11 = vmul.f32 %v3460_v21, %v14883_v26  ;;  %v3486_v34 = vmul.f32 %v3460_v21, %v14884_v18  ;;  %v14886_v9 = vld [vmem:[#allocation99_spill] sm:$0xff]  ;;  %v14889_v53 = vld [vmem:[#allocation28_spill] sm:$0xff] }
 0x50c   : > { %v3487_v1 = vmul.f32 %v3460_v21, %v14885_v15  ;;  %v3488_v8 = vmul.f32 %v3460_v21, %v14886_v9  ;;  %v3489_v16 = vmul.f32 %v3460_v21, %v14887_v42  ;;  %v3490_v59 = vmul.f32 %v3460_v21, %v10453_v50  ;;  %7350 = vmatpush.msk.msrb.mxu0 %vm634_vm0, %v7349_v37 }
 0x50d   : > { %v3491_v38 = vmul.f32 %v3460_v21, %v14888_v14  ;;  %v3492_v63 = vmul.f32 %v3460_v21, %v14889_v53  ;;  %v3493_v26 = vmul.f32 %v3460_v21, %v10505_v29  ;;  %v3494_v18 = vmul.f32 %v3460_v21, %v10517_v46 }
 0x50e   : > { %v3495_v15 = vmul.f32 %v3460_v21, %v10531_v6  ;;  %v3496_v42 = vmul.f32 %v3460_v21, %v10553_v22  ;;  %v3497_v50 = vmul.f32 %v3460_v21, %v10560_v31  ;;  %v3498_v9 = vmul.f32 %v3460_v21, %v10586_v56 }
 0x50f   : > { %v3499_v7 = vmul.f32 %v3460_v21, %v10609_v35  ;;  %v3500_v14 = vmul.f32 %v3460_v21, %v10634_v60  ;;  %v3501_v53 = vmul.f32 %v3460_v21, %v10645_v41  ;;  %v3502_v29 = vmul.f32 %v3460_v21, %v10655_v5 }
 0x510   : > { %v3503_v46 = vmul.f32 %v3460_v21, %v10668_v27  ;;  %v3504_v37 = vmul.f32 %v3460_v21, %v10682_v0  ;;  %v3505_v6 = vmul.f32 %v3460_v21, %v10695_v61  ;;  %v3506_v22 = vmul.f32 %v3460_v21, %v10705_v25 }
 0x511   : > { %v3507_v31 = vmul.f32 %v3460_v21, %v10721_v44  ;;  %v3508_v56 = vmul.f32 %v3460_v21, %v10730_v36  ;;  %v3509_v35 = vmul.f32 %v3460_v21, %v10745_v55  ;;  %v3510_v60 = vmul.f32 %v3460_v21, %v10753_v12 }
 0x512   : > { %v3511_v41 = vmul.f32 %v3460_v21, %v10763_v40  ;;  %v3512_v5 = vmul.f32 %v3460_v21, %v10779_v45  ;;  %v3518_v27 = vadd.f32 %v10830_v49, %v3461_v47  ;;  %v10895_v0 = vadd.f32 %v10830_v49, %v3462_v57 }
 0x513   : > { %v10898_v61 = vadd.f32 %v10830_v49, %v3463_v30  ;;  %v3521_v25 = vadd.f32 %v10830_v49, %v3464_v10  ;;  %v3522_v44 = vadd.f32 %v10830_v49, %v3465_v39  ;;  %v10903_v36 = vadd.f32 %v10830_v49, %v3466_v32 }
 0x514   : > { %v10906_v55 = vadd.f32 %v10830_v49, %v3467_v2  ;;  %v10909_v45 = vadd.f32 %v10830_v49, %v3468_v48  ;;  %v10912_v12 = vadd.f32 %v10830_v49, %v3469_v33  ;;  %v10915_v40 = vadd.f32 %v10830_v49, %v3470_v17 }
 0x515   : > { %v10918_v21 = vadd.f32 %v10830_v49, %v3471_v23  ;;  %v10921_v47 = vadd.f32 %v10830_v49, %v3472_v20  ;;  %v10924_v57 = vadd.f32 %v10830_v49, %v3473_v19  ;;  %v10927_v30 = vadd.f32 %v10830_v49, %v3474_v54 }
 0x516   : > { %v10930_v10 = vadd.f32 %v10830_v49, %v3475_v51  ;;  %v10933_v39 = vadd.f32 %v10830_v49, %v3476_v28  ;;  %v10936_v32 = vadd.f32 %v10830_v49, %v3477_v24  ;;  %v10939_v2 = vadd.f32 %v10830_v49, %v3478_v13 }
 0x517   : > { %v10942_v48 = vadd.f32 %v10830_v49, %v3479_v52  ;;  %v10945_v33 = vadd.f32 %v10830_v49, %v3480_v4  ;;  %v10948_v17 = vadd.f32 %v10830_v49, %v3481_v3  ;;  %v10951_v23 = vadd.f32 %v10830_v49, %v3482_v58 }
 0x518   : > { %v10954_v20 = vadd.f32 %v10830_v49, %v3483_v62  ;;  %v10957_v19 = vadd.f32 %v10830_v49, %v3484_v43  ;;  %v10960_v13 = vadd.f32 %v10830_v49, %v3485_v11  ;;  %v10963_v54 = vadd.f32 %v10830_v49, %v3486_v34 }
 0x519   : > { %v10966_v51 = vadd.f32 %v10830_v49, %v3487_v1  ;;  %v10969_v28 = vadd.f32 %v10830_v49, %v3488_v8  ;;  %v10972_v24 = vadd.f32 %v10830_v49, %v3489_v16  ;;  %v10975_v52 = vadd.f32 %v10830_v49, %v3490_v59  ;;  %v7348_v8 = vld [vmem:[%s14381_s6 + $0x4] sm:$0xf] }
 0x51a   : > { %v10978_v4 = vadd.f32 %v10830_v49, %v3491_v38  ;;  %v10981_v3 = vadd.f32 %v10830_v49, %v3492_v63  ;;  %v10984_v58 = vadd.f32 %v10830_v49, %v3493_v26  ;;  %v10987_v62 = vadd.f32 %v10830_v49, %v3494_v18  ;;  %7405 = vmatpush.msk.msrb.mxu1 %vm634_vm0, %v7348_v8 }
 0x51b   : > { %v10990_v43 = vadd.f32 %v10830_v49, %v3495_v15  ;;  %v10993_v11 = vadd.f32 %v10830_v49, %v3496_v42  ;;  %v10996_v34 = vadd.f32 %v10830_v49, %v3497_v50  ;;  %v10999_v1 = vadd.f32 %v10830_v49, %v3498_v9 }
 0x51c   : > { %v11005_v16 = vadd.f32 %v10830_v49, %v3499_v7  ;;  %v11008_v59 = vadd.f32 %v10830_v49, %v3500_v14  ;;  %v11011_v38 = vadd.f32 %v10830_v49, %v3501_v53  ;;  %v11014_v63 = vadd.f32 %v10830_v49, %v3502_v29 }
 0x51d   : > { %v11018_v26 = vadd.f32 %v10830_v49, %v3503_v46  ;;  %v11021_v18 = vadd.f32 %v10830_v49, %v3504_v37  ;;  %v11024_v7 = vadd.f32 %v10830_v49, %v3505_v6  ;;  %v11027_v15 = vadd.f32 %v10830_v49, %v3506_v22  ;;  %v14890_v6 = vld [vmem:[#allocation12_spill] sm:$0xff] }
 0x51e   : > { %v11030_v42 = vadd.f32 %v10830_v49, %v3507_v31  ;;  %v11033_v50 = vadd.f32 %v10830_v49, %v3508_v56  ;;  %v11036_v9 = vadd.f32 %v10830_v49, %v3509_v35  ;;  %v11039_v14 = vadd.f32 %v10830_v49, %v3510_v60  ;;  %v14892_v31 = vld [vmem:[#allocation26_spill] sm:$0xff] }
 0x51f   : > { %v11042_v53 = vadd.f32 %v10830_v49, %v3511_v41  ;;  %v3569_v29 = vadd.f32 %v10830_v49, %v3512_v5  ;;  %v3572_v46 = vmax.f32 %v3518_v27, 0.0  ;;  %v3575_v37 = vmax.f32 %v3521_v25, 0.0  ;;  %v14894_v35 = vld [vmem:[#allocation22_spill] sm:$0xff]  ;;  %v14896_v5 = vld [vmem:[#allocation16_spill] sm:$0xff] }
 0x520   : > { %v3573_v56 = vmax.f32 %v10895_v0, 0.0  ;;  %v3576_v49 = vmax.f32 %v3522_v44, 0.0  ;;  %v3574_v25 = vmax.f32 %v10898_v61, 0.0  ;;  %v3577_v0 = vmax.f32 %v10903_v36, 0.0  ;;  %v14898_v44 = vld [vmem:[#allocation64_spill] sm:$0xff]  ;;  %v14905_v61 = vld [vmem:[#allocation27_spill] sm:$0xff] }
 0x521   : > { %v11046_v22 = vmul.f32 %v3572_v46, %v14890_v6  ;;  %v11049_v8 = vmul.f32 %v3575_v37, %v14892_v31  ;;  %v3623_v41 = vmax.f32 %v3569_v29, 0.0  ;;  %v14900_v29 = vld [vmem:[#allocation14_spill] sm:$0xff] }
 0x522   : > { %v11059_v60 = vmul.f32 %v3573_v56, %v14894_v35  ;;  %v11062_v27 = vmul.f32 %v3576_v49, %v14896_v5  ;;  %v11078_v37 = vmul.f32 %v3574_v25, %v14900_v29  ;;  %v14902_v56 = vld [vmem:[#allocation31_spill] sm:$0xff]  ;;  %v14903_v5 = vld [vmem:[#allocation33_spill] sm:$0xff]  ;;  %v14907_v25 = vld [vmem:[#allocation32_spill] sm:$0xff] }
 0x523   : > { %14891 = vst [vmem:[#allocation34_spill] sm:$0xff] %v11046_v22  ;;  %7183 = vmatmul.msk.f32.vlgmr.msra.gmra.mxu1 %vm471_vm1, %v11046_v22  ;;  %7294 = vmatmul.msk.f32.vlgmr.msrb.gmra.mxu3 %vm471_vm1, %v11049_v8  ;;  %v11073_v46 = vmul.f32 %v3623_v41, %v14898_v44  ;;  %v3624_v49 = vmax.f32 %v14902_v56, 0.0  ;;  %v11082_v31 = vmul.f32 %v3577_v0, %v14903_v5  ;;  %v3578_v41 = vmax.f32 %v10906_v55, 0.0  ;;  %v14908_v56 = vld [vmem:[#allocation36_spill] sm:$0xff] }
 0x524   : > { %14893 = vst [vmem:[#allocation35_spill] sm:$0xff] %v11049_v8  ;;  %7351 = vmatmul.msk.f32.vlgmr.msrb.gmra.mxu0 %vm471_vm1, %v11046_v22  ;;  %v3625_v0 = vmax.f32 %v14907_v25, 0.0  ;;  %v3579_v55 = vmax.f32 %v10909_v45, 0.0  ;;  %v14912_v25 = vld [vmem:[#allocation42_spill] sm:$0xff]  ;;  %v14914_v45 = vld [vmem:[#allocation51_spill] sm:$0xff] }
 0x525   : > { %14895 = vst [vmem:[#allocation37_spill] sm:$0xff] %v11059_v60  ;;  %7238 = vmatmul.msk.f32.vlgmr.msrb.gmra.mxu2 %vm471_vm1, %v11073_v46  ;;  %v11091_v36 = vmul.f32 %v3624_v49, %v14905_v61  ;;  %v11098_v44 = vmul.f32 %v3578_v41, %v14908_v56  ;;  %v14910_v49 = vld [vmem:[#allocation29_spill] sm:$0xff] }
 0x526   : > { %14897 = vst [vmem:[#allocation38_spill] sm:$0xff] %v11062_v27  ;;  %v11107_v61 = vmul.f32 %v3625_v0, %v14910_v49  ;;  %v11113_v41 = vmul.f32 %v3579_v55, %v14912_v25  ;;  %v3580_v0 = vmax.f32 %v10912_v12, 0.0  ;;  %v3581_v55 = vmax.f32 %v10915_v40, 0.0  ;;  %v14916_v12 = vld [vmem:[#allocation53_spill] sm:$0xff] }
 0x527   : > { %14899 = vst [vmem:[#allocation40_spill] sm:$0xff] %v11073_v46  ;;  %v14918_v40 = vld [vmem:[#allocation57_spill] sm:$0xff] }
 0x528   : > { %14901 = vst [vmem:[#allocation41_spill] sm:$0xff] %v11078_v37  ;;  %v11125_v49 = vmul.f32 %v3580_v0, %v14914_v45  ;;  %v11137_v25 = vmul.f32 %v3581_v55, %v14916_v12  ;;  %v3582_v0 = vmax.f32 %v10918_v21, 0.0  ;;  %v3583_v55 = vmax.f32 %v10921_v47, 0.0  ;;  %v14920_v21 = vld [vmem:[#allocation62_spill] sm:$0xff]  ;;  %v14922_v47 = vld [vmem:[#allocation63_spill] sm:$0xff] }
 0x529   : > { %14904 = vst [vmem:[#allocation43_spill] sm:$0xff] %v11082_v31 }
 0x52a   : > { %14906 = vst [vmem:[#allocation44_spill] sm:$0xff] %v11091_v36  ;;  %v11149_v45 = vmul.f32 %v3582_v0, %v14918_v40  ;;  %v11161_v12 = vmul.f32 %v3583_v55, %v14920_v21  ;;  %v3584_v0 = vmax.f32 %v10924_v57, 0.0  ;;  %v3585_v55 = vmax.f32 %v10927_v30, 0.0  ;;  %v14924_v57 = vld [vmem:[#allocation66_spill] sm:$0xff]  ;;  %v14926_v30 = vld [vmem:[#allocation69_spill] sm:$0xff] }
 0x52b   : > { %7184 = vmatmul.msk.f32.gmra.mxu1 %vm471_vm1, %v11059_v60  ;;  %7295 = vmatmul.msk.f32.gmra.mxu3 %vm471_vm1, %v11062_v27  ;;  %14909 = vst [vmem:[#allocation46_spill] sm:$0xff] %v11098_v44 }
 0x52c   : > { %7352 = vmatmul.msk.f32.gmra.mxu0 %vm471_vm1, %v11059_v60  ;;  %14911 = vst [vmem:[#allocation47_spill] sm:$0xff] %v11107_v61  ;;  %v11173_v40 = vmul.f32 %v3584_v0, %v14922_v47  ;;  %v11185_v21 = vmul.f32 %v3585_v55, %v14924_v57  ;;  %v3586_v0 = vmax.f32 %v10930_v10, 0.0  ;;  %v3587_v55 = vmax.f32 %v10933_v39, 0.0  ;;  %v14928_v10 = vld [vmem:[#allocation70_spill] sm:$0xff]  ;;  %v14929_v39 = vld [vmem:[#allocation72_spill] sm:$0xff] }
 0x52d   : > { %7239 = vmatmul.msk.f32.gmra.mxu2 %vm471_vm1, %v11091_v36  ;;  %14913 = vst [vmem:[#allocation2_spill] sm:$0xff] %v11113_v41 }
 0x52e   : > { %14915 = vst [vmem:[#allocation3_spill] sm:$0xff] %v11125_v49  ;;  %v11197_v47 = vmul.f32 %v3586_v0, %v14926_v30  ;;  %v11209_v57 = vmul.f32 %v3587_v55, %v14928_v10  ;;  %v3588_v0 = vmax.f32 %v10936_v32, 0.0  ;;  %v3589_v55 = vmax.f32 %v10939_v2, 0.0  ;;  %v14930_v32 = vld [vmem:[#allocation74_spill] sm:$0xff]  ;;  %v14931_v2 = vld [vmem:[#allocation75_spill] sm:$0xff] }
 0x52f   : > { %14917 = vst [vmem:[#allocation6_spill] sm:$0xff] %v11137_v25 }
 0x530   : > { %14919 = vst [vmem:[#allocation4_spill] sm:$0xff] %v11149_v45  ;;  %v11221_v30 = vmul.f32 %v3588_v0, %v14929_v39  ;;  %v11233_v10 = vmul.f32 %v3589_v55, %v14930_v32  ;;  %v3590_v0 = vmax.f32 %v10942_v48, 0.0  ;;  %v3591_v55 = vmax.f32 %v10945_v33, 0.0  ;;  %v14932_v32 = vld [vmem:[#allocation77_spill] sm:$0xff] }
 0x531   : > { %14921 = vst [vmem:[#allocation5_spill] sm:$0xff] %v11161_v12  ;;  %v3592_v33 = vmax.f32 %v10948_v17, 0.0  ;;  %v3593_v17 = vmax.f32 %v10951_v23, 0.0  ;;  %v3594_v23 = vmax.f32 %v10954_v20, 0.0  ;;  %v3595_v20 = vmax.f32 %v10957_v19, 0.0 }
 0x532   : > { %14923 = vst [vmem:[#allocation52_spill] sm:$0xff] %v11173_v40  ;;  %v11245_v39 = vmul.f32 %v3590_v0, %v14931_v2  ;;  %v11257_v56 = vmul.f32 %v3591_v55, %v14932_v32  ;;  %v14934_v55 = vld [vmem:[#allocation80_spill] sm:$0xff] }
 0x533   : > { %7185 = vmatmul.msk.f32.gmra.mxu1 %vm471_vm1, %v11078_v37  ;;  %7296 = vmatmul.msk.f32.gmra.mxu3 %vm471_vm1, %v11082_v31  ;;  %14925 = vst [vmem:[#allocation49_spill] sm:$0xff] %v11185_v21  ;;  %v11271_v32 = vmul.f32 %v3592_v33, %v14934_v55  ;;  %v14936_v33 = vld [vmem:[#allocation81_spill] sm:$0xff] }
 0x534   : > { %7353 = vmatmul.msk.f32.gmra.mxu0 %vm471_vm1, %v11078_v37  ;;  %14927 = vst [vmem:[#allocation55_spill] sm:$0xff] %v11197_v47  ;;  %v11285_v55 = vmul.f32 %v3593_v17, %v14936_v33  ;;  %v14939_v33 = vld [vmem:[#allocation84_spill] sm:$0xff] }
 0x535   : > { %7240 = vmatmul.msk.f32.gmra.mxu2 %vm471_vm1, %v11107_v61 }
 0x53b   : > { %7186 = vmatmul.msk.f32.gmra.mxu1 %vm471_vm1, %v11049_v8  ;;  %7297 = vmatmul.msk.f32.gmra.mxu3 %vm471_vm1, %v11098_v44 }
 0x53c   : > { %7354 = vmatmul.msk.f32.gmra.mxu0 %vm471_vm1, %v11049_v8 }
 0x53d   : > { %7241 = vmatmul.msk.f32.gmra.mxu2 %vm471_vm1, %v11046_v22 }
 0x543   : > { %7187 = vmatmul.msk.f32.gmra.mxu1 %vm471_vm1, %v11062_v27  ;;  %7298 = vmatmul.msk.f32.gmra.mxu3 %vm471_vm1, %v11113_v41 }
 0x544   : > { %7355 = vmatmul.msk.f32.gmra.mxu0 %vm471_vm1, %v11062_v27 }
 0x545   : > { %7242 = vmatmul.msk.f32.gmra.mxu2 %vm471_vm1, %v11059_v60 }
 0x54b   : > { %7188 = vmatmul.msk.f32.gmra.mxu1 %vm471_vm1, %v11082_v31  ;;  %7299 = vmatmul.msk.f32.gmra.mxu3 %vm471_vm1, %v11125_v49 }
 0x54c   : > { %7356 = vmatmul.msk.f32.gmra.mxu0 %vm471_vm1, %v11082_v31 }
 0x54d   : > { %7243 = vmatmul.msk.f32.gmra.mxu2 %vm471_vm1, %v11078_v37 }
 0x553   : > { %7189 = vmatmul.msk.f32.gmra.mxu1 %vm471_vm1, %v11098_v44  ;;  %7300 = vmatmul.msk.f32.gmra.mxu3 %vm471_vm1, %v11137_v25 }
 0x554   : > { %7357 = vmatmul.msk.f32.gmra.mxu0 %vm471_vm1, %v11098_v44 }
 0x555   : > { %7244 = vmatmul.msk.f32.gmra.mxu2 %vm471_vm1, %v11049_v8 }
 0x55b   : > { %7190 = vmatmul.msk.f32.gmra.mxu1 %vm471_vm1, %v11113_v41  ;;  %7301 = vmatmul.msk.f32.gmra.mxu3 %vm471_vm1, %v11149_v45 }
 0x55c   : > { %7358 = vmatmul.msk.f32.gmra.mxu0 %vm471_vm1, %v11113_v41 }
 0x55d   : > { %7245 = vmatmul.msk.f32.gmra.mxu2 %vm471_vm1, %v11062_v27 }
 0x563   : > { %7191 = vmatmul.msk.f32.gmra.mxu1 %vm471_vm1, %v11125_v49  ;;  %7302 = vmatmul.msk.f32.gmra.mxu3 %vm471_vm1, %v11161_v12 }
 0x564   : > { %7359 = vmatmul.msk.f32.gmra.mxu0 %vm471_vm1, %v11125_v49 }
 0x565   : > { %7246 = vmatmul.msk.f32.gmra.mxu2 %vm471_vm1, %v11082_v31 }
 0x56b   : > { %7192 = vmatmul.msk.f32.gmra.mxu1 %vm471_vm1, %v11137_v25  ;;  %7303 = vmatmul.msk.f32.gmra.mxu3 %vm471_vm1, %v11173_v40 }
 0x56c   : > { %7360 = vmatmul.msk.f32.gmra.mxu0 %vm471_vm1, %v11137_v25 }
 0x56d   : > { %7247 = vmatmul.msk.f32.gmra.mxu2 %vm471_vm1, %v11098_v44 }
 0x573   : > { %7193 = vmatmul.msk.f32.gmra.mxu1 %vm471_vm1, %v11149_v45  ;;  %7304 = vmatmul.msk.f32.gmra.mxu3 %vm471_vm1, %v11185_v21 }
 0x574   : > { %7361 = vmatmul.msk.f32.gmra.mxu0 %vm471_vm1, %v11149_v45 }
 0x575   : > { %7248 = vmatmul.msk.f32.gmra.mxu2 %vm471_vm1, %v11113_v41 }
 0x57b   : > { %7194 = vmatmul.msk.f32.gmra.mxu1 %vm471_vm1, %v11161_v12  ;;  %7305 = vmatmul.msk.f32.gmra.mxu3 %vm471_vm1, %v11197_v47 }
 0x57c   : > { %7362 = vmatmul.msk.f32.gmra.mxu0 %vm471_vm1, %v11161_v12 }
 0x57d   : > { %7249 = vmatmul.msk.f32.gmra.mxu2 %vm471_vm1, %v11125_v49 }
 0x583   : > { %7195 = vmatmul.msk.f32.gmra.mxu1 %vm471_vm1, %v11173_v40  ;;  %7306 = vmatmul.msk.f32.gmra.mxu3 %vm471_vm1, %v11209_v57 }
 0x584   : > { %7363 = vmatmul.msk.f32.gmra.mxu0 %vm471_vm1, %v11173_v40 }
 0x585   : > { %7250 = vmatmul.msk.f32.gmra.mxu2 %vm471_vm1, %v11137_v25 }
 0x58b   : > { %7196 = vmatmul.msk.f32.gmra.mxu1 %vm471_vm1, %v11185_v21  ;;  %7307 = vmatmul.msk.f32.gmra.mxu3 %vm471_vm1, %v11221_v30 }
 0x58c   : > { %7364 = vmatmul.msk.f32.gmra.mxu0 %vm471_vm1, %v11185_v21 }
 0x58d   : > { %7251 = vmatmul.msk.f32.gmra.mxu2 %vm471_vm1, %v11149_v45 }
 0x593   : > { %7197 = vmatmul.msk.f32.gmra.mxu1 %vm471_vm1, %v11197_v47  ;;  %7308 = vmatmul.msk.f32.gmra.mxu3 %vm471_vm1, %v11233_v10 }
 0x594   : > { %7365 = vmatmul.msk.f32.gmra.mxu0 %vm471_vm1, %v11197_v47 }
 0x595   : > { %7252 = vmatmul.msk.f32.gmra.mxu2 %vm471_vm1, %v11161_v12 }
 0x59b   : > { %7198 = vmatmul.msk.f32.gmra.mxu1 %vm471_vm1, %v11209_v57  ;;  %7309 = vmatmul.msk.f32.gmra.mxu3 %vm471_vm1, %v11245_v39 }
 0x59c   : > { %7366 = vmatmul.msk.f32.gmra.mxu0 %vm471_vm1, %v11209_v57 }
 0x59d   : > { %7253 = vmatmul.msk.f32.gmra.mxu2 %vm471_vm1, %v11173_v40 }
 0x5a0   : > { %v3865_v48 = vpop.f32.mrf.mxu1 }
 0x5a1   : > { %v11259_v0 = vpop.f32.mrf.mxu0 }
 0x5a2   : > { %14933 = vst [vmem:[#allocation56_spill] sm:$0xff] %v11259_v0 }
 0x5a3   : > { %7199 = vmatmul.msk.f32.gmra.mxu1 %vm471_vm1, %v11221_v30  ;;  %7310 = vmatmul.msk.f32.gmra.mxu3 %vm471_vm1, %v11257_v56 }
 0x5a4   : > { %7367 = vmatmul.msk.f32.gmra.mxu0 %vm471_vm1, %v11221_v30 }
 0x5a5   : > { %7254 = vmatmul.msk.f32.gmra.mxu2 %vm471_vm1, %v11185_v21 }
 0x5a6   : > { %v4231_v2 = vpop.f32.mrf.mxu3 }
 0x5a8   : > { %v3868_v5 = vpop.f32.mrf.mxu1  ;;  %v4047_v0 = vpop.f32.mrf.mxu2 }
 0x5a9   : > { %v11273_v29 = vpop.f32.mrf.mxu0  ;;  %v4048_v40 = vadd.f32 %v4047_v0, %v3865_v48 }
 0x5aa   : > { %14935 = vst [vmem:[#allocation58_spill] sm:$0xff] %v11273_v29 }
 0x5ab   : > { %7200 = vmatmul.msk.f32.gmra.mxu1 %vm471_vm1, %v11233_v10  ;;  %7311 = vmatmul.msk.f32.gmra.mxu3 %vm471_vm1, %v11271_v32  ;;  %v11296_v21 = vadd.f32 %v4231_v2, %v4048_v40 }
 0x5ac   : > { %7368 = vmatmul.msk.f32.gmra.mxu0 %vm471_vm1, %v11233_v10 }
 0x5ad   : > { %14938 = vst [vmem:[#allocation65_spill] sm:$0xff] %v11296_v21  ;;  %7255 = vmatmul.msk.f32.gmra.mxu2 %vm471_vm1, %v11197_v47  ;;  %v14941_v47 = vld [vmem:[#allocation87_spill] sm:$0xff] }
 0x5ae   : > { %v4234_v6 = vpop.f32.mrf.mxu3  ;;  %v11316_v25 = vmul.f32 %v3595_v20, %v14941_v47 }
 0x5b0   : > { %v3871_v35 = vpop.f32.mrf.mxu1  ;;  %v4050_v48 = vpop.f32.mrf.mxu2 }
 0x5b1   : > { %v11287_v29 = vpop.f32.mrf.mxu0  ;;  %v4051_v0 = vadd.f32 %v4050_v48, %v3868_v5 }
 0x5b2   : > { %14937 = vst [vmem:[#allocation61_spill] sm:$0xff] %v11287_v29  ;;  %v11301_v29 = vmul.f32 %v3594_v23, %v14939_v33  ;;  %v14542_v23 = vrot.slane %v11296_v21, 7 }
 0x5b3   : > { %7201 = vmatmul.msk.f32.gmra.mxu1 %vm471_vm1, %v11245_v39  ;;  %7312 = vmatmul.msk.f32.gmra.mxu3 %vm471_vm1, %v11285_v55  ;;  %v4394_v40 = vadd.f32 %v4234_v6, %v4051_v0  ;;  %v3596_v0 = vmax.f32 %v10960_v13, 0.0 }
 0x5b4   : > { %7369 = vmatmul.msk.f32.gmra.mxu0 %vm471_vm1, %v11245_v39 }
 0x5b5   : > { %v4448_v33 = vrot.slane %v4394_v40, 7  ;;  %7256 = vmatmul.msk.f32.gmra.mxu2 %vm471_vm1, %v11209_v57 }
 0x5b6   : > { %v4237_v12 = vpop.f32.mrf.mxu3 }
 0x5b7   : > { %v11324_v49 = vsel %vm1293_vm2, %v14542_v23, %v4448_v33 }
 0x5b8   : > { %v3874_v17 = vpop.f32.mrf.mxu1  ;;  %14944 = vst [vmem:[#allocation73_spill] sm:$0xff] %v11324_v49  ;;  %v4053_v19 = vpop.f32.mrf.mxu2 }
 0x5b9   : > { %v11303_v45 = vpop.f32.mrf.mxu0  ;;  %v4054_v6 = vadd.f32 %v4053_v19, %v3871_v35 }
 0x5ba   : > { %14940 = vst [vmem:[#allocation68_spill] sm:$0xff] %v11303_v45 }
 0x5bb   : > { %7202 = vmatmul.msk.f32.gmra.mxu1 %vm471_vm1, %v11257_v56  ;;  %7313 = vmatmul.msk.f32.gmra.mxu3 %vm471_vm1, %v11301_v29  ;;  %v4395_v20 = vadd.f32 %v4237_v12, %v4054_v6  ;;  %v3597_v12 = vmax.f32 %v10963_v54, 0.0 }
 0x5bc   : > { %7370 = vmatmul.msk.f32.gmra.mxu0 %vm471_vm1, %v11257_v56 }
 0x5bd   : > { %v4449_v47 = vrot.slane %v4395_v20, 7  ;;  %7257 = vmatmul.msk.f32.gmra.mxu2 %vm471_vm1, %v11221_v30 }
 0x5be   : > { %v4240_v2 = vpop.f32.mrf.mxu3 }
 0x5bf   : > { %v11342_v35 = vsel %vm1293_vm2, %v4448_v33, %v4449_v47 }
 0x5c0   : > { %v3877_v45 = vpop.f32.mrf.mxu1  ;;  %14947 = vst [vmem:[#allocation78_spill] sm:$0xff] %v11342_v35  ;;  %v4056_v19 = vpop.f32.mrf.mxu2 }
 0x5c1   : > { %v11318_v5 = vpop.f32.mrf.mxu0  ;;  %v4057_v13 = vadd.f32 %v4056_v19, %v3874_v17 }
 0x5c2   : > { %14942 = vst [vmem:[#allocation71_spill] sm:$0xff] %v11318_v5  ;;  %v14945_v5 = vld [vmem:[#allocation88_spill] sm:$0xff] }
 0x5c3   : > { %7203 = vmatmul.msk.f32.gmra.mxu1 %vm471_vm1, %v11271_v32  ;;  %7314 = vmatmul.msk.f32.gmra.mxu3 %vm471_vm1, %v11316_v25  ;;  %v11336_v49 = vmul.f32 %v3596_v0, %v14945_v5  ;;  %v4396_v6 = vadd.f32 %v4240_v2, %v4057_v13  ;;  %v14948_v5 = vld [vmem:[#allocation91_spill] sm:$0xff]  ;;  %v3598_v2 = vmax.f32 %v10966_v51, 0.0 }
 0x5c4   : > { %7371 = vmatmul.msk.f32.gmra.mxu0 %vm471_vm1, %v11271_v32 }
 0x5c5   : > { %v4450_v20 = vrot.slane %v4396_v6, 7  ;;  %7258 = vmatmul.msk.f32.gmra.mxu2 %vm471_vm1, %v11233_v10 }
 0x5c6   : > { %v4243_v40 = vpop.f32.mrf.mxu3 }
 0x5c7   : > { %v11360_v17 = vsel %vm1293_vm2, %v4449_v47, %v4450_v20 }
 0x5c8   : > { %v3880_v23 = vpop.f32.mrf.mxu1  ;;  %14950 = vst [vmem:[#allocation82_spill] sm:$0xff] %v11360_v17  ;;  %v4059_v19 = vpop.f32.mrf.mxu2 }
 0x5c9   : > { %v11338_v21 = vpop.f32.mrf.mxu0  ;;  %v4060_v54 = vadd.f32 %v4059_v19, %v3877_v45 }
 0x5ca   : > { %14946 = vst [vmem:[#allocation76_spill] sm:$0xff] %v11338_v21  ;;  %v11354_v21 = vmul.f32 %v3597_v12, %v14948_v5  ;;  %v14951_v5 = vld [vmem:[#allocation92_spill] sm:$0xff] }
 0x5cb   : > { %7204 = vmatmul.msk.f32.gmra.mxu1 %vm471_vm1, %v11285_v55  ;;  %7315 = vmatmul.msk.f32.gmra.mxu3 %vm471_vm1, %v11336_v49  ;;  %v4397_v13 = vadd.f32 %v4243_v40, %v4060_v54  ;;  %v3599_v40 = vmax.f32 %v10969_v28, 0.0 }
 0x5cc   : > { %7372 = vmatmul.msk.f32.gmra.mxu0 %vm471_vm1, %v11285_v55 }
 0x5cd   : > { %v4451_v6 = vrot.slane %v4397_v13, 7  ;;  %7259 = vmatmul.msk.f32.gmra.mxu2 %vm471_vm1, %v11245_v39 }
 0x5ce   : > { %v4246_v0 = vpop.f32.mrf.mxu3 }
 0x5cf   : > { %v11378_v45 = vsel %vm1293_vm2, %v4450_v20, %v4451_v6 }
 0x5d0   : > { %v3883_v33 = vpop.f32.mrf.mxu1  ;;  %14953 = vst [vmem:[#allocation85_spill] sm:$0xff] %v11378_v45  ;;  %v4062_v19 = vpop.f32.mrf.mxu2 }
 0x5d1   : > { %v11356_v35 = vpop.f32.mrf.mxu0  ;;  %v4063_v51 = vadd.f32 %v4062_v19, %v3880_v23 }
 0x5d2   : > { %14949 = vst [vmem:[#allocation79_spill] sm:$0xff] %v11356_v35  ;;  %v11372_v35 = vmul.f32 %v3598_v2, %v14951_v5  ;;  %v14954_v5 = vld [vmem:[#allocation94_spill] sm:$0xff] }
 0x5d3   : > { %7205 = vmatmul.msk.f32.gmra.mxu1 %vm471_vm1, %v11301_v29  ;;  %7316 = vmatmul.msk.f32.gmra.mxu3 %vm471_vm1, %v11354_v21  ;;  %v4398_v54 = vadd.f32 %v4246_v0, %v4063_v51  ;;  %v3600_v0 = vmax.f32 %v10972_v24, 0.0 }
 0x5d4   : > { %7373 = vmatmul.msk.f32.gmra.mxu0 %vm471_vm1, %v11301_v29 }
 0x5d5   : > { %v4452_v13 = vrot.slane %v4398_v54, 7  ;;  %7260 = vmatmul.msk.f32.gmra.mxu2 %vm471_vm1, %v11257_v56 }
 0x5d6   : > { %v4249_v12 = vpop.f32.mrf.mxu3 }
 0x5d7   : > { %v11396_v23 = vsel %vm1293_vm2, %v4451_v6, %v4452_v13 }
 0x5d8   : > { %v3886_v47 = vpop.f32.mrf.mxu1  ;;  %14956 = vst [vmem:[#allocation89_spill] sm:$0xff] %v11396_v23  ;;  %v4065_v19 = vpop.f32.mrf.mxu2 }
 0x5d9   : > { %v11374_v17 = vpop.f32.mrf.mxu0  ;;  %v4066_v28 = vadd.f32 %v4065_v19, %v3883_v33 }
 0x5da   : > { %14952 = vst [vmem:[#allocation83_spill] sm:$0xff] %v11374_v17  ;;  %v11390_v17 = vmul.f32 %v3599_v40, %v14954_v5  ;;  %v14957_v5 = vld [vmem:[#allocation96_spill] sm:$0xff] }
 0x5db   : > { %7206 = vmatmul.msk.f32.gmra.mxu1 %vm471_vm1, %v11316_v25  ;;  %7317 = vmatmul.msk.f32.gmra.mxu3 %vm471_vm1, %v11372_v35  ;;  %v4399_v51 = vadd.f32 %v4249_v12, %v4066_v28  ;;  %v3601_v12 = vmax.f32 %v10975_v52, 0.0 }
 0x5dc   : > { %7374 = vmatmul.msk.f32.gmra.mxu0 %vm471_vm1, %v11316_v25 }
 0x5dd   : > { %v4453_v54 = vrot.slane %v4399_v51, 7  ;;  %7261 = vmatmul.msk.f32.gmra.mxu2 %vm471_vm1, %v11271_v32 }
 0x5de   : > { %v4252_v2 = vpop.f32.mrf.mxu3 }
 0x5df   : > { %v11414_v33 = vsel %vm1293_vm2, %v4452_v13, %v4453_v54 }
 0x5e0   : > { %v3889_v20 = vpop.f32.mrf.mxu1  ;;  %14959 = vst [vmem:[#allocation93_spill] sm:$0xff] %v11414_v33  ;;  %v4068_v19 = vpop.f32.mrf.mxu2 }
 0x5e1   : > { %v11392_v45 = vpop.f32.mrf.mxu0  ;;  %v4069_v24 = vadd.f32 %v4068_v19, %v3886_v47 }
 0x5e2   : > { %14955 = vst [vmem:[#allocation86_spill] sm:$0xff] %v11392_v45  ;;  %v11408_v45 = vmul.f32 %v3600_v0, %v14957_v5  ;;  %v14960_v5 = vld [vmem:[#allocation98_spill] sm:$0xff] }
 0x5e3   : > { %7207 = vmatmul.msk.f32.gmra.mxu1 %vm471_vm1, %v11336_v49  ;;  %7318 = vmatmul.msk.f32.gmra.mxu3 %vm471_vm1, %v11390_v17  ;;  %v4400_v28 = vadd.f32 %v4252_v2, %v4069_v24  ;;  %v3602_v2 = vmax.f32 %v10978_v4, 0.0 }
 0x5e4   : > { %7375 = vmatmul.msk.f32.gmra.mxu0 %vm471_vm1, %v11336_v49 }
 0x5e5   : > { %v4454_v51 = vrot.slane %v4400_v28, 7  ;;  %7262 = vmatmul.msk.f32.gmra.mxu2 %vm471_vm1, %v11285_v55 }
 0x5e6   : > { %v4255_v40 = vpop.f32.mrf.mxu3 }
 0x5e7   : > { %v11432_v47 = vsel %vm1293_vm2, %v4453_v54, %v4454_v51 }
 0x5e8   : > { %v3892_v6 = vpop.f32.mrf.mxu1  ;;  %14962 = vst [vmem:[#allocation97_spill] sm:$0xff] %v11432_v47  ;;  %v4071_v19 = vpop.f32.mrf.mxu2 }
 0x5e9   : > { %v11410_v23 = vpop.f32.mrf.mxu0  ;;  %v4072_v52 = vadd.f32 %v4071_v19, %v3889_v20 }
 0x5ea   : > { %14958 = vst [vmem:[#allocation90_spill] sm:$0xff] %v11410_v23  ;;  %v11426_v23 = vmul.f32 %v3601_v12, %v14960_v5  ;;  %v14963_v5 = vld [vmem:[#allocation10_spill] sm:$0xff] }
 0x5eb   : > { %7208 = vmatmul.msk.f32.gmra.mxu1 %vm471_vm1, %v11354_v21  ;;  %7319 = vmatmul.msk.f32.gmra.mxu3 %vm471_vm1, %v11408_v45  ;;  %v4401_v24 = vadd.f32 %v4255_v40, %v4072_v52  ;;  %v3603_v40 = vmax.f32 %v10981_v3, 0.0 }
 0x5ec   : > { %7376 = vmatmul.msk.f32.gmra.mxu0 %vm471_vm1, %v11354_v21 }
 0x5ed   : > { %v4455_v28 = vrot.slane %v4401_v24, 7  ;;  %7263 = vmatmul.msk.f32.gmra.mxu2 %vm471_vm1, %v11301_v29 }
 0x5ee   : > { %v4258_v0 = vpop.f32.mrf.mxu3 }
 0x5ef   : > { %v11450_v20 = vsel %vm1293_vm2, %v4454_v51, %v4455_v28 }
 0x5f0   : > { %v3895_v13 = vpop.f32.mrf.mxu1  ;;  %14965 = vst [vmem:[#allocation18_spill] sm:$0xff] %v11450_v20  ;;  %v4074_v19 = vpop.f32.mrf.mxu2 }
 0x5f1   : > { %v11428_v33 = vpop.f32.mrf.mxu0  ;;  %v4075_v4 = vadd.f32 %v4074_v19, %v3892_v6 }
 0x5f2   : > { %14961 = vst [vmem:[#allocation95_spill] sm:$0xff] %v11428_v33  ;;  %v11444_v33 = vmul.f32 %v3602_v2, %v14963_v5  ;;  %v14966_v5 = vld [vmem:[#allocation20_spill] sm:$0xff] }
 0x5f3   : > { %7209 = vmatmul.msk.f32.gmra.mxu1 %vm471_vm1, %v11372_v35  ;;  %7320 = vmatmul.msk.f32.gmra.mxu3 %vm471_vm1, %v11426_v23  ;;  %v4402_v52 = vadd.f32 %v4258_v0, %v4075_v4  ;;  %v3604_v0 = vmax.f32 %v10984_v58, 0.0 }
 0x5f4   : > { %7377 = vmatmul.msk.f32.gmra.mxu0 %vm471_vm1, %v11372_v35 }
 0x5f5   : > { %v4456_v24 = vrot.slane %v4402_v52, 7  ;;  %7264 = vmatmul.msk.f32.gmra.mxu2 %vm471_vm1, %v11316_v25 }
 0x5f6   : > { %v4261_v12 = vpop.f32.mrf.mxu3 }
 0x5f7   : > { %v11468_v6 = vsel %vm1293_vm2, %v4455_v28, %v4456_v24 }
 0x5f8   : > { %v3898_v54 = vpop.f32.mrf.mxu1  ;;  %14968 = vst [vmem:[#allocation28_spill] sm:$0xff] %v11468_v6  ;;  %v4077_v19 = vpop.f32.mrf.mxu2 }
 0x5f9   : > { %v11446_v47 = vpop.f32.mrf.mxu0  ;;  %v4078_v3 = vadd.f32 %v4077_v19, %v3895_v13 }
 0x5fa   : > { %14964 = vst [vmem:[#allocation99_spill] sm:$0xff] %v11446_v47  ;;  %v11462_v47 = vmul.f32 %v3603_v40, %v14966_v5  ;;  %v14969_v5 = vld [vmem:[#allocation8_spill] sm:$0xff] }
 0x5fb   : > { %7210 = vmatmul.msk.f32.gmra.mxu1 %vm471_vm1, %v11390_v17  ;;  %7321 = vmatmul.msk.f32.gmra.mxu3 %vm471_vm1, %v11444_v33  ;;  %v4403_v4 = vadd.f32 %v4261_v12, %v4078_v3  ;;  %v3605_v12 = vmax.f32 %v10987_v62, 0.0 }
 0x5fc   : > { %7378 = vmatmul.msk.f32.gmra.mxu0 %vm471_vm1, %v11390_v17 }
 0x5fd   : > { %v4457_v52 = vrot.slane %v4403_v4, 7  ;;  %7265 = vmatmul.msk.f32.gmra.mxu2 %vm471_vm1, %v11336_v49 }
 0x5fe   : > { %v4264_v2 = vpop.f32.mrf.mxu3 }
 0x5ff   : > { %v11486_v13 = vsel %vm1293_vm2, %v4456_v24, %v4457_v52 }
 0x600   : > { %v3901_v51 = vpop.f32.mrf.mxu1  ;;  %14971 = vst [vmem:[#allocation32_spill] sm:$0xff] %v11486_v13  ;;  %v4080_v19 = vpop.f32.mrf.mxu2 }
 0x601   : > { %v11464_v20 = vpop.f32.mrf.mxu0  ;;  %v4081_v58 = vadd.f32 %v4080_v19, %v3898_v54 }
 0x602   : > { %14967 = vst [vmem:[#allocation11_spill] sm:$0xff] %v11464_v20  ;;  %v11480_v20 = vmul.f32 %v3604_v0, %v14969_v5  ;;  %v14972_v5 = vld [vmem:[#allocation7_spill] sm:$0xff] }
 0x603   : > { %7211 = vmatmul.msk.f32.gmra.mxu1 %vm471_vm1, %v11408_v45  ;;  %7322 = vmatmul.msk.f32.gmra.mxu3 %vm471_vm1, %v11462_v47  ;;  %v4404_v3 = vadd.f32 %v4264_v2, %v4081_v58  ;;  %v3606_v2 = vmax.f32 %v10990_v43, 0.0 }
 0x604   : > { %7379 = vmatmul.msk.f32.gmra.mxu0 %vm471_vm1, %v11408_v45 }
 0x605   : > { %v4458_v4 = vrot.slane %v4404_v3, 7  ;;  %7266 = vmatmul.msk.f32.gmra.mxu2 %vm471_vm1, %v11354_v21 }
 0x606   : > { %v4267_v40 = vpop.f32.mrf.mxu3 }
 0x607   : > { %v11504_v54 = vsel %vm1293_vm2, %v4457_v52, %v4458_v4 }
 0x608   : > { %v3904_v28 = vpop.f32.mrf.mxu1  ;;  %14974 = vst [vmem:[#allocation100_spill] sm:$0xff] %v11504_v54  ;;  %v4083_v19 = vpop.f32.mrf.mxu2 }
 0x609   : > { %v11482_v6 = vpop.f32.mrf.mxu0  ;;  %v4084_v62 = vadd.f32 %v4083_v19, %v3901_v51 }
 0x60a   : > { %14970 = vst [vmem:[#allocation31_spill] sm:$0xff] %v11482_v6  ;;  %v11498_v6 = vmul.f32 %v3605_v12, %v14972_v5  ;;  %v14975_v5 = vld [vmem:[#allocation30_spill] sm:$0xff] }
 0x60b   : > { %7212 = vmatmul.msk.f32.gmra.mxu1 %vm471_vm1, %v11426_v23  ;;  %7323 = vmatmul.msk.f32.gmra.mxu3 %vm471_vm1, %v11480_v20  ;;  %v4405_v58 = vadd.f32 %v4267_v40, %v4084_v62  ;;  %v3607_v40 = vmax.f32 %v10993_v11, 0.0 }
 0x60c   : > { %7380 = vmatmul.msk.f32.gmra.mxu0 %vm471_vm1, %v11426_v23 }
 0x60d   : > { %v4459_v3 = vrot.slane %v4405_v58, 7  ;;  %7267 = vmatmul.msk.f32.gmra.mxu2 %vm471_vm1, %v11372_v35 }
 0x60e   : > { %v4270_v0 = vpop.f32.mrf.mxu3 }
 0x60f   : > { %v11522_v51 = vsel %vm1293_vm2, %v4458_v4, %v4459_v3 }
 0x610   : > { %v3907_v24 = vpop.f32.mrf.mxu1  ;;  %14977 = vst [vmem:[#allocation102_spill] sm:$0xff] %v11522_v51  ;;  %v4086_v19 = vpop.f32.mrf.mxu2 }
 0x611   : > { %v11500_v13 = vpop.f32.mrf.mxu0  ;;  %v4087_v43 = vadd.f32 %v4086_v19, %v3904_v28 }
 0x612   : > { %14973 = vst [vmem:[#allocation50_spill] sm:$0xff] %v11500_v13  ;;  %v11516_v13 = vmul.f32 %v3606_v2, %v14975_v5  ;;  %v14978_v5 = vld [vmem:[#allocation15_spill] sm:$0xff] }
 0x613   : > { %7213 = vmatmul.msk.f32.gmra.mxu1 %vm471_vm1, %v11444_v33  ;;  %7324 = vmatmul.msk.f32.gmra.mxu3 %vm471_vm1, %v11498_v6  ;;  %v4406_v62 = vadd.f32 %v4270_v0, %v4087_v43  ;;  %v3608_v0 = vmax.f32 %v10996_v34, 0.0 }
 0x614   : > { %7381 = vmatmul.msk.f32.gmra.mxu0 %vm471_vm1, %v11444_v33 }
 0x615   : > { %v4460_v58 = vrot.slane %v4406_v62, 7  ;;  %7268 = vmatmul.msk.f32.gmra.mxu2 %vm471_vm1, %v11390_v17 }
 0x616   : > { %v4273_v12 = vpop.f32.mrf.mxu3 }
 0x617   : > { %v11540_v28 = vsel %vm1293_vm2, %v4459_v3, %v4460_v58 }
 0x618   : > { %v3910_v52 = vpop.f32.mrf.mxu1  ;;  %14980 = vst [vmem:[#allocation104_spill] sm:$0xff] %v11540_v28  ;;  %v4089_v19 = vpop.f32.mrf.mxu2 }
 0x619   : > { %v11518_v54 = vpop.f32.mrf.mxu0  ;;  %v4090_v11 = vadd.f32 %v4089_v19, %v3907_v24 }
 0x61a   : > { %14976 = vst [vmem:[#allocation101_spill] sm:$0xff] %v11518_v54  ;;  %v11534_v54 = vmul.f32 %v3607_v40, %v14978_v5  ;;  %v14981_v5 = vld [vmem:[#allocation13_spill] sm:$0xff] }
 0x61b   : > { %7214 = vmatmul.msk.f32.gmra.mxu1 %vm471_vm1, %v11462_v47  ;;  %7325 = vmatmul.msk.f32.gmra.mxu3 %vm471_vm1, %v11516_v13  ;;  %v4407_v43 = vadd.f32 %v4273_v12, %v4090_v11  ;;  %v3609_v12 = vmax.f32 %v10999_v1, 0.0 }
 0x61c   : > { %7382 = vmatmul.msk.f32.gmra.mxu0 %vm471_vm1, %v11462_v47 }
 0x61d   : > { %v4461_v62 = vrot.slane %v4407_v43, 7  ;;  %7269 = vmatmul.msk.f32.gmra.mxu2 %vm471_vm1, %v11408_v45 }
 0x61e   : > { %v4276_v2 = vpop.f32.mrf.mxu3 }
 0x61f   : > { %v11558_v24 = vsel %vm1293_vm2, %v4460_v58, %v4461_v62 }
 0x620   : > { %v3913_v4 = vpop.f32.mrf.mxu1  ;;  %14983 = vst [vmem:[#allocation106_spill] sm:$0xff] %v11558_v24  ;;  %v4092_v19 = vpop.f32.mrf.mxu2 }
 0x621   : > { %v11536_v51 = vpop.f32.mrf.mxu0  ;;  %v4093_v34 = vadd.f32 %v4092_v19, %v3910_v52 }
 0x622   : > { %14979 = vst [vmem:[#allocation103_spill] sm:$0xff] %v11536_v51  ;;  %v11552_v51 = vmul.f32 %v3608_v0, %v14981_v5  ;;  %v14984_v5 = vld [vmem:[#allocation45_spill] sm:$0xff] }
 0x623   : > { %7215 = vmatmul.msk.f32.gmra.mxu1 %vm471_vm1, %v11480_v20  ;;  %7326 = vmatmul.msk.f32.gmra.mxu3 %vm471_vm1, %v11534_v54  ;;  %v4408_v11 = vadd.f32 %v4276_v2, %v4093_v34  ;;  %v3610_v2 = vmax.f32 %v11005_v16, 0.0 }
 0x624   : > { %7383 = vmatmul.msk.f32.gmra.mxu0 %vm471_vm1, %v11480_v20 }
 0x625   : > { %v4462_v43 = vrot.slane %v4408_v11, 7  ;;  %7270 = vmatmul.msk.f32.gmra.mxu2 %vm471_vm1, %v11426_v23 }
 0x626   : > { %v4279_v40 = vpop.f32.mrf.mxu3 }
 0x627   : > { %v11576_v52 = vsel %vm1293_vm2, %v4461_v62, %v4462_v43 }
 0x628   : > { %v3916_v3 = vpop.f32.mrf.mxu1  ;;  %14986 = vst [vmem:[#allocation108_spill] sm:$0xff] %v11576_v52  ;;  %v4095_v19 = vpop.f32.mrf.mxu2 }
 0x629   : > { %v11554_v28 = vpop.f32.mrf.mxu0  ;;  %v4096_v1 = vadd.f32 %v4095_v19, %v3913_v4 }
 0x62a   : > { %14982 = vst [vmem:[#allocation105_spill] sm:$0xff] %v11554_v28  ;;  %v11570_v28 = vmul.f32 %v3609_v12, %v14984_v5  ;;  %v14987_v5 = vld [vmem:[#allocation48_spill] sm:$0xff] }
 0x62b   : > { %7216 = vmatmul.msk.f32.gmra.mxu1 %vm471_vm1, %v11498_v6  ;;  %7327 = vmatmul.msk.f32.gmra.mxu3 %vm471_vm1, %v11552_v51  ;;  %v4409_v34 = vadd.f32 %v4279_v40, %v4096_v1  ;;  %v3611_v40 = vmax.f32 %v11008_v59, 0.0 }
 0x62c   : > { %7384 = vmatmul.msk.f32.gmra.mxu0 %vm471_vm1, %v11498_v6 }
 0x62d   : > { %v4463_v11 = vrot.slane %v4409_v34, 7  ;;  %7271 = vmatmul.msk.f32.gmra.mxu2 %vm471_vm1, %v11444_v33 }
 0x62e   : > { %v4282_v0 = vpop.f32.mrf.mxu3 }
 0x62f   : > { %v11594_v4 = vsel %vm1293_vm2, %v4462_v43, %v4463_v11 }
 0x630   : > { %v3919_v58 = vpop.f32.mrf.mxu1  ;;  %14989 = vst [vmem:[#allocation110_spill] sm:$0xff] %v11594_v4  ;;  %v4098_v19 = vpop.f32.mrf.mxu2 }
 0x631   : > { %v11572_v24 = vpop.f32.mrf.mxu0  ;;  %v4099_v16 = vadd.f32 %v4098_v19, %v3916_v3 }
 0x632   : > { %14985 = vst [vmem:[#allocation107_spill] sm:$0xff] %v11572_v24  ;;  %v11588_v24 = vmul.f32 %v3610_v2, %v14987_v5  ;;  %v14990_v5 = vld [vmem:[#allocation9_spill] sm:$0xff] }
 0x633   : > { %7217 = vmatmul.msk.f32.gmra.mxu1 %vm471_vm1, %v11516_v13  ;;  %7328 = vmatmul.msk.f32.gmra.mxu3 %vm471_vm1, %v11570_v28  ;;  %v4410_v1 = vadd.f32 %v4282_v0, %v4099_v16  ;;  %v3612_v0 = vmax.f32 %v11011_v38, 0.0 }
 0x634   : > { %7385 = vmatmul.msk.f32.gmra.mxu0 %vm471_vm1, %v11516_v13 }
 0x635   : > { %v4464_v34 = vrot.slane %v4410_v1, 7  ;;  %7272 = vmatmul.msk.f32.gmra.mxu2 %vm471_vm1, %v11462_v47 }
 0x636   : > { %v4285_v12 = vpop.f32.mrf.mxu3 }
 0x637   : > { %v11612_v3 = vsel %vm1293_vm2, %v4463_v11, %v4464_v34 }
 0x638   : > { %v3922_v62 = vpop.f32.mrf.mxu1  ;;  %14992 = vst [vmem:[#allocation112_spill] sm:$0xff] %v11612_v3  ;;  %v4101_v19 = vpop.f32.mrf.mxu2 }
 0x639   : > { %v11590_v52 = vpop.f32.mrf.mxu0  ;;  %v4102_v59 = vadd.f32 %v4101_v19, %v3919_v58 }
 0x63a   : > { %14988 = vst [vmem:[#allocation109_spill] sm:$0xff] %v11590_v52  ;;  %v11606_v52 = vmul.f32 %v3611_v40, %v14990_v5  ;;  %v14993_v5 = vld [vmem:[#allocation17_spill] sm:$0xff] }
 0x63b   : > { %7218 = vmatmul.msk.f32.gmra.mxu1 %vm471_vm1, %v11534_v54  ;;  %7329 = vmatmul.msk.f32.gmra.mxu3 %vm471_vm1, %v11588_v24  ;;  %v4411_v16 = vadd.f32 %v4285_v12, %v4102_v59  ;;  %v3613_v12 = vmax.f32 %v11014_v63, 0.0 }
 0x63c   : > { %7386 = vmatmul.msk.f32.gmra.mxu0 %vm471_vm1, %v11534_v54 }
 0x63d   : > { %v4465_v1 = vrot.slane %v4411_v16, 7  ;;  %7273 = vmatmul.msk.f32.gmra.mxu2 %vm471_vm1, %v11480_v20 }
 0x63e   : > { %v4288_v2 = vpop.f32.mrf.mxu3 }
 0x63f   : > { %v11630_v58 = vsel %vm1293_vm2, %v4464_v34, %v4465_v1 }
 0x640   : > { %v3925_v43 = vpop.f32.mrf.mxu1  ;;  %14995 = vst [vmem:[#allocation114_spill] sm:$0xff] %v11630_v58  ;;  %v4104_v19 = vpop.f32.mrf.mxu2 }
 0x641   : > { %v11608_v4 = vpop.f32.mrf.mxu0  ;;  %v4105_v38 = vadd.f32 %v4104_v19, %v3922_v62 }
 0x642   : > { %14991 = vst [vmem:[#allocation111_spill] sm:$0xff] %v11608_v4  ;;  %v11624_v4 = vmul.f32 %v3612_v0, %v14993_v5  ;;  %v14996_v5 = vld [vmem:[#allocation24_spill] sm:$0xff] }
 0x643   : > { %7219 = vmatmul.msk.f32.gmra.mxu1 %vm471_vm1, %v11552_v51  ;;  %7330 = vmatmul.msk.f32.gmra.mxu3 %vm471_vm1, %v11606_v52  ;;  %v4412_v59 = vadd.f32 %v4288_v2, %v4105_v38  ;;  %v3614_v2 = vmax.f32 %v11018_v26, 0.0 }
 0x644   : > { %7387 = vmatmul.msk.f32.gmra.mxu0 %vm471_vm1, %v11552_v51 }
 0x645   : > { %v4466_v16 = vrot.slane %v4412_v59, 7  ;;  %7274 = vmatmul.msk.f32.gmra.mxu2 %vm471_vm1, %v11498_v6 }
 0x646   : > { %v4291_v40 = vpop.f32.mrf.mxu3 }
 0x647   : > { %v11648_v62 = vsel %vm1293_vm2, %v4465_v1, %v4466_v16 }
 0x648   : > { %v3928_v11 = vpop.f32.mrf.mxu1  ;;  %14998 = vst [vmem:[#allocation116_spill] sm:$0xff] %v11648_v62  ;;  %v4107_v19 = vpop.f32.mrf.mxu2 }
 0x649   : > { %v11626_v3 = vpop.f32.mrf.mxu0  ;;  %v4108_v63 = vadd.f32 %v4107_v19, %v3925_v43 }
 0x64a   : > { %14994 = vst [vmem:[#allocation113_spill] sm:$0xff] %v11626_v3  ;;  %v11642_v3 = vmul.f32 %v3613_v12, %v14996_v5  ;;  %v14999_v5 = vld [vmem:[#allocation39_spill] sm:$0xff] }
 0x64b   : > { %7220 = vmatmul.msk.f32.gmra.mxu1 %vm471_vm1, %v11570_v28  ;;  %7331 = vmatmul.msk.f32.gmra.mxu3 %vm471_vm1, %v11624_v4  ;;  %v4413_v38 = vadd.f32 %v4291_v40, %v4108_v63  ;;  %v3615_v40 = vmax.f32 %v11021_v18, 0.0 }
 0x64c   : > { %7388 = vmatmul.msk.f32.gmra.mxu0 %vm471_vm1, %v11570_v28 }
 0x64d   : > { %v4467_v59 = vrot.slane %v4413_v38, 7  ;;  %7275 = vmatmul.msk.f32.gmra.mxu2 %vm471_vm1, %v11516_v13 }
 0x64e   : > { %v4294_v0 = vpop.f32.mrf.mxu3 }
 0x64f   : > { %v11666_v43 = vsel %vm1293_vm2, %v4466_v16, %v4467_v59 }
 0x650   : > { %v3931_v34 = vpop.f32.mrf.mxu1  ;;  %15001 = vst [vmem:[#allocation118_spill] sm:$0xff] %v11666_v43  ;;  %v4110_v19 = vpop.f32.mrf.mxu2 }
 0x651   : > { %v11644_v58 = vpop.f32.mrf.mxu0  ;;  %v4111_v26 = vadd.f32 %v4110_v19, %v3928_v11 }
 0x652   : > { %14997 = vst [vmem:[#allocation115_spill] sm:$0xff] %v11644_v58  ;;  %v11660_v58 = vmul.f32 %v3614_v2, %v14999_v5  ;;  %v15002_v5 = vld [vmem:[#allocation59_spill] sm:$0xff] }
 0x653   : > { %7221 = vmatmul.msk.f32.gmra.mxu1 %vm471_vm1, %v11588_v24  ;;  %7332 = vmatmul.msk.f32.gmra.mxu3 %vm471_vm1, %v11642_v3  ;;  %v4414_v63 = vadd.f32 %v4294_v0, %v4111_v26  ;;  %v3616_v0 = vmax.f32 %v11024_v7, 0.0 }
 0x654   : > { %7389 = vmatmul.msk.f32.gmra.mxu0 %vm471_vm1, %v11588_v24 }
 0x655   : > { %v4468_v38 = vrot.slane %v4414_v63, 7  ;;  %7276 = vmatmul.msk.f32.gmra.mxu2 %vm471_vm1, %v11534_v54 }
 0x656   : > { %v4297_v12 = vpop.f32.mrf.mxu3 }
 0x657   : > { %v11684_v11 = vsel %vm1293_vm2, %v4467_v59, %v4468_v38 }
 0x658   : > { %v3934_v1 = vpop.f32.mrf.mxu1  ;;  %15004 = vst [vmem:[#allocation120_spill] sm:$0xff] %v11684_v11  ;;  %v4113_v19 = vpop.f32.mrf.mxu2 }
 0x659   : > { %v11662_v62 = vpop.f32.mrf.mxu0  ;;  %v4114_v18 = vadd.f32 %v4113_v19, %v3931_v34 }
 0x65a   : > { %15000 = vst [vmem:[#allocation117_spill] sm:$0xff] %v11662_v62  ;;  %v11678_v62 = vmul.f32 %v3615_v40, %v15002_v5  ;;  %v15005_v5 = vld [vmem:[#allocation60_spill] sm:$0xff] }
 0x65b   : > { %7222 = vmatmul.msk.f32.gmra.mxu1 %vm471_vm1, %v11606_v52  ;;  %7333 = vmatmul.msk.f32.gmra.mxu3 %vm471_vm1, %v11660_v58  ;;  %v4415_v26 = vadd.f32 %v4297_v12, %v4114_v18  ;;  %v3617_v12 = vmax.f32 %v11027_v15, 0.0 }
 0x65c   : > { %7390 = vmatmul.msk.f32.gmra.mxu0 %vm471_vm1, %v11606_v52 }
 0x65d   : > { %v4469_v63 = vrot.slane %v4415_v26, 7  ;;  %7277 = vmatmul.msk.f32.gmra.mxu2 %vm471_vm1, %v11552_v51 }
 0x65e   : > { %v4300_v2 = vpop.f32.mrf.mxu3 }
 0x65f   : > { %v11702_v34 = vsel %vm1293_vm2, %v4468_v38, %v4469_v63 }
 0x660   : > { %v3937_v16 = vpop.f32.mrf.mxu1  ;;  %15007 = vst [vmem:[#allocation122_spill] sm:$0xff] %v11702_v34  ;;  %v4116_v19 = vpop.f32.mrf.mxu2 }
 0x661   : > { %v11680_v43 = vpop.f32.mrf.mxu0  ;;  %v4117_v7 = vadd.f32 %v4116_v19, %v3934_v1 }
 0x662   : > { %15003 = vst [vmem:[#allocation119_spill] sm:$0xff] %v11680_v43  ;;  %v11696_v43 = vmul.f32 %v3616_v0, %v15005_v5  ;;  %v15008_v5 = vld [vmem:[#allocation19_spill] sm:$0xff] }
 0x663   : > { %7223 = vmatmul.msk.f32.gmra.mxu1 %vm471_vm1, %v11624_v4  ;;  %7334 = vmatmul.msk.f32.gmra.mxu3 %vm471_vm1, %v11678_v62  ;;  %v4416_v18 = vadd.f32 %v4300_v2, %v4117_v7  ;;  %v3618_v2 = vmax.f32 %v11030_v42, 0.0 }
 0x664   : > { %7391 = vmatmul.msk.f32.gmra.mxu0 %vm471_vm1, %v11624_v4 }
 0x665   : > { %v4470_v26 = vrot.slane %v4416_v18, 7  ;;  %7278 = vmatmul.msk.f32.gmra.mxu2 %vm471_vm1, %v11570_v28 }
 0x666   : > { %v4303_v40 = vpop.f32.mrf.mxu3 }
 0x667   : > { %v11720_v1 = vsel %vm1293_vm2, %v4469_v63, %v4470_v26 }
 0x668   : > { %v3940_v59 = vpop.f32.mrf.mxu1  ;;  %15010 = vst [vmem:[#allocation124_spill] sm:$0xff] %v11720_v1  ;;  %v4119_v19 = vpop.f32.mrf.mxu2 }
 0x669   : > { %v11698_v11 = vpop.f32.mrf.mxu0  ;;  %v4120_v15 = vadd.f32 %v4119_v19, %v3937_v16 }
 0x66a   : > { %15006 = vst [vmem:[#allocation121_spill] sm:$0xff] %v11698_v11  ;;  %v11714_v11 = vmul.f32 %v3617_v12, %v15008_v5  ;;  %v15011_v5 = vld [vmem:[#allocation21_spill] sm:$0xff] }
 0x66b   : > { %7224 = vmatmul.msk.f32.gmra.mxu1 %vm471_vm1, %v11642_v3  ;;  %7335 = vmatmul.msk.f32.gmra.mxu3 %vm471_vm1, %v11696_v43  ;;  %v4417_v7 = vadd.f32 %v4303_v40, %v4120_v15  ;;  %v3619_v40 = vmax.f32 %v11033_v50, 0.0 }
 0x66c   : > { %7392 = vmatmul.msk.f32.gmra.mxu0 %vm471_vm1, %v11642_v3 }
 0x66d   : > { %v4471_v18 = vrot.slane %v4417_v7, 7  ;;  %7279 = vmatmul.msk.f32.gmra.mxu2 %vm471_vm1, %v11588_v24 }
 0x66e   : > { %v4306_v0 = vpop.f32.mrf.mxu3 }
 0x66f   : > { %v11738_v16 = vsel %vm1293_vm2, %v4470_v26, %v4471_v18 }
 0x670   : > { %v3943_v38 = vpop.f32.mrf.mxu1  ;;  %15013 = vst [vmem:[#allocation126_spill] sm:$0xff] %v11738_v16  ;;  %v4122_v19 = vpop.f32.mrf.mxu2 }
 0x671   : > { %v11716_v34 = vpop.f32.mrf.mxu0  ;;  %v4123_v42 = vadd.f32 %v4122_v19, %v3940_v59 }
 0x672   : > { %15009 = vst [vmem:[#allocation123_spill] sm:$0xff] %v11716_v34  ;;  %v11732_v34 = vmul.f32 %v3618_v2, %v15011_v5  ;;  %v15014_v5 = vld [vmem:[#allocation54_spill] sm:$0xff] }
 0x673   : > { %7225 = vmatmul.msk.f32.gmra.mxu1 %vm471_vm1, %v11660_v58  ;;  %7336 = vmatmul.msk.f32.gmra.mxu3 %vm471_vm1, %v11714_v11  ;;  %v4418_v15 = vadd.f32 %v4306_v0, %v4123_v42  ;;  %v3620_v0 = vmax.f32 %v11036_v9, 0.0 }
 0x674   : > { %7393 = vmatmul.msk.f32.gmra.mxu0 %vm471_vm1, %v11660_v58 }
 0x675   : > { %v4472_v7 = vrot.slane %v4418_v15, 7  ;;  %7280 = vmatmul.msk.f32.gmra.mxu2 %vm471_vm1, %v11606_v52 }
 0x676   : > { %v4309_v12 = vpop.f32.mrf.mxu3 }
 0x677   : > { %v11756_v59 = vsel %vm1293_vm2, %v4471_v18, %v4472_v7 }
 0x678   : > { %v3946_v63 = vpop.f32.mrf.mxu1  ;;  %15016 = vst [vmem:[#allocation128_spill] sm:$0xff] %v11756_v59  ;;  %v4125_v19 = vpop.f32.mrf.mxu2 }
 0x679   : > { %v11734_v1 = vpop.f32.mrf.mxu0  ;;  %v4126_v50 = vadd.f32 %v4125_v19, %v3943_v38 }
 0x67a   : > { %15012 = vst [vmem:[#allocation125_spill] sm:$0xff] %v11734_v1  ;;  %v11750_v1 = vmul.f32 %v3619_v40, %v15014_v5  ;;  %v15017_v5 = vld [vmem:[#allocation67_spill] sm:$0xff] }
 0x67b   : > { %7226 = vmatmul.msk.f32.gmra.mxu1 %vm471_vm1, %v11678_v62  ;;  %7337 = vmatmul.msk.f32.gmra.mxu3 %vm471_vm1, %v11732_v34  ;;  %v4419_v42 = vadd.f32 %v4309_v12, %v4126_v50  ;;  %v3621_v12 = vmax.f32 %v11039_v14, 0.0 }
 0x67c   : > { %7394 = vmatmul.msk.f32.gmra.mxu0 %vm471_vm1, %v11678_v62 }
 0x67d   : > { %v4473_v15 = vrot.slane %v4419_v42, 7  ;;  %7281 = vmatmul.msk.f32.gmra.mxu2 %vm471_vm1, %v11624_v4 }
 0x67e   : > { %v4312_v2 = vpop.f32.mrf.mxu3 }
 0x67f   : > { %v11774_v38 = vsel %vm1293_vm2, %v4472_v7, %v4473_v15 }
 0x680   : > { %v3949_v26 = vpop.f32.mrf.mxu1  ;;  %15019 = vst [vmem:[#allocation130_spill] sm:$0xff] %v11774_v38  ;;  %v4128_v19 = vpop.f32.mrf.mxu2 }
 0x681   : > { %v11752_v16 = vpop.f32.mrf.mxu0  ;;  %v4129_v9 = vadd.f32 %v4128_v19, %v3946_v63 }
 0x682   : > { %15015 = vst [vmem:[#allocation127_spill] sm:$0xff] %v11752_v16  ;;  %v11768_v16 = vmul.f32 %v3620_v0, %v15017_v5  ;;  %v15020_v5 = vld [vmem:[#allocation23_spill] sm:$0xff] }
 0x683   : > { %7227 = vmatmul.msk.f32.gmra.mxu1 %vm471_vm1, %v11696_v43  ;;  %7338 = vmatmul.msk.f32.gmra.mxu3 %vm471_vm1, %v11750_v1  ;;  %v4420_v50 = vadd.f32 %v4312_v2, %v4129_v9  ;;  %v3622_v2 = vmax.f32 %v11042_v53, 0.0 }
 0x684   : > { %7395 = vmatmul.msk.f32.gmra.mxu0 %vm471_vm1, %v11696_v43 }
 0x685   : > { %v4474_v42 = vrot.slane %v4420_v50, 7  ;;  %7282 = vmatmul.msk.f32.gmra.mxu2 %vm471_vm1, %v11642_v3 }
 0x686   : > { %v4315_v40 = vpop.f32.mrf.mxu3 }
 0x687   : > { %v11792_v63 = vsel %vm1293_vm2, %v4473_v15, %v4474_v42 }
 0x688   : > { %v3952_v18 = vpop.f32.mrf.mxu1  ;;  %15022 = vst [vmem:[#allocation132_spill] sm:$0xff] %v11792_v63  ;;  %v4131_v19 = vpop.f32.mrf.mxu2 }
 0x689   : > { %v11770_v59 = vpop.f32.mrf.mxu0  ;;  %v4132_v14 = vadd.f32 %v4131_v19, %v3949_v26 }
 0x68a   : > { %15018 = vst [vmem:[#allocation129_spill] sm:$0xff] %v11770_v59  ;;  %v11786_v59 = vmul.f32 %v3621_v12, %v15020_v5  ;;  %v15023_v5 = vld [vmem:[#allocation25_spill] sm:$0xff] }
 0x68b   : > { %7228 = vmatmul.msk.f32.gmra.mxu1 %vm471_vm1, %v11714_v11  ;;  %7339 = vmatmul.msk.f32.gmra.mxu3 %vm471_vm1, %v11768_v16  ;;  %v4421_v9 = vadd.f32 %v4315_v40, %v4132_v14 }
 0x68c   : > { %7396 = vmatmul.msk.f32.gmra.mxu0 %vm471_vm1, %v11714_v11 }
 0x68d   : > { %v4475_v50 = vrot.slane %v4421_v9, 7  ;;  %7283 = vmatmul.msk.f32.gmra.mxu2 %vm471_vm1, %v11660_v58 }
 0x68e   : > { %v4318_v0 = vpop.f32.mrf.mxu3 }
 0x68f   : > { %v11810_v26 = vsel %vm1293_vm2, %v4474_v42, %v4475_v50 }
 0x690   : > { %v3955_v7 = vpop.f32.mrf.mxu1  ;;  %v4134_v19 = vpop.f32.mrf.mxu2 }
 0x691   : > { %v11788_v38 = vpop.f32.mrf.mxu0  ;;  %v4135_v53 = vadd.f32 %v4134_v19, %v3952_v18 }
 0x692   : > { %15021 = vst [vmem:[#allocation131_spill] sm:$0xff] %v11788_v38  ;;  %v11804_v38 = vmul.f32 %v3622_v2, %v15023_v5 }
 0x693   : > { %7229 = vmatmul.msk.f32.gmra.mxu1 %vm471_vm1, %v11732_v34  ;;  %7340 = vmatmul.msk.f32.gmra.mxu3 %vm471_vm1, %v11786_v59  ;;  %v4422_v40 = vadd.f32 %v4318_v0, %v4135_v53 }
 0x694   : > { %7397 = vmatmul.msk.f32.gmra.mxu0 %vm471_vm1, %v11732_v34  ;;  %15024 = vst [vmem:[#allocation133_spill] sm:$0xff] %v11804_v38 }
 0x695   : > { %v4476_v2 = vrot.slane %v4422_v40, 7  ;;  %7284 = vmatmul.msk.f32.gmra.mxu2 %vm471_vm1, %v11678_v62 }
 0x696   : > { %v4321_v12 = vpop.f32.mrf.mxu3 }
 0x697   : > { %v11824_v5 = vsel %vm1293_vm2, %v4475_v50, %v4476_v2 }
 0x698   : > { %v3958_v15 = vpop.f32.mrf.mxu1  ;;  %v4137_v18 = vpop.f32.mrf.mxu2 }
 0x699   : > { %v11806_v63 = vpop.f32.mrf.mxu0  ;;  %v4138_v19 = vadd.f32 %v4137_v18, %v3955_v7 }
 0x69a   : > { %15025 = vst [vmem:[#allocation134_spill] sm:$0xff] %v11806_v63 }
 0x69b   : > { %7230 = vmatmul.msk.f32.gmra.mxu1 %vm471_vm1, %v11750_v1  ;;  %7341 = vmatmul.msk.f32.gmra.mxu3 %vm471_vm1, %v11804_v38  ;;  %v4423_v0 = vadd.f32 %v4321_v12, %v4138_v19 }
 0x69c   : > { %7398 = vmatmul.msk.f32.gmra.mxu0 %vm471_vm1, %v11750_v1 }
 0x69d   : > { %v4477_v40 = vrot.slane %v4423_v0, 7  ;;  %7285 = vmatmul.msk.f32.gmra.mxu2 %vm471_vm1, %v11696_v43 }
 0x69e   : > { %v4324_v14 = vpop.f32.mrf.mxu3 }
 0x69f   : > { %v11838_v63 = vsel %vm1293_vm2, %v4476_v2, %v4477_v40 }
 0x6a0   : > { %v3961_v9 = vpop.f32.mrf.mxu1  ;;  %15028 = vst [vmem:[#allocation137_spill] sm:$0xff] %v11838_v63  ;;  %v4140_v7 = vpop.f32.mrf.mxu2 }
 0x6a1   : > { %v11820_v42 = vpop.f32.mrf.mxu0  ;;  %v4141_v18 = vadd.f32 %v4140_v7, %v3958_v15 }
 0x6a2   : > { %15026 = vst [vmem:[#allocation135_spill] sm:$0xff] %v11820_v42 }
 0x6a3   : > { %7231 = vmatmul.msk.f32.gmra.mxu1 %vm471_vm1, %v11768_v16  ;;  %7342 = vmatmul.msk.f32.gmra.mxu3 %vm471_vm1, %v11073_v46  ;;  %v4424_v12 = vadd.f32 %v4324_v14, %v4141_v18 }
 0x6a4   : > { %7399 = vmatmul.msk.f32.gmra.mxu0 %vm471_vm1, %v11768_v16 }
 0x6a5   : > { %v4478_v0 = vrot.slane %v4424_v12, 7  ;;  %7286 = vmatmul.msk.f32.gmra.mxu2 %vm471_vm1, %v11714_v11 }
 0x6a6   : > { %v4327_v53 = vpop.f32.mrf.mxu3 }
 0x6a7   : > { %v11852_v63 = vsel %vm1293_vm2, %v4477_v40, %v4478_v0  ;;  %v7517_v40 = vld [vmem:[%s14381_s6 + $0x14] sm:$0xf] }
 0x6a8   : > { %v3964_v42 = vpop.f32.mrf.mxu1  ;;  %15030 = vst [vmem:[#allocation139_spill] sm:$0xff] %v11852_v63  ;;  %v4143_v15 = vpop.f32.mrf.mxu2  ;;  %7518 = vmatpush.msk.msra.mxu3 %vm634_vm0, %v7517_v40 }
 0x6a9   : > { %v11834_v50 = vpop.f32.mrf.mxu0  ;;  %v4144_v7 = vadd.f32 %v4143_v15, %v3961_v9 }
 0x6aa   : > { %15027 = vst [vmem:[#allocation136_spill] sm:$0xff] %v11834_v50 }
 0x6ab   : > { %7232 = vmatmul.msk.f32.gmra.mxu1 %vm471_vm1, %v11786_v59  ;;  %7343 = vmatmul.msk.f32.gmra.mxu3 %vm471_vm1, %v11091_v36  ;;  %v4425_v14 = vadd.f32 %v4327_v53, %v4144_v7 }
 0x6ac   : > { %7400 = vmatmul.msk.f32.gmra.mxu0 %vm471_vm1, %v11786_v59 }
 0x6ad   : > { %v4479_v12 = vrot.slane %v4425_v14, 7  ;;  %7287 = vmatmul.msk.f32.gmra.mxu2 %vm471_vm1, %v11732_v34  ;;  %v7460_v14 = vld [vmem:[%s14381_s6 + $0x1c] sm:$0xf] }
 0x6ae   : > { %v4330_v19 = vpop.f32.mrf.mxu3  ;;  %7461 = vmatpush.msk.msra.mxu2 %vm634_vm0, %v7460_v14 }
 0x6af   : > { %v11870_v15 = vsel %vm1293_vm2, %v4478_v0, %v4479_v12  ;;  %v7516_v0 = vld [vmem:[%s14381_s6 + $0x8] sm:$0xf] }
 0x6b0   : > { %v3967_v50 = vpop.f32.mrf.mxu1  ;;  %15032 = vst [vmem:[#allocation141_spill] sm:$0xff] %v11870_v15  ;;  %v4146_v63 = vpop.f32.mrf.mxu2  ;;  %7573 = vmatpush.msk.msra.mxu0 %vm634_vm0, %v7516_v0 }
 0x6b1   : > { %v11848_v2 = vpop.f32.mrf.mxu0  ;;  %v4147_v53 = vadd.f32 %v4146_v63, %v3964_v42 }
 0x6b2   : > { %15029 = vst [vmem:[#allocation138_spill] sm:$0xff] %v11848_v2 }
 0x6b3   : > { %7233 = vmatmul.msk.f32.gmra.mxu1 %vm471_vm1, %v11804_v38  ;;  %7344 = vmatmul.msk.f32.gmra.mxu3 %vm471_vm1, %v11107_v61  ;;  %v4426_v7 = vadd.f32 %v4330_v19, %v4147_v53  ;;  %v7628_v19 = vld [vmem:[%s14381_s6 + $0x20] sm:$0xf] }
 0x6b4   : > { %7401 = vmatmul.msk.f32.gmra.mxu0 %vm471_vm1, %v11804_v38  ;;  %7629 = vmatpush.msk.msra.mxu1 %vm634_vm0, %v7628_v19 }
 0x6b5   : > { %v4480_v63 = vrot.slane %v4426_v7, 7  ;;  %7288 = vmatmul.msk.f32.gmra.mxu2 %vm471_vm1, %v11750_v1 }
 0x6b6   : > { %v4333_v18 = vpop.f32.mrf.mxu3 }
 0x6b8   : > { %v3970_v2 = vpop.f32.mrf.mxu1  ;;  %v4149_v14 = vpop.f32.mrf.mxu2 }
 0x6b9   : > { %v11866_v9 = vpop.f32.mrf.mxu0  ;;  %v4150_v7 = vadd.f32 %v4149_v14, %v3967_v50 }
 0x6ba   : > { %15031 = vst [vmem:[#allocation140_spill] sm:$0xff] %v11866_v9  ;;  %v11896_v9 = vsel %vm1293_vm2, %v4479_v12, %v4480_v63 }
 0x6bb   : > { %7234 = vmatmul.msk.f32.gmra.mxu1 %vm471_vm1, %v11073_v46  ;;  %7345 = vmatmul.msk.f32.gmra.mxu3 %vm471_vm1, %v11046_v22  ;;  %15034 = vst [vmem:[#allocation143_spill] sm:$0xff] %v11896_v9  ;;  %v4427_v0 = vadd.f32 %v4333_v18, %v4150_v7 }
 0x6bc   : > { %7402 = vmatmul.msk.f32.gmra.mxu0 %vm471_vm1, %v11073_v46 }
 0x6bd   : > { %v4481_v19 = vrot.slane %v4427_v0, 7  ;;  %7289 = vmatmul.msk.f32.gmra.mxu2 %vm471_vm1, %v11768_v16 }
 0x6be   : > { %v4336_v40 = vpop.f32.mrf.mxu3 }
 0x6bf   : > { %v11910_v9 = vsel %vm1293_vm2, %v4480_v63, %v4481_v19 }
 0x6c0   : > { %v3973_v42 = vpop.f32.mrf.mxu1  ;;  %15036 = vst [vmem:[#allocation145_spill] sm:$0xff] %v11910_v9  ;;  %v4152_v50 = vpop.f32.mrf.mxu2 }
 0x6c1   : > { %v11892_v53 = vpop.f32.mrf.mxu0  ;;  %v4153_v14 = vadd.f32 %v4152_v50, %v3970_v2 }
 0x6c2   : > { %15033 = vst [vmem:[#allocation142_spill] sm:$0xff] %v11892_v53 }
 0x6c3   : > { %7235 = vmatmul.msk.f32.gmra.mxu1 %vm471_vm1, %v11091_v36  ;;  %7346 = vmatmul.msk.f32.gmra.mxu3 %vm471_vm1, %v11059_v60  ;;  %v4428_v18 = vadd.f32 %v4336_v40, %v4153_v14 }
 0x6c4   : > { %7403 = vmatmul.msk.f32.gmra.mxu0 %vm471_vm1, %v11091_v36 }
 0x6c5   : > { %v4482_v0 = vrot.slane %v4428_v18, 7  ;;  %7290 = vmatmul.msk.f32.gmra.mxu2 %vm471_vm1, %v11786_v59 }
 0x6c6   : > { %v4339_v15 = vpop.f32.mrf.mxu3 }
 0x6c7   : > { %v11924_v9 = vsel %vm1293_vm2, %v4481_v19, %v4482_v0 }
 0x6c8   : > { %v3976_v53 = vpop.f32.mrf.mxu1  ;;  %15038 = vst [vmem:[#allocation147_spill] sm:$0xff] %v11924_v9  ;;  %v4155_v2 = vpop.f32.mrf.mxu2 }
 0x6c9   : > { %v11906_v12 = vpop.f32.mrf.mxu0  ;;  %v4156_v50 = vadd.f32 %v4155_v2, %v3973_v42 }
 0x6ca   : > { %15035 = vst [vmem:[#allocation144_spill] sm:$0xff] %v11906_v12 }
 0x6cb   : > { %7236 = vmatmul.msk.f32.gmra.mxu1 %vm471_vm1, %v11107_v61  ;;  %7347 = vmatmul.msk.f32.gmra.mxu3 %vm471_vm1, %v11078_v37  ;;  %v4429_v40 = vadd.f32 %v4339_v15, %v4156_v50 }
 0x6cc   : > { %7404 = vmatmul.msk.f32.gmra.mxu0 %vm471_vm1, %v11107_v61 }
 0x6cd   : > { %v4483_v18 = vrot.slane %v4429_v40, 7  ;;  %7291 = vmatmul.msk.f32.gmra.mxu2 %vm471_vm1, %v11804_v38 }
 0x6ce   : > { %v4342_v7 = vpop.f32.mrf.mxu3 }
 0x6cf   : > { %v11938_v9 = vsel %vm1293_vm2, %v4482_v0, %v4483_v18 }
 0x6d0   : > { %v3979_v12 = vpop.f32.mrf.mxu1  ;;  %15040 = vst [vmem:[#allocation149_spill] sm:$0xff] %v11938_v9  ;;  %v4158_v42 = vpop.f32.mrf.mxu2 }
 0x6d1   : > { %v11920_v63 = vpop.f32.mrf.mxu0  ;;  %v4159_v2 = vadd.f32 %v4158_v42, %v3976_v53 }
 0x6d2   : > { %15037 = vst [vmem:[#allocation146_spill] sm:$0xff] %v11920_v63 }
 0x6d3   : > { %7406 = vmatmul.msk.f32.vlgmr.msrb.gmra.mxu1 %vm471_vm1, %v11073_v46  ;;  %7519 = vmatmul.msk.f32.vlgmr.msra.gmra.mxu3 %vm471_vm1, %v11046_v22  ;;  %v4430_v15 = vadd.f32 %v4342_v7, %v4159_v2 }
 0x6d4   : > { %7574 = vmatmul.msk.f32.vlgmr.msra.gmra.mxu0 %vm471_vm1, %v11073_v46 }
 0x6d5   : > { %v4484_v40 = vrot.slane %v4430_v15, 7  ;;  %7462 = vmatmul.msk.f32.vlgmr.msra.gmra.mxu2 %vm471_vm1, %v11049_v8 }
 0x6d6   : > { %v4345_v14 = vpop.f32.mrf.mxu3 }
 0x6d7   : > { %v11952_v9 = vsel %vm1293_vm2, %v4483_v18, %v4484_v40 }
 0x6d8   : > { %v3982_v63 = vpop.f32.mrf.mxu1  ;;  %15042 = vst [vmem:[#allocation151_spill] sm:$0xff] %v11952_v9  ;;  %v4161_v53 = vpop.f32.mrf.mxu2 }
 0x6d9   : > { %v11934_v19 = vpop.f32.mrf.mxu0  ;;  %v4162_v42 = vadd.f32 %v4161_v53, %v3979_v12 }
 0x6da   : > { %15039 = vst [vmem:[#allocation148_spill] sm:$0xff] %v11934_v19 }
 0x6db   : > { %7407 = vmatmul.msk.f32.gmra.mxu1 %vm471_vm1, %v11091_v36  ;;  %7520 = vmatmul.msk.f32.gmra.mxu3 %vm471_vm1, %v11059_v60  ;;  %v4431_v7 = vadd.f32 %v4345_v14, %v4162_v42 }
 0x6dc   : > { %7575 = vmatmul.msk.f32.gmra.mxu0 %vm471_vm1, %v11091_v36 }
 0x6dd   : > { %v4485_v15 = vrot.slane %v4431_v7, 7  ;;  %7463 = vmatmul.msk.f32.gmra.mxu2 %vm471_vm1, %v11062_v27 }
 0x6de   : > { %v4348_v50 = vpop.f32.mrf.mxu3 }
 0x6df   : > { %v11966_v9 = vsel %vm1293_vm2, %v4484_v40, %v4485_v15 }
 0x6e0   : > { %v3985_v19 = vpop.f32.mrf.mxu1  ;;  %15044 = vst [vmem:[#allocation153_spill] sm:$0xff] %v11966_v9  ;;  %v4164_v12 = vpop.f32.mrf.mxu2 }
 0x6e1   : > { %v11948_v0 = vpop.f32.mrf.mxu0  ;;  %v4165_v53 = vadd.f32 %v4164_v12, %v3982_v63 }
 0x6e2   : > { %15041 = vst [vmem:[#allocation150_spill] sm:$0xff] %v11948_v0 }
 0x6e3   : > { %7408 = vmatmul.msk.f32.gmra.mxu1 %vm471_vm1, %v11107_v61  ;;  %7521 = vmatmul.msk.f32.gmra.mxu3 %vm471_vm1, %v11078_v37  ;;  %v4432_v14 = vadd.f32 %v4348_v50, %v4165_v53 }
 0x6e4   : > { %7576 = vmatmul.msk.f32.gmra.mxu0 %vm471_vm1, %v11107_v61 }
 0x6e5   : > { %v4486_v7 = vrot.slane %v4432_v14, 7  ;;  %7464 = vmatmul.msk.f32.gmra.mxu2 %vm471_vm1, %v11082_v31 }
 0x6e6   : > { %v4351_v2 = vpop.f32.mrf.mxu3 }
 0x6e7   : > { %v11980_v9 = vsel %vm1293_vm2, %v4485_v15, %v4486_v7 }
 0x6e8   : > { %v3988_v0 = vpop.f32.mrf.mxu1  ;;  %15046 = vst [vmem:[#allocation155_spill] sm:$0xff] %v11980_v9  ;;  %v4167_v63 = vpop.f32.mrf.mxu2 }
 0x6e9   : > { %v11962_v18 = vpop.f32.mrf.mxu0  ;;  %v4168_v12 = vadd.f32 %v4167_v63, %v3985_v19 }
 0x6ea   : > { %15043 = vst [vmem:[#allocation152_spill] sm:$0xff] %v11962_v18 }
 0x6eb   : > { %7409 = vmatmul.msk.f32.gmra.mxu1 %vm471_vm1, %v11046_v22  ;;  %7522 = vmatmul.msk.f32.gmra.mxu3 %vm471_vm1, %v11049_v8  ;;  %v4433_v50 = vadd.f32 %v4351_v2, %v4168_v12 }
 0x6ec   : > { %7577 = vmatmul.msk.f32.gmra.mxu0 %vm471_vm1, %v11046_v22 }
 0x6ed   : > { %v4487_v14 = vrot.slane %v4433_v50, 7  ;;  %7465 = vmatmul.msk.f32.gmra.mxu2 %vm471_vm1, %v11098_v44 }
 0x6ee   : > { %v4354_v42 = vpop.f32.mrf.mxu3 }
 0x6ef   : > { %v11994_v9 = vsel %vm1293_vm2, %v4486_v7, %v4487_v14 }
 0x6f0   : > { %v3991_v18 = vpop.f32.mrf.mxu1  ;;  %15048 = vst [vmem:[#allocation157_spill] sm:$0xff] %v11994_v9  ;;  %v4170_v19 = vpop.f32.mrf.mxu2 }
 0x6f1   : > { %v11976_v40 = vpop.f32.mrf.mxu0  ;;  %v4171_v63 = vadd.f32 %v4170_v19, %v3988_v0 }
 0x6f2   : > { %15045 = vst [vmem:[#allocation154_spill] sm:$0xff] %v11976_v40 }
 0x6f3   : > { %7410 = vmatmul.msk.f32.gmra.mxu1 %vm471_vm1, %v11059_v60  ;;  %7523 = vmatmul.msk.f32.gmra.mxu3 %vm471_vm1, %v11062_v27  ;;  %v4434_v2 = vadd.f32 %v4354_v42, %v4171_v63 }
 0x6f4   : > { %7578 = vmatmul.msk.f32.gmra.mxu0 %vm471_vm1, %v11059_v60 }
 0x6f5   : > { %v4488_v50 = vrot.slane %v4434_v2, 7  ;;  %7466 = vmatmul.msk.f32.gmra.mxu2 %vm471_vm1, %v11113_v41 }
 0x6f6   : > { %v4357_v53 = vpop.f32.mrf.mxu3 }
 0x6f7   : > { %v12008_v9 = vsel %vm1293_vm2, %v4487_v14, %v4488_v50 }
 0x6f8   : > { %v3994_v40 = vpop.f32.mrf.mxu1  ;;  %15050 = vst [vmem:[#allocation159_spill] sm:$0xff] %v12008_v9  ;;  %v4173_v0 = vpop.f32.mrf.mxu2 }
 0x6f9   : > { %v11990_v15 = vpop.f32.mrf.mxu0  ;;  %v4174_v19 = vadd.f32 %v4173_v0, %v3991_v18 }
 0x6fa   : > { %15047 = vst [vmem:[#allocation156_spill] sm:$0xff] %v11990_v15 }
 0x6fb   : > { %7411 = vmatmul.msk.f32.gmra.mxu1 %vm471_vm1, %v11078_v37  ;;  %7524 = vmatmul.msk.f32.gmra.mxu3 %vm471_vm1, %v11082_v31  ;;  %v4435_v42 = vadd.f32 %v4357_v53, %v4174_v19 }
 0x6fc   : > { %7579 = vmatmul.msk.f32.gmra.mxu0 %vm471_vm1, %v11078_v37  ;;  %v15051_v37 = vld [vmem:[#allocation3_spill] sm:$0xff] }
 0x6fd   : > { %v4489_v2 = vrot.slane %v4435_v42, 7  ;;  %7467 = vmatmul.msk.f32.gmra.mxu2 %vm471_vm1, %v15051_v37 }
 0x6fe   : > { %v4360_v12 = vpop.f32.mrf.mxu3 }
 0x6ff   : > { %v12022_v9 = vsel %vm1293_vm2, %v4488_v50, %v4489_v2 }
 0x700   : > { %v3997_v15 = vpop.f32.mrf.mxu1  ;;  %15053 = vst [vmem:[#allocation161_spill] sm:$0xff] %v12022_v9  ;;  %v4176_v18 = vpop.f32.mrf.mxu2 }
 0x701   : > { %v12004_v7 = vpop.f32.mrf.mxu0  ;;  %v4177_v0 = vadd.f32 %v4176_v18, %v3994_v40 }
 0x702   : > { %15049 = vst [vmem:[#allocation158_spill] sm:$0xff] %v12004_v7 }
 0x703   : > { %7412 = vmatmul.msk.f32.gmra.mxu1 %vm471_vm1, %v11049_v8  ;;  %7525 = vmatmul.msk.f32.gmra.mxu3 %vm471_vm1, %v11098_v44  ;;  %v4436_v53 = vadd.f32 %v4360_v12, %v4177_v0 }
 0x704   : > { %7580 = vmatmul.msk.f32.gmra.mxu0 %vm471_vm1, %v11049_v8  ;;  %v15054_v8 = vld [vmem:[#allocation6_spill] sm:$0xff] }
 0x705   : > { %v4490_v42 = vrot.slane %v4436_v53, 7  ;;  %7468 = vmatmul.msk.f32.gmra.mxu2 %vm471_vm1, %v15054_v8 }
 0x706   : > { %v4363_v63 = vpop.f32.mrf.mxu3 }
 0x707   : > { %v12036_v9 = vsel %vm1293_vm2, %v4489_v2, %v4490_v42 }
 0x708   : > { %v4000_v7 = vpop.f32.mrf.mxu1  ;;  %15056 = vst [vmem:[#allocation162_spill] sm:$0xff] %v12036_v9  ;;  %v4179_v40 = vpop.f32.mrf.mxu2 }
 0x709   : > { %v12018_v14 = vpop.f32.mrf.mxu0  ;;  %v4180_v18 = vadd.f32 %v4179_v40, %v3997_v15 }
 0x70a   : > { %15052 = vst [vmem:[#allocation160_spill] sm:$0xff] %v12018_v14 }
 0x70b   : > { %7413 = vmatmul.msk.f32.gmra.mxu1 %vm471_vm1, %v11062_v27  ;;  %7526 = vmatmul.msk.f32.gmra.mxu3 %vm471_vm1, %v11113_v41  ;;  %v4437_v12 = vadd.f32 %v4363_v63, %v4180_v18 }
 0x70c   : > { %7581 = vmatmul.msk.f32.gmra.mxu0 %vm471_vm1, %v11062_v27  ;;  %v15057_v27 = vld [vmem:[#allocation4_spill] sm:$0xff] }
 0x70d   : > { %v4491_v53 = vrot.slane %v4437_v12, 7  ;;  %7469 = vmatmul.msk.f32.gmra.mxu2 %vm471_vm1, %v15057_v27 }
 0x70e   : > { %v4366_v19 = vpop.f32.mrf.mxu3 }
 0x70f   : > { %v12050_v9 = vsel %vm1293_vm2, %v4490_v42, %v4491_v53 }
 0x710   : > { %v4003_v14 = vpop.f32.mrf.mxu1  ;;  %15059 = vst [vmem:[#allocation163_spill] sm:$0xff] %v12050_v9  ;;  %v4182_v15 = vpop.f32.mrf.mxu2 }
 0x711   : > { %v12032_v50 = vpop.f32.mrf.mxu0  ;;  %v4183_v40 = vadd.f32 %v4182_v15, %v4000_v7 }
 0x712   : > { %15055 = vst [vmem:[#allocation6_spill] sm:$0xff] %v12032_v50 }
 0x713   : > { %7414 = vmatmul.msk.f32.gmra.mxu1 %vm471_vm1, %v11082_v31  ;;  %7527 = vmatmul.msk.f32.gmra.mxu3 %vm471_vm1, %v15051_v37  ;;  %v4438_v63 = vadd.f32 %v4366_v19, %v4183_v40 }
 0x714   : > { %7582 = vmatmul.msk.f32.gmra.mxu0 %vm471_vm1, %v11082_v31  ;;  %v15060_v31 = vld [vmem:[#allocation5_spill] sm:$0xff] }
 0x715   : > { %v4492_v12 = vrot.slane %v4438_v63, 7  ;;  %7470 = vmatmul.msk.f32.gmra.mxu2 %vm471_vm1, %v15060_v31 }
 0x716   : > { %v4369_v0 = vpop.f32.mrf.mxu3 }
 0x717   : > { %v12064_v9 = vsel %vm1293_vm2, %v4491_v53, %v4492_v12 }
 0x718   : > { %v4006_v50 = vpop.f32.mrf.mxu1  ;;  %15062 = vst [vmem:[#allocation165_spill] sm:$0xff] %v12064_v9  ;;  %v4185_v7 = vpop.f32.mrf.mxu2 }
 0x719   : > { %v12046_v2 = vpop.f32.mrf.mxu0  ;;  %v4186_v15 = vadd.f32 %v4185_v7, %v4003_v14 }
 0x71a   : > { %15058 = vst [vmem:[#allocation4_spill] sm:$0xff] %v12046_v2 }
 0x71b   : > { %7415 = vmatmul.msk.f32.gmra.mxu1 %vm471_vm1, %v11098_v44  ;;  %7528 = vmatmul.msk.f32.gmra.mxu3 %vm471_vm1, %v15054_v8  ;;  %v4439_v19 = vadd.f32 %v4369_v0, %v4186_v15 }
 0x71c   : > { %7583 = vmatmul.msk.f32.gmra.mxu0 %vm471_vm1, %v11098_v44  ;;  %v15063_v44 = vld [vmem:[#allocation52_spill] sm:$0xff] }
 0x71d   : > { %v4493_v63 = vrot.slane %v4439_v19, 7  ;;  %7471 = vmatmul.msk.f32.gmra.mxu2 %vm471_vm1, %v15063_v44 }
 0x71e   : > { %v4372_v18 = vpop.f32.mrf.mxu3 }
 0x71f   : > { %v12078_v9 = vsel %vm1293_vm2, %v4492_v12, %v4493_v63 }
 0x720   : > { %v4009_v2 = vpop.f32.mrf.mxu1  ;;  %15065 = vst [vmem:[#allocation167_spill] sm:$0xff] %v12078_v9  ;;  %v4188_v14 = vpop.f32.mrf.mxu2 }
 0x721   : > { %v12060_v42 = vpop.f32.mrf.mxu0  ;;  %v4189_v7 = vadd.f32 %v4188_v14, %v4006_v50 }
 0x722   : > { %15061 = vst [vmem:[#allocation164_spill] sm:$0xff] %v12060_v42 }
 0x723   : > { %7416 = vmatmul.msk.f32.gmra.mxu1 %vm471_vm1, %v11113_v41  ;;  %7529 = vmatmul.msk.f32.gmra.mxu3 %vm471_vm1, %v15057_v27  ;;  %v4440_v0 = vadd.f32 %v4372_v18, %v4189_v7 }
 0x724   : > { %7584 = vmatmul.msk.f32.gmra.mxu0 %vm471_vm1, %v11113_v41  ;;  %v15066_v41 = vld [vmem:[#allocation49_spill] sm:$0xff] }
 0x725   : > { %v4494_v19 = vrot.slane %v4440_v0, 7  ;;  %7472 = vmatmul.msk.f32.gmra.mxu2 %vm471_vm1, %v15066_v41 }
 0x726   : > { %v4375_v40 = vpop.f32.mrf.mxu3 }
 0x727   : > { %v12092_v9 = vsel %vm1293_vm2, %v4493_v63, %v4494_v19 }
 0x728   : > { %v4012_v42 = vpop.f32.mrf.mxu1  ;;  %15068 = vst [vmem:[#allocation169_spill] sm:$0xff] %v12092_v9  ;;  %v4191_v50 = vpop.f32.mrf.mxu2 }
 0x729   : > { %v12074_v53 = vpop.f32.mrf.mxu0  ;;  %v4192_v14 = vadd.f32 %v4191_v50, %v4009_v2 }
 0x72a   : > { %15064 = vst [vmem:[#allocation166_spill] sm:$0xff] %v12074_v53 }
 0x72b   : > { %7417 = vmatmul.msk.f32.gmra.mxu1 %vm471_vm1, %v15051_v37  ;;  %7530 = vmatmul.msk.f32.gmra.mxu3 %vm471_vm1, %v15060_v31  ;;  %v4441_v18 = vadd.f32 %v4375_v40, %v4192_v14 }
 0x72c   : > { %7585 = vmatmul.msk.f32.gmra.mxu0 %vm471_vm1, %v15051_v37  ;;  %v15069_v37 = vld [vmem:[#allocation55_spill] sm:$0xff] }
 0x72d   : > { %v4495_v0 = vrot.slane %v4441_v18, 7  ;;  %7473 = vmatmul.msk.f32.gmra.mxu2 %vm471_vm1, %v15069_v37 }
 0x72e   : > { %v4378_v15 = vpop.f32.mrf.mxu3 }
 0x72f   : > { %v12106_v9 = vsel %vm1293_vm2, %v4494_v19, %v4495_v0 }
 0x730   : > { %v4015_v53 = vpop.f32.mrf.mxu1  ;;  %15071 = vst [vmem:[#allocation171_spill] sm:$0xff] %v12106_v9  ;;  %v4194_v2 = vpop.f32.mrf.mxu2 }
 0x731   : > { %v12088_v12 = vpop.f32.mrf.mxu0  ;;  %v4195_v50 = vadd.f32 %v4194_v2, %v4012_v42 }
 0x732   : > { %15067 = vst [vmem:[#allocation168_spill] sm:$0xff] %v12088_v12 }
 0x733   : > { %7418 = vmatmul.msk.f32.gmra.mxu1 %vm471_vm1, %v15054_v8  ;;  %7531 = vmatmul.msk.f32.gmra.mxu3 %vm471_vm1, %v15063_v44  ;;  %v4442_v40 = vadd.f32 %v4378_v15, %v4195_v50 }
 0x734   : > { %7586 = vmatmul.msk.f32.gmra.mxu0 %vm471_vm1, %v15054_v8 }
 0x735   : > { %v4496_v18 = vrot.slane %v4442_v40, 7  ;;  %7474 = vmatmul.msk.f32.gmra.mxu2 %vm471_vm1, %v11209_v57 }
 0x736   : > { %v4381_v7 = vpop.f32.mrf.mxu3 }
 0x737   : > { %v12120_v9 = vsel %vm1293_vm2, %v4495_v0, %v4496_v18 }
 0x738   : > { %v4018_v12 = vpop.f32.mrf.mxu1  ;;  %15073 = vst [vmem:[#allocation173_spill] sm:$0xff] %v12120_v9  ;;  %v4197_v42 = vpop.f32.mrf.mxu2 }
 0x739   : > { %v12102_v63 = vpop.f32.mrf.mxu0  ;;  %v4198_v2 = vadd.f32 %v4197_v42, %v4015_v53 }
 0x73a   : > { %15070 = vst [vmem:[#allocation170_spill] sm:$0xff] %v12102_v63 }
 0x73b   : > { %7419 = vmatmul.msk.f32.gmra.mxu1 %vm471_vm1, %v15057_v27  ;;  %7532 = vmatmul.msk.f32.gmra.mxu3 %vm471_vm1, %v15066_v41  ;;  %v4443_v15 = vadd.f32 %v4381_v7, %v4198_v2 }
 0x73c   : > { %7587 = vmatmul.msk.f32.gmra.mxu0 %vm471_vm1, %v15057_v27 }
 0x73d   : > { %v4497_v40 = vrot.slane %v4443_v15, 7  ;;  %7475 = vmatmul.msk.f32.gmra.mxu2 %vm471_vm1, %v11221_v30 }
 0x73e   : > { %v4384_v14 = vpop.f32.mrf.mxu3 }
 0x73f   : > { %v12134_v9 = vsel %vm1293_vm2, %v4496_v18, %v4497_v40 }
 0x740   : > { %v4021_v63 = vpop.f32.mrf.mxu1  ;;  %15075 = vst [vmem:[#allocation175_spill] sm:$0xff] %v12134_v9  ;;  %v4200_v53 = vpop.f32.mrf.mxu2 }
 0x741   : > { %v12116_v19 = vpop.f32.mrf.mxu0  ;;  %v4201_v42 = vadd.f32 %v4200_v53, %v4018_v12 }
 0x742   : > { %15072 = vst [vmem:[#allocation172_spill] sm:$0xff] %v12116_v19 }
 0x743   : > { %7420 = vmatmul.msk.f32.gmra.mxu1 %vm471_vm1, %v15060_v31  ;;  %7533 = vmatmul.msk.f32.gmra.mxu3 %vm471_vm1, %v15069_v37  ;;  %v4444_v7 = vadd.f32 %v4384_v14, %v4201_v42 }
 0x744   : > { %7588 = vmatmul.msk.f32.gmra.mxu0 %vm471_vm1, %v15060_v31 }
 0x745   : > { %v4498_v15 = vrot.slane %v4444_v7, 7  ;;  %7476 = vmatmul.msk.f32.gmra.mxu2 %vm471_vm1, %v11233_v10 }
 0x746   : > { %v4387_v50 = vpop.f32.mrf.mxu3 }
 0x747   : > { %v12146_v9 = vsel %vm1293_vm2, %v4497_v40, %v4498_v15 }
 0x748   : > { %v4024_v19 = vpop.f32.mrf.mxu1  ;;  %15076 = vst [vmem:[#allocation176_spill] sm:$0xff] %v12146_v9  ;;  %v4203_v31 = vpop.f32.mrf.mxu2 }
 0x749   : > { %v12130_v0 = vpop.f32.mrf.mxu0  ;;  %v4204_v12 = vadd.f32 %v4203_v31, %v4021_v63 }
 0x74a   : > { %15074 = vst [vmem:[#allocation174_spill] sm:$0xff] %v12130_v0 }
 0x74b   : > { %7421 = vmatmul.msk.f32.gmra.mxu1 %vm471_vm1, %v15063_v44  ;;  %7534 = vmatmul.msk.f32.gmra.mxu3 %vm471_vm1, %v11209_v57  ;;  %v4445_v14 = vadd.f32 %v4387_v50, %v4204_v12 }
 0x74c   : > { %7589 = vmatmul.msk.f32.gmra.mxu0 %vm471_vm1, %v15063_v44 }
 0x74d   : > { %v4499_v42 = vrot.slane %v4445_v14, 7  ;;  %7477 = vmatmul.msk.f32.gmra.mxu2 %vm471_vm1, %v11245_v39 }
 0x74e   : > { %v4390_v2 = vpop.f32.mrf.mxu3 }
 0x74f   : > { %v12160_v44 = vsel %vm1293_vm2, %v4498_v15, %v4499_v42 }
 0x750   : > { %v4761_v0 = vpop.f32.mrf.mxu1  ;;  %15078 = vst [vmem:[#allocation178_spill] sm:$0xff] %v12160_v44  ;;  %v4206_v31 = vpop.f32.mrf.mxu2 }
 0x751   : > { %v5421_v18 = vpop.f32.mrf.mxu0  ;;  %v4207_v63 = vadd.f32 %v4206_v31, %v4024_v19 }
 0x753   : > { %7422 = vmatmul.msk.f32.gmra.mxu1 %vm471_vm1, %v15066_v41  ;;  %7535 = vmatmul.msk.f32.gmra.mxu3 %vm471_vm1, %v11221_v30  ;;  %v4446_v50 = vadd.f32 %v4390_v2, %v4207_v63 }
 0x754   : > { %7590 = vmatmul.msk.f32.gmra.mxu0 %vm471_vm1, %v15066_v41 }
 0x755   : > { %v4500_v12 = vrot.slane %v4446_v50, 7  ;;  %7478 = vmatmul.msk.f32.gmra.mxu2 %vm471_vm1, %v11257_v56 }
 0x756   : > { %v5239_v53 = vpop.f32.mrf.mxu3 }
 0x757   : > { %v12156_v7 = vadd.f32 %v5421_v18, %v5239_v53  ;;  %v15079_v53 = vld [vmem:[#allocation56_spill] sm:$0xff] }
 0x758   : > { %v4764_v40 = vpop.f32.mrf.mxu1  ;;  %v4762_v44 = vadd.f32 %v4761_v0, %v15079_v53  ;;  %v4945_v2 = vpop.f32.mrf.mxu2  ;;  %v15084_v53 = vld [vmem:[#allocation73_spill] sm:$0xff] }
 0x759   : > { %15077 = vst [vmem:[#allocation177_spill] sm:$0xff] %v12156_v7  ;;  %v5424_v9 = vpop.f32.mrf.mxu0  ;;  %v15080_v7 = vld [vmem:[#allocation65_spill] sm:$0xff] }
 0x75a   : > { %v15081_v41 = vrot.slane %v15080_v7, 7  ;;  %v5107_v63 = vadd.f32 %v4945_v2, %v4762_v44  ;;  %v15083_v7 = vld [vmem:[#allocation58_spill] sm:$0xff] }
 0x75b   : > { %7423 = vmatmul.msk.f32.gmra.mxu1 %vm471_vm1, %v15069_v37  ;;  %7536 = vmatmul.msk.f32.gmra.mxu3 %vm471_vm1, %v11233_v10  ;;  %v4765_v50 = vadd.f32 %v4764_v40, %v15083_v7 }
 0x75c   : > { %7591 = vmatmul.msk.f32.gmra.mxu0 %vm471_vm1, %v15069_v37  ;;  %v4554_v19 = vsel %vm1293_vm2, %v4500_v12, %v15081_v41  ;;  %v12179_v37 = vsel %vm1293_vm2, %v4499_v42, %v4500_v12 }
 0x75d   : > { %15082 = vst [vmem:[#allocation56_spill] sm:$0xff] %v12179_v37  ;;  %7479 = vmatmul.msk.f32.gmra.mxu2 %vm471_vm1, %v11271_v32 }
 0x75e   : > { %v5242_v18 = vpop.f32.mrf.mxu3 }
 0x75f   : > { %v12170_v14 = vadd.f32 %v5424_v9, %v5242_v18  ;;  %v12187_v9 = vadd.f32 %v5107_v63, %v4554_v19  ;;  %v15086_v63 = vld [vmem:[#allocation61_spill] sm:$0xff] }
 0x760   : > { %v4767_v15 = vpop.f32.mrf.mxu1  ;;  %v4948_v12 = vpop.f32.mrf.mxu2 }
 0x761   : > { %v5427_v31 = vpop.f32.mrf.mxu0  ;;  %v5108_v44 = vadd.f32 %v4948_v12, %v4765_v50 }
 0x763   : > { %7424 = vmatmul.msk.f32.gmra.mxu1 %vm471_vm1, %v11209_v57  ;;  %7537 = vmatmul.msk.f32.gmra.mxu3 %vm471_vm1, %v11245_v39  ;;  %v12201_v19 = vadd.f32 %v5108_v44, %v15084_v53  ;;  %v15087_v44 = vld [vmem:[#allocation78_spill] sm:$0xff] }
 0x764   : > { %7592 = vmatmul.msk.f32.gmra.mxu0 %vm471_vm1, %v11209_v57 }
 0x765   : > { %7480 = vmatmul.msk.f32.gmra.mxu2 %vm471_vm1, %v11285_v55 }
 0x766   : > { %v5245_v0 = vpop.f32.mrf.mxu3 }
 0x767   : > { %v12191_v41 = vadd.f32 %v5427_v31, %v5245_v0  ;;  %v4768_v0 = vadd.f32 %v4767_v15, %v15086_v63  ;;  %v15090_v63 = vld [vmem:[#allocation68_spill] sm:$0xff] }
 0x768   : > { %v4770_v42 = vpop.f32.mrf.mxu1  ;;  %v4951_v50 = vpop.f32.mrf.mxu2 }
 0x769   : > { %v5430_v18 = vpop.f32.mrf.mxu0  ;;  %v5109_v12 = vadd.f32 %v4951_v50, %v4768_v0  ;;  %v4771_v37 = vadd.f32 %v4770_v42, %v15090_v63  ;;  %v15094_v63 = vld [vmem:[#allocation71_spill] sm:$0xff] }
 0x76b   : > { %7425 = vmatmul.msk.f32.gmra.mxu1 %vm471_vm1, %v11221_v30  ;;  %7538 = vmatmul.msk.f32.gmra.mxu3 %vm471_vm1, %v11257_v56  ;;  %v12215_v53 = vadd.f32 %v5109_v12, %v15087_v44  ;;  %v15091_v12 = vld [vmem:[#allocation82_spill] sm:$0xff] }
 0x76c   : > { %7593 = vmatmul.msk.f32.gmra.mxu0 %vm471_vm1, %v11221_v30 }
 0x76d   : > { %15088 = vst [vmem:[#allocation58_spill] sm:$0xff] %v12215_v53  ;;  %7481 = vmatmul.msk.f32.gmra.mxu2 %vm471_vm1, %v11301_v29 }
 0x76e   : > { %v5248_v31 = vpop.f32.mrf.mxu3 }
 0x76f   : > { %v12205_v40 = vadd.f32 %v5430_v18, %v5248_v31 }
 0x770   : > { %v4773_v2 = vpop.f32.mrf.mxu1  ;;  %v4954_v0 = vpop.f32.mrf.mxu2 }
 0x771   : > { %15085 = vst [vmem:[#allocation65_spill] sm:$0xff] %v12205_v40  ;;  %v5433_v7 = vpop.f32.mrf.mxu0  ;;  %v5110_v50 = vadd.f32 %v4954_v0, %v4771_v37 }
 0x773   : > { %7426 = vmatmul.msk.f32.gmra.mxu1 %vm471_vm1, %v11233_v10  ;;  %7539 = vmatmul.msk.f32.gmra.mxu3 %vm471_vm1, %v11271_v32  ;;  %v12229_v44 = vadd.f32 %v5110_v50, %v15091_v12  ;;  %v15095_v50 = vld [vmem:[#allocation85_spill] sm:$0xff] }
 0x774   : > { %7594 = vmatmul.msk.f32.gmra.mxu0 %vm471_vm1, %v11233_v10 }
 0x775   : > { %15092 = vst [vmem:[#allocation61_spill] sm:$0xff] %v12229_v44  ;;  %7482 = vmatmul.msk.f32.gmra.mxu2 %vm471_vm1, %v11316_v25 }
 0x776   : > { %v5251_v18 = vpop.f32.mrf.mxu3 }
 0x777   : > { %v12219_v15 = vadd.f32 %v5433_v7, %v5251_v18 }
 0x778   : > { %v4776_v31 = vpop.f32.mrf.mxu1  ;;  %v4957_v37 = vpop.f32.mrf.mxu2 }
 0x779   : > { %15089 = vst [vmem:[#allocation73_spill] sm:$0xff] %v12219_v15  ;;  %v5436_v40 = vpop.f32.mrf.mxu0  ;;  %v4774_v15 = vadd.f32 %v4773_v2, %v15094_v63  ;;  %v15098_v63 = vld [vmem:[#allocation76_spill] sm:$0xff] }
 0x77b   : > { %7427 = vmatmul.msk.f32.gmra.mxu1 %vm471_vm1, %v11245_v39  ;;  %7540 = vmatmul.msk.f32.gmra.mxu3 %vm471_vm1, %v11285_v55  ;;  %v5111_v0 = vadd.f32 %v4957_v37, %v4774_v15 }
 0x77c   : > { %7595 = vmatmul.msk.f32.gmra.mxu0 %vm471_vm1, %v11245_v39 }
 0x77d   : > { %v12243_v12 = vadd.f32 %v5111_v0, %v15095_v50  ;;  %7483 = vmatmul.msk.f32.gmra.mxu2 %vm471_vm1, %v11336_v49  ;;  %v15099_v0 = vld [vmem:[#allocation89_spill] sm:$0xff] }
 0x77e   : > { %v5254_v7 = vpop.f32.mrf.mxu3 }
 0x77f   : > { %v12233_v42 = vadd.f32 %v5436_v40, %v5254_v7  ;;  %15096 = vst [vmem:[#allocation68_spill] sm:$0xff] %v12243_v12 }
 0x780   : > { %v4779_v18 = vpop.f32.mrf.mxu1  ;;  %v4960_v15 = vpop.f32.mrf.mxu2 }
 0x781   : > { %15093 = vst [vmem:[#allocation78_spill] sm:$0xff] %v12233_v42  ;;  %v5439_v53 = vpop.f32.mrf.mxu0  ;;  %v4777_v42 = vadd.f32 %v4776_v31, %v15098_v63  ;;  %v15102_v63 = vld [vmem:[#allocation79_spill] sm:$0xff] }
 0x783   : > { %7428 = vmatmul.msk.f32.gmra.mxu1 %vm471_vm1, %v11257_v56  ;;  %7541 = vmatmul.msk.f32.gmra.mxu3 %vm471_vm1, %v11301_v29  ;;  %v5112_v37 = vadd.f32 %v4960_v15, %v4777_v42 }
 0x784   : > { %7596 = vmatmul.msk.f32.gmra.mxu0 %vm471_vm1, %v11257_v56 }
 0x785   : > { %v12257_v50 = vadd.f32 %v5112_v37, %v15099_v0  ;;  %7484 = vmatmul.msk.f32.gmra.mxu2 %vm471_vm1, %v11354_v21  ;;  %v15103_v37 = vld [vmem:[#allocation93_spill] sm:$0xff] }
 0x786   : > { %v5257_v40 = vpop.f32.mrf.mxu3 }
 0x787   : > { %v12247_v2 = vadd.f32 %v5439_v53, %v5257_v40  ;;  %15100 = vst [vmem:[#allocation71_spill] sm:$0xff] %v12257_v50 }
 0x788   : > { %v4782_v7 = vpop.f32.mrf.mxu1  ;;  %v4963_v42 = vpop.f32.mrf.mxu2 }
 0x789   : > { %15097 = vst [vmem:[#allocation82_spill] sm:$0xff] %v12247_v2  ;;  %v5442_v44 = vpop.f32.mrf.mxu0  ;;  %v4780_v2 = vadd.f32 %v4779_v18, %v15102_v63  ;;  %v15106_v63 = vld [vmem:[#allocation83_spill] sm:$0xff] }
 0x78b   : > { %7429 = vmatmul.msk.f32.gmra.mxu1 %vm471_vm1, %v11271_v32  ;;  %7542 = vmatmul.msk.f32.gmra.mxu3 %vm471_vm1, %v11316_v25  ;;  %v5113_v15 = vadd.f32 %v4963_v42, %v4780_v2 }
 0x78c   : > { %7597 = vmatmul.msk.f32.gmra.mxu0 %vm471_vm1, %v11271_v32 }
 0x78d   : > { %v12271_v0 = vadd.f32 %v5113_v15, %v15103_v37  ;;  %7485 = vmatmul.msk.f32.gmra.mxu2 %vm471_vm1, %v11372_v35  ;;  %v15107_v15 = vld [vmem:[#allocation97_spill] sm:$0xff] }
 0x78e   : > { %v5260_v53 = vpop.f32.mrf.mxu3 }
 0x78f   : > { %v12261_v31 = vadd.f32 %v5442_v44, %v5260_v53  ;;  %15104 = vst [vmem:[#allocation76_spill] sm:$0xff] %v12271_v0 }
 0x790   : > { %v4785_v40 = vpop.f32.mrf.mxu1  ;;  %v4966_v2 = vpop.f32.mrf.mxu2 }
 0x791   : > { %15101 = vst [vmem:[#allocation85_spill] sm:$0xff] %v12261_v31  ;;  %v5445_v12 = vpop.f32.mrf.mxu0  ;;  %v4783_v31 = vadd.f32 %v4782_v7, %v15106_v63  ;;  %v15110_v63 = vld [vmem:[#allocation86_spill] sm:$0xff] }
 0x793   : > { %7430 = vmatmul.msk.f32.gmra.mxu1 %vm471_vm1, %v11285_v55  ;;  %7543 = vmatmul.msk.f32.gmra.mxu3 %vm471_vm1, %v11336_v49  ;;  %v5114_v42 = vadd.f32 %v4966_v2, %v4783_v31 }
 0x794   : > { %7598 = vmatmul.msk.f32.gmra.mxu0 %vm471_vm1, %v11285_v55 }
 0x795   : > { %v12285_v37 = vadd.f32 %v5114_v42, %v15107_v15  ;;  %7486 = vmatmul.msk.f32.gmra.mxu2 %vm471_vm1, %v11390_v17  ;;  %v15111_v42 = vld [vmem:[#allocation18_spill] sm:$0xff] }
 0x796   : > { %v5263_v44 = vpop.f32.mrf.mxu3 }
 0x797   : > { %v12275_v18 = vadd.f32 %v5445_v12, %v5263_v44  ;;  %15108 = vst [vmem:[#allocation79_spill] sm:$0xff] %v12285_v37 }
 0x798   : > { %v4788_v53 = vpop.f32.mrf.mxu1  ;;  %v4969_v31 = vpop.f32.mrf.mxu2 }
 0x799   : > { %15105 = vst [vmem:[#allocation89_spill] sm:$0xff] %v12275_v18  ;;  %v5448_v50 = vpop.f32.mrf.mxu0  ;;  %v4786_v18 = vadd.f32 %v4785_v40, %v15110_v63  ;;  %v15114_v63 = vld [vmem:[#allocation90_spill] sm:$0xff] }
 0x79b   : > { %7431 = vmatmul.msk.f32.gmra.mxu1 %vm471_vm1, %v11301_v29  ;;  %7544 = vmatmul.msk.f32.gmra.mxu3 %vm471_vm1, %v11354_v21  ;;  %v5115_v2 = vadd.f32 %v4969_v31, %v4786_v18 }
 0x79c   : > { %7599 = vmatmul.msk.f32.gmra.mxu0 %vm471_vm1, %v11301_v29 }
 0x79d   : > { %v12299_v15 = vadd.f32 %v5115_v2, %v15111_v42  ;;  %7487 = vmatmul.msk.f32.gmra.mxu2 %vm471_vm1, %v11408_v45  ;;  %v15115_v2 = vld [vmem:[#allocation28_spill] sm:$0xff] }
 0x79e   : > { %v5266_v12 = vpop.f32.mrf.mxu3 }
 0x79f   : > { %v12289_v7 = vadd.f32 %v5448_v50, %v5266_v12  ;;  %15112 = vst [vmem:[#allocation83_spill] sm:$0xff] %v12299_v15 }
 0x7a0   : > { %v4791_v44 = vpop.f32.mrf.mxu1  ;;  %v4972_v18 = vpop.f32.mrf.mxu2 }
 0x7a1   : > { %15109 = vst [vmem:[#allocation93_spill] sm:$0xff] %v12289_v7  ;;  %v5451_v0 = vpop.f32.mrf.mxu0  ;;  %v4789_v7 = vadd.f32 %v4788_v53, %v15114_v63  ;;  %v15118_v63 = vld [vmem:[#allocation95_spill] sm:$0xff] }
 0x7a3   : > { %7432 = vmatmul.msk.f32.gmra.mxu1 %vm471_vm1, %v11316_v25  ;;  %7545 = vmatmul.msk.f32.gmra.mxu3 %vm471_vm1, %v11372_v35  ;;  %v5116_v31 = vadd.f32 %v4972_v18, %v4789_v7 }
 0x7a4   : > { %7600 = vmatmul.msk.f32.gmra.mxu0 %vm471_vm1, %v11316_v25 }
 0x7a5   : > { %v12313_v42 = vadd.f32 %v5116_v31, %v15115_v2  ;;  %7488 = vmatmul.msk.f32.gmra.mxu2 %vm471_vm1, %v11426_v23  ;;  %v15119_v31 = vld [vmem:[#allocation32_spill] sm:$0xff] }
 0x7a6   : > { %v5269_v50 = vpop.f32.mrf.mxu3 }
 0x7a7   : > { %v12303_v40 = vadd.f32 %v5451_v0, %v5269_v50  ;;  %15116 = vst [vmem:[#allocation86_spill] sm:$0xff] %v12313_v42 }
 0x7a8   : > { %v4794_v12 = vpop.f32.mrf.mxu1  ;;  %v4975_v7 = vpop.f32.mrf.mxu2 }
 0x7a9   : > { %15113 = vst [vmem:[#allocation97_spill] sm:$0xff] %v12303_v40  ;;  %v5454_v37 = vpop.f32.mrf.mxu0  ;;  %v4792_v40 = vadd.f32 %v4791_v44, %v15118_v63  ;;  %v15122_v63 = vld [vmem:[#allocation99_spill] sm:$0xff] }
 0x7ab   : > { %7433 = vmatmul.msk.f32.gmra.mxu1 %vm471_vm1, %v11336_v49  ;;  %7546 = vmatmul.msk.f32.gmra.mxu3 %vm471_vm1, %v11390_v17  ;;  %v5117_v18 = vadd.f32 %v4975_v7, %v4792_v40 }
 0x7ac   : > { %7601 = vmatmul.msk.f32.gmra.mxu0 %vm471_vm1, %v11336_v49 }
 0x7ad   : > { %v12327_v2 = vadd.f32 %v5117_v18, %v15119_v31  ;;  %7489 = vmatmul.msk.f32.gmra.mxu2 %vm471_vm1, %v11444_v33  ;;  %v15123_v18 = vld [vmem:[#allocation100_spill] sm:$0xff] }
 0x7ae   : > { %v5272_v0 = vpop.f32.mrf.mxu3 }
 0x7af   : > { %v12317_v53 = vadd.f32 %v5454_v37, %v5272_v0  ;;  %15120 = vst [vmem:[#allocation90_spill] sm:$0xff] %v12327_v2 }
 0x7b0   : > { %v4797_v50 = vpop.f32.mrf.mxu1  ;;  %v4978_v40 = vpop.f32.mrf.mxu2 }
 0x7b1   : > { %15117 = vst [vmem:[#allocation18_spill] sm:$0xff] %v12317_v53  ;;  %v5457_v15 = vpop.f32.mrf.mxu0  ;;  %v4795_v53 = vadd.f32 %v4794_v12, %v15122_v63  ;;  %v15126_v63 = vld [vmem:[#allocation11_spill] sm:$0xff] }
 0x7b3   : > { %7434 = vmatmul.msk.f32.gmra.mxu1 %vm471_vm1, %v11354_v21  ;;  %7547 = vmatmul.msk.f32.gmra.mxu3 %vm471_vm1, %v11408_v45  ;;  %v5118_v7 = vadd.f32 %v4978_v40, %v4795_v53 }
 0x7b4   : > { %7602 = vmatmul.msk.f32.gmra.mxu0 %vm471_vm1, %v11354_v21 }
 0x7b5   : > { %v12341_v31 = vadd.f32 %v5118_v7, %v15123_v18  ;;  %7490 = vmatmul.msk.f32.gmra.mxu2 %vm471_vm1, %v11462_v47  ;;  %v15127_v7 = vld [vmem:[#allocation102_spill] sm:$0xff] }
 0x7b6   : > { %v5275_v37 = vpop.f32.mrf.mxu3 }
 0x7b7   : > { %v12331_v44 = vadd.f32 %v5457_v15, %v5275_v37  ;;  %15124 = vst [vmem:[#allocation95_spill] sm:$0xff] %v12341_v31 }
 0x7b8   : > { %v4800_v0 = vpop.f32.mrf.mxu1  ;;  %v4981_v53 = vpop.f32.mrf.mxu2 }
 0x7b9   : > { %15121 = vst [vmem:[#allocation28_spill] sm:$0xff] %v12331_v44  ;;  %v5460_v42 = vpop.f32.mrf.mxu0  ;;  %v4798_v44 = vadd.f32 %v4797_v50, %v15126_v63  ;;  %v15130_v63 = vld [vmem:[#allocation31_spill] sm:$0xff] }
 0x7bb   : > { %7435 = vmatmul.msk.f32.gmra.mxu1 %vm471_vm1, %v11372_v35  ;;  %7548 = vmatmul.msk.f32.gmra.mxu3 %vm471_vm1, %v11426_v23  ;;  %v5119_v40 = vadd.f32 %v4981_v53, %v4798_v44 }
 0x7bc   : > { %7603 = vmatmul.msk.f32.gmra.mxu0 %vm471_vm1, %v11372_v35 }
 0x7bd   : > { %v12355_v18 = vadd.f32 %v5119_v40, %v15127_v7  ;;  %7491 = vmatmul.msk.f32.gmra.mxu2 %vm471_vm1, %v11480_v20  ;;  %v15131_v40 = vld [vmem:[#allocation104_spill] sm:$0xff] }
 0x7be   : > { %v5278_v15 = vpop.f32.mrf.mxu3 }
 0x7bf   : > { %v12345_v12 = vadd.f32 %v5460_v42, %v5278_v15  ;;  %15128 = vst [vmem:[#allocation99_spill] sm:$0xff] %v12355_v18 }
 0x7c0   : > { %v4803_v37 = vpop.f32.mrf.mxu1  ;;  %v4984_v44 = vpop.f32.mrf.mxu2 }
 0x7c1   : > { %15125 = vst [vmem:[#allocation32_spill] sm:$0xff] %v12345_v12  ;;  %v5463_v2 = vpop.f32.mrf.mxu0  ;;  %v4801_v12 = vadd.f32 %v4800_v0, %v15130_v63  ;;  %v15134_v63 = vld [vmem:[#allocation50_spill] sm:$0xff] }
 0x7c3   : > { %7436 = vmatmul.msk.f32.gmra.mxu1 %vm471_vm1, %v11390_v17  ;;  %7549 = vmatmul.msk.f32.gmra.mxu3 %vm471_vm1, %v11444_v33  ;;  %v5120_v53 = vadd.f32 %v4984_v44, %v4801_v12 }
 0x7c4   : > { %7604 = vmatmul.msk.f32.gmra.mxu0 %vm471_vm1, %v11390_v17 }
 0x7c5   : > { %v12369_v7 = vadd.f32 %v5120_v53, %v15131_v40  ;;  %7492 = vmatmul.msk.f32.gmra.mxu2 %vm471_vm1, %v11498_v6  ;;  %v15135_v53 = vld [vmem:[#allocation106_spill] sm:$0xff] }
 0x7c6   : > { %v5281_v42 = vpop.f32.mrf.mxu3 }
 0x7c7   : > { %v12359_v50 = vadd.f32 %v5463_v2, %v5281_v42  ;;  %15132 = vst [vmem:[#allocation11_spill] sm:$0xff] %v12369_v7 }
 0x7c8   : > { %v4806_v15 = vpop.f32.mrf.mxu1  ;;  %v4987_v12 = vpop.f32.mrf.mxu2 }
 0x7c9   : > { %15129 = vst [vmem:[#allocation100_spill] sm:$0xff] %v12359_v50  ;;  %v5466_v31 = vpop.f32.mrf.mxu0  ;;  %v4804_v50 = vadd.f32 %v4803_v37, %v15134_v63  ;;  %v15138_v63 = vld [vmem:[#allocation101_spill] sm:$0xff] }
 0x7cb   : > { %7437 = vmatmul.msk.f32.gmra.mxu1 %vm471_vm1, %v11408_v45  ;;  %7550 = vmatmul.msk.f32.gmra.mxu3 %vm471_vm1, %v11462_v47  ;;  %v5121_v44 = vadd.f32 %v4987_v12, %v4804_v50 }
 0x7cc   : > { %7605 = vmatmul.msk.f32.gmra.mxu0 %vm471_vm1, %v11408_v45 }
 0x7cd   : > { %v12383_v40 = vadd.f32 %v5121_v44, %v15135_v53  ;;  %7493 = vmatmul.msk.f32.gmra.mxu2 %vm471_vm1, %v11516_v13  ;;  %v15139_v44 = vld [vmem:[#allocation108_spill] sm:$0xff] }
 0x7ce   : > { %v5284_v2 = vpop.f32.mrf.mxu3 }
 0x7cf   : > { %v12373_v0 = vadd.f32 %v5466_v31, %v5284_v2  ;;  %15136 = vst [vmem:[#allocation31_spill] sm:$0xff] %v12383_v40 }
 0x7d0   : > { %v4809_v42 = vpop.f32.mrf.mxu1  ;;  %v4990_v50 = vpop.f32.mrf.mxu2 }
 0x7d1   : > { %15133 = vst [vmem:[#allocation102_spill] sm:$0xff] %v12373_v0  ;;  %v5469_v18 = vpop.f32.mrf.mxu0  ;;  %v4807_v0 = vadd.f32 %v4806_v15, %v15138_v63  ;;  %v15142_v63 = vld [vmem:[#allocation103_spill] sm:$0xff] }
 0x7d3   : > { %7438 = vmatmul.msk.f32.gmra.mxu1 %vm471_vm1, %v11426_v23  ;;  %7551 = vmatmul.msk.f32.gmra.mxu3 %vm471_vm1, %v11480_v20  ;;  %v5122_v12 = vadd.f32 %v4990_v50, %v4807_v0 }
 0x7d4   : > { %7606 = vmatmul.msk.f32.gmra.mxu0 %vm471_vm1, %v11426_v23 }
 0x7d5   : > { %v12397_v53 = vadd.f32 %v5122_v12, %v15139_v44  ;;  %7494 = vmatmul.msk.f32.gmra.mxu2 %vm471_vm1, %v11534_v54  ;;  %v15143_v12 = vld [vmem:[#allocation110_spill] sm:$0xff] }
 0x7d6   : > { %v5287_v31 = vpop.f32.mrf.mxu3 }
 0x7d7   : > { %v12387_v37 = vadd.f32 %v5469_v18, %v5287_v31  ;;  %15140 = vst [vmem:[#allocation50_spill] sm:$0xff] %v12397_v53 }
 0x7d8   : > { %v4812_v2 = vpop.f32.mrf.mxu1  ;;  %v4993_v0 = vpop.f32.mrf.mxu2 }
 0x7d9   : > { %15137 = vst [vmem:[#allocation104_spill] sm:$0xff] %v12387_v37  ;;  %v5472_v7 = vpop.f32.mrf.mxu0  ;;  %v4810_v37 = vadd.f32 %v4809_v42, %v15142_v63  ;;  %v15146_v63 = vld [vmem:[#allocation105_spill] sm:$0xff] }
 0x7db   : > { %7439 = vmatmul.msk.f32.gmra.mxu1 %vm471_vm1, %v11444_v33  ;;  %7552 = vmatmul.msk.f32.gmra.mxu3 %vm471_vm1, %v11498_v6  ;;  %v5123_v50 = vadd.f32 %v4993_v0, %v4810_v37 }
 0x7dc   : > { %7607 = vmatmul.msk.f32.gmra.mxu0 %vm471_vm1, %v11444_v33 }
 0x7dd   : > { %v12411_v44 = vadd.f32 %v5123_v50, %v15143_v12  ;;  %7495 = vmatmul.msk.f32.gmra.mxu2 %vm471_vm1, %v11552_v51  ;;  %v15147_v50 = vld [vmem:[#allocation112_spill] sm:$0xff] }
 0x7de   : > { %v5290_v18 = vpop.f32.mrf.mxu3 }
 0x7df   : > { %v12401_v15 = vadd.f32 %v5472_v7, %v5290_v18  ;;  %15144 = vst [vmem:[#allocation101_spill] sm:$0xff] %v12411_v44 }
 0x7e0   : > { %v4815_v31 = vpop.f32.mrf.mxu1  ;;  %v4996_v37 = vpop.f32.mrf.mxu2 }
 0x7e1   : > { %15141 = vst [vmem:[#allocation106_spill] sm:$0xff] %v12401_v15  ;;  %v5475_v40 = vpop.f32.mrf.mxu0  ;;  %v4813_v15 = vadd.f32 %v4812_v2, %v15146_v63  ;;  %v15150_v63 = vld [vmem:[#allocation107_spill] sm:$0xff] }
 0x7e3   : > { %7440 = vmatmul.msk.f32.gmra.mxu1 %vm471_vm1, %v11462_v47  ;;  %7553 = vmatmul.msk.f32.gmra.mxu3 %vm471_vm1, %v11516_v13  ;;  %v5124_v0 = vadd.f32 %v4996_v37, %v4813_v15 }
 0x7e4   : > { %7608 = vmatmul.msk.f32.gmra.mxu0 %vm471_vm1, %v11462_v47 }
 0x7e5   : > { %v12425_v12 = vadd.f32 %v5124_v0, %v15147_v50  ;;  %7496 = vmatmul.msk.f32.gmra.mxu2 %vm471_vm1, %v11570_v28  ;;  %v15151_v0 = vld [vmem:[#allocation114_spill] sm:$0xff] }
 0x7e6   : > { %v5293_v7 = vpop.f32.mrf.mxu3 }
 0x7e7   : > { %v12415_v42 = vadd.f32 %v5475_v40, %v5293_v7  ;;  %15148 = vst [vmem:[#allocation103_spill] sm:$0xff] %v12425_v12 }
 0x7e8   : > { %v4818_v18 = vpop.f32.mrf.mxu1  ;;  %v4999_v15 = vpop.f32.mrf.mxu2 }
 0x7e9   : > { %15145 = vst [vmem:[#allocation108_spill] sm:$0xff] %v12415_v42  ;;  %v5478_v53 = vpop.f32.mrf.mxu0  ;;  %v4816_v42 = vadd.f32 %v4815_v31, %v15150_v63  ;;  %v15154_v63 = vld [vmem:[#allocation109_spill] sm:$0xff] }
 0x7eb   : > { %7441 = vmatmul.msk.f32.gmra.mxu1 %vm471_vm1, %v11480_v20  ;;  %7554 = vmatmul.msk.f32.gmra.mxu3 %vm471_vm1, %v11534_v54  ;;  %v5125_v37 = vadd.f32 %v4999_v15, %v4816_v42 }
 0x7ec   : > { %7609 = vmatmul.msk.f32.gmra.mxu0 %vm471_vm1, %v11480_v20 }
 0x7ed   : > { %v12439_v50 = vadd.f32 %v5125_v37, %v15151_v0  ;;  %7497 = vmatmul.msk.f32.gmra.mxu2 %vm471_vm1, %v11588_v24  ;;  %v15155_v37 = vld [vmem:[#allocation116_spill] sm:$0xff] }
 0x7ee   : > { %v5296_v40 = vpop.f32.mrf.mxu3 }
 0x7ef   : > { %v12429_v2 = vadd.f32 %v5478_v53, %v5296_v40  ;;  %15152 = vst [vmem:[#allocation105_spill] sm:$0xff] %v12439_v50 }
 0x7f0   : > { %v4821_v7 = vpop.f32.mrf.mxu1  ;;  %v5002_v42 = vpop.f32.mrf.mxu2 }
 0x7f1   : > { %15149 = vst [vmem:[#allocation110_spill] sm:$0xff] %v12429_v2  ;;  %v5481_v44 = vpop.f32.mrf.mxu0  ;;  %v4819_v2 = vadd.f32 %v4818_v18, %v15154_v63  ;;  %v15158_v63 = vld [vmem:[#allocation111_spill] sm:$0xff] }
 0x7f3   : > { %7442 = vmatmul.msk.f32.gmra.mxu1 %vm471_vm1, %v11498_v6  ;;  %7555 = vmatmul.msk.f32.gmra.mxu3 %vm471_vm1, %v11552_v51  ;;  %v5126_v15 = vadd.f32 %v5002_v42, %v4819_v2 }
 0x7f4   : > { %7610 = vmatmul.msk.f32.gmra.mxu0 %vm471_vm1, %v11498_v6 }
 0x7f5   : > { %v12453_v0 = vadd.f32 %v5126_v15, %v15155_v37  ;;  %7498 = vmatmul.msk.f32.gmra.mxu2 %vm471_vm1, %v11606_v52  ;;  %v15159_v15 = vld [vmem:[#allocation118_spill] sm:$0xff] }
 0x7f6   : > { %v5299_v53 = vpop.f32.mrf.mxu3 }
 0x7f7   : > { %v12443_v31 = vadd.f32 %v5481_v44, %v5299_v53  ;;  %15156 = vst [vmem:[#allocation107_spill] sm:$0xff] %v12453_v0 }
 0x7f8   : > { %v4824_v40 = vpop.f32.mrf.mxu1  ;;  %v5005_v2 = vpop.f32.mrf.mxu2 }
 0x7f9   : > { %15153 = vst [vmem:[#allocation112_spill] sm:$0xff] %v12443_v31  ;;  %v5484_v12 = vpop.f32.mrf.mxu0  ;;  %v4822_v31 = vadd.f32 %v4821_v7, %v15158_v63  ;;  %v15162_v63 = vld [vmem:[#allocation113_spill] sm:$0xff] }
 0x7fb   : > { %7443 = vmatmul.msk.f32.gmra.mxu1 %vm471_vm1, %v11516_v13  ;;  %7556 = vmatmul.msk.f32.gmra.mxu3 %vm471_vm1, %v11570_v28  ;;  %v5127_v42 = vadd.f32 %v5005_v2, %v4822_v31 }
 0x7fc   : > { %7611 = vmatmul.msk.f32.gmra.mxu0 %vm471_vm1, %v11516_v13 }
 0x7fd   : > { %v12467_v37 = vadd.f32 %v5127_v42, %v15159_v15  ;;  %7499 = vmatmul.msk.f32.gmra.mxu2 %vm471_vm1, %v11624_v4  ;;  %v15163_v42 = vld [vmem:[#allocation120_spill] sm:$0xff] }
 0x7fe   : > { %v5302_v44 = vpop.f32.mrf.mxu3 }
 0x7ff   : > { %v12457_v18 = vadd.f32 %v5484_v12, %v5302_v44  ;;  %15160 = vst [vmem:[#allocation109_spill] sm:$0xff] %v12467_v37 }
 0x800   : > { %v4827_v53 = vpop.f32.mrf.mxu1  ;;  %v5008_v31 = vpop.f32.mrf.mxu2 }
 0x801   : > { %15157 = vst [vmem:[#allocation114_spill] sm:$0xff] %v12457_v18  ;;  %v5487_v50 = vpop.f32.mrf.mxu0  ;;  %v4825_v18 = vadd.f32 %v4824_v40, %v15162_v63  ;;  %v15166_v63 = vld [vmem:[#allocation115_spill] sm:$0xff] }
 0x803   : > { %7444 = vmatmul.msk.f32.gmra.mxu1 %vm471_vm1, %v11534_v54  ;;  %7557 = vmatmul.msk.f32.gmra.mxu3 %vm471_vm1, %v11588_v24  ;;  %v5128_v2 = vadd.f32 %v5008_v31, %v4825_v18 }
 0x804   : > { %7612 = vmatmul.msk.f32.gmra.mxu0 %vm471_vm1, %v11534_v54 }
 0x805   : > { %v12481_v15 = vadd.f32 %v5128_v2, %v15163_v42  ;;  %7500 = vmatmul.msk.f32.gmra.mxu2 %vm471_vm1, %v11642_v3  ;;  %v15167_v2 = vld [vmem:[#allocation122_spill] sm:$0xff] }
 0x806   : > { %v5305_v12 = vpop.f32.mrf.mxu3 }
 0x807   : > { %v12471_v7 = vadd.f32 %v5487_v50, %v5305_v12  ;;  %15164 = vst [vmem:[#allocation111_spill] sm:$0xff] %v12481_v15 }
 0x808   : > { %v4830_v44 = vpop.f32.mrf.mxu1  ;;  %v5011_v18 = vpop.f32.mrf.mxu2 }
 0x809   : > { %15161 = vst [vmem:[#allocation116_spill] sm:$0xff] %v12471_v7  ;;  %v5490_v0 = vpop.f32.mrf.mxu0  ;;  %v4828_v7 = vadd.f32 %v4827_v53, %v15166_v63  ;;  %v15170_v63 = vld [vmem:[#allocation117_spill] sm:$0xff] }
 0x80b   : > { %7445 = vmatmul.msk.f32.gmra.mxu1 %vm471_vm1, %v11552_v51  ;;  %7558 = vmatmul.msk.f32.gmra.mxu3 %vm471_vm1, %v11606_v52  ;;  %v5129_v31 = vadd.f32 %v5011_v18, %v4828_v7 }
 0x80c   : > { %7613 = vmatmul.msk.f32.gmra.mxu0 %vm471_vm1, %v11552_v51 }
 0x80d   : > { %v12495_v42 = vadd.f32 %v5129_v31, %v15167_v2  ;;  %7501 = vmatmul.msk.f32.gmra.mxu2 %vm471_vm1, %v11660_v58  ;;  %v15171_v31 = vld [vmem:[#allocation124_spill] sm:$0xff] }
 0x80e   : > { %v5308_v50 = vpop.f32.mrf.mxu3 }
 0x80f   : > { %v12485_v40 = vadd.f32 %v5490_v0, %v5308_v50  ;;  %15168 = vst [vmem:[#allocation113_spill] sm:$0xff] %v12495_v42 }
 0x810   : > { %v4833_v12 = vpop.f32.mrf.mxu1  ;;  %v5014_v7 = vpop.f32.mrf.mxu2 }
 0x811   : > { %15165 = vst [vmem:[#allocation118_spill] sm:$0xff] %v12485_v40  ;;  %v5493_v37 = vpop.f32.mrf.mxu0  ;;  %v4831_v40 = vadd.f32 %v4830_v44, %v15170_v63  ;;  %v15174_v63 = vld [vmem:[#allocation119_spill] sm:$0xff] }
 0x813   : > { %7446 = vmatmul.msk.f32.gmra.mxu1 %vm471_vm1, %v11570_v28  ;;  %7559 = vmatmul.msk.f32.gmra.mxu3 %vm471_vm1, %v11624_v4  ;;  %v5130_v18 = vadd.f32 %v5014_v7, %v4831_v40 }
 0x814   : > { %7614 = vmatmul.msk.f32.gmra.mxu0 %vm471_vm1, %v11570_v28 }
 0x815   : > { %v12509_v2 = vadd.f32 %v5130_v18, %v15171_v31  ;;  %7502 = vmatmul.msk.f32.gmra.mxu2 %vm471_vm1, %v11678_v62  ;;  %v15175_v18 = vld [vmem:[#allocation126_spill] sm:$0xff] }
 0x816   : > { %v5311_v0 = vpop.f32.mrf.mxu3 }
 0x817   : > { %v12499_v53 = vadd.f32 %v5493_v37, %v5311_v0  ;;  %15172 = vst [vmem:[#allocation115_spill] sm:$0xff] %v12509_v2 }
 0x818   : > { %v4836_v50 = vpop.f32.mrf.mxu1  ;;  %v5017_v40 = vpop.f32.mrf.mxu2 }
 0x819   : > { %15169 = vst [vmem:[#allocation120_spill] sm:$0xff] %v12499_v53  ;;  %v5496_v15 = vpop.f32.mrf.mxu0  ;;  %v4834_v53 = vadd.f32 %v4833_v12, %v15174_v63  ;;  %v15178_v63 = vld [vmem:[#allocation121_spill] sm:$0xff] }
 0x81b   : > { %7447 = vmatmul.msk.f32.gmra.mxu1 %vm471_vm1, %v11588_v24  ;;  %7560 = vmatmul.msk.f32.gmra.mxu3 %vm471_vm1, %v11642_v3  ;;  %v5131_v7 = vadd.f32 %v5017_v40, %v4834_v53 }
 0x81c   : > { %7615 = vmatmul.msk.f32.gmra.mxu0 %vm471_vm1, %v11588_v24 }
 0x81d   : > { %v12523_v31 = vadd.f32 %v5131_v7, %v15175_v18  ;;  %7503 = vmatmul.msk.f32.gmra.mxu2 %vm471_vm1, %v11696_v43  ;;  %v15179_v7 = vld [vmem:[#allocation128_spill] sm:$0xff] }
 0x81e   : > { %v5314_v37 = vpop.f32.mrf.mxu3 }
 0x81f   : > { %v12513_v44 = vadd.f32 %v5496_v15, %v5314_v37  ;;  %15176 = vst [vmem:[#allocation117_spill] sm:$0xff] %v12523_v31 }
 0x820   : > { %v4839_v0 = vpop.f32.mrf.mxu1  ;;  %v5020_v53 = vpop.f32.mrf.mxu2 }
 0x821   : > { %15173 = vst [vmem:[#allocation122_spill] sm:$0xff] %v12513_v44  ;;  %v5499_v42 = vpop.f32.mrf.mxu0  ;;  %v4837_v44 = vadd.f32 %v4836_v50, %v15178_v63  ;;  %v15182_v63 = vld [vmem:[#allocation123_spill] sm:$0xff] }
 0x823   : > { %7448 = vmatmul.msk.f32.gmra.mxu1 %vm471_vm1, %v11606_v52  ;;  %7561 = vmatmul.msk.f32.gmra.mxu3 %vm471_vm1, %v11660_v58  ;;  %v5132_v40 = vadd.f32 %v5020_v53, %v4837_v44 }
 0x824   : > { %7616 = vmatmul.msk.f32.gmra.mxu0 %vm471_vm1, %v11606_v52 }
 0x825   : > { %v12537_v18 = vadd.f32 %v5132_v40, %v15179_v7  ;;  %7504 = vmatmul.msk.f32.gmra.mxu2 %vm471_vm1, %v11714_v11  ;;  %v15183_v40 = vld [vmem:[#allocation130_spill] sm:$0xff] }
 0x826   : > { %v5317_v15 = vpop.f32.mrf.mxu3 }
 0x827   : > { %v12527_v12 = vadd.f32 %v5499_v42, %v5317_v15  ;;  %15180 = vst [vmem:[#allocation119_spill] sm:$0xff] %v12537_v18 }
 0x828   : > { %v4842_v37 = vpop.f32.mrf.mxu1  ;;  %v5023_v44 = vpop.f32.mrf.mxu2 }
 0x829   : > { %15177 = vst [vmem:[#allocation124_spill] sm:$0xff] %v12527_v12  ;;  %v5502_v2 = vpop.f32.mrf.mxu0  ;;  %v4840_v12 = vadd.f32 %v4839_v0, %v15182_v63  ;;  %v15186_v63 = vld [vmem:[#allocation125_spill] sm:$0xff] }
 0x82b   : > { %7449 = vmatmul.msk.f32.gmra.mxu1 %vm471_vm1, %v11624_v4  ;;  %7562 = vmatmul.msk.f32.gmra.mxu3 %vm471_vm1, %v11678_v62  ;;  %v5133_v53 = vadd.f32 %v5023_v44, %v4840_v12 }
 0x82c   : > { %7617 = vmatmul.msk.f32.gmra.mxu0 %vm471_vm1, %v11624_v4 }
 0x82d   : > { %v12551_v7 = vadd.f32 %v5133_v53, %v15183_v40  ;;  %7505 = vmatmul.msk.f32.gmra.mxu2 %vm471_vm1, %v11732_v34  ;;  %v15187_v53 = vld [vmem:[#allocation132_spill] sm:$0xff] }
 0x82e   : > { %v5320_v42 = vpop.f32.mrf.mxu3 }
 0x82f   : > { %v12541_v50 = vadd.f32 %v5502_v2, %v5320_v42  ;;  %15184 = vst [vmem:[#allocation121_spill] sm:$0xff] %v12551_v7 }
 0x830   : > { %v4845_v15 = vpop.f32.mrf.mxu1  ;;  %v5026_v12 = vpop.f32.mrf.mxu2 }
 0x831   : > { %15181 = vst [vmem:[#allocation126_spill] sm:$0xff] %v12541_v50  ;;  %v5505_v31 = vpop.f32.mrf.mxu0  ;;  %v4843_v50 = vadd.f32 %v4842_v37, %v15186_v63  ;;  %v15189_v63 = vld [vmem:[#allocation127_spill] sm:$0xff] }
 0x833   : > { %7450 = vmatmul.msk.f32.gmra.mxu1 %vm471_vm1, %v11642_v3  ;;  %7563 = vmatmul.msk.f32.gmra.mxu3 %vm471_vm1, %v11696_v43  ;;  %v5134_v44 = vadd.f32 %v5026_v12, %v4843_v50 }
 0x834   : > { %7618 = vmatmul.msk.f32.gmra.mxu0 %vm471_vm1, %v11642_v3 }
 0x835   : > { %v12565_v40 = vadd.f32 %v5134_v44, %v15187_v53  ;;  %7506 = vmatmul.msk.f32.gmra.mxu2 %vm471_vm1, %v11750_v1 }
 0x836   : > { %v5323_v2 = vpop.f32.mrf.mxu3 }
 0x837   : > { %v12555_v0 = vadd.f32 %v5505_v31, %v5323_v2 }
 0x838   : > { %v4848_v42 = vpop.f32.mrf.mxu1  ;;  %v5029_v50 = vpop.f32.mrf.mxu2 }
 0x839   : > { %15185 = vst [vmem:[#allocation128_spill] sm:$0xff] %v12555_v0  ;;  %v5508_v18 = vpop.f32.mrf.mxu0  ;;  %v4846_v0 = vadd.f32 %v4845_v15, %v15189_v63 }
 0x83b   : > { %7451 = vmatmul.msk.f32.gmra.mxu1 %vm471_vm1, %v11660_v58  ;;  %7564 = vmatmul.msk.f32.gmra.mxu3 %vm471_vm1, %v11714_v11  ;;  %v5135_v12 = vadd.f32 %v5029_v50, %v4846_v0 }
 0x83c   : > { %7619 = vmatmul.msk.f32.gmra.mxu0 %vm471_vm1, %v11660_v58 }
 0x83d   : > { %v12579_v44 = vadd.f32 %v5135_v12, %v11810_v26  ;;  %7507 = vmatmul.msk.f32.gmra.mxu2 %vm471_vm1, %v11768_v16 }
 0x83e   : > { %v5326_v31 = vpop.f32.mrf.mxu3 }
 0x83f   : > { %v12569_v37 = vadd.f32 %v5508_v18, %v5326_v31  ;;  %v15191_v31 = vld [vmem:[#allocation129_spill] sm:$0xff] }
 0x840   : > { %v4851_v2 = vpop.f32.mrf.mxu1  ;;  %v4849_v63 = vadd.f32 %v4848_v42, %v15191_v31  ;;  %v5032_v0 = vpop.f32.mrf.mxu2 }
 0x841   : > { %15188 = vst [vmem:[#allocation123_spill] sm:$0xff] %v12569_v37  ;;  %v5511_v7 = vpop.f32.mrf.mxu0 }
 0x842   : > { %v5136_v50 = vadd.f32 %v5032_v0, %v4849_v63 }
 0x843   : > { %7452 = vmatmul.msk.f32.gmra.mxu1 %vm471_vm1, %v11678_v62  ;;  %7565 = vmatmul.msk.f32.gmra.mxu3 %vm471_vm1, %v11732_v34 }
 0x844   : > { %7620 = vmatmul.msk.f32.gmra.mxu0 %vm471_vm1, %v11678_v62  ;;  %v12593_v26 = vadd.f32 %v5136_v50, %v11824_v5  ;;  %v15195_v5 = vld [vmem:[#allocation137_spill] sm:$0xff] }
 0x845   : > { %7508 = vmatmul.msk.f32.gmra.mxu2 %vm471_vm1, %v11786_v59 }
 0x846   : > { %v5329_v18 = vpop.f32.mrf.mxu3  ;;  %15192 = vst [vmem:[#allocation125_spill] sm:$0xff] %v12593_v26 }
 0x847   : > { %v12583_v15 = vadd.f32 %v5511_v7, %v5329_v18  ;;  %v15194_v18 = vld [vmem:[#allocation131_spill] sm:$0xff] }
 0x848   : > { %v4854_v53 = vpop.f32.mrf.mxu1  ;;  %v4852_v31 = vadd.f32 %v4851_v2, %v15194_v18  ;;  %v5035_v63 = vpop.f32.mrf.mxu2  ;;  %v15198_v18 = vld [vmem:[#allocation134_spill] sm:$0xff] }
 0x849   : > { %15190 = vst [vmem:[#allocation130_spill] sm:$0xff] %v12583_v15  ;;  %v5514_v37 = vpop.f32.mrf.mxu0 }
 0x84a   : > { %v5137_v0 = vadd.f32 %v5035_v63, %v4852_v31 }
 0x84b   : > { %7453 = vmatmul.msk.f32.gmra.mxu1 %vm471_vm1, %v11696_v43  ;;  %7566 = vmatmul.msk.f32.gmra.mxu3 %vm471_vm1, %v11750_v1 }
 0x84c   : > { %7621 = vmatmul.msk.f32.gmra.mxu0 %vm471_vm1, %v11696_v43  ;;  %v12607_v50 = vadd.f32 %v5137_v0, %v15195_v5  ;;  %v15199_v0 = vld [vmem:[#allocation139_spill] sm:$0xff] }
 0x84d   : > { %7509 = vmatmul.msk.f32.gmra.mxu2 %vm471_vm1, %v11804_v38 }
 0x84e   : > { %v5332_v7 = vpop.f32.mrf.mxu3  ;;  %15196 = vst [vmem:[#allocation127_spill] sm:$0xff] %v12607_v50 }
 0x84f   : > { %v12597_v42 = vadd.f32 %v5514_v37, %v5332_v7 }
 0x850   : > { %v4857_v12 = vpop.f32.mrf.mxu1  ;;  %v5038_v31 = vpop.f32.mrf.mxu2 }
 0x851   : > { %15193 = vst [vmem:[#allocation132_spill] sm:$0xff] %v12597_v42  ;;  %v5517_v15 = vpop.f32.mrf.mxu0  ;;  %v4855_v42 = vadd.f32 %v4854_v53, %v15198_v18  ;;  %v15202_v18 = vld [vmem:[#allocation135_spill] sm:$0xff] }
 0x853   : > { %7454 = vmatmul.msk.f32.gmra.mxu1 %vm471_vm1, %v11714_v11  ;;  %7567 = vmatmul.msk.f32.gmra.mxu3 %vm471_vm1, %v11768_v16  ;;  %v5138_v63 = vadd.f32 %v5038_v31, %v4855_v42 }
 0x854   : > { %7622 = vmatmul.msk.f32.gmra.mxu0 %vm471_vm1, %v11714_v11 }
 0x855   : > { %v12621_v5 = vadd.f32 %v5138_v63, %v15199_v0  ;;  %7510 = vmatmul.msk.f32.gmra.mxu2 %vm471_vm1, %v11073_v46  ;;  %v15203_v63 = vld [vmem:[#allocation141_spill] sm:$0xff] }
 0x856   : > { %v5335_v37 = vpop.f32.mrf.mxu3 }
 0x857   : > { %v12611_v2 = vadd.f32 %v5517_v15, %v5335_v37  ;;  %15200 = vst [vmem:[#allocation131_spill] sm:$0xff] %v12621_v5 }
 0x858   : > { %v4860_v7 = vpop.f32.mrf.mxu1  ;;  %v5041_v42 = vpop.f32.mrf.mxu2 }
 0x859   : > { %15197 = vst [vmem:[#allocation129_spill] sm:$0xff] %v12611_v2  ;;  %v5520_v26 = vpop.f32.mrf.mxu0  ;;  %v4858_v2 = vadd.f32 %v4857_v12, %v15202_v18  ;;  %v15206_v18 = vld [vmem:[#allocation136_spill] sm:$0xff] }
 0x85b   : > { %7455 = vmatmul.msk.f32.gmra.mxu1 %vm471_vm1, %v11732_v34  ;;  %7568 = vmatmul.msk.f32.gmra.mxu3 %vm471_vm1, %v11786_v59  ;;  %v5139_v31 = vadd.f32 %v5041_v42, %v4858_v2 }
 0x85c   : > { %7623 = vmatmul.msk.f32.gmra.mxu0 %vm471_vm1, %v11732_v34 }
 0x85d   : > { %v12635_v0 = vadd.f32 %v5139_v31, %v15203_v63  ;;  %7511 = vmatmul.msk.f32.gmra.mxu2 %vm471_vm1, %v11091_v36  ;;  %v15207_v31 = vld [vmem:[#allocation143_spill] sm:$0xff] }
 0x85e   : > { %v5338_v15 = vpop.f32.mrf.mxu3 }
 0x85f   : > { %v12625_v53 = vadd.f32 %v5520_v26, %v5338_v15  ;;  %15204 = vst [vmem:[#allocation134_spill] sm:$0xff] %v12635_v0 }
 0x860   : > { %v4863_v37 = vpop.f32.mrf.mxu1  ;;  %v5044_v2 = vpop.f32.mrf.mxu2 }
 0x861   : > { %15201 = vst [vmem:[#allocation137_spill] sm:$0xff] %v12625_v53  ;;  %v5523_v50 = vpop.f32.mrf.mxu0  ;;  %v4861_v53 = vadd.f32 %v4860_v7, %v15206_v18  ;;  %v15210_v18 = vld [vmem:[#allocation138_spill] sm:$0xff] }
 0x863   : > { %7456 = vmatmul.msk.f32.gmra.mxu1 %vm471_vm1, %v11750_v1  ;;  %7569 = vmatmul.msk.f32.gmra.mxu3 %vm471_vm1, %v11804_v38  ;;  %v5140_v42 = vadd.f32 %v5044_v2, %v4861_v53 }
 0x864   : > { %7624 = vmatmul.msk.f32.gmra.mxu0 %vm471_vm1, %v11750_v1 }
 0x865   : > { %v12649_v63 = vadd.f32 %v5140_v42, %v15207_v31  ;;  %7512 = vmatmul.msk.f32.gmra.mxu2 %vm471_vm1, %v11107_v61  ;;  %v15211_v42 = vld [vmem:[#allocation145_spill] sm:$0xff] }
 0x866   : > { %v5341_v26 = vpop.f32.mrf.mxu3 }
 0x867   : > { %v12639_v12 = vadd.f32 %v5523_v50, %v5341_v26  ;;  %15208 = vst [vmem:[#allocation135_spill] sm:$0xff] %v12649_v63 }
 0x868   : > { %v4866_v15 = vpop.f32.mrf.mxu1  ;;  %v5047_v53 = vpop.f32.mrf.mxu2 }
 0x869   : > { %15205 = vst [vmem:[#allocation139_spill] sm:$0xff] %v12639_v12  ;;  %v5526_v5 = vpop.f32.mrf.mxu0  ;;  %v4864_v12 = vadd.f32 %v4863_v37, %v15210_v18  ;;  %v15214_v18 = vld [vmem:[#allocation140_spill] sm:$0xff] }
 0x86b   : > { %7457 = vmatmul.msk.f32.gmra.mxu1 %vm471_vm1, %v11768_v16  ;;  %7570 = vmatmul.msk.f32.gmra.mxu3 %vm471_vm1, %v11073_v46  ;;  %v5141_v2 = vadd.f32 %v5047_v53, %v4864_v12 }
 0x86c   : > { %7625 = vmatmul.msk.f32.gmra.mxu0 %vm471_vm1, %v11768_v16 }
 0x86d   : > { %v12663_v31 = vadd.f32 %v5141_v2, %v15211_v42  ;;  %7513 = vmatmul.msk.f32.gmra.mxu2 %vm471_vm1, %v11046_v22  ;;  %v15215_v2 = vld [vmem:[#allocation147_spill] sm:$0xff] }
 0x86e   : > { %v5344_v50 = vpop.f32.mrf.mxu3 }
 0x86f   : > { %v12653_v7 = vadd.f32 %v5526_v5, %v5344_v50  ;;  %15212 = vst [vmem:[#allocation136_spill] sm:$0xff] %v12663_v31 }
 0x870   : > { %v4869_v26 = vpop.f32.mrf.mxu1  ;;  %v5050_v12 = vpop.f32.mrf.mxu2 }
 0x871   : > { %15209 = vst [vmem:[#allocation141_spill] sm:$0xff] %v12653_v7  ;;  %v5529_v0 = vpop.f32.mrf.mxu0  ;;  %v4867_v7 = vadd.f32 %v4866_v15, %v15214_v18  ;;  %v15218_v18 = vld [vmem:[#allocation142_spill] sm:$0xff] }
 0x873   : > { %7458 = vmatmul.msk.f32.gmra.mxu1 %vm471_vm1, %v11786_v59  ;;  %7571 = vmatmul.msk.f32.gmra.mxu3 %vm471_vm1, %v11091_v36  ;;  %v5142_v53 = vadd.f32 %v5050_v12, %v4867_v7  ;;  %v15219_v12 = vld [vmem:[#allocation35_spill] sm:$0xff] }
 0x874   : > { %7626 = vmatmul.msk.f32.gmra.mxu0 %vm471_vm1, %v11786_v59 }
 0x875   : > { %v12677_v42 = vadd.f32 %v5142_v53, %v15215_v2  ;;  %7514 = vmatmul.msk.f32.gmra.mxu2 %vm471_vm1, %v11059_v60  ;;  %v15222_v2 = vld [vmem:[#allocation41_spill] sm:$0xff] }
 0x876   : > { %v5347_v5 = vpop.f32.mrf.mxu3 }
 0x877   : > { %v12667_v37 = vadd.f32 %v5529_v0, %v5347_v5  ;;  %15216 = vst [vmem:[#allocation138_spill] sm:$0xff] %v12677_v42 }
 0x878   : > { %v4872_v50 = vpop.f32.mrf.mxu1  ;;  %v5053_v7 = vpop.f32.mrf.mxu2 }
 0x879   : > { %15213 = vst [vmem:[#allocation143_spill] sm:$0xff] %v12667_v37  ;;  %v5532_v63 = vpop.f32.mrf.mxu0  ;;  %v4870_v37 = vadd.f32 %v4869_v26, %v15218_v18  ;;  %v15225_v18 = vld [vmem:[#allocation38_spill] sm:$0xff] }
 0x87b   : > { %7459 = vmatmul.msk.f32.gmra.mxu1 %vm471_vm1, %v11804_v38  ;;  %7572 = vmatmul.msk.f32.gmra.mxu3 %vm471_vm1, %v11107_v61  ;;  %v5143_v22 = vadd.f32 %v5053_v7, %v4870_v37  ;;  %v15220_v61 = vld [vmem:[#allocation149_spill] sm:$0xff] }
 0x87c   : > { %7627 = vmatmul.msk.f32.gmra.mxu0 %vm471_vm1, %v11804_v38 }
 0x87d   : > { %v12687_v36 = vadd.f32 %v5143_v22, %v15220_v61  ;;  %7515 = vmatmul.msk.f32.gmra.mxu2 %vm471_vm1, %v15222_v2 }
 0x87e   : > { %v5350_v0 = vpop.f32.mrf.mxu3 }
 0x87f   : > { %v12681_v15 = vadd.f32 %v5532_v63, %v5350_v0  ;;  %15221 = vst [vmem:[#allocation140_spill] sm:$0xff] %v12687_v36  ;;  %v15224_v0 = vld [vmem:[#allocation144_spill] sm:$0xff]  ;;  %v15229_v36 = vld [vmem:[#allocation146_spill] sm:$0xff] }
 0x880   : > { %v4875_v5 = vpop.f32.mrf.mxu1  ;;  %v5056_v26 = vpop.f32.mrf.mxu2 }
 0x881   : > { %15217 = vst [vmem:[#allocation145_spill] sm:$0xff] %v12681_v15  ;;  %v5535_v31 = vpop.f32.mrf.mxu0  ;;  %v4873_v15 = vadd.f32 %v4872_v50, %v15224_v0  ;;  %v4876_v2 = vadd.f32 %v4875_v5, %v15229_v36  ;;  %v15231_v0 = vld [vmem:[#allocation153_spill] sm:$0xff] }
 0x883   : > { %7630 = vmatmul.msk.f32.vlgmr.msra.gmra.mxu1 %vm471_vm1, %v15219_v12  ;;  %v5144_v46 = vadd.f32 %v5056_v26, %v4873_v15  ;;  %v15226_v12 = vld [vmem:[#allocation151_spill] sm:$0xff]  ;;  %v15233_v26 = vld [vmem:[#allocation148_spill] sm:$0xff] }
 0x885   : > { %v12697_v37 = vadd.f32 %v5144_v46, %v15226_v12 }
 0x886   : > { %v5353_v53 = vpop.f32.mrf.mxu3 }
 0x887   : > { %v12691_v42 = vadd.f32 %v5535_v31, %v5353_v53  ;;  %15227 = vst [vmem:[#allocation142_spill] sm:$0xff] %v12697_v37 }
 0x888   : > { %v4878_v63 = vpop.f32.mrf.mxu1  ;;  %v5059_v31 = vpop.f32.mrf.mxu2 }
 0x889   : > { %15223 = vst [vmem:[#allocation147_spill] sm:$0xff] %v12691_v42  ;;  %v5538_v60 = vpop.f32.mrf.mxu0  ;;  %v15230_v42 = vld [vmem:[#allocation43_spill] sm:$0xff]  ;;  %v5145_v50 = vadd.f32 %v5059_v31, %v4876_v2  ;;  %v4879_v12 = vadd.f32 %v4878_v63, %v15233_v26  ;;  %v15240_v26 = vld [vmem:[#allocation157_spill] sm:$0xff] }
 0x88b   : > { %7631 = vmatmul.msk.f32.gmra.mxu1 %vm471_vm1, %v15225_v18  ;;  %v12705_v38 = vadd.f32 %v5145_v50, %v15231_v0  ;;  %v15238_v50 = vld [vmem:[#allocation150_spill] sm:$0xff] }
 0x88e   : > { %v5356_v22 = vpop.f32.mrf.mxu3 }
 0x88f   : > { %v12699_v61 = vadd.f32 %v5538_v60, %v5356_v22  ;;  %v15234_v22 = vld [vmem:[#allocation46_spill] sm:$0xff] }
 0x890   : > { %v4881_v7 = vpop.f32.mrf.mxu1  ;;  %v5062_v60 = vpop.f32.mrf.mxu2 }
 0x891   : > { %15228 = vst [vmem:[#allocation35_spill] sm:$0xff] %v12699_v61  ;;  %v5541_v53 = vpop.f32.mrf.mxu0  ;;  %v5146_v36 = vadd.f32 %v5062_v60, %v4879_v12  ;;  %v15235_v61 = vld [vmem:[#allocation155_spill] sm:$0xff]  ;;  %v4882_v0 = vadd.f32 %v4881_v7, %v15238_v50 }
 0x892   : > { %v15243_v50 = vld [vmem:[#allocation159_spill] sm:$0xff] }
 0x893   : > { %7632 = vmatmul.msk.f32.gmra.mxu1 %vm471_vm1, %v15230_v42  ;;  %v12713_v37 = vadd.f32 %v5146_v36, %v15235_v61  ;;  %v15241_v36 = vld [vmem:[#allocation152_spill] sm:$0xff] }
 0x895   : > { %15236 = vst [vmem:[#allocation144_spill] sm:$0xff] %v12713_v37 }
 0x896   : > { %v5359_v18 = vpop.f32.mrf.mxu3 }
 0x897   : > { %v12707_v15 = vadd.f32 %v5541_v53, %v5359_v18  ;;  %v15239_v18 = vld [vmem:[#allocation2_spill] sm:$0xff] }
 0x898   : > { %v4884_v46 = vpop.f32.mrf.mxu1  ;;  %v5065_v53 = vpop.f32.mrf.mxu2 }
 0x899   : > { %15232 = vst [vmem:[#allocation149_spill] sm:$0xff] %v12707_v15  ;;  %v5544_v5 = vpop.f32.mrf.mxu0  ;;  %v5147_v63 = vadd.f32 %v5065_v53, %v4882_v0  ;;  %v15244_v53 = vld [vmem:[#allocation154_spill] sm:$0xff] }
 0x89b   : > { %7633 = vmatmul.msk.f32.gmra.mxu1 %vm471_vm1, %v15234_v22  ;;  %v12721_v15 = vadd.f32 %v5147_v63, %v15240_v26 }
 0x89e   : > { %v5362_v42 = vpop.f32.mrf.mxu3 }
 0x89f   : > { %v12715_v2 = vadd.f32 %v5544_v5, %v5362_v42  ;;  %v4885_v5 = vadd.f32 %v4884_v46, %v15241_v36  ;;  %v15246_v36 = vld [vmem:[#allocation5_spill] sm:$0xff] }
 0x8a0   : > { %v4887_v31 = vpop.f32.mrf.mxu1  ;;  %v5068_v42 = vpop.f32.mrf.mxu2 }
 0x8a1   : > { %15237 = vst [vmem:[#allocation38_spill] sm:$0xff] %v12715_v2  ;;  %v5547_v22 = vpop.f32.mrf.mxu0  ;;  %v15242_v2 = vld [vmem:[#allocation3_spill] sm:$0xff]  ;;  %v5148_v7 = vadd.f32 %v5068_v42, %v4885_v5  ;;  %v15249_v42 = vld [vmem:[#allocation49_spill] sm:$0xff] }
 0x8a3   : > { %7634 = vmatmul.msk.f32.gmra.mxu1 %vm471_vm1, %v15239_v18  ;;  %v12731_v37 = vadd.f32 %v5148_v7, %v15243_v50  ;;  %v4888_v18 = vadd.f32 %v4887_v31, %v15244_v53  ;;  %v15247_v31 = vld [vmem:[#allocation52_spill] sm:$0xff]  ;;  %v15251_v50 = vld [vmem:[#allocation55_spill] sm:$0xff] }
 0x8a6   : > { %v5365_v12 = vpop.f32.mrf.mxu3 }
 0x8a7   : > { %v12723_v60 = vadd.f32 %v5547_v22, %v5365_v12  ;;  %v15245_v22 = vld [vmem:[#allocation161_spill] sm:$0xff] }
 0x8a8   : > { %v12725_v61 = vpop.f32.mrf.mxu1  ;;  %v5071_v63 = vpop.f32.mrf.mxu2 }
 0x8a9   : > { %v5149_v26 = vadd.f32 %v5071_v63, %v4888_v18 }
 0x8ab   : > { %7635 = vmatmul.msk.f32.gmra.mxu1 %vm471_vm1, %v15242_v2  ;;  %v12739_v12 = vadd.f32 %v5149_v26, %v15245_v22 }
 0x8b0   : > { %v12733_v0 = vpop.f32.mrf.mxu1 }
 0x8b3   : > { %7636 = vmatmul.msk.f32.gmra.mxu1 %vm471_vm1, %v15054_v8 }
 0x8b8   : > { %v12741_v46 = vpop.f32.mrf.mxu1 }
 0x8bb   : > { %7637 = vmatmul.msk.f32.gmra.mxu1 %vm471_vm1, %v15057_v27 }
 0x8c0   : > { %v12745_v2 = vpop.f32.mrf.mxu1 }
 0x8c3   : > { %7638 = vmatmul.msk.f32.gmra.mxu1 %vm471_vm1, %v15246_v36 }
 0x8c8   : > { %v12749_v5 = vpop.f32.mrf.mxu1 }
 0x8cb   : > { %7639 = vmatmul.msk.f32.gmra.mxu1 %vm471_vm1, %v15247_v31 }
 0x8d0   : > { %v12753_v8 = vpop.f32.mrf.mxu1 }
 0x8d1   : > { %15248 = vst [vmem:[#allocation151_spill] sm:$0xff] %v12753_v8 }
 0x8d3   : > { %7640 = vmatmul.msk.f32.gmra.mxu1 %vm471_vm1, %v15249_v42 }
 0x8d8   : > { %v12757_v7 = vpop.f32.mrf.mxu1 }
 0x8d9   : > { %15250 = vst [vmem:[#allocation146_spill] sm:$0xff] %v12757_v7 }
 0x8db   : > { %7641 = vmatmul.msk.f32.gmra.mxu1 %vm471_vm1, %v15251_v50 }
 0x8e0   : > { %v12761_v27 = vpop.f32.mrf.mxu1 }
 0x8e1   : > { %15252 = vst [vmem:[#allocation43_spill] sm:$0xff] %v12761_v27  ;;  %v15339_v27 = vld [vmem:[#allocation41_spill] sm:$0xff] }
 0x8e3   : > { %7642 = vmatmul.msk.f32.gmra.mxu1 %vm471_vm1, %v11209_v57  ;;  %v15256_v57 = vld [vmem:[#allocation177_spill] sm:$0xff] }
 0x8e8   : > { %v12765_v53 = vpop.f32.mrf.mxu1 }
 0x8e9   : > { %15253 = vst [vmem:[#allocation153_spill] sm:$0xff] %v12765_v53  ;;  %v15335_v53 = vld [vmem:[#allocation37_spill] sm:$0xff] }
 0x8eb   : > { %7643 = vmatmul.msk.f32.gmra.mxu1 %vm471_vm1, %v11221_v30 }
 0x8f0   : > { %v12769_v18 = vpop.f32.mrf.mxu1 }
 0x8f1   : > { %15254 = vst [vmem:[#allocation148_spill] sm:$0xff] %v12769_v18  ;;  %v15331_v18 = vld [vmem:[#allocation34_spill] sm:$0xff] }
 0x8f3   : > { %7644 = vmatmul.msk.f32.gmra.mxu1 %vm471_vm1, %v11233_v10 }
 0x8f8   : > { %v12773_v63 = vpop.f32.mrf.mxu1 }
 0x8f9   : > { %15255 = vst [vmem:[#allocation46_spill] sm:$0xff] %v12773_v63  ;;  %v15327_v63 = vld [vmem:[#allocation47_spill] sm:$0xff] }
 0x8fb   : > { %7645 = vmatmul.msk.f32.gmra.mxu1 %vm471_vm1, %v11245_v39 }
 0x900   : > { %v5605_v26 = vpop.f32.mrf.mxu1 }
 0x901   : > { %v12780_v22 = vadd.f32 %v5605_v26, %v15256_v57 }
 0x903   : > { %7646 = vmatmul.msk.f32.gmra.mxu1 %vm471_vm1, %v11257_v56  ;;  %15257 = vst [vmem:[#allocation155_spill] sm:$0xff] %v12780_v22  ;;  %v14562_v31 = vrot.slane %v12780_v22, 1  ;;  %v15323_v22 = vld [vmem:[#allocation44_spill] sm:$0xff] }
 0x908   : > { %v5608_v36 = vpop.f32.mrf.mxu1 }
 0x909   : > { %v5768_v30 = vadd.f32 %v5608_v36, %v12170_v14  ;;  %v15258_v36 = vld [vmem:[#allocation65_spill] sm:$0xff] }
 0x90b   : > { %v5822_v42 = vrot.slane %v5768_v30, 1  ;;  %7647 = vmatmul.msk.f32.gmra.mxu1 %vm471_vm1, %v11271_v32 }
 0x90d   : > { %v5927_v10 = vsel %vm2668_vm3, %v14562_v31, %v5822_v42 }
 0x90e   : > { %v12791_v39 = vadd.f32 %v5927_v10, %v12187_v9 }
 0x910   : > { %v5611_v56 = vpop.f32.mrf.mxu1 }
 0x911   : > { %v5769_v50 = vadd.f32 %v5611_v56, %v12191_v41  ;;  %v15259_v41 = vld [vmem:[#allocation58_spill] sm:$0xff]  ;;  %v15260_v56 = vld [vmem:[#allocation73_spill] sm:$0xff] }
 0x913   : > { %v5823_v26 = vrot.slane %v5769_v50, 1  ;;  %7648 = vmatmul.msk.f32.gmra.mxu1 %vm471_vm1, %v11285_v55 }
 0x915   : > { %v5926_v14 = vsel %vm2668_vm3, %v5822_v42, %v5823_v26 }
 0x916   : > { %v12799_v32 = vadd.f32 %v5926_v14, %v12201_v19  ;;  %v15261_v14 = vld [vmem:[#allocation61_spill] sm:$0xff] }
 0x918   : > { %v5614_v57 = vpop.f32.mrf.mxu1 }
 0x919   : > { %v5770_v30 = vadd.f32 %v5614_v57, %v15258_v36  ;;  %v15262_v36 = vld [vmem:[#allocation78_spill] sm:$0xff] }
 0x91b   : > { %v5824_v31 = vrot.slane %v5770_v30, 1  ;;  %7649 = vmatmul.msk.f32.gmra.mxu1 %vm471_vm1, %v11301_v29 }
 0x91d   : > { %v5925_v9 = vsel %vm2668_vm3, %v5823_v26, %v5824_v31 }
 0x91e   : > { %v12807_v10 = vadd.f32 %v5925_v9, %v15259_v41  ;;  %v15263_v41 = vld [vmem:[#allocation68_spill] sm:$0xff] }
 0x920   : > { %v5617_v55 = vpop.f32.mrf.mxu1 }
 0x921   : > { %v5771_v50 = vadd.f32 %v5617_v55, %v15260_v56  ;;  %v15264_v56 = vld [vmem:[#allocation82_spill] sm:$0xff] }
 0x923   : > { %v5825_v42 = vrot.slane %v5771_v50, 1  ;;  %7650 = vmatmul.msk.f32.gmra.mxu1 %vm471_vm1, %v11316_v25 }
 0x925   : > { %v5924_v19 = vsel %vm2668_vm3, %v5824_v31, %v5825_v42 }
 0x926   : > { %v12815_v57 = vadd.f32 %v5924_v19, %v15261_v14  ;;  %v15265_v14 = vld [vmem:[#allocation71_spill] sm:$0xff] }
 0x928   : > { %v5620_v29 = vpop.f32.mrf.mxu1 }
 0x929   : > { %v5772_v30 = vadd.f32 %v5620_v29, %v15262_v36  ;;  %v15266_v36 = vld [vmem:[#allocation85_spill] sm:$0xff] }
 0x92b   : > { %v5826_v26 = vrot.slane %v5772_v30, 1  ;;  %7651 = vmatmul.msk.f32.gmra.mxu1 %vm471_vm1, %v11336_v49 }
 0x92d   : > { %v5923_v9 = vsel %vm2668_vm3, %v5825_v42, %v5826_v26 }
 0x92e   : > { %v12823_v55 = vadd.f32 %v5923_v9, %v15263_v41  ;;  %v15267_v41 = vld [vmem:[#allocation76_spill] sm:$0xff] }
 0x930   : > { %v5623_v25 = vpop.f32.mrf.mxu1 }
 0x931   : > { %v5773_v50 = vadd.f32 %v5623_v25, %v15264_v56  ;;  %v15268_v56 = vld [vmem:[#allocation89_spill] sm:$0xff] }
 0x933   : > { %v5827_v31 = vrot.slane %v5773_v50, 1  ;;  %7652 = vmatmul.msk.f32.gmra.mxu1 %vm471_vm1, %v11354_v21 }
 0x935   : > { %v5922_v19 = vsel %vm2668_vm3, %v5826_v26, %v5827_v31 }
 0x936   : > { %v12831_v29 = vadd.f32 %v5922_v19, %v15265_v14  ;;  %v15269_v14 = vld [vmem:[#allocation79_spill] sm:$0xff] }
 0x938   : > { %v5626_v49 = vpop.f32.mrf.mxu1 }
 0x939   : > { %v5774_v30 = vadd.f32 %v5626_v49, %v15266_v36  ;;  %v15270_v36 = vld [vmem:[#allocation93_spill] sm:$0xff] }
 0x93b   : > { %v5828_v42 = vrot.slane %v5774_v30, 1  ;;  %7653 = vmatmul.msk.f32.gmra.mxu1 %vm471_vm1, %v11372_v35 }
 0x93d   : > { %v5921_v9 = vsel %vm2668_vm3, %v5827_v31, %v5828_v42 }
 0x93e   : > { %v12839_v25 = vadd.f32 %v5921_v9, %v15267_v41  ;;  %v15271_v41 = vld [vmem:[#allocation83_spill] sm:$0xff] }
 0x940   : > { %v5629_v21 = vpop.f32.mrf.mxu1 }
 0x941   : > { %v5775_v50 = vadd.f32 %v5629_v21, %v15268_v56  ;;  %v15272_v56 = vld [vmem:[#allocation97_spill] sm:$0xff] }
 0x943   : > { %v5829_v26 = vrot.slane %v5775_v50, 1  ;;  %7654 = vmatmul.msk.f32.gmra.mxu1 %vm471_vm1, %v11390_v17 }
 0x945   : > { %v5920_v19 = vsel %vm2668_vm3, %v5828_v42, %v5829_v26 }
 0x946   : > { %v12847_v49 = vadd.f32 %v5920_v19, %v15269_v14  ;;  %v15273_v14 = vld [vmem:[#allocation86_spill] sm:$0xff] }
 0x948   : > { %v5632_v35 = vpop.f32.mrf.mxu1 }
 0x949   : > { %v5776_v30 = vadd.f32 %v5632_v35, %v15270_v36  ;;  %v15274_v36 = vld [vmem:[#allocation18_spill] sm:$0xff] }
 0x94b   : > { %v5830_v31 = vrot.slane %v5776_v30, 1  ;;  %7655 = vmatmul.msk.f32.gmra.mxu1 %vm471_vm1, %v11408_v45 }
 0x94d   : > { %v5919_v9 = vsel %vm2668_vm3, %v5829_v26, %v5830_v31 }
 0x94e   : > { %v12855_v21 = vadd.f32 %v5919_v9, %v15271_v41  ;;  %v15275_v41 = vld [vmem:[#allocation90_spill] sm:$0xff] }
 0x950   : > { %v5635_v17 = vpop.f32.mrf.mxu1 }
 0x951   : > { %v5777_v50 = vadd.f32 %v5635_v17, %v15272_v56  ;;  %v15276_v56 = vld [vmem:[#allocation28_spill] sm:$0xff] }
 0x953   : > { %v5831_v42 = vrot.slane %v5777_v50, 1  ;;  %7656 = vmatmul.msk.f32.gmra.mxu1 %vm471_vm1, %v11426_v23 }
 0x955   : > { %v5918_v19 = vsel %vm2668_vm3, %v5830_v31, %v5831_v42 }
 0x956   : > { %v12863_v35 = vadd.f32 %v5918_v19, %v15273_v14  ;;  %v15277_v14 = vld [vmem:[#allocation95_spill] sm:$0xff] }
 0x958   : > { %v5638_v45 = vpop.f32.mrf.mxu1 }
 0x959   : > { %v5778_v30 = vadd.f32 %v5638_v45, %v15274_v36  ;;  %v15278_v36 = vld [vmem:[#allocation32_spill] sm:$0xff] }
 0x95b   : > { %v5832_v26 = vrot.slane %v5778_v30, 1  ;;  %7657 = vmatmul.msk.f32.gmra.mxu1 %vm471_vm1, %v11444_v33 }
 0x95d   : > { %v5917_v9 = vsel %vm2668_vm3, %v5831_v42, %v5832_v26 }
 0x95e   : > { %v12871_v17 = vadd.f32 %v5917_v9, %v15275_v41  ;;  %v15279_v41 = vld [vmem:[#allocation99_spill] sm:$0xff] }
 0x960   : > { %v5641_v23 = vpop.f32.mrf.mxu1 }
 0x961   : > { %v5779_v50 = vadd.f32 %v5641_v23, %v15276_v56  ;;  %v15280_v56 = vld [vmem:[#allocation100_spill] sm:$0xff] }
 0x963   : > { %v5833_v31 = vrot.slane %v5779_v50, 1  ;;  %7658 = vmatmul.msk.f32.gmra.mxu1 %vm471_vm1, %v11462_v47 }
 0x965   : > { %v5916_v19 = vsel %vm2668_vm3, %v5832_v26, %v5833_v31 }
 0x966   : > { %v12879_v45 = vadd.f32 %v5916_v19, %v15277_v14  ;;  %v15281_v14 = vld [vmem:[#allocation11_spill] sm:$0xff] }
 0x968   : > { %v5644_v33 = vpop.f32.mrf.mxu1 }
 0x969   : > { %v5780_v30 = vadd.f32 %v5644_v33, %v15278_v36  ;;  %v15282_v36 = vld [vmem:[#allocation102_spill] sm:$0xff] }
 0x96b   : > { %v5834_v42 = vrot.slane %v5780_v30, 1  ;;  %7659 = vmatmul.msk.f32.gmra.mxu1 %vm471_vm1, %v11480_v20 }
 0x96d   : > { %v5915_v9 = vsel %vm2668_vm3, %v5833_v31, %v5834_v42 }
 0x96e   : > { %v12887_v23 = vadd.f32 %v5915_v9, %v15279_v41  ;;  %v15283_v41 = vld [vmem:[#allocation31_spill] sm:$0xff] }
 0x970   : > { %v5647_v47 = vpop.f32.mrf.mxu1 }
 0x971   : > { %v5781_v50 = vadd.f32 %v5647_v47, %v15280_v56  ;;  %v15284_v56 = vld [vmem:[#allocation104_spill] sm:$0xff] }
 0x973   : > { %v5835_v26 = vrot.slane %v5781_v50, 1  ;;  %7660 = vmatmul.msk.f32.gmra.mxu1 %vm471_vm1, %v11498_v6 }
 0x975   : > { %v5914_v19 = vsel %vm2668_vm3, %v5834_v42, %v5835_v26 }
 0x976   : > { %v12895_v33 = vadd.f32 %v5914_v19, %v15281_v14  ;;  %v15285_v14 = vld [vmem:[#allocation50_spill] sm:$0xff] }
 0x978   : > { %v5650_v20 = vpop.f32.mrf.mxu1 }
 0x979   : > { %v5782_v30 = vadd.f32 %v5650_v20, %v15282_v36  ;;  %v15286_v36 = vld [vmem:[#allocation106_spill] sm:$0xff] }
 0x97b   : > { %v5836_v31 = vrot.slane %v5782_v30, 1  ;;  %7661 = vmatmul.msk.f32.gmra.mxu1 %vm471_vm1, %v11516_v13 }
 0x97d   : > { %v5913_v9 = vsel %vm2668_vm3, %v5835_v26, %v5836_v31 }
 0x97e   : > { %v12903_v47 = vadd.f32 %v5913_v9, %v15283_v41  ;;  %v15287_v41 = vld [vmem:[#allocation101_spill] sm:$0xff] }
 0x980   : > { %v5653_v6 = vpop.f32.mrf.mxu1 }
 0x981   : > { %v5783_v50 = vadd.f32 %v5653_v6, %v15284_v56  ;;  %v15288_v56 = vld [vmem:[#allocation108_spill] sm:$0xff] }
 0x983   : > { %v5837_v42 = vrot.slane %v5783_v50, 1  ;;  %7662 = vmatmul.msk.f32.gmra.mxu1 %vm471_vm1, %v11534_v54 }
 0x985   : > { %v5912_v19 = vsel %vm2668_vm3, %v5836_v31, %v5837_v42 }
 0x986   : > { %v12911_v20 = vadd.f32 %v5912_v19, %v15285_v14  ;;  %v15289_v14 = vld [vmem:[#allocation103_spill] sm:$0xff] }
 0x988   : > { %v5656_v13 = vpop.f32.mrf.mxu1 }
 0x989   : > { %v5784_v30 = vadd.f32 %v5656_v13, %v15286_v36  ;;  %v15290_v36 = vld [vmem:[#allocation110_spill] sm:$0xff] }
 0x98b   : > { %v5838_v26 = vrot.slane %v5784_v30, 1  ;;  %7663 = vmatmul.msk.f32.gmra.mxu1 %vm471_vm1, %v11552_v51 }
 0x98d   : > { %v5911_v9 = vsel %vm2668_vm3, %v5837_v42, %v5838_v26 }
 0x98e   : > { %v12919_v6 = vadd.f32 %v5911_v9, %v15287_v41  ;;  %v15291_v41 = vld [vmem:[#allocation105_spill] sm:$0xff] }
 0x990   : > { %v5659_v54 = vpop.f32.mrf.mxu1 }
 0x991   : > { %v5785_v50 = vadd.f32 %v5659_v54, %v15288_v56  ;;  %v15292_v56 = vld [vmem:[#allocation112_spill] sm:$0xff] }
 0x993   : > { %v5839_v31 = vrot.slane %v5785_v50, 1  ;;  %7664 = vmatmul.msk.f32.gmra.mxu1 %vm471_vm1, %v11570_v28 }
 0x995   : > { %v5910_v19 = vsel %vm2668_vm3, %v5838_v26, %v5839_v31 }
 0x996   : > { %v12927_v13 = vadd.f32 %v5910_v19, %v15289_v14  ;;  %v15293_v14 = vld [vmem:[#allocation107_spill] sm:$0xff] }
 0x998   : > { %v5662_v51 = vpop.f32.mrf.mxu1 }
 0x999   : > { %v5786_v30 = vadd.f32 %v5662_v51, %v15290_v36  ;;  %v15294_v36 = vld [vmem:[#allocation114_spill] sm:$0xff] }
 0x99b   : > { %v5840_v42 = vrot.slane %v5786_v30, 1  ;;  %7665 = vmatmul.msk.f32.gmra.mxu1 %vm471_vm1, %v11588_v24 }
 0x99d   : > { %v5909_v9 = vsel %vm2668_vm3, %v5839_v31, %v5840_v42 }
 0x99e   : > { %v12935_v54 = vadd.f32 %v5909_v9, %v15291_v41  ;;  %v15295_v41 = vld [vmem:[#allocation109_spill] sm:$0xff] }
 0x9a0   : > { %v5665_v28 = vpop.f32.mrf.mxu1 }
 0x9a1   : > { %v5787_v50 = vadd.f32 %v5665_v28, %v15292_v56  ;;  %v15296_v56 = vld [vmem:[#allocation116_spill] sm:$0xff] }
 0x9a3   : > { %v5841_v26 = vrot.slane %v5787_v50, 1  ;;  %7666 = vmatmul.msk.f32.gmra.mxu1 %vm471_vm1, %v11606_v52 }
 0x9a5   : > { %v5908_v19 = vsel %vm2668_vm3, %v5840_v42, %v5841_v26 }
 0x9a6   : > { %v12943_v51 = vadd.f32 %v5908_v19, %v15293_v14  ;;  %v15297_v14 = vld [vmem:[#allocation111_spill] sm:$0xff] }
 0x9a8   : > { %v5668_v24 = vpop.f32.mrf.mxu1 }
 0x9a9   : > { %v5788_v30 = vadd.f32 %v5668_v24, %v15294_v36  ;;  %v15298_v36 = vld [vmem:[#allocation118_spill] sm:$0xff] }
 0x9ab   : > { %v5842_v31 = vrot.slane %v5788_v30, 1  ;;  %7667 = vmatmul.msk.f32.gmra.mxu1 %vm471_vm1, %v11624_v4 }
 0x9ad   : > { %v5907_v9 = vsel %vm2668_vm3, %v5841_v26, %v5842_v31 }
 0x9ae   : > { %v12951_v28 = vadd.f32 %v5907_v9, %v15295_v41  ;;  %v15299_v41 = vld [vmem:[#allocation113_spill] sm:$0xff] }
 0x9b0   : > { %v5671_v52 = vpop.f32.mrf.mxu1 }
 0x9b1   : > { %v5789_v50 = vadd.f32 %v5671_v52, %v15296_v56  ;;  %v15300_v56 = vld [vmem:[#allocation120_spill] sm:$0xff] }
 0x9b3   : > { %v5843_v42 = vrot.slane %v5789_v50, 1  ;;  %7668 = vmatmul.msk.f32.gmra.mxu1 %vm471_vm1, %v11642_v3 }
 0x9b5   : > { %v5906_v19 = vsel %vm2668_vm3, %v5842_v31, %v5843_v42 }
 0x9b6   : > { %v12959_v24 = vadd.f32 %v5906_v19, %v15297_v14  ;;  %v15301_v14 = vld [vmem:[#allocation115_spill] sm:$0xff] }
 0x9b8   : > { %v5674_v4 = vpop.f32.mrf.mxu1 }
 0x9b9   : > { %v5790_v30 = vadd.f32 %v5674_v4, %v15298_v36  ;;  %v15302_v36 = vld [vmem:[#allocation122_spill] sm:$0xff] }
 0x9bb   : > { %v5844_v26 = vrot.slane %v5790_v30, 1  ;;  %7669 = vmatmul.msk.f32.gmra.mxu1 %vm471_vm1, %v11660_v58 }
 0x9bd   : > { %v5905_v9 = vsel %vm2668_vm3, %v5843_v42, %v5844_v26 }
 0x9be   : > { %v12967_v52 = vadd.f32 %v5905_v9, %v15299_v41  ;;  %v15303_v41 = vld [vmem:[#allocation117_spill] sm:$0xff] }
 0x9c0   : > { %v5677_v3 = vpop.f32.mrf.mxu1 }
 0x9c1   : > { %v5791_v50 = vadd.f32 %v5677_v3, %v15300_v56  ;;  %v15304_v56 = vld [vmem:[#allocation124_spill] sm:$0xff] }
 0x9c3   : > { %v5845_v31 = vrot.slane %v5791_v50, 1  ;;  %7670 = vmatmul.msk.f32.gmra.mxu1 %vm471_vm1, %v11678_v62 }
 0x9c5   : > { %v5904_v19 = vsel %vm2668_vm3, %v5844_v26, %v5845_v31 }
 0x9c6   : > { %v12975_v4 = vadd.f32 %v5904_v19, %v15301_v14  ;;  %v15305_v14 = vld [vmem:[#allocation119_spill] sm:$0xff] }
 0x9c8   : > { %v5680_v58 = vpop.f32.mrf.mxu1 }
 0x9c9   : > { %v5792_v30 = vadd.f32 %v5680_v58, %v15302_v36  ;;  %v15306_v36 = vld [vmem:[#allocation126_spill] sm:$0xff] }
 0x9cb   : > { %v5846_v42 = vrot.slane %v5792_v30, 1  ;;  %7671 = vmatmul.msk.f32.gmra.mxu1 %vm471_vm1, %v11696_v43 }
 0x9cd   : > { %v5903_v9 = vsel %vm2668_vm3, %v5845_v31, %v5846_v42 }
 0x9ce   : > { %v12983_v3 = vadd.f32 %v5903_v9, %v15303_v41  ;;  %v15307_v41 = vld [vmem:[#allocation121_spill] sm:$0xff] }
 0x9d0   : > { %v5683_v62 = vpop.f32.mrf.mxu1 }
 0x9d1   : > { %v5793_v50 = vadd.f32 %v5683_v62, %v15304_v56  ;;  %v15308_v56 = vld [vmem:[#allocation128_spill] sm:$0xff] }
 0x9d3   : > { %v5847_v26 = vrot.slane %v5793_v50, 1  ;;  %7672 = vmatmul.msk.f32.gmra.mxu1 %vm471_vm1, %v11714_v11 }
 0x9d5   : > { %v5902_v19 = vsel %vm2668_vm3, %v5846_v42, %v5847_v26 }
 0x9d6   : > { %v12991_v58 = vadd.f32 %v5902_v19, %v15305_v14 }
 0x9d8   : > { %v5686_v43 = vpop.f32.mrf.mxu1 }
 0x9d9   : > { %v5794_v30 = vadd.f32 %v5686_v43, %v15306_v36  ;;  %v15309_v43 = vld [vmem:[#allocation123_spill] sm:$0xff] }
 0x9db   : > { %v5848_v31 = vrot.slane %v5794_v30, 1  ;;  %7673 = vmatmul.msk.f32.gmra.mxu1 %vm471_vm1, %v11732_v34 }
 0x9dd   : > { %v5901_v9 = vsel %vm2668_vm3, %v5847_v26, %v5848_v31 }
 0x9de   : > { %v12999_v62 = vadd.f32 %v5901_v9, %v15307_v41  ;;  %v15311_v41 = vld [vmem:[#allocation130_spill] sm:$0xff] }
 0x9e0   : > { %v5689_v11 = vpop.f32.mrf.mxu1 }
 0x9e1   : > { %v5795_v50 = vadd.f32 %v5689_v11, %v15308_v56  ;;  %v15312_v56 = vld [vmem:[#allocation125_spill] sm:$0xff] }
 0x9e3   : > { %v5849_v42 = vrot.slane %v5795_v50, 1  ;;  %7674 = vmatmul.msk.f32.gmra.mxu1 %vm471_vm1, %v11750_v1 }
 0x9e5   : > { %v5900_v19 = vsel %vm2668_vm3, %v5848_v31, %v5849_v42 }
 0x9e6   : > { %v13007_v14 = vadd.f32 %v5900_v19, %v12565_v40  ;;  %v15314_v19 = vld [vmem:[#allocation132_spill] sm:$0xff] }
 0x9e8   : > { %v5692_v34 = vpop.f32.mrf.mxu1 }
 0x9e9   : > { %v5796_v36 = vadd.f32 %v5692_v34, %v15309_v43  ;;  %v15315_v43 = vld [vmem:[#allocation133_spill] sm:$0xff] }
 0x9eb   : > { %v5850_v26 = vrot.slane %v5796_v36, 1  ;;  %7675 = vmatmul.msk.f32.gmra.mxu1 %vm471_vm1, %v11768_v16  ;;  %v15316_v36 = vld [vmem:[#allocation127_spill] sm:$0xff] }
 0x9ed   : > { %v5899_v30 = vsel %vm2668_vm3, %v5849_v42, %v5850_v26 }
 0x9ee   : > { %v13015_v9 = vadd.f32 %v5899_v30, %v12579_v44 }
 0x9f0   : > { %15310 = vst [vmem:[#allocation150_spill] sm:$0xff] %v13015_v9  ;;  %v5695_v1 = vpop.f32.mrf.mxu1 }
 0x9f1   : > { %v5797_v11 = vadd.f32 %v5695_v1, %v15311_v41  ;;  %v15318_v1 = vld [vmem:[#allocation129_spill] sm:$0xff] }
 0x9f3   : > { %v5851_v31 = vrot.slane %v5797_v11, 1  ;;  %7676 = vmatmul.msk.f32.gmra.mxu1 %vm471_vm1, %v11786_v59  ;;  %v15319_v11 = vld [vmem:[#allocation40_spill] sm:$0xff] }
 0x9f5   : > { %v5898_v40 = vsel %vm2668_vm3, %v5850_v26, %v5851_v31 }
 0x9f6   : > { %v13023_v50 = vadd.f32 %v5898_v40, %v15312_v56  ;;  %v15320_v56 = vld [vmem:[#allocation131_spill] sm:$0xff] }
 0x9f8   : > { %15313 = vst [vmem:[#allocation2_spill] sm:$0xff] %v13023_v50  ;;  %v5698_v16 = vpop.f32.mrf.mxu1 }
 0x9f9   : > { %v5798_v34 = vadd.f32 %v5698_v16, %v15314_v19 }
 0x9fb   : > { %v5852_v42 = vrot.slane %v5798_v34, 1  ;;  %7677 = vmatmul.msk.f32.gmra.mxu1 %vm471_vm1, %v15315_v43  ;;  %v15322_v34 = vld [vmem:[#allocation137_spill] sm:$0xff] }
 0x9fd   : > { %v5897_v44 = vsel %vm2668_vm3, %v5851_v31, %v5852_v42 }
 0x9fe   : > { %v13031_v30 = vadd.f32 %v5897_v44, %v15316_v36  ;;  %v15324_v36 = vld [vmem:[#allocation134_spill] sm:$0xff] }
 0xa00   : > { %15317 = vst [vmem:[#allocation157_spill] sm:$0xff] %v13031_v30  ;;  %v5701_v59 = vpop.f32.mrf.mxu1 }
 0xa01   : > { %v5799_v41 = vadd.f32 %v5701_v59, %v15318_v1 }
 0xa03   : > { %v5853_v26 = vrot.slane %v5799_v41, 1  ;;  %7678 = vmatmul.msk.f32.gmra.mxu1 %vm471_vm1, %v15319_v11  ;;  %v15326_v41 = vld [vmem:[#allocation139_spill] sm:$0xff] }
 0xa05   : > { %v5896_v40 = vsel %vm2668_vm3, %v5852_v42, %v5853_v26 }
 0xa06   : > { %v13039_v16 = vadd.f32 %v5896_v40, %v15320_v56  ;;  %v15328_v56 = vld [vmem:[#allocation135_spill] sm:$0xff] }
 0xa08   : > { %15321 = vst [vmem:[#allocation152_spill] sm:$0xff] %v13039_v16  ;;  %v5704_v19 = vpop.f32.mrf.mxu1 }
 0xa09   : > { %v5800_v43 = vadd.f32 %v5704_v19, %v15322_v34  ;;  %v15330_v34 = vld [vmem:[#allocation141_spill] sm:$0xff] }
 0xa0b   : > { %v5854_v31 = vrot.slane %v5800_v43, 1  ;;  %7679 = vmatmul.msk.f32.gmra.mxu1 %vm471_vm1, %v15323_v22 }
 0xa0d   : > { %v5895_v44 = vsel %vm2668_vm3, %v5853_v26, %v5854_v31 }
 0xa0e   : > { %v13047_v59 = vadd.f32 %v5895_v44, %v15324_v36  ;;  %v15332_v36 = vld [vmem:[#allocation136_spill] sm:$0xff] }
 0xa10   : > { %15325 = vst [vmem:[#allocation3_spill] sm:$0xff] %v13047_v59  ;;  %v5707_v1 = vpop.f32.mrf.mxu1 }
 0xa11   : > { %v5801_v11 = vadd.f32 %v5707_v1, %v15326_v41  ;;  %v15334_v41 = vld [vmem:[#allocation143_spill] sm:$0xff] }
 0xa13   : > { %v5855_v42 = vrot.slane %v5801_v11, 1  ;;  %7680 = vmatmul.msk.f32.gmra.mxu1 %vm471_vm1, %v15327_v63 }
 0xa15   : > { %v5894_v40 = vsel %vm2668_vm3, %v5854_v31, %v5855_v42 }
 0xa16   : > { %v13055_v19 = vadd.f32 %v5894_v40, %v15328_v56  ;;  %v15336_v56 = vld [vmem:[#allocation138_spill] sm:$0xff] }
 0xa18   : > { %15329 = vst [vmem:[#allocation159_spill] sm:$0xff] %v13055_v19  ;;  %v5710_v22 = vpop.f32.mrf.mxu1  ;;  %v15359_v19 = vld [vmem:[#allocation156_spill] sm:$0xff] }
 0xa19   : > { %v5802_v43 = vadd.f32 %v5710_v22, %v15330_v34  ;;  %v15338_v34 = vld [vmem:[#allocation145_spill] sm:$0xff] }
 0xa1b   : > { %v5856_v26 = vrot.slane %v5802_v43, 1  ;;  %7681 = vmatmul.msk.f32.gmra.mxu1 %vm471_vm1, %v15331_v18 }
 0xa1d   : > { %v5893_v44 = vsel %vm2668_vm3, %v5855_v42, %v5856_v26 }
 0xa1e   : > { %v13063_v1 = vadd.f32 %v5893_v44, %v15332_v36  ;;  %v15340_v36 = vld [vmem:[#allocation140_spill] sm:$0xff] }
 0xa20   : > { %15333 = vst [vmem:[#allocation154_spill] sm:$0xff] %v13063_v1  ;;  %v5713_v63 = vpop.f32.mrf.mxu1  ;;  %v15357_v1 = vld [vmem:[#allocation16_spill] sm:$0xff] }
 0xa21   : > { %v5803_v11 = vadd.f32 %v5713_v63, %v15334_v41  ;;  %v15342_v41 = vld [vmem:[#allocation147_spill] sm:$0xff] }
 0xa23   : > { %v5857_v31 = vrot.slane %v5803_v11, 1  ;;  %7682 = vmatmul.msk.f32.gmra.mxu1 %vm471_vm1, %v15335_v53 }
 0xa25   : > { %v5892_v40 = vsel %vm2668_vm3, %v5856_v26, %v5857_v31  ;;  %v13085_v26 = vld [vmem:[%s14382_s7] ss:$0 sm:$0xff] }
 0xa26   : > { %v13071_v22 = vadd.f32 %v5892_v40, %v15336_v56 }
 0xa28   : > { %15337 = vst [vmem:[#allocation161_spill] sm:$0xff] %v13071_v22  ;;  %v5716_v18 = vpop.f32.mrf.mxu1  ;;  %v15354_v22 = vld [vmem:[#allocation26_spill] sm:$0xff] }
 0xa29   : > { %v5804_v43 = vadd.f32 %v5716_v18, %v15338_v34  ;;  %v5368_v34 = vpop.f32.mrf.mxu3 }
 0xa2b   : > { %v5858_v42 = vrot.slane %v5804_v43, 1  ;;  %7683 = vmatmul.msk.f32.gmra.mxu1 %vm471_vm1, %v15339_v27  ;;  %v13091_v27 = vadd.f32 %v13085_v26, %v12799_v32  ;;  %v13098_v43 = vadd.f32 %v13085_v26, %v12791_v39  ;;  %v15349_v32 = vld [vmem:[#allocation35_spill] sm:$0xff] }
 0xa2d   : > { %v5891_v44 = vsel %vm2668_vm3, %v5857_v31, %v5858_v42  ;;  %15343 = vst [vmem:[#allocation52_spill] sm:$0xff] %v13091_v27  ;;  %v15344_v31 = vld [vmem:[#allocation142_spill] sm:$0xff] }
 0xa2e   : > { %v13079_v63 = vadd.f32 %v5891_v44, %v15340_v36  ;;  %15346 = vst [vmem:[#allocation55_spill] sm:$0xff] %v13098_v43  ;;  %v13102_v44 = vadd.f32 %v13085_v26, %v12807_v10  ;;  %v13117_v10 = vadd.f32 %v13085_v26, %v12823_v55 }
 0xa30   : > { %15341 = vst [vmem:[#allocation5_spill] sm:$0xff] %v13079_v63  ;;  %v5719_v53 = vpop.f32.mrf.mxu1  ;;  %v15352_v63 = vld [vmem:[#allocation14_spill] sm:$0xff] }
 0xa31   : > { %v5805_v11 = vadd.f32 %v5719_v53, %v15342_v41  ;;  %15347 = vst [vmem:[#allocation177_spill] sm:$0xff] %v13102_v44  ;;  %v5550_v53 = vpop.f32.mrf.mxu0  ;;  %v6043_v7 = vmul.f32 %v13102_v44, %v15352_v63 }
 0xa32   : > { %15353 = vst [vmem:[#allocation58_spill] sm:$0xff] %v13117_v10 }
 0xa33   : > { %v5859_v40 = vrot.slane %v5805_v11, 1  ;;  %v15350_v11 = vld [vmem:[#allocation22_spill] sm:$0xff] }
 0xa35   : > { %v5890_v56 = vsel %vm2668_vm3, %v5858_v42, %v5859_v40  ;;  %v13106_v42 = vadd.f32 %v13085_v26, %v12815_v57 }
 0xa36   : > { %v13094_v18 = vadd.f32 %v5890_v56, %v15344_v31  ;;  %v6042_v56 = vmul.f32 %v13091_v27, %v15350_v11  ;;  %v15351_v31 = vld [vmem:[#allocation12_spill] sm:$0xff]  ;;  %v13126_v11 = vadd.f32 %v13085_v26, %v12831_v29 }
 0xa37   : > { %15348 = vst [vmem:[#allocation65_spill] sm:$0xff] %v13106_v42  ;;  %v6044_v57 = vmul.f32 %v13106_v42, %v15354_v22  ;;  %v6210_v22 = vmul.f32 %v6043_v7, %v13102_v44 }
 0xa38   : > { %15345 = vst [vmem:[#allocation49_spill] sm:$0xff] %v13094_v18  ;;  %v5722_v36 = vpop.f32.mrf.mxu1  ;;  %v6041_v18 = vmul.f32 %v13098_v43, %v15351_v31  ;;  %v13132_v31 = vpop.f32.mrf.mxu2  ;;  %v6096_v55 = vsel %vm471_vm1, %v6042_v56, 0.0 }
 0xa39   : > { %v5806_v41 = vadd.f32 %v5722_v36, %v15349_v32  ;;  %v6209_v32 = vmul.f32 %v6042_v56, %v13091_v27  ;;  %15355 = vst [vmem:[#allocation73_spill] sm:$0xff] %v13126_v11  ;;  %v13140_v27 = vadd.f32 %v13085_v26, %v12839_v25  ;;  %v13156_v25 = vadd.f32 %v13085_v26, %v12847_v49  ;;  %v13158_v16 = vpop.f32.mrf.mxu0 }
 0xa3a   : > { %v6208_v63 = vmul.f32 %v6041_v18, %v13098_v43  ;;  %v6211_v43 = vmul.f32 %v6044_v57, %v13106_v42  ;;  %v6095_v44 = vsel %vm471_vm1, %v6041_v18, 0.0  ;;  %v6098_v42 = vsel %vm471_vm1, %v6043_v7, 0.0 }
 0xa3b   : > { %v5860_v39 = vrot.slane %v5806_v41, 1  ;;  %15358 = vst [vmem:[#allocation78_spill] sm:$0xff] %v13140_v27  ;;  %v6263_v59 = vsel %vm471_vm1, %v6209_v32, 0.0  ;;  %v15363_v32 = vld [vmem:[#allocation36_spill] sm:$0xff]  ;;  %v6100_v50 = vsel %vm471_vm1, %v6044_v57, 0.0 }
 0xa3c   : > { %15362 = vst [vmem:[#allocation68_spill] sm:$0xff] %v13156_v25 }
 0xa3d   : > { %v5889_v36 = vsel %vm2668_vm3, %v5859_v40, %v5860_v39  ;;  %v6045_v40 = vmul.f32 %v13117_v10, %v15357_v1  ;;  %v15361_v1 = vld [vmem:[#allocation33_spill] sm:$0xff] }
 0xa3e   : > { %v13129_v41 = vadd.f32 %v5889_v36, %v12705_v38  ;;  %v13144_v38 = vadd.f32 %v12725_v61, %v15359_v19  ;;  %v13146_v36 = vpop.f32.mrf.mxu3  ;;  %v6046_v8 = vmul.f32 %v13126_v11, %v15361_v1  ;;  %v6262_v61 = vsel %vm471_vm1, %v6208_v63, 0.0 }
 0xa3f   : > { %v6097_v19 = vadd.f32 %v6096_v55, %v6095_v44  ;;  %v6212_v18 = vmul.f32 %v6045_v40, %v13117_v10  ;;  %v13168_v1 = vadd.f32 %v13085_v26, %v12855_v21  ;;  %v6264_v49 = vadd.f32 %v6263_v59, %v6262_v61  ;;  %v15364_v55 = vld [vmem:[#allocation42_spill] sm:$0xff]  ;;  %v15367_v10 = vld [vmem:[#allocation51_spill] sm:$0xff] }
 0xa40   : > { %15356 = vst [vmem:[#allocation61_spill] sm:$0xff] %v13129_v41  ;;  %v5725_v29 = vpop.f32.mrf.mxu1  ;;  %v15360_v41 = vld [vmem:[#allocation149_spill] sm:$0xff]  ;;  %v6267_v63 = vsel %vm471_vm1, %v6211_v43, 0.0  ;;  %v6213_v44 = vmul.f32 %v6046_v8, %v13126_v11  ;;  %v13184_v59 = vadd.f32 %v5550_v53, %v5368_v34  ;;  %v6102_v43 = vsel %vm471_vm1, %v6045_v40, 0.0  ;;  %v15368_v53 = vld [vmem:[#allocation38_spill] sm:$0xff] }
 0xa41   : > { %v5807_v56 = vadd.f32 %v5725_v29, %v15360_v41  ;;  %v6265_v41 = vsel %vm471_vm1, %v6210_v22, 0.0  ;;  %v6047_v29 = vmul.f32 %v13140_v27, %v15363_v32  ;;  %v6048_v22 = vmul.f32 %v13156_v25, %v15364_v55  ;;  %v15366_v32 = vld [vmem:[#allocation144_spill] sm:$0xff] }
 0xa42   : > { %v6099_v57 = vadd.f32 %v6098_v42, %v6097_v19  ;;  %v6266_v61 = vadd.f32 %v6265_v41, %v6264_v49  ;;  %v6049_v55 = vmul.f32 %v13168_v1, %v15367_v10  ;;  %v6104_v34 = vsel %vm471_vm1, %v6046_v8, 0.0  ;;  %v13197_v19 = vpop.f32.mrf.mxu2 }
 0xa43   : > { %v5861_v30 = vrot.slane %v5807_v56, 1  ;;  %v13179_v56 = vadd.f32 %v13085_v26, %v12863_v35  ;;  %v6214_v11 = vmul.f32 %v6047_v29, %v13140_v27  ;;  %v13193_v35 = vadd.f32 %v13085_v26, %v12871_v17 }
 0xa44   : > { %v6271_v40 = vsel %vm471_vm1, %v6213_v44, 0.0  ;;  %v6215_v41 = vmul.f32 %v6048_v22, %v13156_v25  ;;  %v13205_v17 = vadd.f32 %v13085_v26, %v12879_v45  ;;  %v6106_v8 = vsel %vm471_vm1, %v6047_v29, 0.0  ;;  %v13218_v45 = vpop.f32.mrf.mxu0 }
 0xa45   : > { %v5888_v7 = vsel %vm2668_vm3, %v5860_v39, %v5861_v30  ;;  %15365 = vst [vmem:[#allocation82_spill] sm:$0xff] %v13179_v56  ;;  %v6269_v39 = vsel %vm471_vm1, %v6212_v18, 0.0  ;;  %v15369_v18 = vld [vmem:[#allocation53_spill] sm:$0xff]  ;;  %v6216_v44 = vmul.f32 %v6049_v55, %v13168_v1 }
 0xa46   : > { %v13182_v21 = vadd.f32 %v5888_v7, %v15366_v32  ;;  %v6101_v7 = vadd.f32 %v6100_v50, %v6099_v57  ;;  %v6268_v32 = vadd.f32 %v6267_v63, %v6266_v61  ;;  %v6050_v10 = vmul.f32 %v13179_v56, %v15369_v18  ;;  %v13207_v49 = vpop.f32.mrf.mxu3  ;;  %v15370_v61 = vld [vmem:[#allocation57_spill] sm:$0xff] }
 0xa47   : > { %v6273_v57 = vsel %vm471_vm1, %v6214_v11, 0.0  ;;  %v13216_v18 = vadd.f32 %v13085_v26, %v12887_v23  ;;  %v6275_v11 = vsel %vm471_vm1, %v6215_v41, 0.0  ;;  %v15372_v23 = vld [vmem:[#allocation158_spill] sm:$0xff]  ;;  %v6277_v41 = vsel %vm471_vm1, %v6216_v44, 0.0 }
 0xa48   : > { %v5728_v9 = vpop.f32.mrf.mxu1  ;;  %v6103_v50 = vadd.f32 %v6102_v43, %v6101_v7  ;;  %v6270_v63 = vadd.f32 %v6269_v39, %v6268_v32  ;;  %v6108_v43 = vsel %vm471_vm1, %v6048_v22, 0.0  ;;  %v6217_v39 = vmul.f32 %v6050_v10, %v13179_v56  ;;  %v15371_v7 = vld [vmem:[#allocation62_spill] sm:$0xff] }
 0xa49   : > { %v5808_v42 = vadd.f32 %v5728_v9, %v15368_v53  ;;  %v6051_v53 = vmul.f32 %v13193_v35, %v15370_v61  ;;  %v6052_v32 = vmul.f32 %v13205_v17, %v15371_v7  ;;  %v13232_v61 = vadd.f32 %v12733_v0, %v15372_v23 }
 0xa4a   : > { %v6105_v25 = vadd.f32 %v6104_v34, %v6103_v50  ;;  %v6272_v27 = vadd.f32 %v6271_v40, %v6270_v63  ;;  %v13236_v22 = vadd.f32 %v13085_v26, %v12895_v33  ;;  %v15373_v63 = vld [vmem:[#allocation63_spill] sm:$0xff]  ;;  %v13245_v0 = vadd.f32 %v13085_v26, %v12903_v47  ;;  %v13257_v47 = vpop.f32.mrf.mxu2 }
 0xa4b   : > { %v5862_v9 = vrot.slane %v5808_v42, 1  ;;  %v6218_v50 = vmul.f32 %v6051_v53, %v13193_v35  ;;  %v13250_v33 = vadd.f32 %v13158_v16, %v13146_v36  ;;  %v13264_v36 = vadd.f32 %v13085_v26, %v12911_v20 }
 0xa4c   : > { %v6107_v34 = vadd.f32 %v6106_v8, %v6105_v25  ;;  %v6274_v40 = vadd.f32 %v6273_v57, %v6272_v27  ;;  %v6112_v25 = vsel %vm471_vm1, %v6050_v10, 0.0  ;;  %v6219_v8 = vmul.f32 %v6052_v32, %v13205_v17 }
 0xa4d   : > { %v5887_v29 = vsel %vm2668_vm3, %v5861_v30, %v5862_v9  ;;  %v6110_v30 = vsel %vm471_vm1, %v6049_v55, 0.0  ;;  %v6279_v55 = vsel %vm471_vm1, %v6217_v39, 0.0  ;;  %15375 = vst [vmem:[#allocation71_spill] sm:$0xff] %v13264_v36 }
 0xa4e   : > { %v13228_v42 = vadd.f32 %v5887_v29, %v12721_v15  ;;  %v6053_v15 = vmul.f32 %v13216_v18, %v15373_v63  ;;  %v6109_v7 = vadd.f32 %v6108_v43, %v6107_v34  ;;  %v6276_v56 = vadd.f32 %v6275_v11, %v6274_v40  ;;  %v15374_v43 = vld [vmem:[#allocation66_spill] sm:$0xff]  ;;  %v13266_v10 = vpop.f32.mrf.mxu3  ;;  %v15376_v40 = vld [vmem:[#allocation69_spill] sm:$0xff] }
 0xa4f   : > { %v6054_v11 = vmul.f32 %v13236_v22, %v15374_v43  ;;  %v6281_v34 = vsel %vm471_vm1, %v6218_v50, 0.0  ;;  %v6283_v50 = vsel %vm471_vm1, %v6219_v8, 0.0  ;;  %v13276_v63 = vadd.f32 %v13085_v26, %v12919_v6 }
 0xa50   : > { %v5731_v29 = vpop.f32.mrf.mxu1  ;;  %v6111_v57 = vadd.f32 %v6110_v30, %v6109_v7  ;;  %v6278_v44 = vadd.f32 %v6277_v41, %v6276_v56  ;;  %v6220_v16 = vmul.f32 %v6053_v15, %v13216_v18  ;;  %v6055_v30 = vmul.f32 %v13245_v0, %v15376_v40 }
 0xa51   : > { %v5809_v27 = vadd.f32 %v5731_v29, %v12723_v60  ;;  %v6114_v60 = vsel %vm471_vm1, %v6051_v53, 0.0  ;;  %v6116_v53 = vsel %vm471_vm1, %v6052_v32, 0.0  ;;  %15377 = vst [vmem:[#allocation85_spill] sm:$0xff] %v13276_v63  ;;  %v15378_v29 = vld [vmem:[#allocation160_spill] sm:$0xff]  ;;  %v6118_v32 = vsel %vm471_vm1, %v6053_v15, 0.0 }
 0xa52   : > { %v6113_v39 = vadd.f32 %v6112_v25, %v6111_v57  ;;  %v6280_v56 = vadd.f32 %v6279_v55, %v6278_v44  ;;  %v13283_v7 = vadd.f32 %v12741_v46, %v15378_v29  ;;  %v6285_v8 = vsel %vm471_vm1, %v6220_v16, 0.0  ;;  %v15379_v57 = vld [vmem:[#allocation70_spill] sm:$0xff]  ;;  %v15381_v16 = vld [vmem:[#allocation72_spill] sm:$0xff] }
 0xa53   : > { %v5863_v23 = vrot.slane %v5809_v27, 1  ;;  %v13285_v27 = vpop.f32.mrf.mxu0  ;;  %v6056_v6 = vmul.f32 %v13264_v36, %v15379_v57  ;;  %v6222_v40 = vmul.f32 %v6055_v30, %v13245_v0  ;;  %v5150_v15 = vadd.f32 %v13132_v31, %v13144_v38  ;;  %v15383_v31 = vld [vmem:[#allocation74_spill] sm:$0xff] }
 0xa54   : > { %v6115_v25 = vadd.f32 %v6114_v60, %v6113_v39  ;;  %v6282_v55 = vadd.f32 %v6281_v34, %v6280_v56  ;;  %v6120_v34 = vsel %vm471_vm1, %v6054_v11, 0.0  ;;  %v6057_v39 = vmul.f32 %v13276_v63, %v15381_v16 }
 0xa55   : > { %v5886_v41 = vsel %vm2668_vm3, %v5862_v9, %v5863_v23  ;;  %v6221_v9 = vmul.f32 %v6054_v11, %v13236_v22  ;;  %v6223_v29 = vmul.f32 %v6056_v6, %v13264_v36  ;;  %v13317_v11 = vadd.f32 %v13085_v26, %v12943_v51  ;;  %v15386_v51 = vld [vmem:[#allocation75_spill] sm:$0xff]  ;;  %v15440_v36 = vld [vmem:[#allocation13_spill] sm:$0xff] }
 0xa56   : > { %v13279_v20 = vadd.f32 %v5886_v41, %v12731_v37  ;;  %v13294_v37 = vadd.f32 %v13085_v26, %v12927_v13  ;;  %v6117_v46 = vadd.f32 %v6116_v53, %v6115_v25  ;;  %v6284_v43 = vadd.f32 %v6283_v50, %v6282_v55 }
 0xa57   : > { %v13307_v13 = vadd.f32 %v13085_v26, %v12935_v54  ;;  %v6287_v53 = vsel %vm471_vm1, %v6221_v9, 0.0  ;;  %15384 = vst [vmem:[#allocation79_spill] sm:$0xff] %v13317_v11  ;;  %v6289_v54 = vsel %vm471_vm1, %v6222_v40, 0.0  ;;  %v13322_v55 = vadd.f32 %v13085_v26, %v12951_v28  ;;  %v13328_v9 = vpop.f32.mrf.mxu2 }
 0xa58   : > { %15380 = vst [vmem:[#allocation76_spill] sm:$0xff] %v13294_v37  ;;  %v5734_v44 = vpop.f32.mrf.mxu1  ;;  %v6119_v56 = vadd.f32 %v6118_v32, %v6117_v46  ;;  %v6286_v41 = vadd.f32 %v6285_v8, %v6284_v43  ;;  %v6058_v38 = vmul.f32 %v13294_v37, %v15383_v31  ;;  %v6124_v32 = vsel %vm471_vm1, %v6056_v6, 0.0  ;;  %v15387_v46 = vld [vmem:[#allocation162_spill] sm:$0xff]  ;;  %v13340_v43 = vpop.f32.mrf.mxu3  ;;  %v15389_v31 = vld [vmem:[#allocation77_spill] sm:$0xff] }
 0xa59   : > { %v13298_v60 = vadd.f32 %v5734_v44, %v13184_v59  ;;  %15382 = vst [vmem:[#allocation89_spill] sm:$0xff] %v13307_v13  ;;  %v6122_v59 = vsel %vm471_vm1, %v6055_v30, 0.0  ;;  %v6224_v8 = vmul.f32 %v6057_v39, %v13276_v63  ;;  %v6059_v57 = vmul.f32 %v13307_v13, %v15386_v51  ;;  %v15435_v63 = vld [vmem:[#allocation5_spill] sm:$0xff] }
 0xa5a   : > { %v6121_v25 = vadd.f32 %v6120_v34, %v6119_v56  ;;  %15385 = vst [vmem:[#allocation93_spill] sm:$0xff] %v13322_v55  ;;  %v13338_v28 = vadd.f32 %v5150_v15, %v15387_v46  ;;  %v6288_v40 = vadd.f32 %v6287_v53, %v6286_v41  ;;  %v6291_v6 = vsel %vm471_vm1, %v6223_v29, 0.0 }
 0xa5b   : > { %v14573_v50 = vrot.slane %v13298_v60, 1  ;;  %v6126_v16 = vsel %vm471_vm1, %v6057_v39, 0.0  ;;  %v6225_v56 = vmul.f32 %v6058_v38, %v13294_v37  ;;  %v13355_v15 = vadd.f32 %v13218_v45, %v13207_v49  ;;  %v13357_v41 = vpop.f32.mrf.mxu0 }
 0xa5c   : > { %v6123_v34 = vadd.f32 %v6122_v59, %v6121_v25  ;;  %v6290_v53 = vadd.f32 %v6289_v54, %v6288_v40  ;;  %v15390_v59 = vld [vmem:[#allocation80_spill] sm:$0xff]  ;;  %v6293_v39 = vsel %vm471_vm1, %v6224_v8, 0.0  ;;  %v6128_v25 = vsel %vm471_vm1, %v6058_v38, 0.0  ;;  %v15392_v54 = vld [vmem:[#allocation81_spill] sm:$0xff] }
 0xa5d   : > { %v5885_v30 = vsel %vm2668_vm3, %v5863_v23, %v14573_v50  ;;  %v13344_v23 = vadd.f32 %v13085_v26, %v12959_v24  ;;  %v6061_v29 = vmul.f32 %v13322_v55, %v15390_v59  ;;  %v6226_v51 = vmul.f32 %v6059_v57, %v13307_v13  ;;  %v15432_v13 = vld [vmem:[#allocation146_spill] sm:$0xff] }
 0xa5e   : > { %v13335_v44 = vadd.f32 %v5885_v30, %v12739_v12  ;;  %v6060_v12 = vmul.f32 %v13317_v11, %v15389_v31  ;;  %v6125_v24 = vadd.f32 %v6124_v32, %v6123_v34  ;;  %v13366_v46 = vadd.f32 %v13085_v26, %v12967_v52  ;;  %v15394_v52 = vld [vmem:[#allocation6_spill] sm:$0xff] }
 0xa5f   : > { %15388 = vst [vmem:[#allocation83_spill] sm:$0xff] %v13344_v23  ;;  %v5151_v49 = vadd.f32 %v13197_v19, %v13232_v61  ;;  %v6292_v45 = vadd.f32 %v6291_v6, %v6290_v53  ;;  %v6062_v32 = vmul.f32 %v13344_v23, %v15392_v54  ;;  %v6295_v40 = vsel %vm471_vm1, %v6225_v56, 0.0  ;;  %v15395_v56 = vld [vmem:[#allocation84_spill] sm:$0xff] }
 0xa60   : > { %v13351_v30 = vpop.f32.mrf.mxu1  ;;  %15391 = vst [vmem:[#allocation97_spill] sm:$0xff] %v13366_v46  ;;  %v6127_v31 = vadd.f32 %v6126_v16, %v6125_v24  ;;  %v6130_v8 = vsel %vm471_vm1, %v6059_v57, 0.0  ;;  %v6227_v38 = vmul.f32 %v6060_v12, %v13317_v11  ;;  %v13377_v34 = vadd.f32 %v13085_v26, %v12975_v4  ;;  %v15397_v4 = vld [vmem:[#allocation163_spill] sm:$0xff] }
 0xa61   : > { %v4900_v59 = vadd.f32 %v12745_v2, %v15394_v52  ;;  %v6294_v50 = vadd.f32 %v6293_v39, %v6292_v45  ;;  %v6228_v61 = vmul.f32 %v6061_v29, %v13322_v55  ;;  %v6297_v6 = vsel %vm471_vm1, %v6226_v51, 0.0  ;;  %v15398_v45 = vld [vmem:[#allocation87_spill] sm:$0xff] }
 0xa62   : > { %15393 = vst [vmem:[#allocation86_spill] sm:$0xff] %v13377_v34  ;;  %v6129_v19 = vadd.f32 %v6128_v25, %v6127_v31  ;;  %v6132_v16 = vsel %vm471_vm1, %v6060_v12, 0.0  ;;  %v6063_v57 = vmul.f32 %v13366_v46, %v15395_v56  ;;  %v13388_v53 = vadd.f32 %v13085_v26, %v12983_v3  ;;  %v13394_v25 = vpop.f32.mrf.mxu2  ;;  %v15400_v56 = vld [vmem:[#allocation88_spill] sm:$0xff] }
 0xa63   : > { %v13391_v24 = vadd.f32 %v5151_v49, %v15397_v4  ;;  %v6296_v54 = vadd.f32 %v6295_v40, %v6294_v50  ;;  %v6229_v39 = vmul.f32 %v6062_v32, %v13344_v23  ;;  %v6299_v51 = vsel %vm471_vm1, %v6227_v38, 0.0  ;;  %v13410_v49 = vpop.f32.mrf.mxu3 }
 0xa64   : > { %15396 = vst [vmem:[#allocation18_spill] sm:$0xff] %v13388_v53  ;;  %v6131_v2 = vadd.f32 %v6130_v8, %v6129_v19  ;;  %v6134_v12 = vsel %vm471_vm1, %v6061_v29, 0.0  ;;  %v6064_v31 = vmul.f32 %v13377_v34, %v15398_v45  ;;  %v13402_v3 = vadd.f32 %v13085_v26, %v12991_v58 }
 0xa65   : > { %v13408_v50 = vadd.f32 %v13285_v27, %v13266_v10  ;;  %v6298_v40 = vadd.f32 %v6297_v6, %v6296_v54  ;;  %v6301_v38 = vsel %vm471_vm1, %v6228_v61, 0.0  ;;  %v6136_v29 = vsel %vm471_vm1, %v6062_v32, 0.0  ;;  %v5565_v27 = vpop.f32.mrf.mxu0  ;;  %v15402_v54 = vld [vmem:[#allocation91_spill] sm:$0xff] }
 0xa66   : > { %15399 = vst [vmem:[#allocation90_spill] sm:$0xff] %v13402_v3  ;;  %v6133_v8 = vadd.f32 %v6132_v16, %v6131_v2  ;;  %v6230_v19 = vmul.f32 %v6063_v57, %v13366_v46  ;;  %v6065_v58 = vmul.f32 %v13388_v53, %v15400_v56  ;;  %v13419_v4 = vadd.f32 %v13085_v26, %v12999_v62  ;;  %v15404_v62 = vld [vmem:[#allocation4_spill] sm:$0xff] }
 0xa67   : > { %v5152_v10 = vadd.f32 %v13257_v47, %v13283_v7  ;;  %v6300_v45 = vadd.f32 %v6299_v51, %v6298_v40  ;;  %v6303_v16 = vsel %vm471_vm1, %v6229_v39, 0.0  ;;  %v6138_v61 = vsel %vm471_vm1, %v6063_v57, 0.0  ;;  %v15405_v51 = vld [vmem:[#allocation150_spill] sm:$0xff] }
 0xa68   : > { %v13404_v52 = vpop.f32.mrf.mxu1  ;;  %15401 = vst [vmem:[#allocation28_spill] sm:$0xff] %v13419_v4  ;;  %v6135_v6 = vadd.f32 %v6134_v12, %v6133_v8  ;;  %v6231_v32 = vmul.f32 %v6064_v31, %v13377_v34  ;;  %v6066_v2 = vmul.f32 %v13402_v3, %v15402_v54  ;;  %v13430_v56 = vadd.f32 %v13085_v26, %v13007_v14  ;;  %v15407_v8 = vld [vmem:[#allocation92_spill] sm:$0xff]  ;;  %v15408_v14 = vld [vmem:[#allocation165_spill] sm:$0xff] }
 0xa69   : > { %v4903_v46 = vadd.f32 %v12749_v5, %v15404_v62  ;;  %v6302_v47 = vadd.f32 %v6301_v38, %v6300_v45  ;;  %v13436_v12 = vadd.f32 %v13085_v26, %v15405_v51  ;;  %v6305_v57 = vsel %vm471_vm1, %v6230_v19, 0.0  ;;  %v15409_v38 = vld [vmem:[#allocation2_spill] sm:$0xff] }
 0xa6a   : > { %15403 = vst [vmem:[#allocation95_spill] sm:$0xff] %v13430_v56  ;;  %v6137_v7 = vadd.f32 %v6136_v29, %v6135_v6  ;;  %v6140_v39 = vsel %vm471_vm1, %v6064_v31, 0.0  ;;  %v6232_v40 = vmul.f32 %v6065_v58, %v13388_v53  ;;  %v6067_v54 = vmul.f32 %v13419_v4, %v15407_v8  ;;  %v15411_v6 = vld [vmem:[#allocation94_spill] sm:$0xff]  ;;  %v5089_v8 = vpop.f32.mrf.mxu2  ;;  %v15419_v53 = vld [vmem:[#allocation151_spill] sm:$0xff] }
 0xa6b   : > { %15406 = vst [vmem:[#allocation32_spill] sm:$0xff] %v13436_v12  ;;  %v13444_v34 = vadd.f32 %v5152_v10, %v15408_v14  ;;  %v6304_v23 = vadd.f32 %v6303_v16, %v6302_v47  ;;  %v13448_v29 = vadd.f32 %v13085_v26, %v15409_v38  ;;  %v6307_v45 = vsel %vm471_vm1, %v6231_v32, 0.0  ;;  %v15412_v47 = vld [vmem:[#allocation96_spill] sm:$0xff]  ;;  %v15413_v38 = vld [vmem:[#allocation157_spill] sm:$0xff] }
 0xa6c   : > { %v6139_v5 = vadd.f32 %v6138_v61, %v6137_v7  ;;  %v6142_v19 = vsel %vm471_vm1, %v6065_v58, 0.0  ;;  %v6233_v31 = vmul.f32 %v6066_v2, %v13402_v3  ;;  %v6068_v62 = vmul.f32 %v13430_v56, %v15411_v6 }
 0xa6d   : > { %15410 = vst [vmem:[#allocation99_spill] sm:$0xff] %v13448_v29  ;;  %v13459_v10 = vadd.f32 %v13357_v41, %v13340_v43  ;;  %v6306_v16 = vadd.f32 %v6305_v57, %v6304_v23  ;;  %v6069_v7 = vmul.f32 %v13436_v12, %v15412_v47  ;;  %v6309_v32 = vsel %vm471_vm1, %v6232_v40, 0.0  ;;  %v5386_v43 = vpop.f32.mrf.mxu3  ;;  %v15415_v57 = vld [vmem:[#allocation98_spill] sm:$0xff]  ;;  %v15416_v47 = vld [vmem:[#allocation152_spill] sm:$0xff] }
 0xa6e   : > { %v6141_v61 = vadd.f32 %v6140_v39, %v6139_v5  ;;  %v6144_v58 = vsel %vm471_vm1, %v6066_v2, 0.0  ;;  %v6234_v14 = vmul.f32 %v6067_v54, %v13419_v4  ;;  %v13468_v6 = vadd.f32 %v13085_v26, %v15413_v38  ;;  %v15418_v38 = vld [vmem:[#allocation164_spill] sm:$0xff] }
 0xa6f   : > { %v5153_v3 = vadd.f32 %v13328_v9, %v4900_v59  ;;  %v6308_v41 = vadd.f32 %v6307_v45, %v6306_v16  ;;  %v6070_v39 = vmul.f32 %v13448_v29, %v15415_v57  ;;  %v6311_v5 = vsel %vm471_vm1, %v6233_v31, 0.0  ;;  %v5568_v9 = vpop.f32.mrf.mxu0  ;;  %v15421_v57 = vld [vmem:[#allocation3_spill] sm:$0xff] }
 0xa70   : > { %v13455_v51 = vpop.f32.mrf.mxu1  ;;  %15414 = vst [vmem:[#allocation100_spill] sm:$0xff] %v13468_v6  ;;  %v6143_v23 = vadd.f32 %v6142_v19, %v6141_v61  ;;  %v6146_v40 = vsel %vm471_vm1, %v6067_v54, 0.0  ;;  %v6235_v2 = vmul.f32 %v6068_v62, %v13430_v56  ;;  %v13478_v4 = vadd.f32 %v13085_v26, %v15416_v47  ;;  %v15420_v61 = vld [vmem:[#allocation10_spill] sm:$0xff]  ;;  %v15423_v47 = vld [vmem:[#allocation167_spill] sm:$0xff] }
 0xa71   : > { %v4906_v55 = vadd.f32 %v15419_v53, %v15418_v38  ;;  %v6310_v59 = vadd.f32 %v6309_v32, %v6308_v41  ;;  %v6236_v19 = vmul.f32 %v6069_v7, %v13436_v12  ;;  %v6313_v16 = vsel %vm471_vm1, %v6234_v14, 0.0  ;;  %v15424_v41 = vld [vmem:[#allocation20_spill] sm:$0xff] }
 0xa72   : > { %15417 = vst [vmem:[#allocation11_spill] sm:$0xff] %v13478_v4  ;;  %v6145_v45 = vadd.f32 %v6144_v58, %v6143_v23  ;;  %v6148_v31 = vsel %vm471_vm1, %v6068_v62, 0.0  ;;  %v6071_v54 = vmul.f32 %v13468_v6, %v15420_v61  ;;  %v13489_v56 = vadd.f32 %v13085_v26, %v15421_v57  ;;  %v15425_v23 = vld [vmem:[#allocation159_spill] sm:$0xff] }
 0xa73   : > { %v13492_v11 = vadd.f32 %v5153_v3, %v15423_v47  ;;  %v6312_v53 = vadd.f32 %v6311_v5, %v6310_v59  ;;  %v6237_v32 = vmul.f32 %v6070_v39, %v13448_v29  ;;  %v6315_v58 = vsel %vm471_vm1, %v6235_v2, 0.0 }
 0xa74   : > { %15422 = vst [vmem:[#allocation102_spill] sm:$0xff] %v13489_v56  ;;  %v6147_v38 = vadd.f32 %v6146_v40, %v6145_v45  ;;  %v6150_v14 = vsel %vm471_vm1, %v6069_v7, 0.0  ;;  %v6072_v62 = vmul.f32 %v13478_v4, %v15424_v41  ;;  %v13501_v61 = vadd.f32 %v13085_v26, %v15425_v23  ;;  %v15427_v45 = vld [vmem:[#allocation8_spill] sm:$0xff]  ;;  %v15428_v41 = vld [vmem:[#allocation154_spill] sm:$0xff] }
 0xa75   : > { %v13506_v3 = vadd.f32 %v5565_v27, %v13410_v49  ;;  %v6314_v5 = vadd.f32 %v6313_v16, %v6312_v53  ;;  %v6317_v59 = vsel %vm471_vm1, %v6236_v19, 0.0  ;;  %v6152_v2 = vsel %vm471_vm1, %v6070_v39, 0.0  ;;  %v5092_v16 = vpop.f32.mrf.mxu2 }
 0xa76   : > { %15426 = vst [vmem:[#allocation31_spill] sm:$0xff] %v13501_v61  ;;  %v6149_v40 = vadd.f32 %v6148_v31, %v6147_v38  ;;  %v6238_v7 = vmul.f32 %v6071_v54, %v13468_v6  ;;  %v6073_v47 = vmul.f32 %v13489_v56, %v15427_v45  ;;  %v13515_v23 = vadd.f32 %v13085_v26, %v15428_v41  ;;  %v15429_v31 = vld [vmem:[#allocation7_spill] sm:$0xff]  ;;  %v15430_v38 = vld [vmem:[#allocation161_spill] sm:$0xff]  ;;  %v15431_v6 = vld [vmem:[#allocation166_spill] sm:$0xff] }
 0xa77   : > { %v5154_v29 = vadd.f32 %v13394_v25, %v4903_v46  ;;  %v6316_v12 = vadd.f32 %v6315_v58, %v6314_v5  ;;  %v6319_v27 = vsel %vm471_vm1, %v6237_v32, 0.0  ;;  %v6154_v19 = vsel %vm471_vm1, %v6071_v54, 0.0  ;;  %v5389_v25 = vpop.f32.mrf.mxu3 }
 0xa78   : > { %v13503_v57 = vpop.f32.mrf.mxu1  ;;  %v6151_v49 = vadd.f32 %v6150_v14, %v6149_v40  ;;  %v6239_v39 = vmul.f32 %v6072_v62, %v13478_v4  ;;  %v6074_v53 = vmul.f32 %v13501_v61, %v15429_v31  ;;  %v13525_v45 = vadd.f32 %v13085_v26, %v15430_v38  ;;  %v15433_v40 = vld [vmem:[#allocation30_spill] sm:$0xff]  ;;  %v15434_v4 = vld [vmem:[#allocation169_spill] sm:$0xff]  ;;  %v5571_v38 = vpop.f32.mrf.mxu0 }
 0xa79   : > { %v5155_v41 = vadd.f32 %v5089_v8, %v4906_v55  ;;  %v4909_v46 = vadd.f32 %v15432_v13, %v15431_v6  ;;  %v6318_v58 = vadd.f32 %v6317_v59, %v6316_v12  ;;  %v6321_v32 = vsel %vm471_vm1, %v6238_v7, 0.0  ;;  %v15436_v59 = vld [vmem:[#allocation15_spill] sm:$0xff] }
 0xa7a   : > { %v6153_v14 = vadd.f32 %v6152_v2, %v6151_v49  ;;  %v6156_v54 = vsel %vm471_vm1, %v6072_v62, 0.0  ;;  %v6240_v5 = vmul.f32 %v6073_v47, %v13489_v56  ;;  %v6075_v31 = vmul.f32 %v13515_v23, %v15433_v40 }
 0xa7b   : > { %v13535_v37 = vadd.f32 %v5154_v29, %v15434_v4  ;;  %v6320_v55 = vadd.f32 %v6319_v27, %v6318_v58  ;;  %v13539_v13 = vadd.f32 %v13085_v26, %v15435_v63  ;;  %v6323_v12 = vsel %vm471_vm1, %v6239_v39, 0.0  ;;  %v15437_v4 = vld [vmem:[#allocation168_spill] sm:$0xff]  ;;  %v15438_v29 = vld [vmem:[#allocation43_spill] sm:$0xff] }
 0xa7c   : > { %v6155_v8 = vadd.f32 %v6154_v19, %v6153_v14  ;;  %v6158_v6 = vsel %vm471_vm1, %v6073_v47, 0.0  ;;  %v6241_v62 = vmul.f32 %v6074_v53, %v13501_v61  ;;  %v6076_v2 = vmul.f32 %v13525_v45, %v15436_v59  ;;  %v15439_v14 = vld [vmem:[#allocation171_spill] sm:$0xff] }
 0xa7d   : > { %v13546_v49 = vadd.f32 %v5568_v9, %v5386_v43  ;;  %v4912_v27 = vadd.f32 %v15438_v29, %v15437_v4  ;;  %v6322_v19 = vadd.f32 %v6321_v32, %v6320_v55  ;;  %v13551_v63 = vadd.f32 %v5155_v41, %v15439_v14  ;;  %v15445_v4 = vld [vmem:[#allocation153_spill] sm:$0xff] }
 0xa7e   : > { %v6157_v58 = vadd.f32 %v6156_v54, %v6155_v8  ;;  %v5156_v40 = vadd.f32 %v5092_v16, %v4909_v46  ;;  %v6325_v39 = vsel %vm471_vm1, %v6240_v5, 0.0  ;;  %v6242_v47 = vmul.f32 %v6075_v31, %v13515_v23  ;;  %v15441_v54 = vld [vmem:[#allocation49_spill] sm:$0xff] }
 0xa7f   : > { %v6324_v61 = vadd.f32 %v6323_v12, %v6322_v19  ;;  %v6160_v59 = vsel %vm471_vm1, %v6074_v53, 0.0  ;;  %v6077_v43 = vmul.f32 %v13539_v13, %v15440_v36  ;;  %v6327_v9 = vsel %vm471_vm1, %v6241_v62, 0.0  ;;  %v15442_v8 = vld [vmem:[#allocation61_spill] sm:$0xff]  ;;  %v15444_v62 = vld [vmem:[#allocation170_spill] sm:$0xff] }
 0xa80   : > { %v5749_v7 = vpop.f32.mrf.mxu1  ;;  %v6159_v56 = vadd.f32 %v6158_v6, %v6157_v58  ;;  %v6243_v32 = vmul.f32 %v6076_v2, %v13525_v45  ;;  %v13562_v41 = vadd.f32 %v13085_v26, %v15441_v54  ;;  %v5811_v16 = vadd.f32 %v13351_v30, %v13250_v33  ;;  %v15443_v36 = vld [vmem:[#allocation173_spill] sm:$0xff]  ;;  %v5095_v6 = vpop.f32.mrf.mxu2 }
 0xa81   : > { %v5572_v46 = vadd.f32 %v5571_v38, %v5389_v25  ;;  %v6326_v5 = vadd.f32 %v6325_v39, %v6324_v61  ;;  %v6162_v55 = vsel %vm471_vm1, %v6075_v31, 0.0  ;;  %v13569_v53 = vadd.f32 %v13085_v26, %v15442_v8  ;;  %v5392_v33 = vpop.f32.mrf.mxu3 }
 0xa82   : > { %v13572_v12 = vadd.f32 %v5156_v40, %v15443_v36  ;;  %v13576_v29 = vadd.f32 %v15445_v4, %v15444_v62  ;;  %v6161_v19 = vadd.f32 %v6160_v59, %v6159_v56  ;;  %v6329_v58 = vsel %vm471_vm1, %v6242_v47, 0.0  ;;  %v15446_v40 = vld [vmem:[#allocation45_spill] sm:$0xff]  ;;  %v5574_v56 = vpop.f32.mrf.mxu0  ;;  %v15447_v47 = vld [vmem:[#allocation48_spill] sm:$0xff] }
 0xa83   : > { %v6328_v30 = vadd.f32 %v6327_v9, %v6326_v5  ;;  %v6164_v61 = vsel %vm471_vm1, %v6076_v2, 0.0  ;;  %v6244_v25 = vmul.f32 %v6077_v43, %v13539_v13  ;;  %v5812_v31 = vadd.f32 %v13404_v52, %v13355_v15 }
 0xa84   : > { %v6163_v38 = vadd.f32 %v6162_v55, %v6161_v19  ;;  %v6331_v14 = vsel %vm471_vm1, %v6243_v32, 0.0  ;;  %v6078_v39 = vmul.f32 %v13562_v41, %v15446_v40  ;;  %v5865_v54 = vrot.slane %v5811_v16, 1 }
 0xa85   : > { %v6330_v59 = vadd.f32 %v6329_v58, %v6328_v30  ;;  %v6079_v9 = vmul.f32 %v13569_v53, %v15447_v47  ;;  %v13590_v2 = vadd.f32 %v13085_v26, %v13182_v21  ;;  %v5813_v15 = vadd.f32 %v13455_v51, %v13408_v50  ;;  %v15449_v58 = vld [vmem:[#allocation9_spill] sm:$0xff]  ;;  %v15450_v30 = vld [vmem:[#allocation175_spill] sm:$0xff] }
 0xa86   : > { %v5157_v52 = vadd.f32 %v5095_v6, %v4912_v27  ;;  %v13594_v5 = vadd.f32 %v5574_v56, %v5392_v33  ;;  %v6165_v32 = vadd.f32 %v6164_v61, %v6163_v38  ;;  %v6166_v55 = vsel %vm471_vm1, %v6077_v43, 0.0 }
 0xa87   : > { %v6332_v16 = vadd.f32 %v6331_v14, %v6330_v59  ;;  %v6333_v36 = vsel %vm471_vm1, %v6244_v25, 0.0  ;;  %v13600_v62 = vadd.f32 %v13085_v26, %v13228_v42  ;;  %v5866_v4 = vrot.slane %v5812_v31, 1  ;;  %v15451_v14 = vld [vmem:[#allocation17_spill] sm:$0xff] }
 0xa88   : > { %v5752_v8 = vpop.f32.mrf.mxu1  ;;  %v6168_v21 = vsel %vm471_vm1, %v6078_v39, 0.0  ;;  %v6245_v19 = vmul.f32 %v6078_v39, %v13562_v41  ;;  %v15448_v50 = vrot.slane %v13298_v60, 1  ;;  %v5814_v27 = vadd.f32 %v13503_v57, %v13459_v10  ;;  %v13626_v39 = vpop.f32.mrf.mxu2 }
 0xa89   : > { %v6167_v43 = vadd.f32 %v6166_v55, %v6165_v32  ;;  %v6246_v6 = vmul.f32 %v6079_v9, %v13569_v53  ;;  %v6080_v42 = vmul.f32 %v13590_v2, %v15449_v58  ;;  %v5867_v33 = vrot.slane %v5813_v15, 1 }
 0xa8a   : > { %v5884_v51 = vsel %vm2668_vm3, %v15448_v50, %v5865_v54  ;;  %v13614_v61 = vadd.f32 %v5157_v52, %v15450_v30  ;;  %v6334_v25 = vadd.f32 %v6333_v36, %v6332_v16  ;;  %v13618_v60 = vadd.f32 %v13085_v26, %v13279_v20  ;;  %v15452_v52 = vld [vmem:[#allocation24_spill] sm:$0xff] }
 0xa8b   : > { %v5815_v31 = vadd.f32 %v5749_v7, %v13506_v3  ;;  %v6169_v38 = vadd.f32 %v6168_v21, %v6167_v43  ;;  %v6081_v10 = vmul.f32 %v13600_v62, %v15451_v14  ;;  %v5972_v57 = vadd.f32 %v5884_v51, %v13338_v28  ;;  %v15453_v51 = vld [vmem:[#allocation39_spill] sm:$0xff] }
 0xa8c   : > { %v5883_v40 = vsel %vm2668_vm3, %v5865_v54, %v5866_v4  ;;  %v6335_v56 = vsel %vm471_vm1, %v6245_v19, 0.0  ;;  %v6170_v59 = vsel %vm471_vm1, %v6079_v9, 0.0  ;;  %v13632_v20 = vadd.f32 %v13085_v26, %v13335_v44 }
 0xa8d   : > { %v5868_v3 = vrot.slane %v5814_v27, 1  ;;  %v6337_v47 = vsel %vm471_vm1, %v6246_v6, 0.0  ;;  %v6247_v15 = vmul.f32 %v6080_v42, %v13590_v2  ;;  %v5882_v28 = vsel %vm2668_vm3, %v5866_v4, %v5867_v33 }
 0xa8e   : > { %v5816_v54 = vadd.f32 %v5752_v8, %v13546_v49  ;;  %v6082_v32 = vmul.f32 %v13618_v60, %v15452_v52  ;;  %v5973_v9 = vadd.f32 %v5883_v40, %v13391_v24  ;;  %v5869_v55 = vrot.slane %v5815_v31, 1  ;;  %v15454_v31 = vld [vmem:[#allocation59_spill] sm:$0xff]  ;;  %v15455_v52 = vld [vmem:[#allocation60_spill] sm:$0xff] }
 0xa8f   : > { %v6336_v44 = vadd.f32 %v6335_v56, %v6334_v25  ;;  %v6171_v36 = vadd.f32 %v6170_v59, %v6169_v38  ;;  %v6248_v21 = vmul.f32 %v6081_v10, %v13600_v62  ;;  %v13644_v19 = vadd.f32 %v13085_v26, %v5972_v57  ;;  %v5395_v59 = vpop.f32.mrf.mxu3 }
 0xa90   : > { %v5755_v7 = vpop.f32.mrf.mxu1  ;;  %v6172_v50 = vsel %vm471_vm1, %v6080_v42, 0.0  ;;  %v6083_v4 = vmul.f32 %v13632_v20, %v15453_v51  ;;  %v5974_v49 = vadd.f32 %v5882_v28, %v13444_v34  ;;  %v5881_v8 = vsel %vm2668_vm3, %v5867_v33, %v5868_v3  ;;  %v5101_v28 = vpop.f32.mrf.mxu2 }
 0xa91   : > { %v5817_v16 = vadd.f32 %v5755_v7, %v5572_v46  ;;  %v6338_v24 = vadd.f32 %v6337_v47, %v6336_v44  ;;  %v6339_v46 = vsel %vm471_vm1, %v6247_v15, 0.0  ;;  %v6174_v27 = vsel %vm471_vm1, %v6081_v10, 0.0 }
 0xa92   : > { %v5870_v43 = vrot.slane %v5816_v54, 1  ;;  %v6249_v6 = vmul.f32 %v6082_v32, %v13618_v60  ;;  %v13656_v58 = vadd.f32 %v13085_v26, %v5973_v9  ;;  %v5880_v42 = vsel %vm2668_vm3, %v5868_v3, %v5869_v55 }
 0xa93   : > { %v5871_v30 = vrot.slane %v5817_v16, 1  ;;  %v6173_v25 = vadd.f32 %v6172_v50, %v6171_v36  ;;  %v6341_v34 = vsel %vm471_vm1, %v6248_v21, 0.0  ;;  %v6084_v33 = vmul.f32 %v13644_v19, %v15454_v31  ;;  %v5577_v16 = vpop.f32.mrf.mxu0  ;;  %v15456_v50 = vld [vmem:[#allocation19_spill] sm:$0xff]  ;;  %v15457_v31 = vld [vmem:[#allocation21_spill] sm:$0xff] }
 0xa94   : > { %v5975_v38 = vadd.f32 %v5881_v8, %v13492_v11  ;;  %v6340_v14 = vadd.f32 %v6339_v46, %v6338_v24  ;;  %v6176_v10 = vsel %vm471_vm1, %v6082_v32, 0.0  ;;  %v6250_v57 = vmul.f32 %v6083_v4, %v13632_v20 }
 0xa95   : > { %v13667_v40 = vadd.f32 %v13085_v26, %v5974_v49  ;;  %v6175_v3 = vadd.f32 %v6174_v27, %v6173_v25  ;;  %v5976_v7 = vadd.f32 %v5880_v42, %v13535_v37  ;;  %v5879_v47 = vsel %vm2668_vm3, %v5869_v55, %v5870_v43 }
 0xa96   : > { %v6342_v11 = vadd.f32 %v6341_v34, %v6340_v14  ;;  %v6343_v54 = vsel %vm471_vm1, %v6249_v6, 0.0  ;;  %v6085_v32 = vmul.f32 %v13656_v58, %v15455_v52  ;;  %v5878_v9 = vsel %vm2668_vm3, %v5870_v43, %v5871_v30  ;;  %v15463_v52 = vld [vmem:[#allocation46_spill] sm:$0xff] }
 0xa97   : > { %v6177_v44 = vadd.f32 %v6176_v10, %v6175_v3  ;;  %v6251_v36 = vmul.f32 %v6084_v33, %v13644_v19  ;;  %v13680_v37 = vadd.f32 %v13085_v26, %v5975_v38  ;;  %v6345_v21 = vsel %vm471_vm1, %v6250_v57, 0.0  ;;  %v15458_v10 = vld [vmem:[#allocation54_spill] sm:$0xff]  ;;  %v15459_v3 = vld [vmem:[#allocation176_spill] sm:$0xff] }
 0xa98   : > { %v5758_v56 = vpop.f32.mrf.mxu1  ;;  %v6086_v51 = vmul.f32 %v13667_v40, %v15456_v50  ;;  %v5977_v49 = vadd.f32 %v5879_v47, %v13551_v63  ;;  %v6344_v8 = vadd.f32 %v6343_v54, %v6342_v11  ;;  %v13688_v24 = vadd.f32 %v13085_v26, %v5976_v7  ;;  %v15460_v47 = vld [vmem:[#allocation172_spill] sm:$0xff]  ;;  %v15462_v54 = vld [vmem:[#allocation174_spill] sm:$0xff] }
 0xa99   : > { %v5818_v15 = vadd.f32 %v5758_v56, %v13594_v5  ;;  %v6178_v5 = vsel %vm471_vm1, %v6083_v4, 0.0  ;;  %v5978_v46 = vadd.f32 %v5878_v9, %v13572_v12  ;;  %v5158_v43 = vadd.f32 %v13626_v39, %v13576_v29 }
 0xa9a   : > { %v5578_v4 = vadd.f32 %v5577_v16, %v5395_v59  ;;  %v6180_v6 = vsel %vm471_vm1, %v6084_v33, 0.0  ;;  %v6252_v42 = vmul.f32 %v6085_v32, %v13656_v58  ;;  %v6179_v25 = vadd.f32 %v6178_v5, %v6177_v44 }
 0xa9b   : > { %v5872_v55 = vrot.slane %v5818_v15, 1  ;;  %v6346_v34 = vadd.f32 %v6345_v21, %v6344_v8  ;;  %v6347_v63 = vsel %vm471_vm1, %v6251_v36, 0.0  ;;  %v6087_v38 = vmul.f32 %v13680_v37, %v15457_v31  ;;  %v15461_v15 = vld [vmem:[#allocation148_spill] sm:$0xff]  ;;  %v5104_v21 = vpop.f32.mrf.mxu2  ;;  %v15464_v8 = vld [vmem:[#allocation67_spill] sm:$0xff] }
 0xa9c   : > { %v6182_v12 = vsel %vm471_vm1, %v6085_v32, 0.0  ;;  %v6253_v14 = vmul.f32 %v6086_v51, %v13667_v40  ;;  %v6181_v33 = vadd.f32 %v6180_v6, %v6179_v25  ;;  %v6088_v57 = vmul.f32 %v13688_v24, %v15458_v10 }
 0xa9d   : > { %v5877_v27 = vsel %vm2668_vm3, %v5871_v30, %v5872_v55  ;;  %v13703_v30 = vadd.f32 %v13085_v26, %v5977_v49  ;;  %v13709_v56 = vadd.f32 %v13085_v26, %v5978_v46  ;;  %v5212_v7 = vadd.f32 %v5158_v43, %v15459_v3  ;;  %v5580_v43 = vpop.f32.mrf.mxu0  ;;  %v15466_v3 = vld [vmem:[#allocation25_spill] sm:$0xff] }
 0xa9e   : > { %v5979_v29 = vadd.f32 %v5877_v27, %v13614_v61  ;;  %v4918_v11 = vadd.f32 %v15461_v15, %v15460_v47  ;;  %v4921_v32 = vadd.f32 %v15463_v52, %v15462_v54  ;;  %v6349_v9 = vsel %vm471_vm1, %v6252_v42, 0.0  ;;  %v5398_v61 = vpop.f32.mrf.mxu3  ;;  %v15465_v42 = vld [vmem:[#allocation23_spill] sm:$0xff] }
 0xa9f   : > { %v6348_v16 = vadd.f32 %v6347_v63, %v6346_v34  ;;  %v6183_v44 = vadd.f32 %v6182_v12, %v6181_v33  ;;  %v6254_v36 = vmul.f32 %v6087_v38, %v13680_v37  ;;  %v6184_v50 = vsel %vm471_vm1, %v6086_v51, 0.0 }
 0xaa0   : > { %v5761_v39 = vpop.f32.mrf.mxu1  ;;  %v6351_v49 = vsel %vm471_vm1, %v6253_v14, 0.0  ;;  %v6089_v46 = vmul.f32 %v13703_v30, %v15464_v8  ;;  %v13723_v27 = vadd.f32 %v13085_v26, %v5979_v29  ;;  %v6255_v6 = vmul.f32 %v6088_v57, %v13688_v24 }
 0xaa1   : > { %v5819_v59 = vadd.f32 %v5761_v39, %v5578_v4  ;;  %v6350_v4 = vadd.f32 %v6349_v9, %v6348_v16  ;;  %v6090_v25 = vmul.f32 %v13709_v56, %v15465_v42  ;;  %v5159_v63 = vadd.f32 %v5101_v28, %v4918_v11  ;;  %v15468_v9 = vld [vmem:[#allocation178_spill] sm:$0xff]  ;;  %v15469_v16 = vld [vmem:[#allocation56_spill] sm:$0xff] }
 0xaa2   : > { %v5581_v51 = vadd.f32 %v5580_v43, %v5398_v61  ;;  %v6186_v31 = vsel %vm471_vm1, %v6087_v38, 0.0  ;;  %v5160_v14 = vadd.f32 %v5104_v21, %v4921_v32  ;;  %v6185_v39 = vadd.f32 %v6184_v50, %v6183_v44  ;;  %v15467_v32 = vld [vmem:[#allocation64_spill] sm:$0xff] }
 0xaa3   : > { %v5873_v5 = vrot.slane %v5819_v59, 1  ;;  %v6352_v33 = vadd.f32 %v6351_v49, %v6350_v4  ;;  %v6353_v29 = vsel %vm471_vm1, %v6254_v36, 0.0  ;;  %v6188_v10 = vsel %vm471_vm1, %v6088_v57, 0.0 }
 0xaa4   : > { %v6256_v59 = vmul.f32 %v6089_v46, %v13703_v30  ;;  %v6091_v47 = vmul.f32 %v13723_v27, %v15466_v3  ;;  %v6355_v38 = vsel %vm471_vm1, %v6255_v6, 0.0  ;;  %v6190_v52 = vsel %vm471_vm1, %v6089_v46, 0.0  ;;  %v15470_v6 = vld [vmem:[#allocation155_spill] sm:$0xff] }
 0xaa5   : > { %v5876_v34 = vsel %vm2668_vm3, %v5872_v55, %v5873_v5  ;;  %v6187_v55 = vadd.f32 %v6186_v31, %v6185_v39  ;;  %v6354_v54 = vadd.f32 %v6353_v29, %v6352_v33  ;;  %v5213_v61 = vadd.f32 %v5159_v63, %v15468_v9 }
 0xaa6   : > { %v5980_v12 = vadd.f32 %v5876_v34, %v5212_v7  ;;  %v6257_v7 = vmul.f32 %v6090_v25, %v13709_v56  ;;  %v5214_v44 = vadd.f32 %v5160_v14, %v15469_v16  ;;  %v6357_v50 = vsel %vm471_vm1, %v6256_v59, 0.0 }
 0xaa7   : > { %v6189_v36 = vadd.f32 %v6188_v10, %v6187_v55  ;;  %v6356_v21 = vadd.f32 %v6355_v38, %v6354_v54  ;;  %v6192_v49 = vsel %vm471_vm1, %v6090_v25, 0.0  ;;  %v6258_v8 = vmul.f32 %v6091_v47, %v13723_v27  ;;  %v15473_v55 = vld [vmem:[#allocation29_spill] sm:$0xff] }
 0xaa8   : > { %v13737_v15 = vadd.f32 %v13085_v26, %v5980_v12  ;;  %v5764_v28 = vpop.f32.mrf.mxu1  ;;  %v6359_v4 = vsel %vm471_vm1, %v6257_v7, 0.0  ;;  %v15471_v42 = vrot.slane %v15470_v6, 1  ;;  %v6194_v63 = vsel %vm471_vm1, %v6091_v47, 0.0  ;;  %v15472_v47 = vld [vmem:[#allocation27_spill] sm:$0xff] }
 0xaa9   : > { %v5820_v11 = vadd.f32 %v5764_v28, %v5581_v51  ;;  %v6191_v43 = vadd.f32 %v6190_v52, %v6189_v36  ;;  %v6358_v25 = vadd.f32 %v6357_v50, %v6356_v21  ;;  %v6361_v39 = vsel %vm471_vm1, %v6258_v8, 0.0 }
 0xaaa   : > { %v6092_v57 = vmul.f32 %v13737_v15, %v15467_v32 }
 0xaab   : > { %v5874_v26 = vrot.slane %v5820_v11, 1  ;;  %v6193_v14 = vadd.f32 %v6192_v49, %v6191_v43  ;;  %v6360_v10 = vadd.f32 %v6359_v4, %v6358_v25 }
 0xaac   : > { %v6259_v51 = vmul.f32 %v6092_v57, %v13737_v15  ;;  %v6196_v33 = vsel %vm471_vm1, %v6092_v57, 0.0 }
 0xaad   : > { %v5875_v46 = vsel %vm2668_vm3, %v5873_v5, %v5874_v26  ;;  %v5928_v34 = vsel %vm2668_vm3, %v5874_v26, %v15471_v42  ;;  %v7795_v5 = vld [vmem:[%s14382_s7] ss:$0 sm:$0xff]  ;;  %v6195_v59 = vadd.f32 %v6194_v63, %v6193_v14  ;;  %v6362_v7 = vadd.f32 %v6361_v39, %v6360_v10 }
 0xaae   : > { %v5981_v31 = vadd.f32 %v5875_v46, %v5213_v61  ;;  %v5982_v12 = vadd.f32 %v5928_v34, %v5214_v44  ;;  %v6363_v3 = vsel %vm471_vm1, %v6259_v51, 0.0 }
 0xaaf   : > { %v6197_v11 = vadd.f32 %v6196_v33, %v6195_v59  ;;  %v6364_v57 = vadd.f32 %v6363_v3, %v6362_v7 }
 0xab0   : > { %v13763_v29 = vadd.f32 %v7795_v5, %v5981_v31  ;;  %v13765_v48 = vadd.f32 %v7795_v5, %v5982_v12 }
 0xab2   : > { %v6093_v28 = vmul.f32 %v13763_v29, %v15472_v47  ;;  %v6094_v38 = vmul.f32 %v13765_v48, %v15473_v55 }
 0xab4   : > { %v6198_v54 = vsel %vm471_vm1, %v6093_v28, 0.0  ;;  %v6260_v52 = vmul.f32 %v6093_v28, %v13763_v29  ;;  %v6261_v32 = vmul.f32 %v6094_v38, %v13765_v48  ;;  %v6200_v61 = vsel %vm471_vm1, %v6094_v38, 0.0  ;;  %v6391_v38 = vld [vmem:[%s14383_s8] sm:$0x1] }
 0xab5   : > { %v6199_v9 = vadd.f32 %v6198_v54, %v6197_v11  ;;  %v13784_v54 = vld [vmem:[%s14384_s9] sm:$0x1] }
 0xab6   : > { %v6365_v16 = vsel %vm471_vm1, %v6260_v52, 0.0  ;;  %v6367_v26 = vsel %vm471_vm1, %v6261_v32, 0.0 }
 0xab7   : > { %v6201_v44 = vadd.f32 %v6200_v61, %v6199_v9  ;;  %v6366_v36 = vadd.f32 %v6365_v16, %v6364_v57  ;;  %v15474_v9 = vld [vmem:[#allocation55_spill] sm:$0xff]  ;;  %v15475_v16 = vld [vmem:[#allocation52_spill] sm:$0xff] }
 0xab9   : > { %v6202_v21 = vrot.slane %v6201_v44, 4  ;;  %v6368_v50 = vadd.f32 %v6367_v26, %v6366_v36  ;;  %v15476_v36 = vld [vmem:[#allocation177_spill] sm:$0xff] }
 0xabb   : > { %v6203_v49 = vadd.f32 %v6202_v21, %v6201_v44  ;;  %v6369_v8 = vrot.slane %v6368_v50, 4  ;;  %v15477_v21 = vld [vmem:[#allocation65_spill] sm:$0xff] }
 0xabd   : > { %v6204_v43 = vrot.slane %v6203_v49, 2  ;;  %v6370_v4 = vadd.f32 %v6369_v8, %v6368_v50 }
 0xabf   : > { %v6205_v46 = vadd.f32 %v6204_v43, %v6203_v49  ;;  %v6371_v6 = vrot.slane %v6370_v4, 2  ;;  %v15478_v49 = vld [vmem:[#allocation58_spill] sm:$0xff]  ;;  %v15479_v43 = vld [vmem:[#allocation73_spill] sm:$0xff] }
 0xac1   : > { %v6206_v42 = vrot.slane %v6205_v46, 1  ;;  %v6372_v34 = vadd.f32 %v6371_v6, %v6370_v4 }
 0xac3   : > { %v6207_v63 = vadd.f32 %v6206_v42, %v6205_v46  ;;  %v6373_v51 = vrot.slane %v6372_v34, 1  ;;  %v15480_v46 = vld [vmem:[#allocation78_spill] sm:$0xff]  ;;  %v15481_v42 = vld [vmem:[#allocation68_spill] sm:$0xff] }
 0xac5   : > { %v6374_v31 = vadd.f32 %v6373_v51, %v6372_v34  ;;  %v6375_v12 = vmul.f32 0.00390625, %v6207_v63  ;;  %v15482_v51 = vld [vmem:[#allocation82_spill] sm:$0xff] }
 0xac7   : > { %v6376_v25 = vmul.f32 0.00390625, %v6374_v31  ;;  %v6377_v14 = vmul.f32 %v6375_v12, %v6375_v12 }
 0xac9   : > { %v6378_v39 = vsub.f32 %v6376_v25, %v6377_v14 }
 0xacb   : > { %v6379_v33 = vmax.f32 %v6378_v39, 0.0 }
 0xacd   : > { %v6380_v5 = vadd.f32 1e-05, %v6379_v33 }
 0xacf   : > { %7705 = vrsqrt.f32 %v6380_v5  ;;  %vm6387_vm8 = vweird.f32 %v6380_v5 }
 0xad5   : > { %v7706_v10 = vpop.eup %7705 }
 0xad6   : > { %v6382_v59 = vmul.f32 %v7706_v10, %v6380_v5  ;;  %vm6388_vm7 = vweird.f32 %v7706_v10 }
 0xad7   : > { %vm6389_vm9 = vmor %vm6387_vm8, %vm6388_vm7 }
 0xad8   : > { %v6383_v3 = vmul.f32 %v7706_v10, %v6382_v59 }
 0xada   : > { %v6384_v47 = vmul.f32 0.5, %v6383_v3 }
 0xadc   : > { %v6385_v28 = vsub.f32 1.5, %v6384_v47 }
 0xade   : > { %v6386_v55 = vmul.f32 %v7706_v10, %v6385_v28 }
 0xae0   : > { %v6390_v7 = vsel %vm6389_vm9, %v7706_v10, %v6386_v55  ;;  %v15484_v10 = vld [vmem:[#allocation85_spill] sm:$0xff] }
 0xae1   : > { %v6392_v11 = vmul.f32 %v6391_v38, %v6390_v7  ;;  %v15490_v7 = vld [vmem:[#allocation97_spill] sm:$0xff] }
 0xae3   : > { %v13786_v52 = vmul.f32 %v6392_v11, %v6375_v12  ;;  %v6396_v32 = vperm.slane %v6392_v11, 0 }
 0xae5   : > { %v6397_v61 = vmul.f32 %v6396_v32, %v15474_v9  ;;  %v6398_v44 = vmul.f32 %v6396_v32, %v15475_v16  ;;  %v6399_v26 = vmul.f32 %v6396_v32, %v15476_v36  ;;  %v6400_v50 = vmul.f32 %v6396_v32, %v15477_v21  ;;  %v15491_v9 = vld [vmem:[#allocation86_spill] sm:$0xff] }
 0xae6   : > { %v6401_v8 = vmul.f32 %v6396_v32, %v15478_v49  ;;  %v6402_v4 = vmul.f32 %v6396_v32, %v15479_v43  ;;  %v6403_v6 = vmul.f32 %v6396_v32, %v15480_v46  ;;  %v6404_v34 = vmul.f32 %v6396_v32, %v15481_v42  ;;  %v15492_v36 = vld [vmem:[#allocation18_spill] sm:$0xff]  ;;  %v15494_v46 = vld [vmem:[#allocation28_spill] sm:$0xff] }
 0xae7   : > { %v13799_v63 = vmul.f32 %v6396_v32, %v13168_v1  ;;  %v13802_v31 = vmul.f32 %v6396_v32, %v15482_v51  ;;  %v13805_v12 = vmul.f32 %v6396_v32, %v13193_v35  ;;  %v13808_v25 = vmul.f32 %v6396_v32, %v13205_v17  ;;  %v15483_v1 = vld [vmem:[#allocation71_spill] sm:$0xff]  ;;  %v15485_v35 = vld [vmem:[#allocation76_spill] sm:$0xff]  ;;  %v15486_v17 = vld [vmem:[#allocation89_spill] sm:$0xff] }
 0xae8   : > { %v13811_v14 = vmul.f32 %v6396_v32, %v13216_v18  ;;  %v13814_v39 = vmul.f32 %v6396_v32, %v13236_v22  ;;  %v13817_v33 = vmul.f32 %v6396_v32, %v13245_v0  ;;  %v13820_v5 = vmul.f32 %v6396_v32, %v15483_v1  ;;  %v15487_v18 = vld [vmem:[#allocation79_spill] sm:$0xff]  ;;  %v15488_v22 = vld [vmem:[#allocation93_spill] sm:$0xff]  ;;  %v15493_v49 = vld [vmem:[#allocation90_spill] sm:$0xff] }
 0xae9   : > { %v13823_v59 = vmul.f32 %v6396_v32, %v15484_v10  ;;  %v13826_v3 = vmul.f32 %v6396_v32, %v15485_v35  ;;  %v13829_v47 = vmul.f32 %v6396_v32, %v15486_v17  ;;  %v13832_v28 = vmul.f32 %v6396_v32, %v15487_v18  ;;  %v15489_v0 = vld [vmem:[#allocation83_spill] sm:$0xff]  ;;  %v15496_v10 = vld [vmem:[#allocation32_spill] sm:$0xff] }
 0xaea   : > { %v13835_v55 = vmul.f32 %v6396_v32, %v15488_v22  ;;  %v13838_v38 = vmul.f32 %v6396_v32, %v15489_v0  ;;  %v13841_v11 = vmul.f32 %v6396_v32, %v15490_v7  ;;  %v13844_v16 = vmul.f32 %v6396_v32, %v15491_v9  ;;  %v15495_v51 = vld [vmem:[#allocation95_spill] sm:$0xff]  ;;  %v15498_v22 = vld [vmem:[#allocation100_spill] sm:$0xff] }
 0xaeb   : > { %v13847_v21 = vmul.f32 %v6396_v32, %v15492_v36  ;;  %v13850_v43 = vmul.f32 %v6396_v32, %v15493_v49  ;;  %v13853_v42 = vmul.f32 %v6396_v32, %v15494_v46  ;;  %v13856_v1 = vmul.f32 %v6396_v32, %v15495_v51  ;;  %v15497_v17 = vld [vmem:[#allocation99_spill] sm:$0xff]  ;;  %v15500_v36 = vld [vmem:[#allocation102_spill] sm:$0xff] }
 0xaec   : > { %v13859_v35 = vmul.f32 %v6396_v32, %v15496_v10  ;;  %v13862_v18 = vmul.f32 %v6396_v32, %v15497_v17  ;;  %v13865_v0 = vmul.f32 %v6396_v32, %v15498_v22  ;;  %v15499_v7 = vld [vmem:[#allocation11_spill] sm:$0xff]  ;;  %v13871_v49 = vmul.f32 %v6396_v32, %v15500_v36 }
 0xaed   : > { %v13868_v9 = vmul.f32 %v6396_v32, %v15499_v7  ;;  %v15501_v46 = vld [vmem:[#allocation31_spill] sm:$0xff]  ;;  %v13877_v51 = vmul.f32 %v6396_v32, %v13515_v23  ;;  %v13880_v10 = vmul.f32 %v6396_v32, %v13525_v45  ;;  %v13883_v17 = vmul.f32 %v6396_v32, %v13539_v13 }
 0xaee   : > { %v13874_v57 = vmul.f32 %v6396_v32, %v15501_v46  ;;  %v13886_v22 = vmul.f32 %v6396_v32, %v13562_v41  ;;  %v13889_v7 = vmul.f32 %v6396_v32, %v13569_v53  ;;  %v13892_v36 = vmul.f32 %v6396_v32, %v13590_v2 }
 0xaef   : > { %v13895_v46 = vmul.f32 %v6396_v32, %v13600_v62  ;;  %v13898_v23 = vmul.f32 %v6396_v32, %v13618_v60  ;;  %v13901_v45 = vmul.f32 %v6396_v32, %v13632_v20  ;;  %v13904_v13 = vmul.f32 %v6396_v32, %v13644_v19 }
 0xaf0   : > { %v13907_v41 = vmul.f32 %v6396_v32, %v13656_v58  ;;  %v13910_v53 = vmul.f32 %v6396_v32, %v13667_v40  ;;  %v13913_v2 = vmul.f32 %v6396_v32, %v13680_v37  ;;  %v13916_v62 = vmul.f32 %v6396_v32, %v13763_v29  ;;  %v7796_v29 = vld [vmem:[%s7952_s28] sm:$0xff] }
 0xaf1   : > { %v13919_v60 = vmul.f32 %v6396_v32, %v13765_v48  ;;  %v13922_v20 = vmul.f32 %v6396_v32, %v13688_v24  ;;  %v13925_v19 = vmul.f32 %v6396_v32, %v13703_v30  ;;  %v13928_v58 = vmul.f32 %v6396_v32, %v13709_v56  ;;  %v7797_v24 = vld [vmem:[%s7952_s28 + $0x8] sm:$0xff]  ;;  %v7798_v30 = vld [vmem:[%s7952_s28 + $0x10] sm:$0xff]  ;;  %v7799_v56 = vld [vmem:[%s7952_s28 + $0x18] sm:$0xff] }
 0xaf2   : > { %15502 = vst [vmem:[#allocation104_spill] sm:$0xff] %v13916_v62  ;;  %v13931_v40 = vmul.f32 %v6396_v32, %v13723_v27  ;;  %v13934_v37 = vmul.f32 %v6396_v32, %v13737_v15  ;;  %v13937_v48 = vadd.f32 %v7796_v29, %v6397_v61  ;;  %v13943_v62 = vadd.f32 %v7798_v30, %v6399_v26  ;;  %v7801_v32 = vld [vmem:[%s7952_s28 + $0x28] sm:$0xff]  ;;  %v7802_v29 = vld [vmem:[%s7952_s28 + $0x30] sm:$0xff]  ;;  %v7804_v30 = vld [vmem:[%s7952_s28 + $0x40] sm:$0xff] }
 0xaf3   : > { %15503 = vst [vmem:[#allocation50_spill] sm:$0xff] %v13919_v60  ;;  %v13940_v60 = vadd.f32 %v7797_v24, %v6398_v44  ;;  %v13946_v27 = vadd.f32 %v7799_v56, %v6400_v50  ;;  %v13952_v61 = vadd.f32 %v7801_v32, %v6402_v4  ;;  %v13955_v44 = vadd.f32 %v7802_v29, %v6403_v6  ;;  %v7803_v24 = vld [vmem:[%s7952_s28 + $0x38] sm:$0xff]  ;;  %v7805_v56 = vld [vmem:[%s7952_s28 + $0x48] sm:$0xff]  ;;  %v7806_v4 = vld [vmem:[%s7952_s28 + $0x50] sm:$0xff] }
 0xaf4   : > { %15504 = vst [vmem:[#allocation106_spill] sm:$0xff] %v13931_v40  ;;  %v7800_v40 = vld [vmem:[%s7952_s28 + $0x20] sm:$0xff]  ;;  %v13958_v26 = vadd.f32 %v7803_v24, %v6404_v34  ;;  %v13962_v50 = vadd.f32 %v7804_v30, %v13799_v63  ;;  %v7807_v6 = vld [vmem:[%s7952_s28 + $0x58] sm:$0xff]  ;;  %v7809_v29 = vld [vmem:[%s7952_s28 + $0x68] sm:$0xff] }
 0xaf5   : > { %v13949_v15 = vadd.f32 %v7800_v40, %v6401_v8  ;;  %v13966_v8 = vadd.f32 %v7805_v56, %v13802_v31  ;;  %v13970_v40 = vadd.f32 %v7806_v4, %v13805_v12  ;;  %v13974_v34 = vadd.f32 %v7807_v6, %v13808_v25  ;;  %v7808_v32 = vld [vmem:[%s7952_s28 + $0x60] sm:$0xff]  ;;  %v7810_v24 = vld [vmem:[%s7952_s28 + $0x70] sm:$0xff]  ;;  %v7811_v30 = vld [vmem:[%s7952_s28 + $0x78] sm:$0xff] }
 0xaf6   : > { %v13978_v63 = vadd.f32 %v7808_v32, %v13811_v14  ;;  %v13982_v31 = vadd.f32 %v7809_v29, %v13814_v39  ;;  %v13986_v12 = vadd.f32 %v7810_v24, %v13817_v33  ;;  %v13990_v25 = vadd.f32 %v7811_v30, %v13820_v5  ;;  %v7812_v56 = vld [vmem:[%s7952_s28 + $0x80] sm:$0xff]  ;;  %v7813_v4 = vld [vmem:[%s7952_s28 + $0x88] sm:$0xff]  ;;  %v7814_v6 = vld [vmem:[%s7952_s28 + $0x90] sm:$0xff] }
 0xaf7   : > { %v13994_v14 = vadd.f32 %v7812_v56, %v13823_v59  ;;  %v13998_v39 = vadd.f32 %v7813_v4, %v13826_v3  ;;  %v14002_v33 = vadd.f32 %v7814_v6, %v13829_v47  ;;  %v7815_v32 = vld [vmem:[%s7952_s28 + $0x98] sm:$0xff]  ;;  %v7816_v29 = vld [vmem:[%s7952_s28 + $0xa0] sm:$0xff]  ;;  %v7817_v24 = vld [vmem:[%s7952_s28 + $0xa8] sm:$0xff] }
 0xaf8   : > { %v14006_v5 = vadd.f32 %v7815_v32, %v13832_v28  ;;  %v14010_v59 = vadd.f32 %v7816_v29, %v13835_v55  ;;  %v14014_v3 = vadd.f32 %v7817_v24, %v13838_v38  ;;  %v7818_v30 = vld [vmem:[%s7952_s28 + $0xb0] sm:$0xff]  ;;  %v7819_v56 = vld [vmem:[%s7952_s28 + $0xb8] sm:$0xff]  ;;  %v7820_v4 = vld [vmem:[%s7952_s28 + $0xc0] sm:$0xff] }
 0xaf9   : > { %v14018_v47 = vadd.f32 %v7818_v30, %v13841_v11  ;;  %v14022_v28 = vadd.f32 %v7819_v56, %v13844_v16  ;;  %v14026_v55 = vadd.f32 %v7820_v4, %v13847_v21  ;;  %v7821_v6 = vld [vmem:[%s7952_s28 + $0xc8] sm:$0xff]  ;;  %v7822_v32 = vld [vmem:[%s7952_s28 + $0xd0] sm:$0xff]  ;;  %v7823_v29 = vld [vmem:[%s7952_s28 + $0xd8] sm:$0xff] }
 0xafa   : > { %v14030_v38 = vadd.f32 %v7821_v6, %v13850_v43  ;;  %v14034_v11 = vadd.f32 %v7822_v32, %v13853_v42  ;;  %v14038_v16 = vadd.f32 %v7823_v29, %v13856_v1  ;;  %v7824_v24 = vld [vmem:[%s7952_s28 + $0xe0] sm:$0xff]  ;;  %v7825_v30 = vld [vmem:[%s7952_s28 + $0xe8] sm:$0xff]  ;;  %v7826_v56 = vld [vmem:[%s7952_s28 + $0xf0] sm:$0xff] }
 0xafb   : > { %v14042_v21 = vadd.f32 %v7824_v24, %v13859_v35  ;;  %v14046_v43 = vadd.f32 %v7825_v30, %v13862_v18  ;;  %v14050_v42 = vadd.f32 %v7826_v56, %v13865_v0  ;;  %v7827_v4 = vld [vmem:[%s7952_s28 + $0xf8] sm:$0xff]  ;;  %v7828_v6 = vld [vmem:[%s7952_s28 + $0x100] sm:$0xff]  ;;  %v7829_v32 = vld [vmem:[%s7952_s28 + $0x108] sm:$0xff] }
 0xafc   : > { %v14054_v1 = vadd.f32 %v7827_v4, %v13868_v9  ;;  %v14058_v35 = vadd.f32 %v7828_v6, %v13871_v49  ;;  %v14062_v18 = vadd.f32 %v7829_v32, %v13874_v57  ;;  %v7830_v29 = vld [vmem:[%s7952_s28 + $0x110] sm:$0xff]  ;;  %v7831_v24 = vld [vmem:[%s7952_s28 + $0x118] sm:$0xff]  ;;  %v7832_v30 = vld [vmem:[%s7952_s28 + $0x120] sm:$0xff] }
 0xafd   : > { %v14066_v0 = vadd.f32 %v7830_v29, %v13877_v51  ;;  %v14070_v9 = vadd.f32 %v7831_v24, %v13880_v10  ;;  %v14074_v49 = vadd.f32 %v7832_v30, %v13883_v17  ;;  %v7833_v56 = vld [vmem:[%s7952_s28 + $0x128] sm:$0xff]  ;;  %v7834_v4 = vld [vmem:[%s7952_s28 + $0x130] sm:$0xff]  ;;  %v7835_v6 = vld [vmem:[%s7952_s28 + $0x138] sm:$0xff] }
 0xafe   : > { %v14078_v57 = vadd.f32 %v7833_v56, %v13886_v22  ;;  %v14082_v51 = vadd.f32 %v7834_v4, %v13889_v7  ;;  %v14086_v10 = vadd.f32 %v7835_v6, %v13892_v36  ;;  %v7836_v32 = vld [vmem:[%s7952_s28 + $0x140] sm:$0xff]  ;;  %v7837_v29 = vld [vmem:[%s7952_s28 + $0x148] sm:$0xff]  ;;  %v7838_v24 = vld [vmem:[%s7952_s28 + $0x150] sm:$0xff] }
 0xaff   : > { %v14090_v17 = vadd.f32 %v7836_v32, %v13895_v46  ;;  %v14094_v22 = vadd.f32 %v7837_v29, %v13898_v23  ;;  %v14098_v30 = vadd.f32 %v7838_v24, %v13901_v45  ;;  %v7839_v7 = vld [vmem:[%s7952_s28 + $0x158] sm:$0xff]  ;;  %v7840_v56 = vld [vmem:[%s7952_s28 + $0x160] sm:$0xff]  ;;  %v7841_v4 = vld [vmem:[%s7952_s28 + $0x168] sm:$0xff] }
 0xb00   : > { %v14102_v36 = vadd.f32 %v7839_v7, %v13904_v13  ;;  %v14106_v46 = vadd.f32 %v7840_v56, %v13907_v41  ;;  %v14110_v23 = vadd.f32 %v7841_v4, %v13910_v53  ;;  %v7842_v6 = vld [vmem:[%s7952_s28 + $0x170] sm:$0xff]  ;;  %v7843_v32 = vld [vmem:[%s7952_s28 + $0x178] sm:$0xff]  ;;  %v7844_v13 = vld [vmem:[%s7952_s28 + $0x180] sm:$0xff]  ;;  %v15505_v53 = vsub.f32 %v13784_v54, %v13786_v52 }
 0xb01   : > { %v14114_v45 = vadd.f32 %v7842_v6, %v13913_v2  ;;  %v14118_v29 = vadd.f32 %v7843_v32, %v13922_v20  ;;  %v14122_v24 = vadd.f32 %v7844_v13, %v13925_v19  ;;  %v7845_v41 = vld [vmem:[%s7952_s28 + $0x188] sm:$0xff]  ;;  %v7846_v2 = vld [vmem:[%s7952_s28 + $0x190] sm:$0xff]  ;;  %v15506_v20 = vld [vmem:[#allocation106_spill] sm:$0xff] }
 0xb02   : > { %v14126_v7 = vadd.f32 %v7845_v41, %v13928_v58  ;;  %v14131_v56 = vperm.slane %v15505_v53, 0  ;;  %v14142_v4 = vadd.f32 %v7846_v2, %v15506_v20  ;;  %v7847_v19 = vld [vmem:[%s7952_s28 + $0x198] sm:$0xff]  ;;  %v7848_v58 = vld [vmem:[%s7952_s28 + $0x1a0] sm:$0xff]  ;;  %v15507_v32 = vld [vmem:[#allocation104_spill] sm:$0xff] }
 0xb03   : > { %v14146_v6 = vadd.f32 %v7847_v19, %v13934_v37  ;;  %v14150_v54 = vadd.f32 %v7848_v58, %v15507_v32  ;;  %v7849_v52 = vld [vmem:[%s7952_s28 + $0x1a8] sm:$0xff]  ;;  %v15508_v13 = vld [vmem:[#allocation50_spill] sm:$0xff] }
 0xb04   : > { %v14154_v41 = vadd.f32 %v7849_v52, %v15508_v13  ;;  %v6508_v53 = vadd.f32 %v14131_v56, %v13937_v48  ;;  %v6509_v2 = vadd.f32 %v14131_v56, %v13940_v60  ;;  %v6510_v37 = vadd.f32 %v14131_v56, %v13943_v62 }
 0xb05   : > { %v6511_v20 = vadd.f32 %v14131_v56, %v13946_v27  ;;  %v6512_v19 = vadd.f32 %v14131_v56, %v13949_v15  ;;  %v6513_v58 = vadd.f32 %v14131_v56, %v13952_v61  ;;  %v6514_v32 = vadd.f32 %v14131_v56, %v13955_v44 }
 0xb06   : > { %v6515_v60 = vadd.f32 %v14131_v56, %v13958_v26  ;;  %v6516_v48 = vadd.f32 %v14131_v56, %v13962_v50  ;;  %v6517_v62 = vadd.f32 %v14131_v56, %v13966_v8  ;;  %v6518_v27 = vadd.f32 %v14131_v56, %v13970_v40  ;;  %6562 = vst.msk [vmem:[%s14138_s19] sm:$0xff] %vm471_vm1, %v6508_v53 }
 0xb07   : > { %v6519_v15 = vadd.f32 %v14131_v56, %v13974_v34  ;;  %v6520_v61 = vadd.f32 %v14131_v56, %v13978_v63  ;;  %v6521_v44 = vadd.f32 %v14131_v56, %v13982_v31  ;;  %v6522_v26 = vadd.f32 %v14131_v56, %v13986_v12  ;;  %6563 = vst.msk [vmem:[%s14138_s19 + $0x8] sm:$0xff] %vm471_vm1, %v6509_v2 }
 0xb08   : > { %v6523_v50 = vadd.f32 %v14131_v56, %v13990_v25  ;;  %v6524_v8 = vadd.f32 %v14131_v56, %v13994_v14  ;;  %v6525_v40 = vadd.f32 %v14131_v56, %v13998_v39  ;;  %v6526_v34 = vadd.f32 %v14131_v56, %v14002_v33  ;;  %6564 = vst.msk [vmem:[%s14138_s19 + $0x10] sm:$0xff] %vm471_vm1, %v6510_v37 }
 0xb09   : > { %v6527_v63 = vadd.f32 %v14131_v56, %v14006_v5  ;;  %v6528_v31 = vadd.f32 %v14131_v56, %v14010_v59  ;;  %v6529_v12 = vadd.f32 %v14131_v56, %v14014_v3  ;;  %v6530_v25 = vadd.f32 %v14131_v56, %v14018_v47  ;;  %6565 = vst.msk [vmem:[%s14138_s19 + $0x18] sm:$0xff] %vm471_vm1, %v6511_v20 }
 0xb0a   : > { %v6531_v14 = vadd.f32 %v14131_v56, %v14022_v28  ;;  %v6532_v39 = vadd.f32 %v14131_v56, %v14026_v55  ;;  %v6533_v33 = vadd.f32 %v14131_v56, %v14030_v38  ;;  %v6534_v5 = vadd.f32 %v14131_v56, %v14034_v11  ;;  %6566 = vst.msk [vmem:[%s14138_s19 + $0x20] sm:$0xff] %vm471_vm1, %v6512_v19 }
 0xb0b   : > { %v6535_v59 = vadd.f32 %v14131_v56, %v14038_v16  ;;  %v6536_v3 = vadd.f32 %v14131_v56, %v14042_v21  ;;  %v6537_v47 = vadd.f32 %v14131_v56, %v14046_v43  ;;  %v6538_v28 = vadd.f32 %v14131_v56, %v14050_v42  ;;  %6567 = vst.msk [vmem:[%s14138_s19 + $0x28] sm:$0xff] %vm471_vm1, %v6513_v58 }
 0xb0c   : > { %v6539_v55 = vadd.f32 %v14131_v56, %v14054_v1  ;;  %v6540_v38 = vadd.f32 %v14131_v56, %v14058_v35  ;;  %v6541_v11 = vadd.f32 %v14131_v56, %v14062_v18  ;;  %v6542_v16 = vadd.f32 %v14131_v56, %v14066_v0  ;;  %6568 = vst.msk [vmem:[%s14138_s19 + $0x30] sm:$0xff] %vm471_vm1, %v6514_v32 }
 0xb0d   : > { %v6543_v21 = vadd.f32 %v14131_v56, %v14070_v9  ;;  %v6544_v43 = vadd.f32 %v14131_v56, %v14074_v49  ;;  %v6545_v42 = vadd.f32 %v14131_v56, %v14078_v57  ;;  %v6546_v1 = vadd.f32 %v14131_v56, %v14082_v51  ;;  %6569 = vst.msk [vmem:[%s14138_s19 + $0x38] sm:$0xff] %vm471_vm1, %v6515_v60 }
 0xb0e   : > { %v6547_v35 = vadd.f32 %v14131_v56, %v14086_v10  ;;  %v6548_v18 = vadd.f32 %v14131_v56, %v14090_v17  ;;  %v6549_v0 = vadd.f32 %v14131_v56, %v14094_v22  ;;  %v6550_v9 = vadd.f32 %v14131_v56, %v14098_v30  ;;  %6570 = vst.msk [vmem:[%s14138_s19 + $0x40] sm:$0xff] %vm471_vm1, %v6516_v48 }
 0xb0f   : > { %v6551_v49 = vadd.f32 %v14131_v56, %v14102_v36  ;;  %v6552_v57 = vadd.f32 %v14131_v56, %v14106_v46  ;;  %v6553_v51 = vadd.f32 %v14131_v56, %v14110_v23  ;;  %v6554_v10 = vadd.f32 %v14131_v56, %v14114_v45  ;;  %6571 = vst.msk [vmem:[%s14138_s19 + $0x48] sm:$0xff] %vm471_vm1, %v6517_v62 }
 0xb10   : > { %v6555_v17 = vadd.f32 %v14131_v56, %v14118_v29  ;;  %v6556_v22 = vadd.f32 %v14131_v56, %v14122_v24  ;;  %v6557_v30 = vadd.f32 %v14131_v56, %v14126_v7  ;;  %v6558_v36 = vadd.f32 %v14131_v56, %v14142_v4  ;;  %6572 = vst.msk [vmem:[%s14138_s19 + $0x50] sm:$0xff] %vm471_vm1, %v6518_v27 }
 0xb11   : > { %v6559_v46 = vadd.f32 %v14131_v56, %v14146_v6  ;;  %v6560_v23 = vadd.f32 %v14131_v56, %v14150_v54  ;;  %v6561_v45 = vadd.f32 %v14131_v56, %v14154_v41  ;;  %6573 = vst.msk [vmem:[%s14138_s19 + $0x58] sm:$0xff] %vm471_vm1, %v6519_v15 }
 0xb12   : > { %6574 = vst.msk [vmem:[%s14138_s19 + $0x60] sm:$0xff] %vm471_vm1, %v6520_v61 }
 0xb13   : > { %6575 = vst.msk [vmem:[%s14138_s19 + $0x68] sm:$0xff] %vm471_vm1, %v6521_v44 }
 0xb14   : > { %6576 = vst.msk [vmem:[%s14138_s19 + $0x70] sm:$0xff] %vm471_vm1, %v6522_v26 }
 0xb15   : > { %6577 = vst.msk [vmem:[%s14138_s19 + $0x78] sm:$0xff] %vm471_vm1, %v6523_v50 }
 0xb16   : > { %6578 = vst.msk [vmem:[%s14138_s19 + $0x80] sm:$0xff] %vm471_vm1, %v6524_v8 }
 0xb17   : > { %6579 = vst.msk [vmem:[%s14138_s19 + $0x88] sm:$0xff] %vm471_vm1, %v6525_v40 }
 0xb18   : > { %6580 = vst.msk [vmem:[%s14138_s19 + $0x90] sm:$0xff] %vm471_vm1, %v6526_v34 }
 0xb19   : > { %6581 = vst.msk [vmem:[%s14138_s19 + $0x98] sm:$0xff] %vm471_vm1, %v6527_v63 }
 0xb1a   : > { %6582 = vst.msk [vmem:[%s14138_s19 + $0xa0] sm:$0xff] %vm471_vm1, %v6528_v31 }
 0xb1b   : > { %6583 = vst.msk [vmem:[%s14138_s19 + $0xa8] sm:$0xff] %vm471_vm1, %v6529_v12 }
 0xb1c   : > { %6584 = vst.msk [vmem:[%s14138_s19 + $0xb0] sm:$0xff] %vm471_vm1, %v6530_v25 }
 0xb1d   : > { %6585 = vst.msk [vmem:[%s14138_s19 + $0xb8] sm:$0xff] %vm471_vm1, %v6531_v14 }
 0xb1e   : > { %6586 = vst.msk [vmem:[%s14138_s19 + $0xc0] sm:$0xff] %vm471_vm1, %v6532_v39 }
 0xb1f   : > { %6587 = vst.msk [vmem:[%s14138_s19 + $0xc8] sm:$0xff] %vm471_vm1, %v6533_v33 }
 0xb20   : > { %6588 = vst.msk [vmem:[%s14138_s19 + $0xd0] sm:$0xff] %vm471_vm1, %v6534_v5 }
 0xb21   : > { %6589 = vst.msk [vmem:[%s14138_s19 + $0xd8] sm:$0xff] %vm471_vm1, %v6535_v59 }
 0xb22   : > { %6590 = vst.msk [vmem:[%s14138_s19 + $0xe0] sm:$0xff] %vm471_vm1, %v6536_v3 }
 0xb23   : > { %6591 = vst.msk [vmem:[%s14138_s19 + $0xe8] sm:$0xff] %vm471_vm1, %v6537_v47 }
 0xb24   : > { %6592 = vst.msk [vmem:[%s14138_s19 + $0xf0] sm:$0xff] %vm471_vm1, %v6538_v28 }
 0xb25   : > { %6593 = vst.msk [vmem:[%s14138_s19 + $0xf8] sm:$0xff] %vm471_vm1, %v6539_v55 }
 0xb26   : > { %6594 = vst.msk [vmem:[%s14138_s19 + $0x100] sm:$0xff] %vm471_vm1, %v6540_v38 }
 0xb27   : > { %6595 = vst.msk [vmem:[%s14138_s19 + $0x108] sm:$0xff] %vm471_vm1, %v6541_v11 }
 0xb28   : > { %6596 = vst.msk [vmem:[%s14138_s19 + $0x110] sm:$0xff] %vm471_vm1, %v6542_v16 }
 0xb29   : > { %6597 = vst.msk [vmem:[%s14138_s19 + $0x118] sm:$0xff] %vm471_vm1, %v6543_v21 }
 0xb2a   : > { %6598 = vst.msk [vmem:[%s14138_s19 + $0x120] sm:$0xff] %vm471_vm1, %v6544_v43 }
 0xb2b   : > { %6599 = vst.msk [vmem:[%s14138_s19 + $0x128] sm:$0xff] %vm471_vm1, %v6545_v42 }
 0xb2c   : > { %6600 = vst.msk [vmem:[%s14138_s19 + $0x130] sm:$0xff] %vm471_vm1, %v6546_v1 }
 0xb2d   : > { %6601 = vst.msk [vmem:[%s14138_s19 + $0x138] sm:$0xff] %vm471_vm1, %v6547_v35 }
 0xb2e   : > { %6602 = vst.msk [vmem:[%s14138_s19 + $0x140] sm:$0xff] %vm471_vm1, %v6548_v18 }
 0xb2f   : > { %6603 = vst.msk [vmem:[%s14138_s19 + $0x148] sm:$0xff] %vm471_vm1, %v6549_v0 }
 0xb30   : > { %6604 = vst.msk [vmem:[%s14138_s19 + $0x150] sm:$0xff] %vm471_vm1, %v6550_v9 }
 0xb31   : > { %6605 = vst.msk [vmem:[%s14138_s19 + $0x158] sm:$0xff] %vm471_vm1, %v6551_v49 }
 0xb32   : > { %6606 = vst.msk [vmem:[%s14138_s19 + $0x160] sm:$0xff] %vm471_vm1, %v6552_v57 }
 0xb33   : > { %6607 = vst.msk [vmem:[%s14138_s19 + $0x168] sm:$0xff] %vm471_vm1, %v6553_v51 }
 0xb34   : > { %6608 = vst.msk [vmem:[%s14138_s19 + $0x170] sm:$0xff] %vm471_vm1, %v6554_v10 }
 0xb35   : > { %6609 = vst.msk [vmem:[%s14138_s19 + $0x178] sm:$0xff] %vm471_vm1, %v6555_v17 }
 0xb36   : > { %6610 = vst.msk [vmem:[%s14138_s19 + $0x180] sm:$0xff] %vm471_vm1, %v6556_v22 }
 0xb37   : > { %6611 = vst.msk [vmem:[%s14138_s19 + $0x188] sm:$0xff] %vm471_vm1, %v6557_v30 }
 0xb38   : > { %6612 = vst.msk [vmem:[%s14138_s19 + $0x190] sm:$0xff] %vm471_vm1, %v6558_v36 }
 0xb39   : > { %6613 = vst.msk [vmem:[%s14138_s19 + $0x198] sm:$0xff] %vm471_vm1, %v6559_v46 }
 0xb3a   : > { %6614 = vst.msk [vmem:[%s14138_s19 + $0x1a0] sm:$0xff] %vm471_vm1, %v6560_v23 }
 0xb3b   : > { %6615 = vst.msk [vmem:[%s14138_s19 + $0x1a8] sm:$0xff] %vm471_vm1, %v6561_v45 }
 0xb3c PF: > { %s20_s13 = sadd.s32 1, %s7856_s13  }
 0xb3d   : > { %p17_p4 = scmp.ge.s32.totalorder %s20_s13, 4  }
 0xb3f   :  { %19 = sbr.rel (!%p17_p4) target bundleno = 1 (0x1), region = 106 }

</bundles_post_ra>
